<compile_context>
chip_gen: v6e
topology: v6e:2x2x1
jax: 0.10.0
libtpu: 0.0.40
codegen_flags: <defaults>
</compile_context>

<pallas_src>
import functools

import jax
import jax.numpy as jnp
from jax import lax
from jax.experimental import pallas as pl
from jax.experimental.pallas import tpu as pltpu

_MXU_DTYPE = jnp.bfloat16
# Target contraction length per MXU push when grouping taps along K.
# ~256 suits v6e/v7x (2x256^2 MXU); set ~128 for v5e (4x128^2 MXU).
_TAP_TARGET_K = 256

# Parity decomposition of ConvTranspose2d(k=4, s=2, p=1): output pixel
# (2i+ry, 2j+rx) only receives kernel rows/cols of matching parity, i.e. a
# 2x2-tap conv over the pad-1 input; all four parities share one 3x3 im2col.
_KY = {0: (1, 3), 1: (0, 2)}   # output parity -> contributing kernel indices
_OFF = {0: (1, 0), 1: (2, 1)}  # output parity -> offsets into the pad-1 input


# ----------------------------------------------------------------------------
# One-time weight re-layout (flip, transpose, parity packing, bf16 cast)
# ----------------------------------------------------------------------------
def prepare_decoder_params(params):
    w1, b1 = params["w1"], params["b1"]        # ConvT: (in_dim, h_dim, 3, 3), (h_dim,)
    wr3, wr1 = params["wr3"], params["wr1"]    # Conv2d OIHW: (res_h, h_dim, 3, 3), (h_dim, res_h, 1, 1)
    w3, b3 = params["w3"], params["b3"]        # ConvT: (h_dim, out_dim, 4, 4), (out_dim,)
    in_dim, h_dim = w1.shape[0], w1.shape[1]
    res_h = wr3.shape[0]
    out_dim = w3.shape[1]

    # ConvTranspose2d(k=3, s=1, p=1) == 3x3 cross-correlation (pad 1) with the
    # spatially flipped kernel; taps flattened to (9*Cin, Cout), row = tap*Cin+cin.
    w1_taps = jnp.transpose(w1[:, :, ::-1, ::-1], (2, 3, 0, 1)).reshape(9 * in_dim, h_dim)

    # Residual-stack convs (plain cross-correlation, bias-free).
    wr3_taps = jnp.transpose(wr3, (2, 3, 1, 0)).reshape(9 * h_dim, res_h)
    wr1_mat = jnp.transpose(wr1, (2, 3, 1, 0)).reshape(res_h, h_dim)

    # Pack all 4 output parities of the k=4/s=2 transposed conv into one
    # (9*h_dim, 4*out_dim) tap weight.  Packed output channel order: (ry, rx, c).
    w3_full = jnp.zeros((3, 3, h_dim, 2, 2, out_dim), w3.dtype)
    for ry in (0, 1):
        for rx in (0, 1):
            for a in (0, 1):
                for b in (0, 1):
                    dy, dx = _OFF[ry][a], _OFF[rx][b]
                    ky, kx = _KY[ry][a], _KY[rx][b]
                    w3_full = w3_full.at[dy, dx, :, ry, rx, :].set(w3[:, :, ky, kx])
    w3_taps = w3_full.reshape(9 * h_dim, 4 * out_dim)
    b3_tiled = jnp.tile(b3, 4).reshape(1, 4 * out_dim)

    cast = lambda a: a.astype(_MXU_DTYPE)
    return {
        "w1": cast(w1_taps),
        "b1": b1.reshape(1, h_dim).astype(jnp.float32),
        "wr3": cast(wr3_taps),
        "wr1": cast(wr1_mat),
        "w3": cast(w3_taps),
        "b3": b3_tiled.astype(jnp.float32),
    }


# ----------------------------------------------------------------------------
# Fused decoder kernel (NB batch elements per grid step)
# ----------------------------------------------------------------------------
def _decoder_kernel(x_ref, w1_ref, b1_ref, wr3_ref, wr1_ref, w3_ref, b3_ref,
                    o_ref, xpad_ref, h_ref, hrelu_ref, *, NB, H, W, n_res):
    h_dim = h_ref.shape[-1]
    M = NB * H * W

    def zero_ring(ref):
        # Zero only the 1-pixel pad ring (the interior is fully overwritten).
        c = ref.shape[-1]
        zrow = jnp.zeros((NB, 1, W + 2, c), ref.dtype)
        zcol = jnp.zeros((NB, H + 2, 1, c), ref.dtype)
        ref[:, 0:1, :, :] = zrow
        ref[:, H + 1:H + 2, :, :] = zrow
        ref[:, :, 0:1, :] = zcol
        ref[:, :, W + 1:W + 2, :] = zcol

    def tap_conv(src_ref, w_ref, bias):
        # src_ref: (NB, H+2, W+2, Cin) bf16 padded scratch (ring == 0).
        # w_ref:   (9*Cin, Cout) bf16, row = tap*Cin + cin.
        # Returns (M, Cout) f32.  Taps are grouped along the contraction axis so
        # each MXU push sees K ~= _TAP_TARGET_K instead of K = Cin; windows are
        # read directly from the bf16 ref (plain offset loads, no re-casts).
        cin = src_ref.shape[-1]
        g = max(1, min(9, _TAP_TARGET_K // cin))
        acc = None
        for t0 in range(0, 9, g):
            gg = min(g, 9 - t0)
            wins = []
            for t in range(t0, t0 + gg):
                dy, dx = t // 3, t % 3
                wins.append(src_ref[:, dy:dy + H, dx:dx + W, :].reshape(M, cin))
            a_op = wins[0] if gg == 1 else jnp.concatenate(wins, axis=-1)
            part = jnp.dot(a_op, w_ref[t0 * cin:(t0 + gg) * cin, :],
                           preferred_element_type=jnp.float32)
            if acc is None:
                # fold the bias into the first dot's result: no zeros/broadcast init
                acc = part if bias is None else part + bias
            else:
                acc = acc + part
        return acc

    # ---- stage 1: ConvTranspose2d(in_dim, h_dim, k=3, s=1, p=1) ----
    zero_ring(xpad_ref)
    xpad_ref[:, 1:H + 1, 1:W + 1, :] = x_ref[...]            # input already bf16
    h_ref[...] = tap_conv(xpad_ref, w1_ref, b1_ref[...]).reshape(NB, H, W, h_dim)

    # ---- stage 2: ResidualStack (shared weights); h stays resident in VMEM (f32) ----
    zero_ring(hrelu_ref)                                      # ring stays zero for all layers
    for _ in range(n_res):                                    # static -> unrolled at trace time
        hrelu_ref[:, 1:H + 1, 1:W + 1, :] = (
            jnp.maximum(h_ref[...], 0.0).astype(_MXU_DTYPE))  # relu'd bf16 written once
        t = tap_conv(hrelu_ref, wr3_ref, None)                # 3x3, bias-free -> (M, res_h)
        t = jnp.maximum(t, 0.0).astype(_MXU_DTYPE)
        d = jnp.dot(t, wr1_ref[...], preferred_element_type=jnp.float32)  # 1x1 -> (M, h_dim)
        h_ref[...] = h_ref[...] + d.reshape(NB, H, W, h_dim)  # direct ref update

    # ---- stage 3: trailing relu + ConvTranspose2d(h_dim, out_dim, k=4, s=2, p=1) ----
    hrelu_ref[:, 1:H + 1, 1:W + 1, :] = (
        jnp.maximum(h_ref[...], 0.0).astype(_MXU_DTYPE))
    y = tap_conv(hrelu_ref, w3_ref, b3_ref[...])              # (M, 4*out_dim), parities packed
    # NOTE: a lane-dense (NB, H, W*out4) store was evaluated but needs a
    # minor-dim-folding relayout of the matmul result; kept the proven 4-D store.
    o_ref[...] = y.reshape(NB, H, W, -1).astype(o_ref.dtype)


# ----------------------------------------------------------------------------
# Forward wrapper (NCHW in / NCHW out)
# ----------------------------------------------------------------------------
def _pick_batch_block(n, max_nb=8):
    # Largest divisor of n that (a) is <= max_nb and (b) keeps the grid length
    # >= 2 when possible, so the "parallel" batch axis can split across v7x's 2 TCs.
    best = 1
    for nb in range(1, min(n, max_nb) + 1):
        if n % nb == 0 and (n // nb >= 2 or n == 1):
            best = nb
    return best


def _vmem_limit_bytes():
    # ~3/4 of the chip's VMEM (v7x: 64 MiB -> 48 MiB; v5e/v6e: 128 MiB -> 96 MiB).
    try:
        cap = pltpu.get_tpu_info().vmem_capacity_bytes
        return int(min(96 * 1024 * 1024, (cap * 3) // 4))
    except Exception:
        return 48 * 1024 * 1024


def top_decoder_large_forward(x_nchw, prepped, num_res_layers,
                              batch_block=None, out_dtype=jnp.float32):
    N, in_dim, H, W = x_nchw.shape
    h_dim = prepped["w1"].shape[1]
    res_h = prepped["wr1"].shape[0]
    out4 = prepped["w3"].shape[1]
    out_dim = out4 // 4

    NB = batch_block if batch_block is not None else _pick_batch_block(N)
    assert N % NB == 0, (N, NB)

    # NCHW -> NHWC (channels on the lane axis); bf16 at the kernel boundary
    # halves DMA-in bytes and removes the in-kernel cast.
    x = jnp.transpose(x_nchw, (0, 2, 3, 1)).astype(_MXU_DTYPE)

    kernel = functools.partial(_decoder_kernel, NB=NB, H=H, W=W, n_res=num_res_layers)
    full = lambda shape: pl.BlockSpec(shape, lambda n: (0,) * len(shape))

    y4 = pl.pallas_call(
        kernel,
        out_shape=jax.ShapeDtypeStruct((N, H, W, out4), out_dtype),
        grid=(N // NB,),                                 # NB images per program
        in_specs=[
            pl.BlockSpec((NB, H, W, in_dim), lambda n: (n, 0, 0, 0)),
            full((9 * in_dim, h_dim)),
            full((1, h_dim)),
            full((9 * h_dim, res_h)),
            full((res_h, h_dim)),
            full((9 * h_dim, out4)),
            full((1, out4)),
        ],
        out_specs=pl.BlockSpec((NB, H, W, out4), lambda n: (n, 0, 0, 0)),
        scratch_shapes=[
            pltpu.VMEM((NB, H + 2, W + 2, in_dim), _MXU_DTYPE),   # padded bf16 input
            pltpu.VMEM((NB, H, W, h_dim), jnp.float32),           # resident f32 h
            pltpu.VMEM((NB, H + 2, W + 2, h_dim), _MXU_DTYPE),    # padded bf16 relu(h)
        ],
        compiler_params=pltpu.CompilerParams(
            dimension_semantics=("parallel",),
            vmem_limit_bytes=_vmem_limit_bytes(),
        ),
    )(x, prepped["w1"], prepped["b1"], prepped["wr3"], prepped["wr1"],
      prepped["w3"], prepped["b3"])

    # pixel-shuffle the packed parities (ry, rx, c) into the 2x upsampled NCHW output
    y = y4.reshape(N, H, W, 2, 2, out_dim)
    y = jnp.transpose(y, (0, 5, 1, 3, 2, 4)).reshape(N, out_dim, 2 * H, 2 * W)
    return y


# ----------------------------------------------------------------------------
# Pure-JAX f32 reference (NCHW, lax convolutions) for verification
# ----------------------------------------------------------------------------
def _conv2d_ref(x, w, pad):
    return lax.conv_general_dilated(
        x, w, (1, 1), ((pad, pad), (pad, pad)),
        dimension_numbers=("NCHW", "OIHW", "NCHW"),
        precision=lax.Precision.HIGHEST)


def _convT_ref(x, wt, b, k, s, p):
    w = jnp.transpose(wt[:, :, ::-1, ::-1], (1, 0, 2, 3))
    pp = k - 1 - p
    y = lax.conv_general_dilated(
        x, w, (1, 1), ((pp, pp), (pp, pp)), lhs_dilation=(s, s),
        dimension_numbers=("NCHW", "OIHW", "NCHW"),
        precision=lax.Precision.HIGHEST)
    return y + b.reshape(1, -1, 1, 1)


def decoder_ref(x, params, n_res):
    relu = lambda v: jnp.maximum(v, 0.0)
    h = _convT_ref(x, params["w1"], params["b1"], 3, 1, 1)
    for _ in range(n_res):
        t = _conv2d_ref(relu(h), params["wr3"], 1)
        h = h + _conv2d_ref(relu(t), params["wr1"], 0)
    h = relu(h)
    return _convT_ref(h, params["w3"], params["b3"], 4, 2, 1)


# ----------------------------------------------------------------------------
if __name__ == "__main__":
    key = jax.random.PRNGKey(0)
    N, in_dim, h_dim, res_h_dim, out_dim, n_res = 4, 8, 16, 8, 4, 2
    H = W = 8

    ks = jax.random.split(key, 7)
    x = jax.random.normal(ks[0], (N, in_dim, H, W), jnp.float32)
    params = {
        # PyTorch layouts: ConvTranspose2d weight = (Cin, Cout, kH, kW); Conv2d = (Cout, Cin, kH, kW)
        "w1":  0.1 * jax.random.normal(ks[1], (in_dim, h_dim, 3, 3), jnp.float32),
        "b1":  0.1 * jax.random.normal(ks[2], (h_dim,), jnp.float32),
        "wr3": 0.1 * jax.random.normal(ks[3], (res_h_dim, h_dim, 3, 3), jnp.float32),
        "wr1": 0.1 * jax.random.normal(ks[4], (h_dim, res_h_dim, 1, 1), jnp.float32),
        "w3":  0.1 * jax.random.normal(ks[5], (h_dim, out_dim, 4, 4), jnp.float32),
        "b3":  0.1 * jax.random.normal(ks[6], (out_dim,), jnp.float32),
    }

    prepped = prepare_decoder_params(params)          # one-time weight re-layout
    fwd = jax.jit(functools.partial(top_decoder_large_forward,
                                    num_res_layers=n_res))

    y = jax.block_until_ready(fwd(x, prepped))
    assert y.shape == (N, out_dim, 2 * H, 2 * W), y.shape

    y_ref = jax.block_until_ready(decoder_ref(x, params, n_res))
    max_err = float(jnp.max(jnp.abs(y - y_ref)))
    # bf16 MXU inputs (f32 accumulation) vs the all-f32 reference: allow a few e-2.
    assert max_err < 5e-2, f"mismatch vs reference: {max_err}"

    print("KERNEL_OK")
</pallas_src>

<mosaic_0001>
module attributes {stable_mosaic.version = 11 : i64} {
  func.func @_decoder_kernel(%arg0: i32, %arg1: memref<2x8x8x8xbf16, #tpu.memory_space<vmem>>, %arg2: memref<72x16xbf16, #tpu.memory_space<vmem>>, %arg3: memref<1x16xf32, #tpu.memory_space<vmem>>, %arg4: memref<144x8xbf16, #tpu.memory_space<vmem>>, %arg5: memref<8x16xbf16, #tpu.memory_space<vmem>>, %arg6: memref<144x16xbf16, #tpu.memory_space<vmem>>, %arg7: memref<1x16xf32, #tpu.memory_space<vmem>>, %arg8: memref<2x8x8x16xf32, #tpu.memory_space<vmem>>, %arg9: memref<2x10x10x8xbf16, #tpu.memory_space<vmem>>, %arg10: memref<2x8x8x16xf32, #tpu.memory_space<vmem>>, %arg11: memref<2x10x10x16xbf16, #tpu.memory_space<vmem>>) attributes {dimension_semantics = [#tpu.dimension_semantics<parallel>], iteration_bounds = array<i64: 2>, scalar_prefetch = 0 : i64, scratch_operands = 3 : i64, tpu.core_type = #tpu.core_type<tc>, window_params = [{transform_indices = @transform_0, window_bounds = array<i64: 2, 8, 8, 8>}, {pipeline_mode = #tpu.pipeline_mode<synchronous>, transform_indices = @transform_1, window_bounds = array<i64: 72, 16>}, {pipeline_mode = #tpu.pipeline_mode<synchronous>, transform_indices = @transform_2, window_bounds = array<i64: 1, 16>}, {pipeline_mode = #tpu.pipeline_mode<synchronous>, transform_indices = @transform_3, window_bounds = array<i64: 144, 8>}, {pipeline_mode = #tpu.pipeline_mode<synchronous>, transform_indices = @transform_4, window_bounds = array<i64: 8, 16>}, {pipeline_mode = #tpu.pipeline_mode<synchronous>, transform_indices = @transform_5, window_bounds = array<i64: 144, 16>}, {pipeline_mode = #tpu.pipeline_mode<synchronous>, transform_indices = @transform_6, window_bounds = array<i64: 1, 16>}, {transform_indices = @transform_7, window_bounds = array<i64: 2, 8, 8, 16>}]} {
    %cst = arith.constant 0.000000e+00 : bf16
    %0 = vector.broadcast %cst : bf16 to vector<2x1x10x8xbf16>
    %cst_0 = arith.constant 0.000000e+00 : bf16
    %1 = vector.broadcast %cst_0 : bf16 to vector<2x10x1x8xbf16>
    %c0 = arith.constant 0 : index
    %c0_1 = arith.constant 0 : index
    %c0_2 = arith.constant 0 : index
    %c0_3 = arith.constant 0 : index
    %2 = vector.load %arg9[%c0, %c0_1, %c0_2, %c0_3] : memref<2x10x10x8xbf16, #tpu.memory_space<vmem>>, vector<2x1x10x8xbf16>
    tpu.vector_store %arg9[%c0, %c0_1, %c0_2, %c0_3], %0 {strides = array<i32>} : memref<2x10x10x8xbf16, #tpu.memory_space<vmem>>, vector<2x1x10x8xbf16>,
    %c0_4 = arith.constant 0 : index
    %c9 = arith.constant 9 : index
    %c0_5 = arith.constant 0 : index
    %c0_6 = arith.constant 0 : index
    %3 = vector.load %arg9[%c0_4, %c9, %c0_5, %c0_6] : memref<2x10x10x8xbf16, #tpu.memory_space<vmem>>, vector<2x1x10x8xbf16>
    tpu.vector_store %arg9[%c0_4, %c9, %c0_5, %c0_6], %0 {strides = array<i32>} : memref<2x10x10x8xbf16, #tpu.memory_space<vmem>>, vector<2x1x10x8xbf16>,
    %c0_7 = arith.constant 0 : index
    %c0_8 = arith.constant 0 : index
    %c0_9 = arith.constant 0 : index
    %c0_10 = arith.constant 0 : index
    %4 = vector.load %arg9[%c0_7, %c0_8, %c0_9, %c0_10] : memref<2x10x10x8xbf16, #tpu.memory_space<vmem>>, vector<2x10x1x8xbf16>
    tpu.vector_store %arg9[%c0_7, %c0_8, %c0_9, %c0_10], %1 {strides = array<i32>} : memref<2x10x10x8xbf16, #tpu.memory_space<vmem>>, vector<2x10x1x8xbf16>,
    %c0_11 = arith.constant 0 : index
    %c0_12 = arith.constant 0 : index
    %c9_13 = arith.constant 9 : index
    %c0_14 = arith.constant 0 : index
    %5 = vector.load %arg9[%c0_11, %c0_12, %c9_13, %c0_14] : memref<2x10x10x8xbf16, #tpu.memory_space<vmem>>, vector<2x10x1x8xbf16>
    tpu.vector_store %arg9[%c0_11, %c0_12, %c9_13, %c0_14], %1 {strides = array<i32>} : memref<2x10x10x8xbf16, #tpu.memory_space<vmem>>, vector<2x10x1x8xbf16>,
    %c0_15 = arith.constant 0 : index
    %c0_16 = arith.constant 0 : index
    %c0_17 = arith.constant 0 : index
    %c0_18 = arith.constant 0 : index
    %6 = vector.load %arg1[%c0_15, %c0_16, %c0_17, %c0_18] : memref<2x8x8x8xbf16, #tpu.memory_space<vmem>>, vector<2x8x8x8xbf16>
    %c0_19 = arith.constant 0 : index
    %c1 = arith.constant 1 : index
    %c1_20 = arith.constant 1 : index
    %c0_21 = arith.constant 0 : index
    %7 = vector.load %arg9[%c0_19, %c1, %c1_20, %c0_21] : memref<2x10x10x8xbf16, #tpu.memory_space<vmem>>, vector<2x8x8x8xbf16>
    tpu.vector_store %arg9[%c0_19, %c1, %c1_20, %c0_21], %6 {strides = array<i32>} : memref<2x10x10x8xbf16, #tpu.memory_space<vmem>>, vector<2x8x8x8xbf16>,
    %c0_22 = arith.constant 0 : index
    %c0_23 = arith.constant 0 : index
    %8 = vector.load %arg3[%c0_22, %c0_23] : memref<1x16xf32, #tpu.memory_space<vmem>>, vector<1x16xf32>
    %c0_24 = arith.constant 0 : index
    %c0_25 = arith.constant 0 : index
    %c0_26 = arith.constant 0 : index
    %c0_27 = arith.constant 0 : index
    %9 = vector.load %arg9[%c0_24, %c0_25, %c0_26, %c0_27] : memref<2x10x10x8xbf16, #tpu.memory_space<vmem>>, vector<2x8x8x8xbf16>
    %10 = vector.shape_cast %9 : vector<2x8x8x8xbf16> to vector<128x8xbf16>
    %c0_28 = arith.constant 0 : index
    %c0_29 = arith.constant 0 : index
    %c1_30 = arith.constant 1 : index
    %c0_31 = arith.constant 0 : index
    %11 = vector.load %arg9[%c0_28, %c0_29, %c1_30, %c0_31] : memref<2x10x10x8xbf16, #tpu.memory_space<vmem>>, vector<2x8x8x8xbf16>
    %12 = vector.shape_cast %11 : vector<2x8x8x8xbf16> to vector<128x8xbf16>
    %c0_32 = arith.constant 0 : index
    %c0_33 = arith.constant 0 : index
    %c2 = arith.constant 2 : index
    %c0_34 = arith.constant 0 : index
    %13 = vector.load %arg9[%c0_32, %c0_33, %c2, %c0_34] : memref<2x10x10x8xbf16, #tpu.memory_space<vmem>>, vector<2x8x8x8xbf16>
    %14 = vector.shape_cast %13 : vector<2x8x8x8xbf16> to vector<128x8xbf16>
    %c0_35 = arith.constant 0 : index
    %c1_36 = arith.constant 1 : index
    %c0_37 = arith.constant 0 : index
    %c0_38 = arith.constant 0 : index
    %15 = vector.load %arg9[%c0_35, %c1_36, %c0_37, %c0_38] : memref<2x10x10x8xbf16, #tpu.memory_space<vmem>>, vector<2x8x8x8xbf16>
    %16 = vector.shape_cast %15 : vector<2x8x8x8xbf16> to vector<128x8xbf16>
    %c0_39 = arith.constant 0 : index
    %c1_40 = arith.constant 1 : index
    %c1_41 = arith.constant 1 : index
    %c0_42 = arith.constant 0 : index
    %17 = vector.load %arg9[%c0_39, %c1_40, %c1_41, %c0_42] : memref<2x10x10x8xbf16, #tpu.memory_space<vmem>>, vector<2x8x8x8xbf16>
    %18 = vector.shape_cast %17 : vector<2x8x8x8xbf16> to vector<128x8xbf16>
    %c0_43 = arith.constant 0 : index
    %c1_44 = arith.constant 1 : index
    %c2_45 = arith.constant 2 : index
    %c0_46 = arith.constant 0 : index
    %19 = vector.load %arg9[%c0_43, %c1_44, %c2_45, %c0_46] : memref<2x10x10x8xbf16, #tpu.memory_space<vmem>>, vector<2x8x8x8xbf16>
    %20 = vector.shape_cast %19 : vector<2x8x8x8xbf16> to vector<128x8xbf16>
    %c0_47 = arith.constant 0 : index
    %c2_48 = arith.constant 2 : index
    %c0_49 = arith.constant 0 : index
    %c0_50 = arith.constant 0 : index
    %21 = vector.load %arg9[%c0_47, %c2_48, %c0_49, %c0_50] : memref<2x10x10x8xbf16, #tpu.memory_space<vmem>>, vector<2x8x8x8xbf16>
    %22 = vector.shape_cast %21 : vector<2x8x8x8xbf16> to vector<128x8xbf16>
    %c0_51 = arith.constant 0 : index
    %c2_52 = arith.constant 2 : index
    %c1_53 = arith.constant 1 : index
    %c0_54 = arith.constant 0 : index
    %23 = vector.load %arg9[%c0_51, %c2_52, %c1_53, %c0_54] : memref<2x10x10x8xbf16, #tpu.memory_space<vmem>>, vector<2x8x8x8xbf16>
    %24 = vector.shape_cast %23 : vector<2x8x8x8xbf16> to vector<128x8xbf16>
    %c0_55 = arith.constant 0 : index
    %c2_56 = arith.constant 2 : index
    %c2_57 = arith.constant 2 : index
    %c0_58 = arith.constant 0 : index
    %25 = vector.load %arg9[%c0_55, %c2_56, %c2_57, %c0_58] : memref<2x10x10x8xbf16, #tpu.memory_space<vmem>>, vector<2x8x8x8xbf16>
    %26 = vector.shape_cast %25 : vector<2x8x8x8xbf16> to vector<128x8xbf16>
    %27 = tpu.concatenate %10, %12, %14, %16, %18, %20, %22, %24, %26 in 1 : vector<128x8xbf16>, vector<128x8xbf16>, vector<128x8xbf16>, vector<128x8xbf16>, vector<128x8xbf16>, vector<128x8xbf16>, vector<128x8xbf16>, vector<128x8xbf16>, vector<128x8xbf16> -> vector<128x72xbf16>
    %c0_59 = arith.constant 0 : index
    %c0_60 = arith.constant 0 : index
    %28 = vector.load %arg2[%c0_59, %c0_60] : memref<72x16xbf16, #tpu.memory_space<vmem>>, vector<72x16xbf16>
    %cst_61 = arith.constant dense<0.000000e+00> : vector<128x16xf32>
    %29 = tpu.matmul %27, %28, %cst_61 {dimension_numbers = #tpu.dot_dimension_numbers<[1], [0], [0], [1], [0, 0, 1, 1], [], []>} : vector<128x72xbf16>, vector<72x16xbf16>, vector<128x16xf32> -> vector<128x16xf32>
    %30 = vector.broadcast %8 : vector<1x16xf32> to vector<128x16xf32>
    %31 = arith.addf %29, %30 : vector<128x16xf32>
    %32 = vector.shape_cast %31 : vector<128x16xf32> to vector<2x8x8x16xf32>
    %c0_62 = arith.constant 0 : index
    %c0_63 = arith.constant 0 : index
    %c0_64 = arith.constant 0 : index
    %c0_65 = arith.constant 0 : index
    %33 = vector.load %arg10[%c0_62, %c0_63, %c0_64, %c0_65] : memref<2x8x8x16xf32, #tpu.memory_space<vmem>>, vector<2x8x8x16xf32>
    tpu.vector_store %arg10[%c0_62, %c0_63, %c0_64, %c0_65], %32 {strides = array<i32>} : memref<2x8x8x16xf32, #tpu.memory_space<vmem>>, vector<2x8x8x16xf32>,
    %cst_66 = arith.constant 0.000000e+00 : bf16
    %34 = vector.broadcast %cst_66 : bf16 to vector<2x1x10x16xbf16>
    %cst_67 = arith.constant 0.000000e+00 : bf16
    %35 = vector.broadcast %cst_67 : bf16 to vector<2x10x1x16xbf16>
    %c0_68 = arith.constant 0 : index
    %c0_69 = arith.constant 0 : index
    %c0_70 = arith.constant 0 : index
    %c0_71 = arith.constant 0 : index
    %36 = vector.load %arg11[%c0_68, %c0_69, %c0_70, %c0_71] : memref<2x10x10x16xbf16, #tpu.memory_space<vmem>>, vector<2x1x10x16xbf16>
    tpu.vector_store %arg11[%c0_68, %c0_69, %c0_70, %c0_71], %34 {strides = array<i32>} : memref<2x10x10x16xbf16, #tpu.memory_space<vmem>>, vector<2x1x10x16xbf16>,
    %c0_72 = arith.constant 0 : index
    %c9_73 = arith.constant 9 : index
    %c0_74 = arith.constant 0 : index
    %c0_75 = arith.constant 0 : index
    %37 = vector.load %arg11[%c0_72, %c9_73, %c0_74, %c0_75] : memref<2x10x10x16xbf16, #tpu.memory_space<vmem>>, vector<2x1x10x16xbf16>
    tpu.vector_store %arg11[%c0_72, %c9_73, %c0_74, %c0_75], %34 {strides = array<i32>} : memref<2x10x10x16xbf16, #tpu.memory_space<vmem>>, vector<2x1x10x16xbf16>,
    %c0_76 = arith.constant 0 : index
    %c0_77 = arith.constant 0 : index
    %c0_78 = arith.constant 0 : index
    %c0_79 = arith.constant 0 : index
    %38 = vector.load %arg11[%c0_76, %c0_77, %c0_78, %c0_79] : memref<2x10x10x16xbf16, #tpu.memory_space<vmem>>, vector<2x10x1x16xbf16>
    tpu.vector_store %arg11[%c0_76, %c0_77, %c0_78, %c0_79], %35 {strides = array<i32>} : memref<2x10x10x16xbf16, #tpu.memory_space<vmem>>, vector<2x10x1x16xbf16>,
    %c0_80 = arith.constant 0 : index
    %c0_81 = arith.constant 0 : index
    %c9_82 = arith.constant 9 : index
    %c0_83 = arith.constant 0 : index
    %39 = vector.load %arg11[%c0_80, %c0_81, %c9_82, %c0_83] : memref<2x10x10x16xbf16, #tpu.memory_space<vmem>>, vector<2x10x1x16xbf16>
    tpu.vector_store %arg11[%c0_80, %c0_81, %c9_82, %c0_83], %35 {strides = array<i32>} : memref<2x10x10x16xbf16, #tpu.memory_space<vmem>>, vector<2x10x1x16xbf16>,
    %c0_84 = arith.constant 0 : index
    %c0_85 = arith.constant 0 : index
    %c0_86 = arith.constant 0 : index
    %c0_87 = arith.constant 0 : index
    %40 = vector.load %arg10[%c0_84, %c0_85, %c0_86, %c0_87] : memref<2x8x8x16xf32, #tpu.memory_space<vmem>>, vector<2x8x8x16xf32>
    %cst_88 = arith.constant 0.000000e+00 : f32
    %41 = vector.broadcast %cst_88 : f32 to vector<2x8x8x16xf32>
    %42 = arith.maximumf %40, %41 : vector<2x8x8x16xf32>
    %43 = arith.truncf %42 : vector<2x8x8x16xf32> to vector<2x8x8x16xbf16>
    %c0_89 = arith.constant 0 : index
    %c1_90 = arith.constant 1 : index
    %c1_91 = arith.constant 1 : index
    %c0_92 = arith.constant 0 : index
    %44 = vector.load %arg11[%c0_89, %c1_90, %c1_91, %c0_92] : memref<2x10x10x16xbf16, #tpu.memory_space<vmem>>, vector<2x8x8x16xbf16>
    tpu.vector_store %arg11[%c0_89, %c1_90, %c1_91, %c0_92], %43 {strides = array<i32>} : memref<2x10x10x16xbf16, #tpu.memory_space<vmem>>, vector<2x8x8x16xbf16>,
    %c0_93 = arith.constant 0 : index
    %c0_94 = arith.constant 0 : index
    %c0_95 = arith.constant 0 : index
    %c0_96 = arith.constant 0 : index
    %45 = vector.load %arg11[%c0_93, %c0_94, %c0_95, %c0_96] : memref<2x10x10x16xbf16, #tpu.memory_space<vmem>>, vector<2x8x8x16xbf16>
    %46 = vector.shape_cast %45 : vector<2x8x8x16xbf16> to vector<128x16xbf16>
    %c0_97 = arith.constant 0 : index
    %c0_98 = arith.constant 0 : index
    %c1_99 = arith.constant 1 : index
    %c0_100 = arith.constant 0 : index
    %47 = vector.load %arg11[%c0_97, %c0_98, %c1_99, %c0_100] : memref<2x10x10x16xbf16, #tpu.memory_space<vmem>>, vector<2x8x8x16xbf16>
    %48 = vector.shape_cast %47 : vector<2x8x8x16xbf16> to vector<128x16xbf16>
    %c0_101 = arith.constant 0 : index
    %c0_102 = arith.constant 0 : index
    %c2_103 = arith.constant 2 : index
    %c0_104 = arith.constant 0 : index
    %49 = vector.load %arg11[%c0_101, %c0_102, %c2_103, %c0_104] : memref<2x10x10x16xbf16, #tpu.memory_space<vmem>>, vector<2x8x8x16xbf16>
    %50 = vector.shape_cast %49 : vector<2x8x8x16xbf16> to vector<128x16xbf16>
    %c0_105 = arith.constant 0 : index
    %c1_106 = arith.constant 1 : index
    %c0_107 = arith.constant 0 : index
    %c0_108 = arith.constant 0 : index
    %51 = vector.load %arg11[%c0_105, %c1_106, %c0_107, %c0_108] : memref<2x10x10x16xbf16, #tpu.memory_space<vmem>>, vector<2x8x8x16xbf16>
    %52 = vector.shape_cast %51 : vector<2x8x8x16xbf16> to vector<128x16xbf16>
    %c0_109 = arith.constant 0 : index
    %c1_110 = arith.constant 1 : index
    %c1_111 = arith.constant 1 : index
    %c0_112 = arith.constant 0 : index
    %53 = vector.load %arg11[%c0_109, %c1_110, %c1_111, %c0_112] : memref<2x10x10x16xbf16, #tpu.memory_space<vmem>>, vector<2x8x8x16xbf16>
    %54 = vector.shape_cast %53 : vector<2x8x8x16xbf16> to vector<128x16xbf16>
    %c0_113 = arith.constant 0 : index
    %c1_114 = arith.constant 1 : index
    %c2_115 = arith.constant 2 : index
    %c0_116 = arith.constant 0 : index
    %55 = vector.load %arg11[%c0_113, %c1_114, %c2_115, %c0_116] : memref<2x10x10x16xbf16, #tpu.memory_space<vmem>>, vector<2x8x8x16xbf16>
    %56 = vector.shape_cast %55 : vector<2x8x8x16xbf16> to vector<128x16xbf16>
    %c0_117 = arith.constant 0 : index
    %c2_118 = arith.constant 2 : index
    %c0_119 = arith.constant 0 : index
    %c0_120 = arith.constant 0 : index
    %57 = vector.load %arg11[%c0_117, %c2_118, %c0_119, %c0_120] : memref<2x10x10x16xbf16, #tpu.memory_space<vmem>>, vector<2x8x8x16xbf16>
    %58 = vector.shape_cast %57 : vector<2x8x8x16xbf16> to vector<128x16xbf16>
    %c0_121 = arith.constant 0 : index
    %c2_122 = arith.constant 2 : index
    %c1_123 = arith.constant 1 : index
    %c0_124 = arith.constant 0 : index
    %59 = vector.load %arg11[%c0_121, %c2_122, %c1_123, %c0_124] : memref<2x10x10x16xbf16, #tpu.memory_space<vmem>>, vector<2x8x8x16xbf16>
    %60 = vector.shape_cast %59 : vector<2x8x8x16xbf16> to vector<128x16xbf16>
    %c0_125 = arith.constant 0 : index
    %c2_126 = arith.constant 2 : index
    %c2_127 = arith.constant 2 : index
    %c0_128 = arith.constant 0 : index
    %61 = vector.load %arg11[%c0_125, %c2_126, %c2_127, %c0_128] : memref<2x10x10x16xbf16, #tpu.memory_space<vmem>>, vector<2x8x8x16xbf16>
    %62 = vector.shape_cast %61 : vector<2x8x8x16xbf16> to vector<128x16xbf16>
    %63 = tpu.concatenate %46, %48, %50, %52, %54, %56, %58, %60, %62 in 1 : vector<128x16xbf16>, vector<128x16xbf16>, vector<128x16xbf16>, vector<128x16xbf16>, vector<128x16xbf16>, vector<128x16xbf16>, vector<128x16xbf16>, vector<128x16xbf16>, vector<128x16xbf16> -> vector<128x144xbf16>
    %c0_129 = arith.constant 0 : index
    %c0_130 = arith.constant 0 : index
    %64 = vector.load %arg4[%c0_129, %c0_130] : memref<144x8xbf16, #tpu.memory_space<vmem>>, vector<144x8xbf16>
    %cst_131 = arith.constant dense<0.000000e+00> : vector<128x8xf32>
    %65 = tpu.matmul %63, %64, %cst_131 {dimension_numbers = #tpu.dot_dimension_numbers<[1], [0], [0], [1], [0, 0, 1, 1], [], []>} : vector<128x144xbf16>, vector<144x8xbf16>, vector<128x8xf32> -> vector<128x8xf32>
    %cst_132 = arith.constant 0.000000e+00 : f32
    %66 = vector.broadcast %cst_132 : f32 to vector<128x8xf32>
    %67 = arith.maximumf %65, %66 : vector<128x8xf32>
    %68 = arith.truncf %67 : vector<128x8xf32> to vector<128x8xbf16>
    %c0_133 = arith.constant 0 : index
    %c0_134 = arith.constant 0 : index
    %69 = vector.load %arg5[%c0_133, %c0_134] : memref<8x16xbf16, #tpu.memory_space<vmem>>, vector<8x16xbf16>
    %cst_135 = arith.constant dense<0.000000e+00> : vector<128x16xf32>
    %70 = tpu.matmul %68, %69, %cst_135 {dimension_numbers = #tpu.dot_dimension_numbers<[1], [0], [0], [1], [0, 0, 1, 1], [], []>} : vector<128x8xbf16>, vector<8x16xbf16>, vector<128x16xf32> -> vector<128x16xf32>
    %c0_136 = arith.constant 0 : index
    %c0_137 = arith.constant 0 : index
    %c0_138 = arith.constant 0 : index
    %c0_139 = arith.constant 0 : index
    %71 = vector.load %arg10[%c0_136, %c0_137, %c0_138, %c0_139] : memref<2x8x8x16xf32, #tpu.memory_space<vmem>>, vector<2x8x8x16xf32>
    %72 = vector.shape_cast %70 : vector<128x16xf32> to vector<2x8x8x16xf32>
    %73 = arith.addf %71, %72 : vector<2x8x8x16xf32>
    %c0_140 = arith.constant 0 : index
    %c0_141 = arith.constant 0 : index
    %c0_142 = arith.constant 0 : index
    %c0_143 = arith.constant 0 : index
    %74 = vector.load %arg10[%c0_140, %c0_141, %c0_142, %c0_143] : memref<2x8x8x16xf32, #tpu.memory_space<vmem>>, vector<2x8x8x16xf32>
    tpu.vector_store %arg10[%c0_140, %c0_141, %c0_142, %c0_143], %73 {strides = array<i32>} : memref<2x8x8x16xf32, #tpu.memory_space<vmem>>, vector<2x8x8x16xf32>,
    %c0_144 = arith.constant 0 : index
    %c0_145 = arith.constant 0 : index
    %c0_146 = arith.constant 0 : index
    %c0_147 = arith.constant 0 : index
    %75 = vector.load %arg10[%c0_144, %c0_145, %c0_146, %c0_147] : memref<2x8x8x16xf32, #tpu.memory_space<vmem>>, vector<2x8x8x16xf32>
    %cst_148 = arith.constant 0.000000e+00 : f32
    %76 = vector.broadcast %cst_148 : f32 to vector<2x8x8x16xf32>
    %77 = arith.maximumf %75, %76 : vector<2x8x8x16xf32>
    %78 = arith.truncf %77 : vector<2x8x8x16xf32> to vector<2x8x8x16xbf16>
    %c0_149 = arith.constant 0 : index
    %c1_150 = arith.constant 1 : index
    %c1_151 = arith.constant 1 : index
    %c0_152 = arith.constant 0 : index
    %79 = vector.load %arg11[%c0_149, %c1_150, %c1_151, %c0_152] : memref<2x10x10x16xbf16, #tpu.memory_space<vmem>>, vector<2x8x8x16xbf16>
    tpu.vector_store %arg11[%c0_149, %c1_150, %c1_151, %c0_152], %78 {strides = array<i32>} : memref<2x10x10x16xbf16, #tpu.memory_space<vmem>>, vector<2x8x8x16xbf16>,
    %c0_153 = arith.constant 0 : index
    %c0_154 = arith.constant 0 : index
    %c0_155 = arith.constant 0 : index
    %c0_156 = arith.constant 0 : index
    %80 = vector.load %arg11[%c0_153, %c0_154, %c0_155, %c0_156] : memref<2x10x10x16xbf16, #tpu.memory_space<vmem>>, vector<2x8x8x16xbf16>
    %81 = vector.shape_cast %80 : vector<2x8x8x16xbf16> to vector<128x16xbf16>
    %c0_157 = arith.constant 0 : index
    %c0_158 = arith.constant 0 : index
    %c1_159 = arith.constant 1 : index
    %c0_160 = arith.constant 0 : index
    %82 = vector.load %arg11[%c0_157, %c0_158, %c1_159, %c0_160] : memref<2x10x10x16xbf16, #tpu.memory_space<vmem>>, vector<2x8x8x16xbf16>
    %83 = vector.shape_cast %82 : vector<2x8x8x16xbf16> to vector<128x16xbf16>
    %c0_161 = arith.constant 0 : index
    %c0_162 = arith.constant 0 : index
    %c2_163 = arith.constant 2 : index
    %c0_164 = arith.constant 0 : index
    %84 = vector.load %arg11[%c0_161, %c0_162, %c2_163, %c0_164] : memref<2x10x10x16xbf16, #tpu.memory_space<vmem>>, vector<2x8x8x16xbf16>
    %85 = vector.shape_cast %84 : vector<2x8x8x16xbf16> to vector<128x16xbf16>
    %c0_165 = arith.constant 0 : index
    %c1_166 = arith.constant 1 : index
    %c0_167 = arith.constant 0 : index
    %c0_168 = arith.constant 0 : index
    %86 = vector.load %arg11[%c0_165, %c1_166, %c0_167, %c0_168] : memref<2x10x10x16xbf16, #tpu.memory_space<vmem>>, vector<2x8x8x16xbf16>
    %87 = vector.shape_cast %86 : vector<2x8x8x16xbf16> to vector<128x16xbf16>
    %c0_169 = arith.constant 0 : index
    %c1_170 = arith.constant 1 : index
    %c1_171 = arith.constant 1 : index
    %c0_172 = arith.constant 0 : index
    %88 = vector.load %arg11[%c0_169, %c1_170, %c1_171, %c0_172] : memref<2x10x10x16xbf16, #tpu.memory_space<vmem>>, vector<2x8x8x16xbf16>
    %89 = vector.shape_cast %88 : vector<2x8x8x16xbf16> to vector<128x16xbf16>
    %c0_173 = arith.constant 0 : index
    %c1_174 = arith.constant 1 : index
    %c2_175 = arith.constant 2 : index
    %c0_176 = arith.constant 0 : index
    %90 = vector.load %arg11[%c0_173, %c1_174, %c2_175, %c0_176] : memref<2x10x10x16xbf16, #tpu.memory_space<vmem>>, vector<2x8x8x16xbf16>
    %91 = vector.shape_cast %90 : vector<2x8x8x16xbf16> to vector<128x16xbf16>
    %c0_177 = arith.constant 0 : index
    %c2_178 = arith.constant 2 : index
    %c0_179 = arith.constant 0 : index
    %c0_180 = arith.constant 0 : index
    %92 = vector.load %arg11[%c0_177, %c2_178, %c0_179, %c0_180] : memref<2x10x10x16xbf16, #tpu.memory_space<vmem>>, vector<2x8x8x16xbf16>
    %93 = vector.shape_cast %92 : vector<2x8x8x16xbf16> to vector<128x16xbf16>
    %c0_181 = arith.constant 0 : index
    %c2_182 = arith.constant 2 : index
    %c1_183 = arith.constant 1 : index
    %c0_184 = arith.constant 0 : index
    %94 = vector.load %arg11[%c0_181, %c2_182, %c1_183, %c0_184] : memref<2x10x10x16xbf16, #tpu.memory_space<vmem>>, vector<2x8x8x16xbf16>
    %95 = vector.shape_cast %94 : vector<2x8x8x16xbf16> to vector<128x16xbf16>
    %c0_185 = arith.constant 0 : index
    %c2_186 = arith.constant 2 : index
    %c2_187 = arith.constant 2 : index
    %c0_188 = arith.constant 0 : index
    %96 = vector.load %arg11[%c0_185, %c2_186, %c2_187, %c0_188] : memref<2x10x10x16xbf16, #tpu.memory_space<vmem>>, vector<2x8x8x16xbf16>
    %97 = vector.shape_cast %96 : vector<2x8x8x16xbf16> to vector<128x16xbf16>
    %98 = tpu.concatenate %81, %83, %85, %87, %89, %91, %93, %95, %97 in 1 : vector<128x16xbf16>, vector<128x16xbf16>, vector<128x16xbf16>, vector<128x16xbf16>, vector<128x16xbf16>, vector<128x16xbf16>, vector<128x16xbf16>, vector<128x16xbf16>, vector<128x16xbf16> -> vector<128x144xbf16>
    %c0_189 = arith.constant 0 : index
    %c0_190 = arith.constant 0 : index
    %99 = vector.load %arg4[%c0_189, %c0_190] : memref<144x8xbf16, #tpu.memory_space<vmem>>, vector<144x8xbf16>
    %cst_191 = arith.constant dense<0.000000e+00> : vector<128x8xf32>
    %100 = tpu.matmul %98, %99, %cst_191 {dimension_numbers = #tpu.dot_dimension_numbers<[1], [0], [0], [1], [0, 0, 1, 1], [], []>} : vector<128x144xbf16>, vector<144x8xbf16>, vector<128x8xf32> -> vector<128x8xf32>
    %cst_192 = arith.constant 0.000000e+00 : f32
    %101 = vector.broadcast %cst_192 : f32 to vector<128x8xf32>
    %102 = arith.maximumf %100, %101 : vector<128x8xf32>
    %103 = arith.truncf %102 : vector<128x8xf32> to vector<128x8xbf16>
    %c0_193 = arith.constant 0 : index
    %c0_194 = arith.constant 0 : index
    %104 = vector.load %arg5[%c0_193, %c0_194] : memref<8x16xbf16, #tpu.memory_space<vmem>>, vector<8x16xbf16>
    %cst_195 = arith.constant dense<0.000000e+00> : vector<128x16xf32>
    %105 = tpu.matmul %103, %104, %cst_195 {dimension_numbers = #tpu.dot_dimension_numbers<[1], [0], [0], [1], [0, 0, 1, 1], [], []>} : vector<128x8xbf16>, vector<8x16xbf16>, vector<128x16xf32> -> vector<128x16xf32>
    %c0_196 = arith.constant 0 : index
    %c0_197 = arith.constant 0 : index
    %c0_198 = arith.constant 0 : index
    %c0_199 = arith.constant 0 : index
    %106 = vector.load %arg10[%c0_196, %c0_197, %c0_198, %c0_199] : memref<2x8x8x16xf32, #tpu.memory_space<vmem>>, vector<2x8x8x16xf32>
    %107 = vector.shape_cast %105 : vector<128x16xf32> to vector<2x8x8x16xf32>
    %108 = arith.addf %106, %107 : vector<2x8x8x16xf32>
    %c0_200 = arith.constant 0 : index
    %c0_201 = arith.constant 0 : index
    %c0_202 = arith.constant 0 : index
    %c0_203 = arith.constant 0 : index
    %109 = vector.load %arg10[%c0_200, %c0_201, %c0_202, %c0_203] : memref<2x8x8x16xf32, #tpu.memory_space<vmem>>, vector<2x8x8x16xf32>
    tpu.vector_store %arg10[%c0_200, %c0_201, %c0_202, %c0_203], %108 {strides = array<i32>} : memref<2x8x8x16xf32, #tpu.memory_space<vmem>>, vector<2x8x8x16xf32>,
    %c0_204 = arith.constant 0 : index
    %c0_205 = arith.constant 0 : index
    %c0_206 = arith.constant 0 : index
    %c0_207 = arith.constant 0 : index
    %110 = vector.load %arg10[%c0_204, %c0_205, %c0_206, %c0_207] : memref<2x8x8x16xf32, #tpu.memory_space<vmem>>, vector<2x8x8x16xf32>
    %cst_208 = arith.constant 0.000000e+00 : f32
    %111 = vector.broadcast %cst_208 : f32 to vector<2x8x8x16xf32>
    %112 = arith.maximumf %110, %111 : vector<2x8x8x16xf32>
    %113 = arith.truncf %112 : vector<2x8x8x16xf32> to vector<2x8x8x16xbf16>
    %c0_209 = arith.constant 0 : index
    %c1_210 = arith.constant 1 : index
    %c1_211 = arith.constant 1 : index
    %c0_212 = arith.constant 0 : index
    %114 = vector.load %arg11[%c0_209, %c1_210, %c1_211, %c0_212] : memref<2x10x10x16xbf16, #tpu.memory_space<vmem>>, vector<2x8x8x16xbf16>
    tpu.vector_store %arg11[%c0_209, %c1_210, %c1_211, %c0_212], %113 {strides = array<i32>} : memref<2x10x10x16xbf16, #tpu.memory_space<vmem>>, vector<2x8x8x16xbf16>,
    %c0_213 = arith.constant 0 : index
    %c0_214 = arith.constant 0 : index
    %115 = vector.load %arg7[%c0_213, %c0_214] : memref<1x16xf32, #tpu.memory_space<vmem>>, vector<1x16xf32>
    %c0_215 = arith.constant 0 : index
    %c0_216 = arith.constant 0 : index
    %c0_217 = arith.constant 0 : index
    %c0_218 = arith.constant 0 : index
    %116 = vector.load %arg11[%c0_215, %c0_216, %c0_217, %c0_218] : memref<2x10x10x16xbf16, #tpu.memory_space<vmem>>, vector<2x8x8x16xbf16>
    %117 = vector.shape_cast %116 : vector<2x8x8x16xbf16> to vector<128x16xbf16>
    %c0_219 = arith.constant 0 : index
    %c0_220 = arith.constant 0 : index
    %c1_221 = arith.constant 1 : index
    %c0_222 = arith.constant 0 : index
    %118 = vector.load %arg11[%c0_219, %c0_220, %c1_221, %c0_222] : memref<2x10x10x16xbf16, #tpu.memory_space<vmem>>, vector<2x8x8x16xbf16>
    %119 = vector.shape_cast %118 : vector<2x8x8x16xbf16> to vector<128x16xbf16>
    %c0_223 = arith.constant 0 : index
    %c0_224 = arith.constant 0 : index
    %c2_225 = arith.constant 2 : index
    %c0_226 = arith.constant 0 : index
    %120 = vector.load %arg11[%c0_223, %c0_224, %c2_225, %c0_226] : memref<2x10x10x16xbf16, #tpu.memory_space<vmem>>, vector<2x8x8x16xbf16>
    %121 = vector.shape_cast %120 : vector<2x8x8x16xbf16> to vector<128x16xbf16>
    %c0_227 = arith.constant 0 : index
    %c1_228 = arith.constant 1 : index
    %c0_229 = arith.constant 0 : index
    %c0_230 = arith.constant 0 : index
    %122 = vector.load %arg11[%c0_227, %c1_228, %c0_229, %c0_230] : memref<2x10x10x16xbf16, #tpu.memory_space<vmem>>, vector<2x8x8x16xbf16>
    %123 = vector.shape_cast %122 : vector<2x8x8x16xbf16> to vector<128x16xbf16>
    %c0_231 = arith.constant 0 : index
    %c1_232 = arith.constant 1 : index
    %c1_233 = arith.constant 1 : index
    %c0_234 = arith.constant 0 : index
    %124 = vector.load %arg11[%c0_231, %c1_232, %c1_233, %c0_234] : memref<2x10x10x16xbf16, #tpu.memory_space<vmem>>, vector<2x8x8x16xbf16>
    %125 = vector.shape_cast %124 : vector<2x8x8x16xbf16> to vector<128x16xbf16>
    %c0_235 = arith.constant 0 : index
    %c1_236 = arith.constant 1 : index
    %c2_237 = arith.constant 2 : index
    %c0_238 = arith.constant 0 : index
    %126 = vector.load %arg11[%c0_235, %c1_236, %c2_237, %c0_238] : memref<2x10x10x16xbf16, #tpu.memory_space<vmem>>, vector<2x8x8x16xbf16>
    %127 = vector.shape_cast %126 : vector<2x8x8x16xbf16> to vector<128x16xbf16>
    %c0_239 = arith.constant 0 : index
    %c2_240 = arith.constant 2 : index
    %c0_241 = arith.constant 0 : index
    %c0_242 = arith.constant 0 : index
    %128 = vector.load %arg11[%c0_239, %c2_240, %c0_241, %c0_242] : memref<2x10x10x16xbf16, #tpu.memory_space<vmem>>, vector<2x8x8x16xbf16>
    %129 = vector.shape_cast %128 : vector<2x8x8x16xbf16> to vector<128x16xbf16>
    %c0_243 = arith.constant 0 : index
    %c2_244 = arith.constant 2 : index
    %c1_245 = arith.constant 1 : index
    %c0_246 = arith.constant 0 : index
    %130 = vector.load %arg11[%c0_243, %c2_244, %c1_245, %c0_246] : memref<2x10x10x16xbf16, #tpu.memory_space<vmem>>, vector<2x8x8x16xbf16>
    %131 = vector.shape_cast %130 : vector<2x8x8x16xbf16> to vector<128x16xbf16>
    %c0_247 = arith.constant 0 : index
    %c2_248 = arith.constant 2 : index
    %c2_249 = arith.constant 2 : index
    %c0_250 = arith.constant 0 : index
    %132 = vector.load %arg11[%c0_247, %c2_248, %c2_249, %c0_250] : memref<2x10x10x16xbf16, #tpu.memory_space<vmem>>, vector<2x8x8x16xbf16>
    %133 = vector.shape_cast %132 : vector<2x8x8x16xbf16> to vector<128x16xbf16>
    %134 = tpu.concatenate %117, %119, %121, %123, %125, %127, %129, %131, %133 in 1 : vector<128x16xbf16>, vector<128x16xbf16>, vector<128x16xbf16>, vector<128x16xbf16>, vector<128x16xbf16>, vector<128x16xbf16>, vector<128x16xbf16>, vector<128x16xbf16>, vector<128x16xbf16> -> vector<128x144xbf16>
    %c0_251 = arith.constant 0 : index
    %c0_252 = arith.constant 0 : index
    %135 = vector.load %arg6[%c0_251, %c0_252] : memref<144x16xbf16, #tpu.memory_space<vmem>>, vector<144x16xbf16>
    %cst_253 = arith.constant dense<0.000000e+00> : vector<128x16xf32>
    %136 = tpu.matmul %134, %135, %cst_253 {dimension_numbers = #tpu.dot_dimension_numbers<[1], [0], [0], [1], [0, 0, 1, 1], [], []>} : vector<128x144xbf16>, vector<144x16xbf16>, vector<128x16xf32> -> vector<128x16xf32>
    %137 = vector.broadcast %115 : vector<1x16xf32> to vector<128x16xf32>
    %138 = arith.addf %136, %137 : vector<128x16xf32>
    %139 = vector.shape_cast %138 : vector<128x16xf32> to vector<2x8x8x16xf32>
    %c0_254 = arith.constant 0 : index
    %c0_255 = arith.constant 0 : index
    %c0_256 = arith.constant 0 : index
    %c0_257 = arith.constant 0 : index
    %140 = vector.load %arg8[%c0_254, %c0_255, %c0_256, %c0_257] : memref<2x8x8x16xf32, #tpu.memory_space<vmem>>, vector<2x8x8x16xf32>
    tpu.vector_store %arg8[%c0_254, %c0_255, %c0_256, %c0_257], %139 {strides = array<i32>} : memref<2x8x8x16xf32, #tpu.memory_space<vmem>>, vector<2x8x8x16xf32>,
    return
  }
  func.func @transform_0(%arg0: i32) -> (i32, i32, i32, i32) {
    %c0_i32 = arith.constant 0 : i32
    %c0_i32_0 = arith.constant 0 : i32
    %c0_i32_1 = arith.constant 0 : i32
    %c0_i32_2 = arith.constant 0 : i32
    return %arg0, %c0_i32, %c0_i32_0, %c0_i32_1 : i32, i32, i32, i32
  }
  func.func @transform_1(%arg0: i32) -> (i32, i32) {
    %c0_i32 = arith.constant 0 : i32
    %c0_i32_0 = arith.constant 0 : i32
    %c0_i32_1 = arith.constant 0 : i32
    return %c0_i32, %c0_i32_0 : i32, i32
  }
  func.func @transform_2(%arg0: i32) -> (i32, i32) {
    %c0_i32 = arith.constant 0 : i32
    %c0_i32_0 = arith.constant 0 : i32
    %c0_i32_1 = arith.constant 0 : i32
    return %c0_i32, %c0_i32_0 : i32, i32
  }
  func.func @transform_3(%arg0: i32) -> (i32, i32) {
    %c0_i32 = arith.constant 0 : i32
    %c0_i32_0 = arith.constant 0 : i32
    %c0_i32_1 = arith.constant 0 : i32
    return %c0_i32, %c0_i32_0 : i32, i32
  }
  func.func @transform_4(%arg0: i32) -> (i32, i32) {
    %c0_i32 = arith.constant 0 : i32
    %c0_i32_0 = arith.constant 0 : i32
    %c0_i32_1 = arith.constant 0 : i32
    return %c0_i32, %c0_i32_0 : i32, i32
  }
  func.func @transform_5(%arg0: i32) -> (i32, i32) {
    %c0_i32 = arith.constant 0 : i32
    %c0_i32_0 = arith.constant 0 : i32
    %c0_i32_1 = arith.constant 0 : i32
    return %c0_i32, %c0_i32_0 : i32, i32
  }
  func.func @transform_6(%arg0: i32) -> (i32, i32) {
    %c0_i32 = arith.constant 0 : i32
    %c0_i32_0 = arith.constant 0 : i32
    %c0_i32_1 = arith.constant 0 : i32
    return %c0_i32, %c0_i32_0 : i32, i32
  }
  func.func @transform_7(%arg0: i32) -> (i32, i32, i32, i32) {
    %c0_i32 = arith.constant 0 : i32
    %c0_i32_0 = arith.constant 0 : i32
    %c0_i32_1 = arith.constant 0 : i32
    %c0_i32_2 = arith.constant 0 : i32
    return %arg0, %c0_i32, %c0_i32_0, %c0_i32_1 : i32, i32, i32, i32
  }
}

</mosaic_0001>

<bundles_post_ra>
// kernel: top_decoder_large_forward.1
= control target key start
LH: loop header
LB: loop body
LE: loop exit
PB: predicated region body
PF: predicated region fallthrough
CT: control target
= control target key end

     0   :  { %s10623_s24 = smov 0   ;;  %s15035_s0 = inlined_call_operand.vmem [shape: bf16[4,8,8,8], index: 0, kind: input, shape index: {}]   ;;  %s15036_s1 = inlined_call_operand.vmem [shape: bf16[72,16], index: 1, kind: input, shape index: {}]   ;;  %s15037_s2 = inlined_call_operand.vmem [shape: f32[1,16], index: 2, kind: input, shape index: {}]   ;;  %s15038_s3 = inlined_call_operand.vmem [shape: bf16[144,8], index: 3, kind: input, shape index: {}]   ;;  %s15039_s4 = inlined_call_operand.vmem [shape: bf16[8,16], index: 4, kind: input, shape index: {}]   ;;  %s15040_s5 = inlined_call_operand.vmem [shape: bf16[144,16], index: 5, kind: input, shape index: {}]   ;;  %s15041_s6 = inlined_call_operand.vmem [shape: f32[1,16], index: 6, kind: input, shape index: {}]   ;;  %s15042_s7 = inlined_call_operand.vmem [shape: f32[4,8,8,16], index: 7, kind: output, shape index: {}]  }
   0x1 LB: > { %s9598_s25 = sadd.s32 4294967295, %s10569_s24   ;;  %p9602_p0 = scmp.ge.s32.totalorder %s10569_s24, 1  ;;  %s10569_s24 = sphi %s10623_s24, %s17_s24  }
   0x2   : > { %p239_p1 = scmp.lt.s32.totalorder %s10569_s24, 3 }
   0x4   : > { %p240_p2 = pnand %p9602_p0, %p239_p1 }
   0x6   : > { %243 = sbr.rel (%p240_p2) target bundleno = 2215 (0x8a7), region = 48 }
   0xb   : > { %s9603_s26 = sshll.u32 %s9598_s25, 1  ;;  %vm290_vm0 = vcmask 57344   ;;  %vm300_vm1 = vsmask.f32 256  ;;  %v311_v1 = vld [vmem:[#allocation2 + $0x18] sm:$0x1] }
   0xc   : > { %p274_p3 = scmp.lt.s32.totalorder %s9603_s26, 3  ;;  %vm10633_vm2 = vmand %vm290_vm0, %vm300_vm1  ;;  %v314_v2 = vld [vmem:[#allocation2 + $0x20] sm:$0x1]  ;;  %vm288_vm3 = vcmask 60416   ;;  %vm362_vm4 = vsmask.f32 7938 }
   0xd   : > { %v312_v3 = vsel %vm10633_vm2, 0, %v311_v1  ;;  %v315_v4 = vsel %vm10633_vm2, 0, %v314_v2  ;;  %vm10645_vm5 = vmand %vm290_vm0, %vm362_vm4  ;;  %vm2523_vm6 = vcmask 125952   ;;  %v305_v6 = vld [vmem:[#allocation2 + $0x8] sm:$0x1]  ;;  %vm2525_vm7 = vcmask 122880  }
   0xe   : > { %s15172_s26 = smov (!%p274_p3, %s9603_s26), 3  ;;  %313 = vst [vmem:[#allocation2 + $0x18] sm:$0x1] %v312_v3  ;;  %316 = vst [vmem:[#allocation2 + $0x20] sm:$0x1] %v315_v4  ;;  %v306_v8 = vsel %vm10633_vm2, 0, %v305_v6 }
   0xf   : > { %v308_v7 = vld [vmem:[#allocation2 + $0x10] sm:$0x1]  ;;  %v317_v10 = vld [vmem:[#allocation2 + $0x28] sm:$0x1]  ;;  %v367_v11 = vld [vmem:[#allocation2 + $0xc] sm:$0x1] }
  0x10   : > { %v309_v9 = vsel %vm10633_vm2, 0, %v308_v7  ;;  %s10221_s27 = sshll.u32 %s15172_s26, 5  ;;  %307 = vst [vmem:[#allocation2 + $0x8] sm:$0x1] %v306_v8  ;;  %v318_v12 = vsel %vm10633_vm2, 0, %v317_v10  ;;  %v368_v13 = vsel %vm10645_vm5, 0, %v367_v11  ;;  %vm10665_vm8 = vmand %vm2523_vm6, %vm362_vm4 }
  0x11   : > { %310 = vst [vmem:[#allocation2 + $0x10] sm:$0x1] %v309_v9  ;;  %v370_v14 = vld [vmem:[#allocation2 + $0x14] sm:$0x1]  ;;  %s10661_s30 = scalar_lea.vmem %s15035_s0, %s10221_s27  ;;  %v15069_v15 = vmov 0  ;;  %v15043_v20 = vmov 0   ;;  %vm10715_vm9 = vmand %vm288_vm3, %vm362_vm4 }
  0x12   : > { %v15070_v15 = vsel %vm10665_vm8, 4294967295, %v15069_v15  ;;  %319 = vst [vmem:[#allocation2 + $0x28] sm:$0x1] %v318_v12  ;;  %369 = vst [vmem:[#allocation2 + $0xc] sm:$0x1] %v368_v13  ;;  %v371_v16 = vsel %vm10645_vm5, 0, %v370_v14  ;;  %4720 = vmatprep.subr.bf16.mxu1 %v15043_v20 }
  0x13   : > { %15071 = vst [vmem:[#allocation5_spill] sm:$0xff] %v15070_v15  ;;  %v426_v17 = vld [vmem:[%s10661_s30 + $0x8] sm:$0xf]  ;;  %v427_v18 = vld [vmem:[%s10661_s30 + $0xc] sm:$0xf]  ;;  %vm1007_vm10 = vcmask 1042432  }
  0x14   : > { %v424_v19 = vld [vmem:[%s10661_s30] sm:$0xf]  ;;  %372 = vst [vmem:[#allocation2 + $0x14] sm:$0x1] %v371_v16  ;;  %289 = vst.msk [vmem:[#allocation2] sm:$0xf] %vm288_vm3, %v15043_v20 }
  0x15   : > { %291 = vst.msk [vmem:[#allocation2 + $0x4] sm:$0x1] %vm290_vm0, %v15043_v20  ;;  %293 = vst.msk [vmem:[#allocation2 + $0x54] sm:$0x1] %vm290_vm0, %v15043_v20  ;;  %v457_v21 = vshrl.u32 %v426_v17, 16  ;;  %v460_v22 = vshll.u32 %v426_v17, 16 }
  0x16   : > { %292 = vst.msk [vmem:[#allocation2 + $0x50] sm:$0xf] %vm288_vm3, %v15043_v20  ;;  %295 = vst.msk [vmem:[#allocation2 + $0x48] sm:$0xf] %vm288_vm3, %v15043_v20  ;;  %v465_v23 = vshrl.u32 %v427_v18, 16  ;;  %v468_v24 = vshll.u32 %v427_v18, 16 }
  0x17   : > { %296 = vst.msk [vmem:[#allocation2 + $0x4c] sm:$0x1] %vm290_vm0, %v15043_v20  ;;  %298 = vst.msk [vmem:[#allocation2 + $0x9c] sm:$0x1] %vm290_vm0, %v15043_v20  ;;  %v425_v25 = vld [vmem:[%s10661_s30 + $0x4] sm:$0xf] }
  0x18   : > { %297 = vst.msk [vmem:[#allocation2 + $0x98] sm:$0xf] %vm288_vm3, %v15043_v20  ;;  %v441_v26 = vshrl.u32 %v424_v19, 16  ;;  %v444_v27 = vshll.u32 %v424_v19, 16  ;;  %v449_v28 = vshrl.u32 %v425_v25, 16  ;;  %v452_v29 = vshll.u32 %v425_v25, 16 }
  0x19   : > { %2524 = vst.msk [vmem:[#allocation4] sm:$0xf] %vm2523_vm6, %v15043_v20  ;;  %2527 = vst.msk [vmem:[#allocation4 + $0x50] sm:$0xf] %vm2523_vm6, %v15043_v20  ;;  %v428_v30 = vld [vmem:[%s10661_s30 + $0x10] sm:$0xf] }
  0x1a   : > { %2526 = vst.msk [vmem:[#allocation4 + $0x4] sm:$0x1] %vm2525_vm7, %v15043_v20  ;;  %2528 = vst.msk [vmem:[#allocation4 + $0x54] sm:$0x1] %vm2525_vm7, %v15043_v20  ;;  %v10709_v31 = vrot.slane %v457_v21, 7  ;;  %v10711_v32 = vrot.slane %v465_v23, 7 }
  0x1b   : > { %2530 = vst.msk [vmem:[#allocation4 + $0x48] sm:$0xf] %vm2523_vm6, %v15043_v20  ;;  %2532 = vst.msk [vmem:[#allocation4 + $0x98] sm:$0xf] %vm2523_vm6, %v15043_v20  ;;  %v615_v33 = vld [vmem:[#allocation2 + $0x18] sm:$0xf] }
  0x1c   : > { %2531 = vst.msk [vmem:[#allocation4 + $0x4c] sm:$0x1] %vm2525_vm7, %v15043_v20  ;;  %2533 = vst.msk [vmem:[#allocation4 + $0x9c] sm:$0x1] %vm2525_vm7, %v15043_v20  ;;  %v373_v34 = vld [vmem:[#allocation2 + $0x1c] sm:$0x1]  ;;  %v462_v40 = vor.u32 %v460_v22, %v10709_v31  ;;  %v470_v41 = vor.u32 %v468_v24, %v10711_v32 }
  0x1d   : > { %v621_v36 = vld [vmem:[#allocation2 + $0x20] sm:$0xf]  ;;  %v443_v37 = vrot.slane %v441_v26, 7  ;;  %v451_v38 = vrot.slane %v449_v28, 7  ;;  %v473_v39 = vshrl.u32 %v428_v30, 16  ;;  %v476_v44 = vshll.u32 %v428_v30, 16 }
  0x1e   : > { %v603_v42 = vld [vmem:[#allocation2 + $0x8] sm:$0xf]  ;;  %v609_v43 = vld [vmem:[#allocation2 + $0x10] sm:$0xf]  ;;  %v606_v49 = vld [vmem:[#allocation2 + $0xc] sm:$0x1]  ;;  %v616_v50 = vsel %vm10715_vm9, %v462_v40, %v615_v33  ;;  %v622_v51 = vsel %vm10715_vm9, %v470_v41, %v621_v36 }
  0x1f   : > { %v446_v45 = vor.u32 %v444_v27, %v443_v37  ;;  %v447_v46 = vrot.slane %v443_v37, 4  ;;  %v454_v47 = vor.u32 %v452_v29, %v451_v38  ;;  %v455_v48 = vrot.slane %v451_v38, 4  ;;  %v612_v53 = vld [vmem:[#allocation2 + $0x14] sm:$0x1]  ;;  %v302_v54 = vld [vmem:[#allocation2] sm:$0x1] }
  0x20   : > { %v10725_v52 = vrot.slane %v473_v39, 7  ;;  %v374_v55 = vsel %vm10645_vm5, 0, %v373_v34  ;;  %617 = vst [vmem:[#allocation2 + $0x18] sm:$0xf] %v616_v50  ;;  %623 = vst [vmem:[#allocation2 + $0x20] sm:$0xf] %v622_v51 }
  0x21   : > { %v604_v56 = vsel %vm10715_vm9, %v446_v45, %v603_v42  ;;  %v610_v57 = vsel %vm10715_vm9, %v454_v47, %v609_v43  ;;  %v627_v58 = vld [vmem:[#allocation2 + $0x28] sm:$0xf]  ;;  %v607_v59 = vsel %vm10633_vm2, %v447_v46, %v606_v49  ;;  %v613_v60 = vsel %vm10633_vm2, %v455_v48, %v612_v53  ;;  %v364_v61 = vld [vmem:[#allocation2 + $0x4] sm:$0x1]  ;;  %375 = vst [vmem:[#allocation2 + $0x1c] sm:$0x1] %v374_v55 }
  0x22   : > { %v376_v62 = vld [vmem:[#allocation2 + $0x24] sm:$0x1]  ;;  %605 = vst [vmem:[#allocation2 + $0x8] sm:$0xf] %v604_v56  ;;  %611 = vst [vmem:[#allocation2 + $0x10] sm:$0xf] %v610_v57  ;;  %v478_v63 = vor.u32 %v476_v44, %v10725_v52 }
  0x23   : > { %608 = vst [vmem:[#allocation2 + $0xc] sm:$0x1] %v607_v59  ;;  %614 = vst [vmem:[#allocation2 + $0x14] sm:$0x1] %v613_v60  ;;  %v303_v1 = vsel %vm10633_vm2, 0, %v302_v54  ;;  %v365_v2 = vsel %vm10645_vm5, 0, %v364_v61 }
  0x24   : > { %v379_v3 = vld [vmem:[#allocation2 + $0x2c] sm:$0x1]  ;;  %v463_v4 = vrot.slane %v10709_v31, 4  ;;  %304 = vst [vmem:[#allocation2] sm:$0x1] %v303_v1  ;;  %v377_v6 = vsel %vm10645_vm5, 0, %v376_v62  ;;  %v628_v8 = vsel %vm10715_vm9, %v478_v63, %v627_v58 }
  0x25   : > { %366 = vst [vmem:[#allocation2 + $0x4] sm:$0x1] %v365_v2  ;;  %v471_v7 = vrot.slane %v10711_v32, 4  ;;  %v10748_v9 = vld [vmem:[#allocation2] sm:$0xe]  ;;  %v380_v10 = vsel %vm10645_vm5, 0, %v379_v3 }
  0x26   : > { %378 = vst [vmem:[#allocation2 + $0x24] sm:$0x1] %v377_v6  ;;  %v320_v11 = vld [vmem:[#allocation2 + $0x30] sm:$0x1]  ;;  %v479_v12 = vrot.slane %v10725_v52, 4  ;;  %vm1008_vm11 = vcmask 1046532  }
  0x27   : > { %629 = vst [vmem:[#allocation2 + $0x28] sm:$0xf] %v628_v8  ;;  %381 = vst [vmem:[#allocation2 + $0x2c] sm:$0x1] %v380_v10  ;;  %v321_v13 = vsel %vm10633_vm2, 0, %v320_v11  ;;  %v9609_v22 = vrot.slane %v10748_v9, 9 }
  0x28   : > { %v323_v14 = vld [vmem:[#allocation2 + $0x38] sm:$0x1]  ;;  %v382_v16 = vld [vmem:[#allocation2 + $0x34] sm:$0x1]  ;;  %322 = vst [vmem:[#allocation2 + $0x30] sm:$0x1] %v321_v13  ;;  %vm10792_vm12 = vmor %vm1007_vm10, %vm1008_vm11 }
  0x29   : > { %v324_v17 = vsel %vm10633_vm2, 0, %v323_v14  ;;  %v383_v18 = vsel %vm10645_vm5, 0, %v382_v16  ;;  %v385_v19 = vld [vmem:[#allocation2 + $0x3c] sm:$0x1]  ;;  %v10760_v21 = vld [vmem:[%s10661_s30 + $0x14] sm:$0xf] }
  0x2a   : > { %325 = vst [vmem:[#allocation2 + $0x38] sm:$0x1] %v324_v17  ;;  %384 = vst [vmem:[#allocation2 + $0x34] sm:$0x1] %v383_v18  ;;  %v386_v23 = vsel %vm10645_vm5, 0, %v385_v19  ;;  %v481_v24 = vshrl.u32 %v10760_v21, 16 }
  0x2b   : > { %v484_v25 = vshll.u32 %v10760_v21, 16  ;;  %v1076_v26 = vld [vmem:[#allocation2 + $0x18] sm:$0xf]  ;;  %v1077_v27 = vld [vmem:[#allocation2 + $0x20] sm:$0xf]  ;;  %s10572_s8 = smov 24  }
  0x2c   : > { %v1445_v28 = vld [vmem:[#allocation2 + $0x20] sm:$0xf]  ;;  %387 = vst [vmem:[#allocation2 + $0x3c] sm:$0x1] %v386_v23  ;;  %v1149_v29 = vshrl.u32 %v1077_v27, 16  ;;  %v1152_v30 = vshll.u32 %v1077_v27, 16  ;;  %v9682_v33 = vcombine.low %v1076_v26, %v1077_v27 }
  0x2d   : > { %v1135_v34 = vshrl.u32 %v1076_v26, 16  ;;  %v1074_v36 = vld [vmem:[#allocation2 + $0x8] sm:$0xf]  ;;  %v1138_v37 = vshll.u32 %v1076_v26, 16  ;;  %v1075_v38 = vld [vmem:[#allocation2 + $0x10] sm:$0xf] }
  0x2e   : > { %v1107_v39 = vshrl.u32 %v1074_v36, 16  ;;  %v1110_v40 = vshll.u32 %v1074_v36, 16  ;;  %v1504_v41 = vshrl.u32 %v1445_v28, 16  ;;  %v1151_v42 = vrot.slane %v1149_v29, 4  ;;  %1973 = vrot.lane.b32.xlu1 %v9682_v33, %s10572_s8  ;;  %v1446_v50 = vld [vmem:[#allocation2 + $0x28] sm:$0xf] }
  0x2f   : > { %v1154_v43 = vrot.slane %v1152_v30, 5  ;;  %v1137_v44 = vrot.slane %v1135_v34, 4  ;;  %v1121_v45 = vshrl.u32 %v1075_v38, 16  ;;  %v1140_v46 = vrot.slane %v1138_v37, 5  ;;  %v1443_v56 = vld [vmem:[#allocation2 + $0x10] sm:$0xf] }
  0x30   : > { %v1124_v47 = vshll.u32 %v1075_v38, 16  ;;  %v9681_v48 = vcombine.low %v1074_v36, %v1075_v38  ;;  %v1109_v49 = vrot.slane %v1107_v39, 4  ;;  %v1112_v54 = vrot.slane %v1110_v40, 5  ;;  %v1444_v57 = vld [vmem:[#allocation2 + $0x18] sm:$0xf]  ;;  %s10573_s9 = smov 48  }
  0x31   : > { %v1155_v51 = vor.u32 %v1154_v43, %v1151_v42  ;;  %v1123_v53 = vrot.slane %v1121_v45, 4  ;;  %v10768_v55 = vrot.slane %v1504_v41, 4  ;;  %v1141_v58 = vor.u32 %v1140_v46, %v1137_v44  ;;  %v10771_v62 = vld [vmem:[#allocation2 + $0xc] sm:$0x1]  ;;  %v10775_v6 = vld [vmem:[#allocation2 + $0x14] sm:$0x1] }
  0x32   : > { %v1126_v59 = vrot.slane %v1124_v47, 5  ;;  %1971 = vrot.lane.b32.xlu0 %v9681_v48, %s10572_s8  ;;  %v1507_v60 = vshll.u32 %v1445_v28, 16  ;;  %v1518_v61 = vshrl.u32 %v1446_v50, 16  ;;  %v1113_v1 = vor.u32 %v1112_v54, %v1109_v49  ;;  %v1330_v8 = vld [vmem:[#allocation2 + $0x8] sm:$0xe]  ;;  %s10574_s10 = smov 40  }
  0x33   : > { %v10773_v63 = vrot.slane %v1155_v51, 4  ;;  %v1521_v2 = vshll.u32 %v1446_v50, 16  ;;  %v9706_v3 = vcombine.low %v1445_v28, %v1446_v50  ;;  %v10777_v10 = vrot.slane %v1141_v58, 4  ;;  %v1331_v16 = vld [vmem:[#allocation2 + $0x10] sm:$0xe]  ;;  %s10575_s11 = smov 16  }
  0x34   : > { %v1127_v11 = vor.u32 %v1126_v59, %v1123_v53  ;;  %v10779_v13 = vrot.slane %v1507_v60, 5  ;;  %v10781_v14 = vrot.slane %v1518_v61, 4  ;;  %v10783_v17 = vrot.slane %v1113_v1, 4  ;;  %v716_v26 = vld [vmem:[#allocation2 + $0x4] sm:$0x1]  ;;  %s10576_s12 = smov 64  }
  0x35   : > { %v10785_v18 = vrot.slane %v1521_v2, 5  ;;  %2109 = vrot.lane.b32.xlu1 %v9706_v3, %s10573_s9  ;;  %v1476_v19 = vshrl.u32 %v1443_v56, 16  ;;  %v1479_v23 = vshll.u32 %v1443_v56, 16  ;;  %v1490_v28 = vshrl.u32 %v1444_v57, 16  ;;  %v717_v34 = vld [vmem:[#allocation2 + $0xc] sm:$0x1] }
  0x36   : > { %v10788_v27 = vrot.slane %v1127_v11, 4  ;;  %v1493_v29 = vshll.u32 %v1444_v57, 16  ;;  %v9705_v30 = vcombine.low %v1443_v56, %v1444_v57  ;;  %v9625_v38 = vrot.slane %v1330_v8, 9  ;;  %v960_v40 = vld [vmem:[#allocation2 + $0x8] sm:$0xe]  ;;  %s10577_s13 = smov 8  }
  0x37   : > { %v10796_v36 = vrot.slane %v1476_v19, 4  ;;  %v10798_v37 = vrot.slane %v1479_v23, 5  ;;  %v1380_v39 = vrot.slane %v10771_v62, 5  ;;  %v10801_v41 = vrot.slane %v1490_v28, 4  ;;  %v618_v45 = vld [vmem:[#allocation2 + $0x1c] sm:$0x1] }
  0x38   : > { %v10803_v42 = vrot.slane %v1493_v29, 5  ;;  %2107 = vrot.lane.b32.xlu0 %v9705_v30, %s10573_s9  ;;  %v9626_v43 = vrot.slane %v1331_v16, 9  ;;  %v1384_v44 = vrot.slane %v10775_v6, 5  ;;  %v1012_v47 = vrot.slane %v716_v26, 5  ;;  %v10809_v50 = vld [vmem:[#allocation2 + $0x14] sm:$0x1] }
  0x39   : > { %v1381_v46 = vsel %vm10792_vm12, %v9625_v38, %v1380_v39  ;;  %v9610_v48 = vrot.slane %v960_v40, 9  ;;  %v1016_v49 = vrot.slane %v717_v34, 5  ;;  %vm732_vm13 = vsmask.f32 3328  ;;  %v1699_v54 = vld [vmem:[#allocation2 + $0x10] sm:$0xe] }
  0x3a   : > { %vm733_vm14 = vsmask.f32 7440  ;;  %v1385_v51 = vsel %vm10792_vm12, %v9626_v43, %v1384_v44  ;;  %v619_v53 = vsel %vm10633_vm2, %v463_v4, %v618_v45  ;;  %v10817_v56 = vld [vmem:[#allocation2 + $0x18] sm:$0xe]  ;;  %v1749_v57 = vrot.slane %v10809_v50, 5  ;;  %s10578_s14 = smov 32  }
  0x3b   : > { %v745_v58 = vshll.u32 %v716_v26, 16  ;;  %v9697_v59 = vcombine.low %v1381_v46, %v1385_v51  ;;  %v1013_v60 = vsel %vm10792_vm12, %v9609_v22, %v1012_v47  ;;  %v1017_v61 = vsel %vm10792_vm12, %v9610_v48, %v1016_v49  ;;  %620 = vst [vmem:[#allocation2 + $0x1c] sm:$0x1] %v619_v53  ;;  %v10826_v1 = vld [vmem:[#allocation2 + $0x14] sm:$0x1]  ;;  %vm10864_vm15 = vmor %vm732_vm13, %vm733_vm14  ;;  %s10579_s15 = smov 56  }
  0x3c   : > { %v9641_v31 = vrot.slane %v1699_v54, 9  ;;  %v961_v4 = vld [vmem:[#allocation2 + $0x10] sm:$0xe]  ;;  %v9673_v2 = vcombine.low %v1013_v60, %v1017_v61  ;;  %v9642_v3 = vrot.slane %v10817_v56, 9  ;;  %v962_v8 = vld [vmem:[#allocation2 + $0x18] sm:$0xe]  ;;  %v1482_v52 = vor.u32 %v10798_v37, %v10796_v36 }
  0x3d   : > { %v9611_v11 = vrot.slane %v961_v4, 9  ;;  %v1020_v16 = vrot.slane %v10826_v1, 5  ;;  %2051 = vrot.lane.b32.xlu0 %v9697_v59, %s10574_s10  ;;  %v9612_v9 = vrot.slane %v962_v8, 9  ;;  %v624_v22 = vld [vmem:[#allocation2 + $0x24] sm:$0x1]  ;;  %v10831_v23 = vrot.slane %v745_v58, 5 }
  0x3e   : > { %v1332_v19 = vld [vmem:[#allocation2 + $0x18] sm:$0xe]  ;;  %1915 = vrot.lane.b32.xlu1 %v9673_v2, %s10575_s11  ;;  %v1750_v26 = vsel %vm10792_vm12, %v9641_v31, %v1749_v57  ;;  %v625_v28 = vsel %vm10633_vm2, %v471_v7, %v624_v22  ;;  %v10840_v29 = vld [vmem:[#allocation2 + $0x20] sm:$0xe]  ;;  %v759_v39 = vshll.u32 %v717_v34, 16  ;;  %v773_v46 = vshll.u32 %v10826_v1, 16 }
  0x3f   : > { %v9627_v30 = vrot.slane %v1332_v19, 9  ;;  %v700_v38 = vld [vmem:[#allocation2] sm:$0xf]  ;;  %626 = vst [vmem:[#allocation2 + $0x24] sm:$0x1] %v625_v28  ;;  %v9628_v40 = vrot.slane %v10840_v29, 9  ;;  %v1510_v57 = vor.u32 %v10779_v13, %v10768_v55  ;;  %v1021_v60 = vsel %vm10792_vm12, %v9611_v11, %v1020_v16 }
  0x40   : > { %v701_v43 = vld [vmem:[#allocation2 + $0x8] sm:$0xf]  ;;  %v736_v44 = vshrl.u32 %v700_v38, 16  ;;  %v739_v45 = vshll.u32 %v700_v38, 16  ;;  %v761_v49 = vrot.slane %v759_v39, 5  ;;  %v1116_v51 = vshll.u32 %v10771_v62, 16 }
  0x41   : > { %v750_v47 = vshrl.u32 %v701_v43, 16  ;;  %v753_v48 = vshll.u32 %v701_v43, 16  ;;  %v630_v32 = vld [vmem:[#allocation2 + $0x2c] sm:$0x1]  ;;  %v1701_v54 = vld [vmem:[#allocation2 + $0x20] sm:$0xe]  ;;  %v1524_v31 = vor.u32 %v10785_v18, %v10781_v14 }
  0x42   : > { %v738_v7 = vrot.slane %v736_v44, 4  ;;  %v741_v53 = vrot.slane %v739_v45, 5  ;;  %v631_v34 = vsel %vm10633_vm2, %v479_v12, %v630_v32  ;;  %v1702_v56 = vld [vmem:[#allocation2 + $0x28] sm:$0xe]  ;;  %v10851_v58 = vld [vmem:[#allocation2 + $0x1c] sm:$0x1]  ;;  %v1496_v12 = vor.u32 %v10803_v42, %v10801_v41 }
  0x43   : > { %v719_v59 = vld [vmem:[#allocation2 + $0x1c] sm:$0x1]  ;;  %632 = vst [vmem:[#allocation2 + $0x2c] sm:$0x1] %v631_v34  ;;  %v1753_v1 = vrot.slane %v10851_v58, 5  ;;  %v752_v16 = vrot.slane %v750_v47, 4 }
  0x44   : > { %v1092_v61 = vld [vmem:[#allocation2 + $0x1c] sm:$0x1]  ;;  %v1024_v4 = vrot.slane %v719_v59, 5  ;;  %v742_v8 = vor.u32 %v741_v53, %v738_v7  ;;  %v702_v22 = vld [vmem:[#allocation2 + $0x10] sm:$0xf]  ;;  %v755_v19 = vrot.slane %v753_v48, 5 }
  0x45   : > { %v1388_v2 = vrot.slane %v1092_v61, 5  ;;  %v9643_v28 = vrot.slane %v1701_v54, 9  ;;  %v9644_v29 = vrot.slane %v1702_v56, 9  ;;  %v1754_v38 = vsel %vm10792_vm12, %v9642_v3, %v1753_v1  ;;  %v703_v45 = vld [vmem:[#allocation2 + $0x18] sm:$0xf] }
  0x46   : > { %v1025_v39 = vsel %vm10792_vm12, %v9612_v9, %v1024_v4  ;;  %v743_v44 = vrot.slane %v742_v8, 4  ;;  %v9721_v32 = vcombine.low %v1750_v26, %v1754_v38  ;;  %v1093_v53 = vld [vmem:[#allocation2 + $0x24] sm:$0x1]  ;;  %v756_v34 = vor.u32 %v755_v19, %v752_v16  ;;  %v10920_v14 = vld [vmem:[#allocation2 + $0x20] sm:$0xf] }
  0x47   : > { %v1389_v43 = vsel %vm10792_vm12, %v9627_v30, %v1388_v2  ;;  %v9674_v7 = vcombine.low %v1021_v60, %v1025_v39  ;;  %v1461_v20 = vld [vmem:[#allocation2 + $0x24] sm:$0x1]  ;;  %v764_v47 = vshrl.u32 %v702_v22, 16  ;;  %v1392_v48 = vrot.slane %v1093_v53, 5 }
  0x48   : > { %v748_v54 = vsel %vm10864_vm15, %v743_v44, %v10831_v23  ;;  %v1757_v3 = vrot.slane %v1461_v20, 5  ;;  %v767_v56 = vshll.u32 %v702_v22, 16  ;;  %2187 = vrot.lane.b32.xlu0 %v9721_v32, %s10576_s12  ;;  %v757_v9 = vrot.slane %v756_v34, 4  ;;  %v10936_v42 = vld [vmem:[#allocation2 + $0x24] sm:$0x1] }
  0x49   : > { %1917 = vrot.lane.b32.xlu1 %v9674_v7, %s10575_s11  ;;  %v766_v30 = vrot.slane %v764_v47, 4  ;;  %v775_v26 = vrot.slane %v773_v46, 5  ;;  %v778_v60 = vshrl.u32 %v703_v45, 16  ;;  %v1393_v1 = vsel %vm10792_vm12, %v9628_v40, %v1392_v48 }
  0x4a   : > { %v1462_v4 = vld [vmem:[#allocation2 + $0x2c] sm:$0x1]  ;;  %v1758_v2 = vsel %vm10792_vm12, %v9643_v28, %v1757_v3  ;;  %v769_v8 = vrot.slane %v767_v56, 5  ;;  %v781_v23 = vshll.u32 %v703_v45, 16  ;;  %v9698_v16 = vcombine.low %v1389_v43, %v1393_v1 }
  0x4b   : > { %v762_v22 = vsel %vm10864_vm15, %v757_v9, %v761_v49  ;;  %v1761_v19 = vrot.slane %v1462_v4, 5  ;;  %v780_v38 = vrot.slane %v778_v60, 4  ;;  %v787_v46 = vshll.u32 %v719_v59, 16  ;;  %v430_v9 = vld [vmem:[%s10661_s30 + $0x18] sm:$0xf] }
  0x4c   : > { %v9665_v39 = vcombine.low %v748_v54, %v762_v22  ;;  %v770_v44 = vor.u32 %v769_v8, %v766_v30  ;;  %v783_v32 = vrot.slane %v781_v23, 5  ;;  %v1144_v7 = vshll.u32 %v1092_v61, 16  ;;  %v636_v22 = vld [vmem:[#allocation2 + $0x34] sm:$0x1]  ;;  %v721_v21 = vld [vmem:[#allocation2 + $0x2c] sm:$0x1] }
  0x4d   : > { %2053 = vrot.lane.b32.xlu1 %v9698_v16, %s10574_s10  ;;  %v1762_v40 = vsel %vm10792_vm12, %v9644_v29, %v1761_v19  ;;  %v1158_v34 = vshll.u32 %v1093_v53, 16  ;;  %v1118_v28 = vrot.slane %v1116_v51, 5  ;;  %v789_v47 = vrot.slane %v787_v46, 5  ;;  %v639_v19 = vld [vmem:[#allocation2 + $0x38] sm:$0xf] }
  0x4e   : > { %1875 = vrot.lane.b32.xlu0 %v9665_v39, %s10577_s13  ;;  %v9722_v49 = vcombine.low %v1758_v2, %v1762_v40  ;;  %v771_v43 = vrot.slane %v770_v44, 4  ;;  %v784_v45 = vor.u32 %v783_v32, %v780_v38  ;;  %v1146_v48 = vrot.slane %v1144_v7, 5  ;;  %v642_v44 = vld [vmem:[#allocation2 + $0x3c] sm:$0x1] }
  0x4f   : > { %v1160_v54 = vrot.slane %v1158_v34, 5  ;;  %v1119_v59 = vsel %vm10864_vm15, %v10783_v17, %v1118_v28  ;;  %v1130_v61 = vshll.u32 %v10775_v6, 16  ;;  %v1511_v29 = vrot.slane %v1510_v57, 4  ;;  %v963_v28 = vld [vmem:[#allocation2 + $0x20] sm:$0xe] }
  0x50   : > { %v776_v62 = vsel %vm10864_vm15, %v771_v43, %v775_v26  ;;  %v785_v51 = vrot.slane %v784_v45, 4  ;;  %v1513_v53 = vshll.u32 %v1461_v20, 16  ;;  %v1147_v3 = vsel %vm10864_vm15, %v10777_v10, %v1146_v48  ;;  %v964_v48 = vld [vmem:[#allocation2 + $0x28] sm:$0xe] }
  0x51   : > { %2189 = vrot.lane.b32.xlu1 %v9722_v49, %s10576_s12  ;;  %v1161_v17 = vsel %vm10864_vm15, %v10773_v63, %v1160_v54  ;;  %v1132_v6 = vrot.slane %v1130_v61, 5  ;;  %v1525_v56 = vrot.slane %v1524_v31, 4  ;;  %v1527_v57 = vshll.u32 %v1462_v4, 16  ;;  %v633_v4 = vld [vmem:[#allocation2 + $0x30] sm:$0xf] }
  0x52   : > { %v790_v55 = vsel %vm10864_vm15, %v785_v51, %v789_v47  ;;  %v9690_v13 = vcombine.low %v1147_v3, %v1161_v17  ;;  %v1515_v20 = vrot.slane %v1513_v53, 5  ;;  %v1483_v63 = vrot.slane %v1482_v52, 4  ;;  %v10932_v52 = vld [vmem:[#allocation2 + $0x28] sm:$0xf]  ;;  %v326_v54 = vld [vmem:[#allocation2 + $0x40] sm:$0x1] }
  0x53   : > { %v9666_v30 = vcombine.low %v776_v62, %v790_v55  ;;  %v1133_v10 = vsel %vm10864_vm15, %v10788_v27, %v1132_v6  ;;  %v1485_v26 = vshll.u32 %v10809_v50, 16  ;;  %v1529_v60 = vrot.slane %v1527_v57, 5  ;;  %v10962_v57 = vld [vmem:[#allocation2 + $0x28] sm:$0xf] }
  0x54   : > { %v9689_v18 = vcombine.low %v1119_v59, %v1133_v10  ;;  %v1516_v31 = vsel %vm10864_vm15, %v1511_v29, %v1515_v20  ;;  %v1497_v1 = vrot.slane %v1496_v12, 4  ;;  %v1499_v36 = vshll.u32 %v10851_v58, 16  ;;  %v431_v29 = vld [vmem:[%s10661_s30 + $0x1c] sm:$0xf] }
  0x55   : > { %1877 = vrot.lane.b32.xlu0 %v9666_v30, %s10577_s13  ;;  %2013 = vrot.lane.b32.xlu1 %v9690_v13, %s10578_s14  ;;  %v1487_v27 = vrot.slane %v1485_v26, 5  ;;  %v483_v37 = vrot.slane %v481_v24, 7  ;;  %v489_v50 = vshrl.u32 %v430_v9, 16  ;;  %v1530_v2 = vsel %vm10864_vm15, %v1525_v56, %v1529_v60 }
  0x56   : > { %v492_v41 = vshll.u32 %v430_v9, 16  ;;  %v792_v12 = vshrl.u32 %v10920_v14, 16  ;;  %v795_v8 = vshll.u32 %v10920_v14, 16  ;;  %v9714_v23 = vcombine.low %v1516_v31, %v1530_v2 }
  0x57   : > { %v1488_v58 = vsel %vm10864_vm15, %v1483_v63, %v1487_v27  ;;  %v1501_v16 = vrot.slane %v1499_v36, 5  ;;  %v486_v24 = vor.u32 %v484_v25, %v483_v37  ;;  %v487_v38 = vrot.slane %v483_v37, 4  ;;  %v388_v63 = vld [vmem:[#allocation2 + $0x44] sm:$0x1] }
  0x58   : > { %v491_v39 = vrot.slane %v489_v50, 7  ;;  %v794_v32 = vrot.slane %v792_v12, 4  ;;  %v797_v46 = vrot.slane %v795_v8, 5  ;;  %v801_v25 = vshll.u32 %v10936_v42, 16 }
  0x59   : > { %2011 = vrot.lane.b32.xlu0 %v9689_v18, %s10578_s14  ;;  %2149 = vrot.lane.b32.xlu1 %v9714_v23, %s10579_s15  ;;  %v1502_v40 = vsel %vm10864_vm15, %v1497_v1, %v1501_v16  ;;  %v634_v7 = vsel %vm10715_vm9, %v486_v24, %v633_v4  ;;  %v806_v34 = vshrl.u32 %v10932_v52, 16  ;;  %v637_v47 = vsel %vm10633_vm2, %v487_v38, %v636_v22 }
  0x5a   : > { %v9713_v49 = vcombine.low %v1488_v58, %v1502_v40  ;;  %v494_v43 = vor.u32 %v492_v41, %v491_v39  ;;  %v495_v45 = vrot.slane %v491_v39, 4  ;;  %635 = vst [vmem:[#allocation2 + $0x30] sm:$0xf] %v634_v7  ;;  %638 = vst [vmem:[#allocation2 + $0x34] sm:$0x1] %v637_v47  ;;  %v798_v59 = vor.u32 %v797_v46, %v794_v32 }
  0x5b   : > { %v803_v61 = vrot.slane %v801_v25, 5  ;;  %v808_v62 = vrot.slane %v806_v34, 4  ;;  %v809_v51 = vshll.u32 %v10932_v52, 16  ;;  %v815_v17 = vshll.u32 %v721_v21, 16 }
  0x5c   : > { %v640_v53 = vsel %vm10715_vm9, %v494_v43, %v639_v19  ;;  %v643_v3 = vsel %vm10633_vm2, %v495_v45, %v642_v44  ;;  %v9613_v6 = vrot.slane %v963_v28, 9  ;;  %v799_v56 = vrot.slane %v798_v59, 4 }
  0x5d   : > { %2147 = vrot.lane.b32.xlu0 %v9713_v49, %s10579_s15  ;;  %641 = vst [vmem:[#allocation2 + $0x38] sm:$0xf] %v640_v53  ;;  %644 = vst [vmem:[#allocation2 + $0x3c] sm:$0x1] %v643_v3  ;;  %v811_v55 = vrot.slane %v809_v51, 5  ;;  %v1028_v13 = vrot.slane %v10936_v42, 5 }
  0x5e   : > { %v9614_v20 = vrot.slane %v964_v48, 9  ;;  %v1032_v9 = vrot.slane %v721_v21, 5  ;;  %v327_v30 = vsel %vm10633_vm2, 0, %v326_v54  ;;  %v497_v10 = vshrl.u32 %v431_v29, 16 }
  0x5f   : > { %v812_v26 = vor.u32 %v811_v55, %v808_v62  ;;  %v817_v18 = vrot.slane %v815_v17, 5  ;;  %328 = vst [vmem:[#allocation2 + $0x40] sm:$0x1] %v327_v30  ;;  %v500_v31 = vshll.u32 %v431_v29, 16  ;;  %v804_v60 = vsel %vm10864_vm15, %v799_v56, %v803_v61 }
  0x60   : > { %v10968_v1 = vrot.slane %v497_v10, 7  ;;  %v1163_v4 = vshrl.u32 %v10962_v57, 16  ;;  %v1166_v27 = vshll.u32 %v10962_v57, 16  ;;  %v1029_v2 = vsel %vm10792_vm12, %v9613_v6, %v1028_v13  ;;  %v11006_v10 = vld [vmem:[#allocation2 + $0x2c] sm:$0x1] }
  0x61   : > { %v10972_v36 = vld [vmem:[#allocation2 + $0x30] sm:$0xf]  ;;  %v813_v37 = vrot.slane %v812_v26, 4  ;;  %v1033_v41 = vsel %vm10792_vm12, %v9614_v20, %v1032_v9  ;;  %v389_v42 = vsel %vm10645_vm5, 0, %v388_v63  ;;  %v722_v12 = vld [vmem:[#allocation2 + $0x34] sm:$0x1] }
  0x62   : > { %v965_v50 = vld [vmem:[#allocation2 + $0x30] sm:$0xe]  ;;  %v820_v8 = vshrl.u32 %v10972_v36, 16  ;;  %v823_v23 = vshll.u32 %v10972_v36, 16  ;;  %v502_v16 = vor.u32 %v500_v31, %v10968_v1  ;;  %390 = vst [vmem:[#allocation2 + $0x44] sm:$0x1] %v389_v42  ;;  %v9675_v21 = vcombine.low %v1029_v2, %v1033_v41 }
  0x63   : > { %v9615_v58 = vrot.slane %v965_v50, 9  ;;  %v829_v24 = vshll.u32 %v722_v12, 16  ;;  %v818_v22 = vsel %vm10864_vm15, %v813_v37, %v817_v18  ;;  %v1036_v19 = vrot.slane %v722_v12, 5  ;;  %v1079_v39 = vld [vmem:[#allocation2 + $0x30] sm:$0xf] }
  0x64   : > { %v503_v38 = vrot.slane %v10968_v1, 4  ;;  %v10986_v44 = vld [vmem:[#allocation2 + $0x38] sm:$0xf]  ;;  %v723_v32 = vld [vmem:[#allocation2 + $0x3c] sm:$0x1]  ;;  %v822_v46 = vrot.slane %v820_v8, 4  ;;  %v9667_v7 = vcombine.low %v804_v60, %v818_v22  ;;  %v9683_v61 = vcombine.low %v10962_v57, %v1079_v39 }
  0x65   : > { %v825_v40 = vrot.slane %v823_v23, 5  ;;  %v831_v25 = vrot.slane %v829_v24, 5  ;;  %v834_v34 = vshrl.u32 %v10986_v44, 16  ;;  %v837_v28 = vshll.u32 %v10986_v44, 16  ;;  %v966_v43 = vld [vmem:[#allocation2 + $0x38] sm:$0xe] }
  0x66   : > { %v843_v49 = vshll.u32 %v723_v32, 16  ;;  %1879 = vrot.lane.b32.xlu0 %v9667_v7, %s10577_s13  ;;  %v9616_v47 = vrot.slane %v966_v43, 9  ;;  %v1040_v48 = vrot.slane %v723_v32, 5  ;;  %v645_v54 = vld [vmem:[#allocation2 + $0x40] sm:$0xf]  ;;  %v10996_v29 = vsel %vm10792_vm12, %v9615_v58, %v1036_v19 }
  0x67   : > { %v826_v45 = vor.u32 %v825_v40, %v822_v46  ;;  %v10991_v59 = vld [vmem:[#allocation2 + $0x38] sm:$0xf]  ;;  %v836_v62 = vrot.slane %v834_v34, 4  ;;  %v839_v51 = vrot.slane %v837_v28, 5  ;;  %v646_v53 = vsel %vm10715_vm9, %v502_v16, %v645_v54  ;;  %v11002_v55 = vld [vmem:[#allocation2 + $0x3c] sm:$0x1] }
  0x68   : > { %v845_v17 = vrot.slane %v843_v49, 5  ;;  %647 = vst [vmem:[#allocation2 + $0x40] sm:$0xf] %v646_v53  ;;  %v1191_v6 = vshrl.u32 %v10991_v59, 16  ;;  %v1194_v56 = vshll.u32 %v10991_v59, 16  ;;  %v1041_v20 = vsel %vm10792_vm12, %v9616_v47, %v1040_v48 }
  0x69   : > { %v827_v3 = vrot.slane %v826_v45, 4  ;;  %v840_v13 = vor.u32 %v839_v51, %v836_v62  ;;  %v1165_v57 = vrot.slane %v1163_v4, 4  ;;  %v1168_v9 = vrot.slane %v1166_v27, 5  ;;  %v648_v30 = vld [vmem:[#allocation2 + $0x44] sm:$0x1] }
  0x6a   : > { %1919 = vrot.lane.b32.xlu0 %v9675_v21, %s10575_s11  ;;  %v1193_v26 = vrot.slane %v1191_v6, 4  ;;  %v1196_v18 = vrot.slane %v1194_v56, 5  ;;  %v1177_v31 = vshrl.u32 %v1079_v39, 16  ;;  %v1095_v60 = vld [vmem:[#allocation2 + $0x34] sm:$0x1]  ;;  %v1180_v37 = vshll.u32 %v1079_v39, 16 }
  0x6b   : > { %v832_v63 = vsel %vm10864_vm15, %v827_v3, %v831_v25  ;;  %v841_v1 = vrot.slane %v840_v13, 4  ;;  %v649_v50 = vsel %vm10633_vm2, %v503_v38, %v648_v30  ;;  %v1200_v4 = vshll.u32 %v11002_v55, 16  ;;  %v1336_v12 = vld [vmem:[#allocation2 + $0x38] sm:$0xe]  ;;  %v1334_v24 = vld [vmem:[#allocation2 + $0x28] sm:$0xe] }
  0x6c   : > { %v1179_v27 = vrot.slane %v1177_v31, 4  ;;  %650 = vst [vmem:[#allocation2 + $0x44] sm:$0x1] %v649_v50  ;;  %v1197_v2 = vor.u32 %v1196_v18, %v1193_v26  ;;  %v1169_v41 = vor.u32 %v1168_v9, %v1165_v57  ;;  %v1172_v42 = vshll.u32 %v11006_v10, 16  ;;  %v11020_v32 = vld [vmem:[#allocation2 + $0x30] sm:$0xf] }
  0x6d   : > { %v846_v8 = vsel %vm10864_vm15, %v841_v1, %v845_v17  ;;  %v1182_v23 = vrot.slane %v1180_v37, 5  ;;  %v11017_v58 = vrot.slane %v1200_v4, 5  ;;  %v1186_v16 = vshll.u32 %v1095_v60, 16  ;;  %v11023_v34 = vld [vmem:[#allocation2 + $0x38] sm:$0xf] }
  0x6e   : > { %v9668_v22 = vcombine.low %v832_v63, %v846_v8  ;;  %1975 = vrot.lane.b32.xlu0 %v9683_v61, %s10572_s8  ;;  %v1198_v19 = vrot.slane %v1197_v2, 4  ;;  %v1170_v38 = vrot.slane %v1169_v41, 4  ;;  %v1174_v39 = vrot.slane %v1172_v42, 5  ;;  %v1335_v47 = vld [vmem:[#allocation2 + $0x30] sm:$0xe] }
  0x6f   : > { %v9676_v46 = vcombine.low %v10996_v29, %v1041_v20  ;;  %v1081_v40 = vld [vmem:[#allocation2 + $0x40] sm:$0xf]  ;;  %v1183_v7 = vor.u32 %v1182_v23, %v1179_v27  ;;  %v1188_v21 = vrot.slane %v1186_v16, 5  ;;  %v9631_v25 = vrot.slane %v1336_v12, 9  ;;  %v329_v29 = vld [vmem:[#allocation2 + $0x48] sm:$0x1] }
  0x70   : > { %1881 = vrot.lane.b32.xlu1 %v9668_v22, %s10577_s13  ;;  %v1205_v28 = vshrl.u32 %v1081_v40, 16  ;;  %v1208_v49 = vshll.u32 %v1081_v40, 16  ;;  %v9684_v43 = vcombine.low %v10991_v59, %v1081_v40  ;;  %v1337_v45 = vld [vmem:[#allocation2 + $0x40] sm:$0xe]  ;;  %v9707_v48 = vcombine.low %v11020_v32, %v11023_v34  ;;  %v391_v27 = vld [vmem:[#allocation2 + $0x4c] sm:$0x1] }
  0x71   : > { %v1203_v54 = vsel %vm10864_vm15, %v1198_v19, %v11017_v58  ;;  %v1175_v61 = vsel %vm10864_vm15, %v1170_v38, %v1174_v39  ;;  %v1184_v62 = vrot.slane %v1183_v7, 4  ;;  %v1404_v51 = vrot.slane %v11002_v55, 5  ;;  %v11036_v6 = vld [vmem:[#allocation2 + $0x40] sm:$0xf]  ;;  %v11051_v2 = vld [vmem:[#allocation2 + $0x34] sm:$0x1] }
  0x72   : > { %v1207_v53 = vrot.slane %v1205_v28, 4  ;;  %v1210_v3 = vrot.slane %v1208_v49, 5  ;;  %v9629_v17 = vrot.slane %v1334_v24, 9  ;;  %v1396_v59 = vrot.slane %v11006_v10, 5  ;;  %v11065_v19 = vld [vmem:[#allocation2 + $0x3c] sm:$0x1] }
  0x73   : > { %v1097_v56 = vld [vmem:[#allocation2 + $0x44] sm:$0x1]  ;;  %v1189_v13 = vsel %vm10864_vm15, %v1184_v62, %v1188_v21  ;;  %v9632_v20 = vrot.slane %v1337_v45, 9  ;;  %v9630_v57 = vrot.slane %v1335_v47, 9  ;;  %v1400_v9 = vrot.slane %v1095_v60, 5 }
  0x74   : > { %1921 = vrot.lane.b32.xlu1 %v9676_v46, %s10575_s11  ;;  %v1211_v30 = vor.u32 %v1210_v3, %v1207_v53  ;;  %v1214_v63 = vshll.u32 %v1097_v56, 16  ;;  %v9691_v55 = vcombine.low %v1175_v61, %v1189_v13  ;;  %v1408_v26 = vrot.slane %v1097_v56, 5  ;;  %v11057_v23 = vld [vmem:[#allocation2 + $0x44] sm:$0x1]  ;;  %v11069_v7 = vld [vmem:[#allocation2 + $0x40] sm:$0xe] }
  0x75   : > { %v1397_v18 = vsel %vm10792_vm12, %v9629_v17, %v1396_v59  ;;  %v1401_v10 = vsel %vm10792_vm12, %v9630_v57, %v1400_v9  ;;  %v330_v31 = vsel %vm10633_vm2, 0, %v329_v29  ;;  %v1560_v1 = vshrl.u32 %v11036_v6, 16  ;;  %v11075_v61 = vld [vmem:[#allocation2 + $0x48] sm:$0xe]  ;;  %v1703_v62 = vld [vmem:[#allocation2 + $0x30] sm:$0xe] }
  0x76   : > { %v1212_v37 = vrot.slane %v1211_v30, 4  ;;  %v1216_v50 = vrot.slane %v1214_v63, 5  ;;  %2015 = vrot.lane.b32.xlu0 %v9691_v55, %s10578_s14  ;;  %v1405_v60 = vsel %vm10792_vm12, %v9631_v25, %v1404_v51  ;;  %v9699_v4 = vcombine.low %v1397_v18, %v1401_v10  ;;  %331 = vst [vmem:[#allocation2 + $0x48] sm:$0x1] %v330_v31  ;;  %v1704_v17 = vld [vmem:[#allocation2 + $0x38] sm:$0xe] }
  0x77   : > { %v1409_v41 = vsel %vm10792_vm12, %v9632_v20, %v1408_v26  ;;  %v1562_v42 = vrot.slane %v1560_v1, 4  ;;  %v1563_v12 = vshll.u32 %v11036_v6, 16  ;;  %v1532_v8 = vshrl.u32 %v11020_v32, 16  ;;  %v338_v59 = vld [vmem:[#allocation2 + $0x60] sm:$0x1] }
  0x78   : > { %1977 = vrot.lane.b32.xlu1 %v9684_v43, %s10572_s8  ;;  %v1217_v58 = vsel %vm10864_vm15, %v1212_v37, %v1216_v50  ;;  %v1535_v16 = vshll.u32 %v11020_v32, 16  ;;  %v1546_v24 = vshrl.u32 %v11023_v34, 16  ;;  %v1549_v22 = vshll.u32 %v11023_v34, 16  ;;  %v341_v18 = vld [vmem:[#allocation2 + $0x68] sm:$0x1] }
  0x79   : > { %v9692_v38 = vcombine.low %v1203_v54, %v1217_v58  ;;  %v1565_v39 = vrot.slane %v1563_v12, 5  ;;  %v1534_v46 = vrot.slane %v1532_v8, 4  ;;  %v392_v40 = vsel %vm10645_vm5, 0, %v391_v27  ;;  %v400_v10 = vld [vmem:[#allocation2 + $0x64] sm:$0x1] }
  0x7a   : > { %2055 = vrot.lane.b32.xlu0 %v9699_v4, %s10574_s10  ;;  %v1537_v21 = vrot.slane %v1535_v16, 5  ;;  %v1548_v25 = vrot.slane %v1546_v24, 4  ;;  %v1551_v28 = vrot.slane %v1549_v22, 5  ;;  %393 = vst [vmem:[#allocation2 + $0x4c] sm:$0x1] %v392_v40  ;;  %v1569_v49 = vshll.u32 %v11057_v23, 16 }
  0x7b   : > { %v9700_v43 = vcombine.low %v1405_v60, %v1409_v41  ;;  %v1566_v45 = vor.u32 %v1565_v39, %v1562_v42  ;;  %v1541_v47 = vshll.u32 %v11051_v2, 16  ;;  %v1555_v54 = vshll.u32 %v11065_v19, 16  ;;  %v403_v4 = vld [vmem:[#allocation2 + $0x6c] sm:$0x1]  ;;  %v433_v27 = vld [vmem:[%s10661_s30 + $0x24] sm:$0xf] }
  0x7c   : > { %2017 = vrot.lane.b32.xlu1 %v9692_v38, %s10578_s14  ;;  %v11078_v51 = vrot.slane %v1569_v49, 5  ;;  %v1538_v29 = vor.u32 %v1537_v21, %v1534_v46  ;;  %v1552_v53 = vor.u32 %v1551_v28, %v1548_v25  ;;  %v9647_v3 = vrot.slane %v11069_v7, 9  ;;  %v332_v58 = vld [vmem:[#allocation2 + $0x50] sm:$0x1]  ;;  %v394_v39 = vld [vmem:[#allocation2 + $0x54] sm:$0x1] }
  0x7d   : > { %v1450_v56 = vld [vmem:[#allocation2 + $0x48] sm:$0xf]  ;;  %v11081_v13 = vrot.slane %v1566_v45, 4  ;;  %v1543_v20 = vrot.slane %v1541_v47, 5  ;;  %v1557_v57 = vrot.slane %v1555_v54, 5  ;;  %v1773_v9 = vrot.slane %v11057_v23, 5 }
  0x7e   : > { %v1574_v30 = vshrl.u32 %v1450_v56, 16  ;;  %v1577_v63 = vshll.u32 %v1450_v56, 16  ;;  %2111 = vrot.lane.b32.xlu0 %v9707_v48, %s10573_s9  ;;  %v1539_v55 = vrot.slane %v1538_v29, 4  ;;  %v9648_v26 = vrot.slane %v11075_v61, 9  ;;  %v434_v23 = vld [vmem:[%s10661_s30 + $0x28] sm:$0xf] }
  0x7f   : > { %v9708_v31 = vcombine.low %v11036_v6, %v1450_v56  ;;  %v1572_v1 = vsel %vm10864_vm15, %v11081_v13, %v11078_v51  ;;  %v1553_v37 = vrot.slane %v1552_v53, 4  ;;  %v9645_v50 = vrot.slane %v1703_v62, 9  ;;  %v397_v21 = vld [vmem:[#allocation2 + $0x5c] sm:$0x1]  ;;  %v432_v25 = vld [vmem:[%s10661_s30 + $0x20] sm:$0xf] }
  0x80   : > { %2057 = vrot.lane.b32.xlu1 %v9700_v43, %s10574_s10  ;;  %v1576_v32 = vrot.slane %v1574_v30, 4  ;;  %v1579_v34 = vrot.slane %v1577_v63, 5  ;;  %v1544_v48 = vsel %vm10864_vm15, %v1539_v55, %v1543_v20  ;;  %v1765_v60 = vrot.slane %v11051_v2, 5  ;;  %v335_v2 = vld [vmem:[#allocation2 + $0x58] sm:$0x1] }
  0x81   : > { %v1466_v6 = vld [vmem:[#allocation2 + $0x4c] sm:$0x1]  ;;  %v1558_v41 = vsel %vm10864_vm15, %v1553_v37, %v1557_v57  ;;  %v9646_v42 = vrot.slane %v1704_v17, 9  ;;  %v1769_v12 = vrot.slane %v11065_v19, 5  ;;  %v339_v8 = vsel %vm10633_vm2, 0, %v338_v59 }
  0x82   : > { %v1580_v16 = vor.u32 %v1579_v34, %v1576_v32  ;;  %v1583_v24 = vshll.u32 %v1466_v6, 16  ;;  %v9715_v22 = vcombine.low %v1544_v48, %v1558_v41  ;;  %v1777_v38 = vrot.slane %v1466_v6, 5  ;;  %340 = vst [vmem:[#allocation2 + $0x60] sm:$0x1] %v339_v8  ;;  %v344_v47 = vld [vmem:[#allocation2 + $0x70] sm:$0x1] }
  0x83   : > { %v1766_v46 = vsel %vm10792_vm12, %v9645_v50, %v1765_v60  ;;  %v1770_v40 = vsel %vm10792_vm12, %v9646_v42, %v1769_v12  ;;  %v342_v19 = vsel %vm10633_vm2, 0, %v341_v18  ;;  %v401_v7 = vsel %vm10645_vm5, 0, %v400_v10  ;;  %v11123_v29 = vld [vmem:[%s10661_s30 + $0x2c] sm:$0xf]  ;;  %v406_v56 = vld [vmem:[#allocation2 + $0x74] sm:$0x1] }
  0x84   : > { %2113 = vrot.lane.b32.xlu1 %v9708_v31, %s10573_s9  ;;  %v1581_v28 = vrot.slane %v1580_v16, 4  ;;  %v1585_v49 = vrot.slane %v1583_v24, 5  ;;  %2151 = vrot.lane.b32.xlu0 %v9715_v22, %s10579_s15  ;;  %v1774_v43 = vsel %vm10792_vm12, %v9647_v3, %v1773_v9  ;;  %v9723_v45 = vcombine.low %v1766_v46, %v1770_v40  ;;  %343 = vst [vmem:[#allocation2 + $0x68] sm:$0x1] %v342_v19  ;;  %v11133_v30 = vld [vmem:[#allocation2 + $0x50] sm:$0xe] }
  0x85   : > { %402 = vst [vmem:[#allocation2 + $0x64] sm:$0x1] %v401_v7  ;;  %v1778_v54 = vsel %vm10792_vm12, %v9648_v26, %v1777_v38  ;;  %v404_v61 = vsel %vm10645_vm5, 0, %v403_v4  ;;  %v513_v62 = vshrl.u32 %v433_v27, 16  ;;  %v516_v51 = vshll.u32 %v433_v27, 16 }
  0x86   : > { %v1586_v53 = vsel %vm10864_vm15, %v1581_v28, %v1585_v49  ;;  %405 = vst [vmem:[#allocation2 + $0x6c] sm:$0x1] %v404_v61  ;;  %v521_v17 = vshrl.u32 %v434_v23, 16  ;;  %v524_v3 = vshll.u32 %v434_v23, 16  ;;  %v333_v59 = vsel %vm10633_vm2, 0, %v332_v58 }
  0x87   : > { %v9716_v13 = vcombine.low %v1572_v1, %v1586_v53  ;;  %v515_v20 = vrot.slane %v513_v62, 7  ;;  %334 = vst [vmem:[#allocation2 + $0x50] sm:$0x1] %v333_v59  ;;  %v336_v57 = vsel %vm10633_vm2, 0, %v335_v2  ;;  %v395_v9 = vsel %vm10645_vm5, 0, %v394_v39 }
  0x88   : > { %2191 = vrot.lane.b32.xlu0 %v9723_v45, %s10576_s12  ;;  %v523_v63 = vrot.slane %v521_v17, 7  ;;  %337 = vst [vmem:[#allocation2 + $0x58] sm:$0x1] %v336_v57  ;;  %396 = vst [vmem:[#allocation2 + $0x54] sm:$0x1] %v395_v9  ;;  %v398_v55 = vsel %vm10645_vm5, 0, %v397_v21  ;;  %v9724_v1 = vcombine.low %v1774_v43, %v1778_v54 }
  0x89   : > { %v505_v26 = vshrl.u32 %v432_v25, 16  ;;  %v508_v18 = vshll.u32 %v432_v25, 16  ;;  %v347_v10 = vld [vmem:[#allocation2 + $0x78] sm:$0x1]  ;;  %v11139_v31 = vld [vmem:[%s10661_s30 + $0x30] sm:$0xf]  ;;  %2153 = vrot.lane.b32.xlu1 %v9716_v13, %s10579_s15  ;;  %v518_v37 = vor.u32 %v516_v51, %v515_v20 }
  0x8a   : > { %v519_v50 = vrot.slane %v515_v20, 4  ;;  %v657_v32 = vld [vmem:[#allocation2 + $0x60] sm:$0xf]  ;;  %399 = vst [vmem:[#allocation2 + $0x5c] sm:$0x1] %v398_v55  ;;  %v345_v34 = vsel %vm10633_vm2, 0, %v344_v47  ;;  %v526_v27 = vor.u32 %v524_v3, %v523_v63 }
  0x8b   : > { %v409_v48 = vld [vmem:[#allocation2 + $0x7c] sm:$0x1]  ;;  %v350_v60 = vld [vmem:[#allocation2 + $0x80] sm:$0x1]  ;;  %v353_v4 = vld [vmem:[#allocation2 + $0x88] sm:$0x1]  ;;  %v658_v12 = vsel %vm10715_vm9, %v518_v37, %v657_v32 }
  0x8c   : > { %v527_v6 = vrot.slane %v523_v63, 4  ;;  %v507_v41 = vrot.slane %v505_v26, 7  ;;  %346 = vst [vmem:[#allocation2 + $0x70] sm:$0x1] %v345_v34  ;;  %v529_v42 = vshrl.u32 %v11123_v29, 16  ;;  %v532_v58 = vshll.u32 %v11123_v29, 16 }
  0x8d   : > { %v660_v8 = vld [vmem:[#allocation2 + $0x64] sm:$0x1]  ;;  %v663_v23 = vld [vmem:[#allocation2 + $0x68] sm:$0xf]  ;;  %v407_v16 = vsel %vm10645_vm5, 0, %v406_v56  ;;  %v9617_v2 = vrot.slane %v11133_v30, 9  ;;  %2193 = vrot.lane.b32.xlu1 %v9724_v1, %s10576_s12 }
  0x8e   : > { %659 = vst [vmem:[#allocation2 + $0x60] sm:$0xf] %v658_v12  ;;  %v661_v24 = vsel %vm10633_vm2, %v519_v50, %v660_v8  ;;  %v664_v22 = vsel %vm10715_vm9, %v526_v27, %v663_v23  ;;  %v510_v38 = vor.u32 %v508_v18, %v507_v41  ;;  %408 = vst [vmem:[#allocation2 + $0x74] sm:$0x1] %v407_v16  ;;  %v666_v39 = vld [vmem:[#allocation2 + $0x6c] sm:$0x1] }
  0x8f   : > { %662 = vst [vmem:[#allocation2 + $0x64] sm:$0x1] %v661_v24  ;;  %665 = vst [vmem:[#allocation2 + $0x68] sm:$0xf] %v664_v22  ;;  %v511_v46 = vrot.slane %v507_v41, 4  ;;  %v11156_v40 = vrot.slane %v529_v42, 7  ;;  %v667_v25 = vsel %vm10633_vm2, %v527_v6, %v666_v39 }
  0x90   : > { %v348_v19 = vsel %vm10633_vm2, 0, %v347_v10  ;;  %v537_v7 = vshrl.u32 %v11139_v31, 16  ;;  %v412_v21 = vld [vmem:[#allocation2 + $0x84] sm:$0x1]  ;;  %v11163_v28 = vld [vmem:[#allocation2 + $0x50] sm:$0xf] }
  0x91   : > { %349 = vst [vmem:[#allocation2 + $0x78] sm:$0x1] %v348_v19  ;;  %v410_v49 = vsel %vm10645_vm5, 0, %v409_v48  ;;  %v351_v43 = vsel %vm10633_vm2, 0, %v350_v60  ;;  %v354_v45 = vsel %vm10633_vm2, 0, %v353_v4  ;;  %v848_v61 = vshrl.u32 %v11163_v28, 16 }
  0x92   : > { %668 = vst [vmem:[#allocation2 + $0x6c] sm:$0x1] %v667_v25  ;;  %v651_v47 = vld [vmem:[#allocation2 + $0x58] sm:$0xf]  ;;  %v724_v54 = vld [vmem:[#allocation2 + $0x54] sm:$0x1]  ;;  %v534_v51 = vor.u32 %v532_v58, %v11156_v40 }
  0x93   : > { %v851_v62 = vshll.u32 %v11163_v28, 16  ;;  %411 = vst [vmem:[#allocation2 + $0x7c] sm:$0x1] %v410_v49  ;;  %352 = vst [vmem:[#allocation2 + $0x80] sm:$0x1] %v351_v43  ;;  %v652_v29 = vsel %vm10715_vm9, %v510_v38, %v651_v47  ;;  %v857_v17 = vshll.u32 %v724_v54, 16 }
  0x94   : > { %355 = vst [vmem:[#allocation2 + $0x88] sm:$0x1] %v354_v45  ;;  %v654_v53 = vld [vmem:[#allocation2 + $0x5c] sm:$0x1]  ;;  %v1044_v3 = vrot.slane %v724_v54, 5  ;;  %v540_v59 = vshll.u32 %v11139_v31, 16 }
  0x95   : > { %653 = vst [vmem:[#allocation2 + $0x58] sm:$0xf] %v652_v29  ;;  %v655_v56 = vsel %vm10633_vm2, %v511_v46, %v654_v53  ;;  %v850_v13 = vrot.slane %v848_v61, 4  ;;  %v853_v20 = vrot.slane %v851_v62, 5  ;;  %v669_v57 = vld [vmem:[#allocation2 + $0x70] sm:$0xf] }
  0x96   : > { %v11179_v9 = vrot.slane %v537_v7, 7  ;;  %656 = vst [vmem:[#allocation2 + $0x5c] sm:$0x1] %v655_v56  ;;  %v535_v30 = vrot.slane %v11156_v40, 4  ;;  %v670_v63 = vsel %vm10715_vm9, %v534_v51, %v669_v57  ;;  %v413_v55 = vsel %vm10645_vm5, 0, %v412_v21 }
  0x97   : > { %v11186_v26 = vld [vmem:[#allocation2 + $0x60] sm:$0xf]  ;;  %v854_v18 = vor.u32 %v853_v20, %v850_v13  ;;  %v11188_v10 = vrot.slane %v857_v17, 5  ;;  %671 = vst [vmem:[#allocation2 + $0x70] sm:$0xf] %v670_v63  ;;  %v11200_v60 = vsel %vm10792_vm12, %v9617_v2, %v1044_v3  ;;  %vm15052_vm0 = vcmask 1043456  }
  0x98   : > { %15078 = vst [vmem:[#allocation6_spill] sm:$0xff] %v11186_v26  ;;  %v969_v31 = vld [vmem:[#allocation2 + $0x60] sm:$0xe]  ;;  %414 = vst [vmem:[#allocation2 + $0x84] sm:$0x1] %v413_v55  ;;  %v876_v34 = vshrl.u32 %v11186_v26, 16  ;;  %v11203_v4 = vor.u32 %v540_v59, %v11179_v9 }
  0x99   : > { %v11194_v50 = vld [vmem:[#allocation2 + $0x68] sm:$0xf]  ;;  %v726_v32 = vld [vmem:[#allocation2 + $0x64] sm:$0x1]  ;;  %v879_v48 = vshll.u32 %v11186_v26, 16  ;;  %v11207_v42 = vrot.slane %v854_v18, 4 }
  0x9a   : > { %15079 = vst [vmem:[#allocation7_spill] sm:$0xff] %v11194_v50  ;;  %v885_v27 = vshll.u32 %v726_v32, 16  ;;  %v890_v6 = vshrl.u32 %v11194_v50, 16  ;;  %v893_v41 = vshll.u32 %v11194_v50, 16  ;;  %v970_v12 = vld [vmem:[#allocation2 + $0x68] sm:$0xe] }
  0x9b   : > { %v727_v8 = vld [vmem:[#allocation2 + $0x6c] sm:$0x1]  ;;  %v878_v23 = vrot.slane %v876_v34, 4  ;;  %v881_v58 = vrot.slane %v879_v48, 5  ;;  %v9619_v16 = vrot.slane %v969_v31, 9  ;;  %v1052_v24 = vrot.slane %v726_v32, 5 }
  0x9c   : > { %v887_v22 = vrot.slane %v885_v27, 5  ;;  %v892_v38 = vrot.slane %v890_v6, 4  ;;  %v895_v2 = vrot.slane %v893_v41, 5  ;;  %v899_v39 = vshll.u32 %v727_v8, 16  ;;  %v11209_v46 = vld [vmem:[#allocation2 + $0x68] sm:$0xf] }
  0x9d   : > { %v882_v19 = vor.u32 %v881_v58, %v878_v23  ;;  %v11211_v7 = vld [vmem:[#allocation2 + $0x58] sm:$0xf]  ;;  %v860_v21 = vsel %vm10864_vm15, %v11207_v42, %v11188_v10  ;;  %v1053_v25 = vsel %vm10792_vm12, %v9619_v16, %v1052_v24  ;;  %v9620_v49 = vrot.slane %v970_v12, 9  ;;  %v725_v54 = vld [vmem:[#allocation2 + $0x5c] sm:$0x1] }
  0x9e   : > { %15080 = vst [vmem:[#allocation8_spill] sm:$0xff] %v11211_v7  ;;  %v968_v43 = vld [vmem:[#allocation2 + $0x58] sm:$0xe]  ;;  %v896_v45 = vor.u32 %v895_v2, %v892_v38  ;;  %v901_v47 = vrot.slane %v899_v39, 5  ;;  %v862_v61 = vshrl.u32 %v11211_v7, 16  ;;  %v865_v62 = vshll.u32 %v11211_v7, 16 }
  0x9f   : > { %v883_v51 = vrot.slane %v882_v19, 4  ;;  %v871_v29 = vshll.u32 %v725_v54, 16  ;;  %v1056_v53 = vrot.slane %v727_v8, 5  ;;  %v9618_v17 = vrot.slane %v968_v43, 9  ;;  %v1085_v55 = vld [vmem:[#allocation2 + $0x70] sm:$0xf] }
  0xa0   : > { %v897_v3 = vrot.slane %v896_v45, 4  ;;  %v864_v59 = vrot.slane %v862_v61, 4  ;;  %v867_v56 = vrot.slane %v865_v62, 5  ;;  %v1048_v13 = vrot.slane %v725_v54, 5  ;;  %v11230_v48 = vld [vmem:[#allocation2 + $0x58] sm:$0xf] }
  0xa1   : > { %v888_v20 = vsel %vm10864_vm15, %v883_v51, %v887_v22  ;;  %v873_v57 = vrot.slane %v871_v29, 5  ;;  %v1057_v63 = vsel %vm10792_vm12, %v9620_v49, %v1056_v53  ;;  %v1247_v18 = vshrl.u32 %v11209_v46, 16  ;;  %v11232_v27 = vld [vmem:[#allocation2 + $0x60] sm:$0xf]  ;;  %v672_v8 = vld [vmem:[#allocation2 + $0x74] sm:$0x1] }
  0xa2   : > { %v902_v10 = vsel %vm10864_vm15, %v897_v3, %v901_v47  ;;  %v868_v31 = vor.u32 %v867_v56, %v864_v59  ;;  %v9678_v32 = vcombine.low %v1053_v25, %v1057_v63  ;;  %v1049_v34 = vsel %vm10792_vm12, %v9618_v17, %v1048_v13  ;;  %v1100_v22 = vld [vmem:[#allocation2 + $0x6c] sm:$0x1]  ;;  %v1099_v47 = vld [vmem:[#allocation2 + $0x64] sm:$0x1]  ;;  %v1340_v51 = vld [vmem:[#allocation2 + $0x68] sm:$0xe] }
  0xa3   : > { %v9670_v6 = vcombine.low %v888_v20, %v902_v10  ;;  %v9677_v41 = vcombine.low %v11200_v60, %v1049_v34  ;;  %v1249_v42 = vrot.slane %v1247_v18, 4  ;;  %v1250_v12 = vshll.u32 %v11209_v46, 16  ;;  %v1098_v60 = vld [vmem:[#allocation2 + $0x5c] sm:$0x1]  ;;  %v1341_v20 = vld [vmem:[#allocation2 + $0x70] sm:$0xe] }
  0xa4   : > { %v869_v23 = vrot.slane %v868_v31, 4  ;;  %v1261_v58 = vshrl.u32 %v1085_v55, 16  ;;  %v1264_v16 = vshll.u32 %v1085_v55, 16  ;;  %v9686_v24 = vcombine.low %v11209_v46, %v1085_v55  ;;  %v1338_v40 = vld [vmem:[#allocation2 + $0x58] sm:$0xe] }
  0xa5   : > { %1885 = vrot.lane.b32.xlu1 %v9670_v6, %s10577_s13  ;;  %v1252_v38 = vrot.slane %v1250_v12, 5  ;;  %v1219_v2 = vshrl.u32 %v11230_v48, 16  ;;  %v1222_v39 = vshll.u32 %v11230_v48, 16  ;;  %v1233_v19 = vshrl.u32 %v11232_v27, 16  ;;  %v675_v12 = vld [vmem:[#allocation2 + $0x78] sm:$0xf] }
  0xa6   : > { %v874_v25 = vsel %vm10864_vm15, %v869_v23, %v873_v57  ;;  %v1263_v49 = vrot.slane %v1261_v58, 4  ;;  %v1266_v43 = vrot.slane %v1264_v16, 5  ;;  %v1236_v45 = vshll.u32 %v11232_v27, 16 }
  0xa7   : > { %v9669_v46 = vcombine.low %v860_v21, %v874_v25  ;;  %v1221_v54 = vrot.slane %v1219_v2, 4  ;;  %v1224_v61 = vrot.slane %v1222_v39, 5  ;;  %v1235_v62 = vrot.slane %v1233_v19, 4  ;;  %v11268_v2 = vld [vmem:[#allocation2 + $0x60] sm:$0xf]  ;;  %v11278_v25 = vpop.permute.xlu0 %1971 }
  0xa8   : > { %v1238_v29 = vrot.slane %v1236_v45, 5  ;;  %v9685_v53 = vcombine.low %v11230_v48, %v11232_v27  ;;  %v673_v17 = vsel %vm10633_vm2, %v535_v30, %v672_v8  ;;  %v1253_v3 = vor.u32 %v1252_v38, %v1249_v42  ;;  %v1339_v48 = vld [vmem:[#allocation2 + $0x60] sm:$0xe]  ;;  %v11266_v38 = vld [vmem:[#allocation2 + $0x70] sm:$0xf] }
  0xa9   : > { %1883 = vrot.lane.b32.xlu0 %v9669_v46, %s10577_s13  ;;  %1925 = vrot.lane.b32.xlu1 %v9678_v32, %s10575_s11  ;;  %674 = vst [vmem:[#allocation2 + $0x74] sm:$0x1] %v673_v17  ;;  %v1256_v21 = vshll.u32 %v1100_v22, 16  ;;  %v1267_v59 = vor.u32 %v1266_v43, %v1263_v49  ;;  %v1225_v56 = vor.u32 %v1224_v61, %v1221_v54  ;;  %v1228_v13 = vshll.u32 %v1098_v60, 16  ;;  %v11276_v19 = vld [vmem:[#allocation2 + $0x68] sm:$0xf] }
  0xaa   : > { %v11252_v57 = vrot.slane %v1253_v3, 4  ;;  %v1239_v63 = vor.u32 %v1238_v29, %v1235_v62  ;;  %v1242_v55 = vshll.u32 %v1099_v47, 16  ;;  %v9635_v18 = vrot.slane %v1340_v51, 9  ;;  %v678_v46 = vld [vmem:[#allocation2 + $0x7c] sm:$0x1] }
  0xab   : > { %v11254_v10 = vrot.slane %v1256_v21, 5  ;;  %v11256_v30 = vrot.slane %v1267_v59, 4  ;;  %v1226_v31 = vrot.slane %v1225_v56, 4  ;;  %v1230_v34 = vrot.slane %v1228_v13, 5  ;;  %v11295_v21 = vld [vmem:[#allocation2 + $0x6c] sm:$0x1] }
  0xac   : > { %v1240_v32 = vrot.slane %v1239_v63, 4  ;;  %v1244_v27 = vrot.slane %v1242_v55, 5  ;;  %v1420_v6 = vrot.slane %v1100_v22, 5  ;;  %v9636_v42 = vrot.slane %v1341_v20, 9 }
  0xad   : > { %1923 = vrot.lane.b32.xlu0 %v9677_v41, %s10575_s11  ;;  %1981 = vrot.lane.b32.xlu1 %v9686_v24, %s10572_s8  ;;  %v1259_v8 = vsel %vm10864_vm15, %v11252_v57, %v11254_v10  ;;  %v1231_v23 = vsel %vm10864_vm15, %v1226_v31, %v1230_v34  ;;  %v9633_v58 = vrot.slane %v1338_v40, 9  ;;  %v1412_v16 = vrot.slane %v1098_v60, 5 }
  0xae   : > { %v1245_v22 = vsel %vm10864_vm15, %v1240_v32, %v1244_v27  ;;  %v11274_v41 = vsel %vm10792_vm12, %v9635_v18, %v1420_v6  ;;  %v9634_v24 = vrot.slane %v1339_v48, 9  ;;  %v1416_v39 = vrot.slane %v1099_v47, 5  ;;  %v11306_v48 = vpop.permute.xlu0 %2107 }
  0xaf   : > { %v9693_v49 = vcombine.low %v1231_v23, %v1245_v22  ;;  %v1413_v60 = vsel %vm10792_vm12, %v9633_v58, %v1412_v16  ;;  %v543_v43 = vrot.slane %v11179_v9, 4  ;;  %v676_v45 = vsel %vm10715_vm9, %v11203_v4, %v675_v12  ;;  %v11293_v4 = vld [vmem:[#allocation2 + $0x64] sm:$0x1]  ;;  %v1709_v12 = vld [vmem:[#allocation2 + $0x70] sm:$0xe] }
  0xb0   : > { %v1101_v54 = vld [vmem:[#allocation2 + $0x74] sm:$0x1]  ;;  %v1417_v61 = vsel %vm10792_vm12, %v9634_v24, %v1416_v39  ;;  %677 = vst [vmem:[#allocation2 + $0x78] sm:$0xf] %v676_v45  ;;  %v1616_v47 = vshrl.u32 %v11266_v38, 16  ;;  %v1619_v62 = vshll.u32 %v11266_v38, 16  ;;  %v9709_v31 = vcombine.low %v11268_v2, %v11276_v19 }
  0xb1   : > { %v1588_v51 = vshrl.u32 %v11268_v2, 16  ;;  %1979 = vrot.lane.b32.xlu0 %v9685_v53, %s10572_s8  ;;  %v1270_v29 = vshll.u32 %v1101_v54, 16  ;;  %v1424_v9 = vrot.slane %v1101_v54, 5  ;;  %v9701_v17 = vcombine.low %v1413_v60, %v1417_v61  ;;  %v1469_v57 = vld [vmem:[#allocation2 + $0x74] sm:$0x1] }
  0xb2   : > { %v1591_v3 = vshll.u32 %v11268_v2, 16  ;;  %v1618_v59 = vrot.slane %v1616_v47, 4  ;;  %v1621_v56 = vrot.slane %v1619_v62, 5  ;;  %v1602_v20 = vshrl.u32 %v11276_v19, 16 }
  0xb3   : > { %v1590_v13 = vrot.slane %v1588_v51, 4  ;;  %v1272_v63 = vrot.slane %v1270_v29, 5  ;;  %v1425_v55 = vsel %vm10792_vm12, %v9636_v42, %v1424_v9  ;;  %v1605_v18 = vshll.u32 %v11276_v19, 16  ;;  %v11318_v19 = vpop.permute.xlu1 %1973  ;;  %v415_v51 = vld [vmem:[#allocation2 + $0x8c] sm:$0x1] }
  0xb4   : > { %v1593_v53 = vrot.slane %v1591_v3, 5  ;;  %v9702_v40 = vcombine.low %v11274_v41, %v1425_v55  ;;  %v1604_v10 = vrot.slane %v1602_v20, 4  ;;  %v679_v34 = vsel %vm10633_vm2, %v543_v43, %v678_v46  ;;  %v437_v55 = vld [vmem:[%s10661_s30 + $0x34] sm:$0xf] }
  0xb5   : > { %v1273_v32 = vsel %vm10864_vm15, %v11256_v30, %v1272_v63  ;;  %2019 = vrot.lane.b32.xlu0 %v9693_v49, %s10578_s14  ;;  %v1607_v27 = vrot.slane %v1605_v18, 5  ;;  %680 = vst [vmem:[#allocation2 + $0x7c] sm:$0x1] %v679_v34  ;;  %v1622_v6 = vor.u32 %v1621_v56, %v1618_v59  ;;  %v1625_v42 = vshll.u32 %v1469_v57, 16  ;;  %v1707_v30 = vld [vmem:[#allocation2 + $0x60] sm:$0xe]  ;;  %v11329_v56 = vpop.permute.xlu0 %2051 }
  0xb6   : > { %v9694_v23 = vcombine.low %v1259_v8, %v1273_v32  ;;  %v1594_v58 = vor.u32 %v1593_v53, %v1590_v13  ;;  %v1597_v16 = vshll.u32 %v11293_v4, 16  ;;  %v1611_v2 = vshll.u32 %v11295_v21, 16  ;;  %v438_v32 = vld [vmem:[%s10661_s30 + $0x38] sm:$0xf] }
  0xb7   : > { %v1454_v22 = vld [vmem:[#allocation2 + $0x78] sm:$0xf]  ;;  %v11314_v41 = vrot.slane %v1622_v6, 4  ;;  %v11316_v24 = vrot.slane %v1625_v42, 5  ;;  %v1608_v39 = vor.u32 %v1607_v27, %v1604_v10  ;;  %v9651_v3 = vrot.slane %v1709_v12, 9 }
  0xb8   : > { %2021 = vrot.lane.b32.xlu1 %v9694_v23, %s10578_s14  ;;  %v1630_v8 = vshrl.u32 %v1454_v22, 16  ;;  %v1633_v60 = vshll.u32 %v1454_v22, 16  ;;  %v9710_v43 = vcombine.low %v11266_v38, %v1454_v22  ;;  %v1595_v45 = vrot.slane %v1594_v58, 4  ;;  %v1710_v46 = vld [vmem:[#allocation2 + $0x78] sm:$0xe] }
  0xb9   : > { %2059 = vrot.lane.b32.xlu0 %v9701_v17, %s10574_s10  ;;  %v1628_v54 = vsel %vm10864_vm15, %v11314_v41, %v11316_v24  ;;  %v1599_v61 = vrot.slane %v1597_v16, 5  ;;  %v1609_v47 = vrot.slane %v1608_v39, 4  ;;  %v1613_v62 = vrot.slane %v1611_v2, 5  ;;  %v1708_v38 = vld [vmem:[#allocation2 + $0x68] sm:$0xe] }
  0xba   : > { %v1632_v29 = vrot.slane %v1630_v8, 4  ;;  %v1635_v9 = vrot.slane %v1633_v60, 5  ;;  %v1789_v59 = vrot.slane %v1469_v57, 5  ;;  %v9652_v20 = vrot.slane %v1710_v46, 9  ;;  %v11345_v23 = vld [vmem:[#allocation2 + $0x70] sm:$0xf] }
  0xbb   : > { %v1600_v17 = vsel %vm10864_vm15, %v1595_v45, %v1599_v61  ;;  %v1614_v13 = vsel %vm10864_vm15, %v1609_v47, %v1613_v62  ;;  %v9649_v63 = vrot.slane %v1707_v30, 9  ;;  %v1781_v34 = vrot.slane %v11293_v4, 5  ;;  %v11353_v22 = vld [vmem:[#allocation2 + $0x78] sm:$0xf]  ;;  %v681_v30 = vld [vmem:[#allocation2 + $0x80] sm:$0xf]  ;;  %v11363_v47 = vpop.permute.xlu0 %2187 }
  0xbc   : > { %2061 = vrot.lane.b32.xlu1 %v9702_v40, %s10574_s10  ;;  %v1470_v53 = vld [vmem:[#allocation2 + $0x7c] sm:$0x1]  ;;  %v1636_v18 = vor.u32 %v1635_v9, %v1632_v29  ;;  %v9717_v10 = vcombine.low %v1600_v17, %v1614_v13  ;;  %v11339_v57 = vsel %vm10792_vm12, %v9651_v3, %v1789_v59  ;;  %v9650_v42 = vrot.slane %v1708_v38, 9  ;;  %v11347_v40 = vpop.permute.xlu1 %2109  ;;  %v684_v8 = vld [vmem:[#allocation2 + $0x84] sm:$0x1] }
  0xbd   : > { %2115 = vrot.lane.b32.xlu0 %v9709_v31, %s10573_s9  ;;  %v1639_v27 = vshll.u32 %v1470_v53, 16  ;;  %v1793_v6 = vrot.slane %v1470_v53, 5  ;;  %v1785_v12 = vrot.slane %v11295_v21, 5  ;;  %v1782_v16 = vsel %vm10792_vm12, %v9649_v63, %v1781_v34  ;;  %v11355_v31 = vld [vmem:[#allocation2 + $0x74] sm:$0x1] }
  0xbe   : > { %v1637_v58 = vrot.slane %v1636_v18, 4  ;;  %v416_v2 = vsel %vm10645_vm5, 0, %v415_v51  ;;  %v545_v4 = vshrl.u32 %v437_v55, 16  ;;  %v548_v39 = vshll.u32 %v437_v55, 16  ;;  %v687_v29 = vld [vmem:[#allocation2 + $0x88] sm:$0xf] }
  0xbf   : > { %v1641_v41 = vrot.slane %v1639_v27, 5  ;;  %v1794_v21 = vsel %vm10792_vm12, %v9652_v20, %v1793_v6  ;;  %v1786_v24 = vsel %vm10792_vm12, %v9650_v42, %v1785_v12  ;;  %417 = vst [vmem:[#allocation2 + $0x8c] sm:$0x1] %v416_v2  ;;  %v553_v61 = vshrl.u32 %v438_v32, 16  ;;  %v729_v9 = vld [vmem:[#allocation2 + $0x7c] sm:$0x1] }
  0xc0   : > { %2117 = vrot.lane.b32.xlu1 %v9710_v43, %s10573_s9  ;;  %v9726_v60 = vcombine.low %v11339_v57, %v1794_v21  ;;  %v9725_v45 = vcombine.low %v1782_v16, %v1786_v24  ;;  %v547_v46 = vrot.slane %v545_v4, 7  ;;  %v556_v51 = vshll.u32 %v438_v32, 16  ;;  %v971_v43 = vld [vmem:[#allocation2 + $0x70] sm:$0xe]  ;;  %v972_v63 = vld [vmem:[#allocation2 + $0x78] sm:$0xe]  ;;  %v11372_v34 = vpop.permute.xlu1 %1915 }
  0xc1   : > { %v1642_v62 = vsel %vm10864_vm15, %v1637_v58, %v1641_v41  ;;  %2155 = vrot.lane.b32.xlu0 %v9717_v10, %s10579_s15  ;;  %v904_v3 = vshrl.u32 %v11345_v23, 16  ;;  %v907_v59 = vshll.u32 %v11345_v23, 16  ;;  %v555_v20 = vrot.slane %v553_v61, 7  ;;  %v356_v57 = vld [vmem:[#allocation2 + $0x90] sm:$0x1] }
  0xc2   : > { %v9718_v38 = vcombine.low %v1628_v54, %v1642_v62  ;;  %v550_v17 = vor.u32 %v548_v39, %v547_v46  ;;  %v551_v13 = vrot.slane %v547_v46, 4  ;;  %v913_v18 = vshll.u32 %v11355_v31, 16  ;;  %v11380_v42 = vld [vmem:[%s10661_s30 + $0x3c] sm:$0xf]  ;;  %v418_v4 = vld [vmem:[#allocation2 + $0x94] sm:$0x1] }
  0xc3   : > { %v906_v55 = vrot.slane %v904_v3, 4  ;;  %v909_v53 = vrot.slane %v907_v59, 5  ;;  %v918_v10 = vshrl.u32 %v11353_v22, 16  ;;  %v558_v32 = vor.u32 %v556_v51, %v555_v20  ;;  %v11394_v3 = vld [vmem:[#allocation2 + $0x78] sm:$0xf]  ;;  %s10580_s30 = smov 80  }
  0xc4   : > { %2157 = vrot.lane.b32.xlu1 %v9718_v38, %s10579_s15  ;;  %v559_v27 = vrot.slane %v555_v20, 4  ;;  %v682_v54 = vsel %vm10715_vm9, %v550_v17, %v681_v30  ;;  %v685_v6 = vsel %vm10633_vm2, %v551_v13, %v684_v8  ;;  %v915_v58 = vrot.slane %v913_v18, 5  ;;  %v11387_v8 = vpop.permute.xlu0 %1875  ;;  %v11401_v17 = vpop.permute.xlu1 %1917 }
  0xc5   : > { %2195 = vrot.lane.b32.xlu0 %v9725_v45, %s10576_s12  ;;  %683 = vst [vmem:[#allocation2 + $0x80] sm:$0xf] %v682_v54  ;;  %686 = vst [vmem:[#allocation2 + $0x84] sm:$0x1] %v685_v6  ;;  %v910_v12 = vor.u32 %v909_v53, %v906_v55  ;;  %v920_v16 = vrot.slane %v918_v10, 4  ;;  %v921_v2 = vshll.u32 %v11353_v22, 16  ;;  %v688_v41 = vsel %vm10715_vm9, %v558_v32, %v687_v29 }
  0xc6   : > { %v690_v21 = vld [vmem:[#allocation2 + $0x8c] sm:$0x1]  ;;  %v927_v24 = vshll.u32 %v729_v9, 16  ;;  %v9621_v39 = vrot.slane %v971_v43, 9  ;;  %v1060_v30 = vrot.slane %v11355_v31, 5  ;;  %v9622_v62 = vrot.slane %v972_v63, 9 }
  0xc7   : > { %689 = vst [vmem:[#allocation2 + $0x88] sm:$0xf] %v688_v41  ;;  %v691_v45 = vsel %vm10633_vm2, %v559_v27, %v690_v21  ;;  %v911_v46 = vrot.slane %v910_v12, 4  ;;  %v923_v61 = vrot.slane %v921_v2, 5  ;;  %v1064_v51 = vrot.slane %v729_v9, 5 }
  0xc8   : > { %2197 = vrot.lane.b32.xlu1 %v9726_v60, %s10576_s12  ;;  %692 = vst [vmem:[#allocation2 + $0x8c] sm:$0x1] %v691_v45  ;;  %v357_v29 = vsel %vm10633_vm2, 0, %v356_v57  ;;  %v929_v31 = vrot.slane %v927_v24, 5  ;;  %v11398_v43 = vsel %vm10792_vm12, %v9621_v39, %v1060_v30  ;;  %v561_v38 = vshrl.u32 %v11380_v42, 16  ;;  %v11447_v49 = vpop.permute.xlu1 %2053 }
  0xc9   : > { %v924_v59 = vor.u32 %v923_v61, %v920_v16  ;;  %358 = vst [vmem:[#allocation2 + $0x90] sm:$0x1] %v357_v29  ;;  %v916_v60 = vsel %vm10864_vm15, %v911_v46, %v915_v58  ;;  %v11407_v9 = vsel %vm10792_vm12, %v9622_v62, %v1064_v51  ;;  %v564_v13 = vshll.u32 %v11380_v42, 16  ;;  %v11412_v63 = vld [vmem:[#allocation2 + $0x7c] sm:$0x1] }
  0xca   : > { %v419_v20 = vsel %vm10645_vm5, 0, %v418_v4  ;;  %v11414_v53 = vrot.slane %v561_v38, 7  ;;  %v1275_v18 = vshrl.u32 %v11394_v3, 16  ;;  %v1278_v10 = vshll.u32 %v11394_v3, 16  ;;  %v11422_v6 = vld [vmem:[#allocation2] sm:$0xf]  ;;  %v11434_v4 = vpop.permute.xlu0 %1877 }
  0xcb   : > { %v925_v55 = vrot.slane %v924_v59, 4  ;;  %420 = vst [vmem:[#allocation2 + $0x94] sm:$0x1] %v419_v20  ;;  %v9679_v54 = vcombine.low %v11398_v43, %v11407_v9  ;;  %v11424_v42 = vld [vmem:[#allocation2 + $0x8] sm:$0xf]  ;;  %v1284_v20 = vshll.u32 %v11412_v63, 16 }
  0xcc   : > { %v11418_v57 = vld [vmem:[#allocation2 + $0x80] sm:$0xf]  ;;  %v730_v32 = vld [vmem:[#allocation2 + $0x84] sm:$0x1]  ;;  %v11428_v58 = vld [vmem:[#allocation2 + $0x10] sm:$0xf]  ;;  %v566_v29 = vor.u32 %v564_v13, %v11414_v53  ;;  %v11473_v15 = vpop.permute.xlu1 %2189 }
  0xcd   : > { %15081 = vst [vmem:[#allocation9_spill] sm:$0xff] %v11418_v57  ;;  %v973_v27 = vld [vmem:[#allocation2 + $0x80] sm:$0xe]  ;;  %v11430_v16 = vld [vmem:[#allocation2 + $0x18] sm:$0xf]  ;;  %v932_v21 = vshrl.u32 %v11418_v57, 16  ;;  %v930_v30 = vsel %vm10864_vm15, %v925_v55, %v929_v31 }
  0xce   : > { %v935_v24 = vshll.u32 %v11418_v57, 16  ;;  %v941_v39 = vshll.u32 %v730_v32, 16  ;;  %v11442_v45 = vld [vmem:[#allocation2 + $0x88] sm:$0xf]  ;;  %v9671_v46 = vcombine.low %v916_v60, %v930_v30  ;;  %v9623_v62 = vrot.slane %v973_v27, 9  ;;  %v11457_v37 = vpop.permute.xlu0 %2011 }
  0xcf   : > { %15082 = vst [vmem:[#allocation10_spill] sm:$0xff] %v11442_v45  ;;  %v974_v61 = vld [vmem:[#allocation2 + $0x88] sm:$0xe]  ;;  %v1068_v51 = vrot.slane %v730_v32, 5  ;;  %v731_v59 = vld [vmem:[#allocation2 + $0x8c] sm:$0x1] }
  0xd0   : > { %v934_v43 = vrot.slane %v932_v21, 4  ;;  %v937_v38 = vrot.slane %v935_v24, 5  ;;  %v946_v9 = vshrl.u32 %v11442_v45, 16  ;;  %v943_v41 = vrot.slane %v941_v39, 5  ;;  %1887 = vrot.lane.b32.xlu0 %v9671_v46, %s10577_s13  ;;  %v693_v27 = vld [vmem:[#allocation2 + $0x90] sm:$0xf] }
  0xd1   : > { %v949_v31 = vshll.u32 %v11442_v45, 16  ;;  %v955_v55 = vshll.u32 %v731_v59, 16  ;;  %v9624_v60 = vrot.slane %v974_v61, 9  ;;  %v11453_v13 = vsel %vm10792_vm12, %v9623_v62, %v1068_v51  ;;  %v11455_v24 = vld [vmem:[#allocation2 + $0x88] sm:$0xf] }
  0xd2   : > { %v938_v32 = vor.u32 %v937_v38, %v934_v43  ;;  %v948_v30 = vrot.slane %v946_v9, 4  ;;  %v1072_v21 = vrot.slane %v731_v59, 5  ;;  %v1087_v1 = vld [vmem:[#allocation2 + $0x80] sm:$0xf]  ;;  %v567_v2 = vrot.slane %v11414_v53, 4 }
  0xd3   : > { %v951_v39 = vrot.slane %v949_v31, 5  ;;  %v694_v46 = vsel %vm10715_vm9, %v566_v29, %v693_v27  ;;  %v1303_v61 = vshrl.u32 %v11455_v24, 16  ;;  %v696_v43 = vld [vmem:[#allocation2 + $0x94] sm:$0x1]  ;;  %v957_v9 = vrot.slane %v955_v55, 5 }
  0xd4   : > { %v939_v38 = vrot.slane %v938_v32, 4  ;;  %695 = vst [vmem:[#allocation2 + $0x90] sm:$0xf] %v694_v46  ;;  %v1306_v62 = vshll.u32 %v11455_v24, 16  ;;  %v1277_v51 = vrot.slane %v1275_v18, 4  ;;  %v1073_v31 = vsel %vm10792_vm12, %v9624_v60, %v1072_v21  ;;  %1927 = vrot.lane.b32.xlu0 %v9679_v54, %s10575_s11 }
  0xd5   : > { %v11464_v59 = vld [vmem:[#allocation2 + $0x8c] sm:$0x1]  ;;  %v952_v12 = vor.u32 %v951_v39, %v948_v30  ;;  %v1305_v53 = vrot.slane %v1303_v61, 4  ;;  %v1280_v35 = vrot.slane %v1278_v10, 5  ;;  %v1289_v32 = vshrl.u32 %v1087_v1, 16 }
  0xd6   : > { %v944_v29 = vsel %vm10864_vm15, %v939_v38, %v943_v41  ;;  %v1308_v27 = vrot.slane %v1306_v62, 5  ;;  %v1292_v55 = vshll.u32 %v1087_v1, 16  ;;  %v11471_v46 = vld [vmem:[#allocation2 + $0x84] sm:$0x1]  ;;  %v9687_v30 = vcombine.low %v11394_v3, %v1087_v1  ;;  %v1344_v61 = vld [vmem:[#allocation2 + $0x88] sm:$0xe]  ;;  %v11479_v38 = vpop.permute.xlu0 %2147 }
  0xd7   : > { %v953_v18 = vrot.slane %v952_v12, 4  ;;  %v697_v60 = vsel %vm10633_vm2, %v567_v2, %v696_v43  ;;  %v1312_v54 = vshll.u32 %v11464_v59, 16  ;;  %v1291_v21 = vrot.slane %v1289_v32, 4  ;;  %v1342_v2 = vld [vmem:[#allocation2 + $0x78] sm:$0xe] }
  0xd8   : > { %v1294_v10 = vrot.slane %v1292_v55, 5  ;;  %698 = vst [vmem:[#allocation2 + $0x94] sm:$0x1] %v697_v60  ;;  %v1309_v39 = vor.u32 %v1308_v27, %v1305_v53  ;;  %v1281_v41 = vor.u32 %v1280_v35, %v1277_v51  ;;  %1983 = vrot.lane.b32.xlu0 %v9687_v30, %s10572_s8  ;;  %v1286_v1 = vrot.slane %v1284_v20, 5  ;;  %v11489_v51 = vld [vmem:[#allocation2 + $0x80] sm:$0xf] }
  0xd9   : > { %v958_v62 = vsel %vm10864_vm15, %v953_v18, %v957_v9  ;;  %v11484_v12 = vrot.slane %v1312_v54, 5  ;;  %v1298_v3 = vshll.u32 %v11471_v46, 16  ;;  %v9680_v35 = vcombine.low %v11453_v13, %v1073_v31  ;;  %v11492_v18 = vld [vmem:[#allocation2 + $0x88] sm:$0xf]  ;;  %v11500_v31 = vpop.permute.xlu1 %2013 }
  0xda   : > { %v9672_v43 = vcombine.low %v944_v29, %v958_v62  ;;  %v11487_v32 = vrot.slane %v1309_v39, 4  ;;  %v1282_v55 = vrot.slane %v1281_v41, 4  ;;  %v1295_v53 = vor.u32 %v1294_v10, %v1291_v21  ;;  %v1343_v21 = vld [vmem:[#allocation2 + $0x80] sm:$0xe]  ;;  %v359_v10 = vld [vmem:[#allocation2 + $0x98] sm:$0x1]  ;;  %v11512_v45 = vpop.permute.xlu0 %1879 }
  0xdb   : > { %v1089_v27 = vld [vmem:[#allocation2 + $0x90] sm:$0xf]  ;;  %v1300_v60 = vrot.slane %v1298_v3, 5  ;;  %v9639_v9 = vrot.slane %v1344_v61, 9  ;;  %v1436_v3 = vrot.slane %v11464_v59, 5  ;;  %v9637_v20 = vrot.slane %v1342_v2, 9 }
  0xdc   : > { %1889 = vrot.lane.b32.xlu1 %v9672_v43, %s10577_s13  ;;  %v1317_v30 = vshrl.u32 %v1089_v27, 16  ;;  %v1320_v29 = vshll.u32 %v1089_v27, 16  ;;  %v9688_v54 = vcombine.low %v11455_v24, %v1089_v27  ;;  %v1345_v39 = vld [vmem:[#allocation2 + $0x90] sm:$0xe]  ;;  %v1315_v41 = vsel %vm10864_vm15, %v11487_v32, %v11484_v12 }
  0xdd   : > { %v1287_v61 = vsel %vm10864_vm15, %v1282_v55, %v1286_v1  ;;  %v1296_v62 = vrot.slane %v1295_v53, 4  ;;  %v11509_v24 = vld [vmem:[#allocation2 + $0x90] sm:$0xf]  ;;  %v1428_v13 = vrot.slane %v11412_v63, 5  ;;  %v9640_v12 = vrot.slane %v1345_v39, 9 }
  0xde   : > { %v1319_v43 = vrot.slane %v1317_v30, 4  ;;  %v1322_v27 = vrot.slane %v1320_v29, 5  ;;  %v9638_v32 = vrot.slane %v1343_v21, 9  ;;  %v1432_v1 = vrot.slane %v11471_v46, 5  ;;  %v421_v29 = vld [vmem:[#allocation2 + $0x9c] sm:$0x1]  ;;  %v11536_v0 = vpop.permute.xlu0 %1919 }
  0xdf   : > { %v1105_v57 = vld [vmem:[#allocation2 + $0x94] sm:$0x1]  ;;  %v1301_v50 = vsel %vm10864_vm15, %v1296_v62, %v1300_v60  ;;  %v1429_v63 = vsel %vm10792_vm12, %v9637_v20, %v1428_v13  ;;  %v360_v60 = vsel %vm10633_vm2, 0, %v359_v10  ;;  %v1672_v39 = vshrl.u32 %v11509_v24, 16  ;;  %v11530_v20 = vld [vmem:[#allocation2 + $0x84] sm:$0x1] }
  0xe0   : > { %1929 = vrot.lane.b32.xlu1 %v9680_v35, %s10575_s11  ;;  %v1323_v59 = vor.u32 %v1322_v27, %v1319_v43  ;;  %v1326_v55 = vshll.u32 %v1105_v57, 16  ;;  %v9695_v53 = vcombine.low %v1287_v61, %v1301_v50  ;;  %v1440_v30 = vrot.slane %v1105_v57, 5  ;;  %v11525_v21 = vld [vmem:[#allocation2 + $0x94] sm:$0x1]  ;;  %361 = vst [vmem:[#allocation2 + $0x98] sm:$0x1] %v360_v60  ;;  %v11534_v61 = vpop.permute.xlu1 %2149 }
  0xe1   : > { %v1433_v2 = vsel %vm10792_vm12, %v9638_v32, %v1432_v1  ;;  %v1437_v50 = vsel %vm10792_vm12, %v9639_v9, %v1436_v3  ;;  %v11532_v13 = vld [vmem:[#allocation2 + $0x8c] sm:$0x1]  ;;  %v1674_v62 = vrot.slane %v1672_v39, 4  ;;  %v1675_v43 = vshll.u32 %v11509_v24, 16  ;;  %v11542_v32 = vld [vmem:[#allocation2 + $0x90] sm:$0xe] }
  0xe2   : > { %v1324_v46 = vrot.slane %v1323_v59, 4  ;;  %v1328_v35 = vrot.slane %v1326_v55, 5  ;;  %2023 = vrot.lane.b32.xlu0 %v9695_v53, %s10578_s14  ;;  %v9703_v57 = vcombine.low %v1429_v63, %v1433_v2  ;;  %v1441_v10 = vsel %vm10792_vm12, %v9640_v12, %v1440_v30 }
  0xe3   : > { %v1644_v27 = vshrl.u32 %v11489_v51, 16  ;;  %v1647_v3 = vshll.u32 %v11489_v51, 16  ;;  %v1658_v1 = vshrl.u32 %v11492_v18, 16  ;;  %v1661_v59 = vshll.u32 %v11492_v18, 16 }
  0xe4   : > { %1985 = vrot.lane.b32.xlu1 %v9688_v54, %s10572_s8  ;;  %v1329_v9 = vsel %vm10864_vm15, %v1324_v46, %v1328_v35  ;;  %v1677_v12 = vrot.slane %v1675_v43, 5  ;;  %v422_v30 = vsel %vm10645_vm5, 0, %v421_v29  ;;  %v1681_v60 = vshll.u32 %v11525_v21, 16  ;;  %s10581_s8 = smov 96  }
  0xe5   : > { %v9696_v55 = vcombine.low %v1315_v41, %v1329_v9  ;;  %v1646_v53 = vrot.slane %v1644_v27, 4  ;;  %v1649_v63 = vrot.slane %v1647_v3, 5  ;;  %v1660_v2 = vrot.slane %v1658_v1, 4  ;;  %423 = vst [vmem:[#allocation2 + $0x9c] sm:$0x1] %v422_v30 }
  0xe6   : > { %2063 = vrot.lane.b32.xlu0 %v9703_v57, %s10574_s10  ;;  %v1663_v54 = vrot.slane %v1661_v59, 5  ;;  %v9704_v39 = vcombine.low %v1437_v50, %v1441_v10  ;;  %v1678_v46 = vor.u32 %v1677_v12, %v1674_v62  ;;  %v1653_v35 = vshll.u32 %v11530_v20, 16  ;;  %v1714_v41 = vld [vmem:[#allocation2 + $0x98] sm:$0xe]  ;;  %v1711_v27 = vld [vmem:[#allocation2 + $0x80] sm:$0xe]  ;;  %v11563_v50 = vpop.permute.xlu1 %1881  ;;  %v11565_v10 = vpop.permute.xlu0 %1975 }
  0xe7   : > { %v1667_v26 = vshll.u32 %v11532_v13, 16  ;;  %v11557_v43 = vrot.slane %v1681_v60, 5  ;;  %v1650_v5 = vor.u32 %v1649_v63, %v1646_v53  ;;  %v9655_v57 = vrot.slane %v11542_v32, 9  ;;  %v10421_v9 = vld [vmem:[%s15036_s1 + $0x20] ss:$0 sps:$4 sm:$0xff]  }
  0xe8   : > { %2025 = vrot.lane.b32.xlu1 %v9696_v55, %s10578_s14  ;;  %v1664_v29 = vor.u32 %v1663_v54, %v1660_v2  ;;  %v1458_v62 = vld [vmem:[#allocation2 + $0x98] sm:$0xf]  ;;  %v1679_v3 = vrot.slane %v1678_v46, 4  ;;  %v1655_v1 = vrot.slane %v1653_v35, 5  ;;  %v1805_v55 = vrot.slane %v11525_v21, 5  ;;  %10382 = vmatprep.subr.msk.bf16.mxu0 %vm15052_vm0, %v10421_v9 }
  0xe9   : > { %v1669_v59 = vrot.slane %v1667_v26, 5  ;;  %v1686_v12 = vshrl.u32 %v1458_v62, 16  ;;  %v1689_v53 = vshll.u32 %v1458_v62, 16  ;;  %v15083_v32 = vcombine.low %v11489_v51, %v11492_v18  ;;  %v1712_v2 = vld [vmem:[#allocation2 + $0x88] sm:$0xe] }
  0xea   : > { %v1651_v30 = vrot.slane %v1650_v5, 4  ;;  %v9656_v63 = vrot.slane %v1714_v41, 9  ;;  %v9712_v54 = vcombine.low %v11509_v24, %v1458_v62  ;;  %v1684_v60 = vsel %vm10864_vm15, %v1679_v3, %v11557_v43  ;;  %v11580_v18 = vpop.permute.xlu1 %1921  ;;  %v11589_v3 = vpop.permute.xlu0 %2015 }
  0xeb   : > { %2119 = vrot.lane.b32.xlu0 %v15083_v32, %s10573_s9  ;;  %v1665_v46 = vrot.slane %v1664_v29, 4  ;;  %v9653_v26 = vrot.slane %v1711_v27, 9  ;;  %v1688_v21 = vrot.slane %v1686_v12, 4  ;;  %v1691_v35 = vrot.slane %v1689_v53, 5 }
  0xec   : > { %2065 = vrot.lane.b32.xlu1 %v9704_v39, %s10574_s10  ;;  %v1656_v7 = vsel %vm10864_vm15, %v1651_v30, %v1655_v1  ;;  %v1797_v51 = vrot.slane %v11530_v20, 5  ;;  %v1474_v41 = vld [vmem:[#allocation2 + $0x9c] sm:$0x1]  ;;  %v9654_v5 = vrot.slane %v1712_v2, 9  ;;  %v1801_v43 = vrot.slane %v11532_v13, 5 }
  0xed   : > { %v1670_v24 = vsel %vm10864_vm15, %v1665_v46, %v1669_v59  ;;  %v1692_v29 = vor.u32 %v1691_v35, %v1688_v21  ;;  %v1695_v27 = vshll.u32 %v1474_v41, 16  ;;  %v1809_v62 = vrot.slane %v1474_v41, 5  ;;  %v10422_v20 = vld [vmem:[%s15036_s1 + $0x18] sm:$0xff]  }
  0xee   : > { %v9719_v39 = vcombine.low %v1656_v7, %v1670_v24  ;;  %v1798_v1 = vsel %vm10792_vm12, %v9653_v26, %v1797_v51  ;;  %v1802_v59 = vsel %vm10792_vm12, %v9654_v5, %v1801_v43  ;;  %v2408_v13 = vsel %vm15052_vm0, %v10421_v9, 0  ;;  %v11600_v30 = vpop.permute.xlu1 %1977  ;;  %v10424_v26 = vld [vmem:[%s15036_s1 + $0x10] sm:$0xff]   ;;  %vm11717_vm0 = vmand %vm2525_vm7, %vm362_vm4 }
  0xef   : > { %vm2203_vm2 = vcmask 64512   ;;  %v1693_v7 = vrot.slane %v1692_v29, 4  ;;  %v1697_v12 = vrot.slane %v1695_v27, 5  ;;  %v1806_v53 = vsel %vm10792_vm12, %v9655_v57, %v1805_v55  ;;  %10303 = vmatpush3.bf16.msra.mxu0 %v2408_v13 }
  0xf0   : > { %2121 = vrot.lane.b32.xlu1 %v9712_v54, %s10573_s9  ;;  %2159 = vrot.lane.b32.xlu0 %v9719_v39, %s10579_s15  ;;  %v9727_v32 = vcombine.low %v1798_v1, %v1802_v59  ;;  %v1810_v2 = vsel %vm10792_vm12, %v9656_v63, %v1809_v62  ;;  %vm2228_vm3 = vcmask 130048   ;;  %v15084_v9 = vcombine.low %v11422_v6, %v11424_v42  ;;  %v2056_v6 = vpop.permute.xlu0 %2055 }
  0xf1   : > { %v15085_v46 = vcombine.low %v11428_v58, %v11430_v16  ;;  %v1698_v55 = vsel %vm10864_vm15, %v1693_v7, %v1697_v12  ;;  %10304 = vmatprep.subr.bf16.mxu0 %v10422_v20  ;;  %vm2245_vm5 = vcmask 195584   ;;  %vm2262_vm6 = vcmask 261120  }
  0xf2   : > { %v2206_v54 = vsel %vm2203_vm2, %v15084_v9, %v11387_v8  ;;  %v9720_v42 = vcombine.low %v1684_v60, %v1698_v55  ;;  %vm15053_vm9 = vcmask 326656   ;;  %vm2296_vm10 = vcmask 392192   ;;  %v2018_v16 = vpop.permute.xlu1 %2017  ;;  %v15088_v55 = vld [vmem:[#allocation8_spill] sm:$0xff] }
  0xf3   : > { %v2209_v57 = vsel %vm2203_vm2, %v15085_v46, %v11434_v4  ;;  %v2230_v63 = vsel %vm2228_vm3, %v2206_v54, %v11372_v34  ;;  %v9728_v4 = vcombine.low %v1806_v53, %v1810_v2  ;;  %10305 = vmatpush3.bf16.msra.mxu0 %v10422_v20  ;;  %vm2313_vm11 = vcmask 457728  }
  0xf4   : > { %v2232_v8 = vsel %vm2228_vm3, %v2209_v57, %v11401_v17  ;;  %2199 = vrot.lane.b32.xlu0 %v9727_v32, %s10576_s12  ;;  %v2247_v34 = vsel %vm2245_vm5, %v2230_v63, %v11278_v25  ;;  %2161 = vrot.lane.b32.xlu1 %v9720_v42, %s10579_s15  ;;  %vm2330_vm13 = vcmask 523264   ;;  %v2112_v21 = vpop.permute.xlu0 %2111  ;;  %vm2389_vm14 = vcmask 588800   ;;  %s10582_s15 = smov 112  }
  0xf5   : > { %v2249_v58 = vsel %vm2245_vm5, %v2232_v8, %v11318_v19  ;;  %v2264_v60 = vsel %vm2262_vm6, %v2247_v34, %v11457_v37  ;;  %10306 = vmatprep.subr.bf16.mxu0 %v10424_v26  ;;  %v10426_v19 = vld [vmem:[%s15036_s1 + $0x8] sm:$0xff]   ;;  %v15089_v63 = vcombine.low %v11163_v28, %v15088_v55  ;;  %v2618_v55 = vld [vmem:[#allocation4 + $0x3c] sm:$0x1] }
  0xf6   : > { %v2266_v17 = vsel %vm2262_vm6, %v2249_v58, %v11500_v31  ;;  %v2281_v25 = vsel %vm15053_vm9, %v2264_v60, %v11329_v56  ;;  %v2058_v51 = vpop.permute.xlu1 %2057  ;;  %v10427_v56 = vld [vmem:[%s15036_s1] sm:$0xff]   ;;  %v15090_v34 = vld [vmem:[#allocation6_spill] sm:$0xff] }
  0xf7   : > { %v2298_v35 = vsel %vm2296_vm10, %v2281_v25, %v11306_v48  ;;  %v2283_v31 = vsel %vm15053_vm9, %v2266_v17, %v11447_v49  ;;  %10307 = vmatpush3.bf16.msra.mxu0 %v10424_v26  ;;  %v9663_v48 = vcombine.low %v11345_v23, %v11353_v22  ;;  %v2603_v23 = vld [vmem:[#allocation4 + $0x14] sm:$0x1]  ;;  %v15097_v22 = vld [vmem:[#allocation9_spill] sm:$0xff] }
  0xf8   : > { %v2315_v37 = vsel %vm2313_vm11, %v2298_v35, %v11479_v38  ;;  %2201 = vrot.lane.b32.xlu1 %v9728_v4, %s10576_s12  ;;  %10308 = vmatprep.subr.bf16.mxu0 %v10426_v19  ;;  %v2300_v49 = vsel %vm2296_vm10, %v2283_v31, %v11347_v40  ;;  %v15086_v38 = vcombine.low %v10920_v14, %v10932_v52  ;;  %v2152_v43 = vpop.permute.xlu0 %2151 }
  0xf9   : > { %v2332_v41 = vsel %vm2330_vm13, %v2315_v37, %v11363_v47  ;;  %v2317_v27 = vsel %vm2313_vm11, %v2300_v49, %v11534_v61 }
  0xfa   : > { %10312 = vmatprep.mubr.msk.bf16.mxu0 %vm2389_vm14, %v2332_v41  ;;  %v2212_v24 = vsel %vm2203_vm2, %v15086_v38, %v11512_v45  ;;  %v2114_v5 = vpop.permute.xlu1 %2113 }
  0xfb   : > { %v2234_v47 = vsel %vm2228_vm3, %v2212_v24, %v11536_v0  ;;  %10309 = vmatpush3.bf16.msra.mxu0 %v10426_v19  ;;  %v2334_v0 = vsel %vm2330_vm13, %v2317_v27, %v11473_v15  ;;  %v2545_v27 = vld [vmem:[#allocation4 + $0x18] sm:$0x1] }
  0xfc   : > { %v2251_v29 = vsel %vm2245_vm5, %v2234_v47, %v11565_v10  ;;  %10310 = vmatprep.subr.bf16.mxu0 %v10427_v56  ;;  %v2192_v45 = vpop.permute.xlu0 %2191  ;;  %v15087_v10 = vcombine.low %v10972_v36, %v10986_v44 }
  0xfd   : > { %v2268_v40 = vsel %vm2262_vm6, %v2251_v29, %v11589_v3 }
  0xfe   : > { %v2285_v14 = vsel %vm15053_vm9, %v2268_v40, %v2056_v6  ;;  %v2154_v39 = vpop.permute.xlu1 %2153  ;;  %v2215_v61 = vsel %vm2203_vm2, %v15087_v10, %v11563_v50  ;;  %v2606_v40 = vld [vmem:[#allocation4 + $0x1c] sm:$0x1] }
  0xff   : > { %v2302_v52 = vsel %vm2296_vm10, %v2285_v14, %v2112_v21  ;;  %10311 = vmatpush3.bf16.msra.mxu0 %v10427_v56  ;;  %v2236_v3 = vsel %vm2228_vm3, %v2215_v61, %v11580_v18 }
 0x100   : > { %v2319_v62 = vsel %vm2313_vm11, %v2302_v52, %v2152_v43  ;;  %v2253_v1 = vsel %vm2245_vm5, %v2236_v3, %v11600_v30 }
 0x101   : > { %v2336_v20 = vsel %vm2330_vm13, %v2319_v62, %v2192_v45  ;;  %v2270_v15 = vsel %vm2262_vm6, %v2253_v1, %v2018_v16  ;;  %v15091_v16 = vld [vmem:[#allocation7_spill] sm:$0xff]  ;;  %v2607_v45 = vsel %vm11717_vm0, 0, %v2606_v40  ;;  %v2539_v1 = vld [vmem:[#allocation4 + $0x8] sm:$0x1] }
 0x102   : > { %10313 = vmatmul.mubr.msk.bf16.vlgmr.msra.gmra.mxu0 %vm2389_vm14, %v2334_v0  ;;  %v2287_v59 = vsel %vm15053_vm9, %v2270_v15, %v2058_v51  ;;  %v2194_v13 = vpop.permute.xlu1 %2193  ;;  %v15092_v4 = vcombine.low %v15090_v34, %v15091_v16  ;;  %2608 = vst [vmem:[#allocation4 + $0x1c] sm:$0x1] %v2607_v45  ;;  %v2600_v15 = vld [vmem:[#allocation4 + $0xc] sm:$0x1] }
 0x103   : > { %10316 = vmatprep.mubr.msk.bf16.mxu0 %vm2389_vm14, %v2336_v20  ;;  %v2304_v36 = vsel %vm2296_vm10, %v2287_v59, %v2114_v5 }
 0x104   : > { %v2321_v44 = vsel %vm2313_vm11, %v2304_v36, %v2154_v39 }
 0x105   : > { %v2338_v50 = vsel %vm2330_vm13, %v2321_v44, %v2194_v13  ;;  %v2601_v13 = vsel %vm11717_vm0, 0, %v2600_v15 }
 0x106   : > { %2602 = vst [vmem:[#allocation4 + $0xc] sm:$0x1] %v2601_v13 }
 0x10a   : > { %10317 = vmatmul.mubr.msk.bf16.gmra.mxu0 %vm2389_vm14, %v2338_v50  ;;  %v2548_v50 = vld [vmem:[#allocation4 + $0x20] sm:$0x1] }
 0x117   : > { %v1886_v18 = vpop.permute.xlu1 %1885 }
 0x118   : > { %v2221_v17 = vsel %vm2203_vm2, %v15092_v4, %v1886_v18  ;;  %v2609_v18 = vld [vmem:[#allocation4 + $0x24] sm:$0x1]  ;;  %v2551_v4 = vld [vmem:[#allocation4 + $0x28] sm:$0x1] }
 0x11b   : > { %v1884_v7 = vpop.permute.xlu0 %1883  ;;  %v1926_v12 = vpop.permute.xlu1 %1925 }
 0x11c   : > { %v2218_v26 = vsel %vm2203_vm2, %v15089_v63, %v1884_v7  ;;  %v2240_v19 = vsel %vm2228_vm3, %v2221_v17, %v1926_v12  ;;  %v2610_v12 = vsel %vm11717_vm0, 0, %v2609_v18  ;;  %v2612_v17 = vld [vmem:[#allocation4 + $0x2c] sm:$0x1] }
 0x11d   : > { %2611 = vst [vmem:[#allocation4 + $0x24] sm:$0x1] %v2610_v12  ;;  %v2639_v12 = vld [vmem:[#allocation4 + $0x74] sm:$0x1] }
 0x11f   : > { %v1924_v53 = vpop.permute.xlu0 %1923  ;;  %v1982_v30 = vpop.permute.xlu1 %1981 }
 0x120   : > { %v2238_v8 = vsel %vm2228_vm3, %v2218_v26, %v1924_v53  ;;  %v2257_v28 = vsel %vm2245_vm5, %v2240_v19, %v1982_v30  ;;  %v2542_v30 = vld [vmem:[#allocation4 + $0x10] sm:$0x1] }
 0x123   : > { %v1980_v32 = vpop.permute.xlu0 %1979 }
 0x124   : > { %v2255_v42 = vsel %vm2245_vm5, %v2238_v8, %v1980_v32 }
 0x127   : > { %v2020_v2 = vpop.permute.xlu0 %2019 }
 0x128   : > { %v2272_v60 = vsel %vm2262_vm6, %v2255_v42, %v2020_v2  ;;  %v2619_v42 = vsel %vm11717_vm0, 0, %v2618_v55 }
 0x129   : > { %2620 = vst [vmem:[#allocation4 + $0x3c] sm:$0x1] %v2619_v42 }
 0x12a   : > { %v2022_v9 = vpop.permute.xlu1 %2021 }
 0x12b   : > { %v2060_v54 = vpop.permute.xlu0 %2059  ;;  %v2274_v31 = vsel %vm2262_vm6, %v2257_v28, %v2022_v9 }
 0x12c   : > { %v2289_v25 = vsel %vm15053_vm9, %v2272_v60, %v2060_v54 }
 0x12e   : > { %v2062_v46 = vpop.permute.xlu1 %2061 }
 0x12f   : > { %v2116_v57 = vpop.permute.xlu0 %2115  ;;  %v2291_v41 = vsel %vm15053_vm9, %v2274_v31, %v2062_v46  ;;  %vm11723_vm9 = vmand %vm2525_vm7, %vm300_vm1  ;;  %v2604_v46 = vsel %vm11717_vm0, 0, %v2603_v23  ;;  %vm15100_vm1 = vcmask 326656   ;;  %v2560_v31 = vld [vmem:[#allocation4 + $0x40] sm:$0x1]  ;;  %v2633_v23 = vld [vmem:[#allocation4 + $0x64] sm:$0x1] }
 0x130   : > { %v2306_v21 = vsel %vm2296_vm10, %v2289_v25, %v2116_v57  ;;  %v2546_v52 = vsel %vm11723_vm9, 0, %v2545_v27  ;;  %v2540_v59 = vsel %vm11723_vm9, 0, %v2539_v1  ;;  %v2549_v7 = vsel %vm11723_vm9, 0, %v2548_v50  ;;  %2605 = vst [vmem:[#allocation4 + $0x14] sm:$0x1] %v2604_v46  ;;  %vm15101_vm4 = vmmov %vm15100_vm1 }
 0x131   : > { %2547 = vst [vmem:[#allocation4 + $0x18] sm:$0x1] %v2546_v52  ;;  %2541 = vst [vmem:[#allocation4 + $0x8] sm:$0x1] %v2540_v59  ;;  %v2543_v54 = vsel %vm11723_vm9, 0, %v2542_v30  ;;  %v2552_v19 = vsel %vm11723_vm9, 0, %v2551_v4 }
 0x132   : > { %v2118_v6 = vpop.permute.xlu1 %2117  ;;  %2550 = vst [vmem:[#allocation4 + $0x20] sm:$0x1] %v2549_v7  ;;  %2544 = vst [vmem:[#allocation4 + $0x10] sm:$0x1] %v2543_v54  ;;  %v2557_v57 = vld [vmem:[#allocation4 + $0x38] sm:$0x1] }
 0x133   : > { %v2156_v58 = vpop.permute.xlu0 %2155  ;;  %v2308_v49 = vsel %vm2296_vm10, %v2291_v41, %v2118_v6  ;;  %v2558_v6 = vsel %vm11723_vm9, 0, %v2557_v57  ;;  %v2613_v25 = vsel %vm11717_vm0, 0, %v2612_v17  ;;  %2553 = vst [vmem:[#allocation4 + $0x28] sm:$0x1] %v2552_v19  ;;  %v2615_v52 = vld [vmem:[#allocation4 + $0x34] sm:$0x1] }
 0x134   : > { %v2323_v37 = vsel %vm2313_vm11, %v2306_v21, %v2156_v58  ;;  %2559 = vst [vmem:[#allocation4 + $0x38] sm:$0x1] %v2558_v6  ;;  %2614 = vst [vmem:[#allocation4 + $0x2c] sm:$0x1] %v2613_v25  ;;  %v2563_v59 = vld [vmem:[#allocation4 + $0x48] sm:$0x1] }
 0x135   : > { %v2564_v13 = vsel %vm11723_vm9, 0, %v2563_v59  ;;  %v2578_v7 = vld [vmem:[#allocation4 + $0x70] sm:$0x1]  ;;  %v2572_v30 = vld [vmem:[#allocation4 + $0x60] sm:$0x1]  ;;  %vm4565_vm7 = vcmask 654336  }
 0x136   : > { %v2158_v35 = vpop.permute.xlu1 %2157  ;;  %2565 = vst [vmem:[#allocation4 + $0x48] sm:$0x1] %v2564_v13  ;;  %v2624_v57 = vld [vmem:[#allocation4 + $0x4c] sm:$0x1]  ;;  %v2642_v6 = vld [vmem:[#allocation4 + $0x7c] sm:$0x1] }
 0x137   : > { %v2196_v51 = vpop.permute.xlu0 %2195  ;;  %v2325_v38 = vsel %vm2313_vm11, %v2308_v49, %v2158_v35  ;;  %v2561_v49 = vsel %vm11723_vm9, 0, %v2560_v31  ;;  %v2625_v55 = vsel %vm11717_vm0, 0, %v2624_v57  ;;  %v2590_v4 = vld [vmem:[#allocation4 + $0x90] sm:$0x1]  ;;  %v2651_v17 = vld [vmem:[#allocation4 + $0x94] sm:$0x1] }
 0x138   : > { %v2340_v56 = vsel %vm2330_vm13, %v2323_v37, %v2196_v51  ;;  %v2621_v37 = vld [vmem:[#allocation4 + $0x44] sm:$0x1]  ;;  %2562 = vst [vmem:[#allocation4 + $0x40] sm:$0x1] %v2561_v49  ;;  %2626 = vst [vmem:[#allocation4 + $0x4c] sm:$0x1] %v2625_v55 }
 0x139   : > { %10320 = vmatprep.mubr.msk.bf16.mxu0 %vm2389_vm14, %v2340_v56  ;;  %v2597_v51 = vld [vmem:[#allocation4 + $0x4] sm:$0x1]  ;;  %v2928_v57 = vld [vmem:[#allocation4 + $0x18] sm:$0xf] }
 0x13a   : > { %v2198_v24 = vpop.permute.xlu1 %2197 }
 0x13b   : > { %v2342_v47 = vsel %vm2330_vm13, %v2325_v38, %v2198_v24  ;;  %v2622_v38 = vsel %vm11717_vm0, 0, %v2621_v37  ;;  %v2598_v24 = vsel %vm11717_vm0, 0, %v2597_v51  ;;  %v2584_v37 = vld [vmem:[#allocation4 + $0x80] sm:$0x1]  ;;  %v2645_v51 = vld [vmem:[#allocation4 + $0x84] sm:$0x1] }
 0x13c   : > { %10321 = vmatmul.mubr.msk.bf16.gmra.mxu0 %vm2389_vm14, %v2342_v47  ;;  %v2536_v47 = vld [vmem:[#allocation4] sm:$0x1]  ;;  %2623 = vst [vmem:[#allocation4 + $0x44] sm:$0x1] %v2622_v38  ;;  %2599 = vst [vmem:[#allocation4 + $0x4] sm:$0x1] %v2598_v24 }
 0x13d   : > { %v2537_v27 = vsel %vm11723_vm9, 0, %v2536_v47  ;;  %v2585_v49 = vsel %vm11723_vm9, 0, %v2584_v37  ;;  %v2646_v38 = vsel %vm11717_vm0, 0, %v2645_v51 }
 0x13e   : > { %2538 = vst [vmem:[#allocation4] sm:$0x1] %v2537_v27  ;;  %2586 = vst [vmem:[#allocation4 + $0x80] sm:$0x1] %v2585_v49  ;;  %v2627_v27 = vld [vmem:[#allocation4 + $0x54] sm:$0x1] }
 0x13f   : > { %2647 = vst [vmem:[#allocation4 + $0x84] sm:$0x1] %v2646_v38  ;;  %v2919_v38 = vld [vmem:[#allocation4 + $0xc] sm:$0x1] }
 0x142   : > { %v1888_v5 = vpop.permute.xlu0 %1887 }
 0x143   : > { %v2224_v36 = vsel %vm2203_vm2, %v9663_v48, %v1888_v5  ;;  %v15098_v48 = vld [vmem:[#allocation10_spill] sm:$0xff] }
 0x144   : > { %v15099_v2 = vcombine.low %v15097_v22, %v15098_v48  ;;  %v2573_v22 = vsel %vm11723_vm9, 0, %v2572_v30  ;;  %v2634_v48 = vsel %vm11717_vm0, 0, %v2633_v23 }
 0x145   : > { %2574 = vst [vmem:[#allocation4 + $0x60] sm:$0x1] %v2573_v22  ;;  %2635 = vst [vmem:[#allocation4 + $0x64] sm:$0x1] %v2634_v48 }
 0x146   : > { %v1928_v14 = vpop.permute.xlu0 %1927 }
 0x147   : > { %v2242_v32 = vsel %vm2228_vm3, %v2224_v36, %v1928_v14  ;;  %v2554_v14 = vld [vmem:[#allocation4 + $0x30] sm:$0x1]  ;;  %v2569_v36 = vld [vmem:[#allocation4 + $0x58] sm:$0x1] }
 0x148   : > { %v2570_v50 = vsel %vm11723_vm9, 0, %v2569_v36 }
 0x149   : > { %2571 = vst [vmem:[#allocation4 + $0x58] sm:$0x1] %v2570_v50 }
 0x14a   : > { %v1984_v39 = vpop.permute.xlu0 %1983 }
 0x14b   : > { %v2259_v63 = vsel %vm2245_vm5, %v2242_v32, %v1984_v39  ;;  %v2616_v39 = vsel %vm11717_vm0, 0, %v2615_v52  ;;  %v2640_v32 = vsel %vm11717_vm0, 0, %v2639_v12 }
 0x14c   : > { %2617 = vst [vmem:[#allocation4 + $0x34] sm:$0x1] %v2616_v39  ;;  %2641 = vst [vmem:[#allocation4 + $0x74] sm:$0x1] %v2640_v32 }
 0x14e   : > { %v1890_v0 = vpop.permute.xlu1 %1889 }
 0x14f   : > { %v2227_v9 = vsel %vm2203_vm2, %v15099_v2, %v1890_v0  ;;  %v2555_v0 = vsel %vm11723_vm9, 0, %v2554_v14  ;;  %v2587_v2 = vld [vmem:[#allocation4 + $0x88] sm:$0x1]  ;;  %v2628_v14 = vsel %vm11717_vm0, 0, %v2627_v27 }
 0x150   : > { %2556 = vst [vmem:[#allocation4 + $0x30] sm:$0x1] %v2555_v0  ;;  %v2588_v54 = vsel %vm11723_vm9, 0, %v2587_v2  ;;  %2629 = vst [vmem:[#allocation4 + $0x54] sm:$0x1] %v2628_v14 }
 0x151   : > { %2589 = vst [vmem:[#allocation4 + $0x88] sm:$0x1] %v2588_v54  ;;  %v2566_v2 = vld [vmem:[#allocation4 + $0x50] sm:$0x1] }
 0x152   : > { %v1930_v62 = vpop.permute.xlu1 %1929 }
 0x153   : > { %v2244_v58 = vsel %vm2228_vm3, %v2227_v9, %v1930_v62  ;;  %v2648_v9 = vld [vmem:[#allocation4 + $0x8c] sm:$0x1] }
 0x154   : > { %v2024_v10 = vpop.permute.xlu0 %2023  ;;  %v2649_v46 = vsel %vm11717_vm0, 0, %v2648_v9 }
 0x155   : > { %v2276_v34 = vsel %vm2262_vm6, %v2259_v63, %v2024_v10  ;;  %2650 = vst [vmem:[#allocation4 + $0x8c] sm:$0x1] %v2649_v46  ;;  %v11814_v63 = vld [vmem:[%s15037_s2] ss:$0 sm:$0xff] }
 0x156   : > { %v1986_v61 = vpop.permute.xlu1 %1985 }
 0x157   : > { %v2261_v28 = vsel %vm2245_vm5, %v2244_v58, %v1986_v61  ;;  %vm4599_vm5 = vcmask 916480  }
 0x158   : > { %v2064_v20 = vpop.permute.xlu0 %2063 }
 0x159   : > { %v2293_v16 = vsel %vm15100_vm1, %v2276_v34, %v2064_v20  ;;  %v2575_v20 = vld [vmem:[#allocation4 + $0x68] sm:$0x1]  ;;  %v2643_v34 = vsel %vm11717_vm0, 0, %v2642_v6 }
 0x15a   : > { %v2026_v3 = vpop.permute.xlu1 %2025  ;;  %v2576_v1 = vsel %vm11723_vm9, 0, %v2575_v20  ;;  %2644 = vst [vmem:[#allocation4 + $0x7c] sm:$0x1] %v2643_v34 }
 0x15b   : > { %v2278_v5 = vsel %vm2262_vm6, %v2261_v28, %v2026_v3  ;;  %v2636_v3 = vld [vmem:[#allocation4 + $0x6c] sm:$0x1]  ;;  %2577 = vst [vmem:[#allocation4 + $0x68] sm:$0x1] %v2576_v1  ;;  %v2591_v28 = vsel %vm11723_vm9, 0, %v2590_v4 }
 0x15c   : > { %v2637_v15 = vsel %vm11717_vm0, 0, %v2636_v3  ;;  %2592 = vst [vmem:[#allocation4 + $0x90] sm:$0x1] %v2591_v28 }
 0x15d   : > { %v2120_v44 = vpop.permute.xlu0 %2119  ;;  %2638 = vst [vmem:[#allocation4 + $0x6c] sm:$0x1] %v2637_v15 }
 0x15e   : > { %v2066_v53 = vpop.permute.xlu1 %2065  ;;  %v2310_v60 = vsel %vm2296_vm10, %v2293_v16, %v2120_v44  ;;  %v2630_v44 = vld [vmem:[#allocation4 + $0x5c] sm:$0x1] }
 0x15f   : > { %v2295_v40 = vsel %vm15101_vm4, %v2278_v5, %v2066_v53  ;;  %v2631_v18 = vsel %vm11717_vm0, 0, %v2630_v44  ;;  %v2579_v53 = vsel %vm11723_vm9, 0, %v2578_v7 }
 0x160   : > { %2632 = vst [vmem:[#allocation4 + $0x5c] sm:$0x1] %v2631_v18  ;;  %2580 = vst [vmem:[#allocation4 + $0x70] sm:$0x1] %v2579_v53 }
 0x162   : > { %v2122_v26 = vpop.permute.xlu1 %2121  ;;  %v2160_v8 = vpop.permute.xlu0 %2159 }
 0x163   : > { %v2327_v21 = vsel %vm2313_vm11, %v2310_v60, %v2160_v8  ;;  %v2312_v45 = vsel %vm2296_vm10, %v2295_v40, %v2122_v26  ;;  %v3012_v26 = vld [vmem:[#allocation4] sm:$0xf]  ;;  %v2581_v8 = vld [vmem:[#allocation4 + $0x78] sm:$0x1] }
 0x164   : > { %v2582_v58 = vsel %vm11723_vm9, 0, %v2581_v8  ;;  %v3045_v19 = vshrl.u32 %v3012_v26, 16  ;;  %v3048_v25 = vshll.u32 %v3012_v26, 16 }
 0x165   : > { %2583 = vst [vmem:[#allocation4 + $0x78] sm:$0x1] %v2582_v58 }
 0x166   : > { %v2200_v35 = vpop.permute.xlu0 %2199  ;;  %v2162_v41 = vpop.permute.xlu1 %2161  ;;  %v3047_v47 = vrot.slane %v3045_v19, 4  ;;  %v3050_v5 = vrot.slane %v3048_v25, 5 }
 0x167   : > { %v2344_v56 = vsel %vm2330_vm13, %v2327_v21, %v2200_v35  ;;  %v2329_v62 = vsel %vm2313_vm11, %v2312_v45, %v2162_v41  ;;  %v2652_v21 = vsel %vm11717_vm0, 0, %v2651_v17  ;;  %v3772_v17 = vld [vmem:[#allocation4 + $0x4c] sm:$0x1]  ;;  %vm15106_vm11 = vcmask 1043456  }
 0x168   : > { %10324 = vmatprep.mubr.msk.bf16.mxu0 %vm2389_vm14, %v2344_v56  ;;  %2653 = vst [vmem:[#allocation4 + $0x94] sm:$0x1] %v2652_v21  ;;  %v11829_v56 = vld [vmem:[#allocation4 + $0x48] sm:$0xf]  ;;  %v3051_v3 = vor.u32 %v3050_v5, %v3047_v47  ;;  %vm15133_vm1 = vmmov %vm15106_vm11 }
 0x169   : > { %v3880_v45 = vshrl.u32 %v11829_v56, 16  ;;  %v3883_v0 = vshll.u32 %v11829_v56, 16  ;;  %vm15136_vm4 = vmmov %vm15133_vm1 }
 0x16a   : > { %v2202_v10 = vpop.permute.xlu1 %2201  ;;  %v11847_v22 = vrot.slane %v3051_v3, 4 }
 0x16b   : > { %v2346_v61 = vsel %vm2330_vm13, %v2329_v62, %v2202_v10  ;;  %v3028_v62 = vld [vmem:[#allocation4 + $0x4] sm:$0x1]  ;;  %v3268_v10 = vld [vmem:[#allocation4] sm:$0xe]  ;;  %v3882_v18 = vrot.slane %v3880_v45, 4  ;;  %v3885_v7 = vrot.slane %v3883_v0, 5 }
 0x16c   : > { %10325 = vmatmul.mubr.msk.bf16.gmra.mxu0 %vm2389_vm14, %v2346_v61  ;;  %v3054_v1 = vshll.u32 %v3028_v62, 16  ;;  %v9759_v44 = vrot.slane %v3268_v10, 9  ;;  %v3318_v50 = vrot.slane %v3028_v62, 5  ;;  %vm15107_vm14 = vmmov %vm15106_vm11 }
 0x16d   : > { %v3886_v6 = vor.u32 %v3885_v7, %v3882_v18 }
 0x16e   : > { %v11849_v48 = vrot.slane %v3054_v1, 5  ;;  %v11855_v8 = vsel %vm10792_vm12, %v9759_v44, %v3318_v50  ;;  %v11870_v1 = vld [vmem:[#allocation4 + $0x50] sm:$0xe] }
 0x170   : > { %v3057_v21 = vsel %vm10864_vm15, %v11847_v22, %v11849_v48 }
 0x1c2   : > { %v10314_v42 = vpop.f32.mrf.mxu0 }
 0x1c3   : > { %v2453_v16 = vadd.f32 %v10314_v42, %v11814_v63  ;;  %v2567_v42 = vsel %vm11723_vm9, 0, %v2566_v2 }
 0x1c4   : > { %v2444_v60 = vpop.f32.mrf.mxu0  ;;  %2568 = vst [vmem:[#allocation4 + $0x50] sm:$0x1] %v2567_v42  ;;  %v2952_v42 = vld [vmem:[#allocation4 + $0x38] sm:$0xf] }
 0x1c5   : > { %2509 = vst.msk [vmem:[#allocation3 + $0x10] sm:$0xff] %vm2228_vm3, %v2453_v16  ;;  %v2445_v35 = vadd.f32 %v11814_v63, %v2444_v60  ;;  %v2931_v60 = vld [vmem:[#allocation4 + $0x1c] sm:$0x1] }
 0x1c6   : > { %v10315_v31 = vpop.f32.mrf.mxu0 }
 0x1c7   : > { %2507 = vst.msk [vmem:[#allocation3] sm:$0xff] %vm2228_vm3, %v2445_v35  ;;  %v2456_v41 = vadd.f32 %v10315_v31, %v11814_v63  ;;  %v3889_v35 = vshll.u32 %v3772_v17, 16 }
 0x1c8   : > { %v2447_v24 = vpop.f32.mrf.mxu0 }
 0x1c9   : > { %2510 = vst.msk [vmem:[#allocation3 + $0x18] sm:$0xff] %vm2228_vm3, %v2456_v41  ;;  %v2448_v40 = vadd.f32 %v11814_v63, %v2447_v24  ;;  %v2916_v41 = vld [vmem:[#allocation4 + $0x8] sm:$0xf] }
 0x1ca   : > { %v10318_v52 = vpop.f32.mrf.mxu0 }
 0x1cb   : > { %2508 = vst.msk [vmem:[#allocation3 + $0x8] sm:$0xff] %vm2228_vm3, %v2448_v40  ;;  %v2469_v39 = vadd.f32 %v10318_v52, %v11814_v63  ;;  %v11864_v40 = vrot.slane %v3886_v6, 4 }
 0x1cc   : > { %v2659_v61 = vld [vmem:[#allocation3 + $0x10] sm:$0xff]  ;;  %v2460_v20 = vpop.f32.mrf.mxu0 }
 0x1cd   : > { %v2675_v15 = vmax.f32 %v2659_v61, 0.0  ;;  %2513 = vst.msk [vmem:[#allocation3 + $0x30] sm:$0xff] %vm2228_vm3, %v2469_v39  ;;  %v2461_v59 = vadd.f32 %v11814_v63, %v2460_v20 }
 0x1ce   : > { %v2657_v13 = vld [vmem:[#allocation3] sm:$0xff]  ;;  %v10319_v36 = vpop.f32.mrf.mxu0 }
 0x1cf   : > { %v10225_v12 = vpack.c.bf16 %v2675_v15, %v2675_v15  ;;  %v2673_v53 = vmax.f32 %v2657_v13, 0.0  ;;  %2511 = vst.msk [vmem:[#allocation3 + $0x20] sm:$0xff] %vm2228_vm3, %v2461_v59  ;;  %v2472_v32 = vadd.f32 %v10319_v36, %v11814_v63  ;;  %v2934_v13 = vld [vmem:[#allocation4 + $0x20] sm:$0xf]  ;;  %v2937_v36 = vld [vmem:[#allocation4 + $0x24] sm:$0x1] }
 0x1d0   : > { %v2660_v30 = vld [vmem:[#allocation3 + $0x18] sm:$0xff]  ;;  %v2463_v23 = vpop.f32.mrf.mxu0 }
 0x1d1   : > { %v2770_v9 = vshrl.u32 %v10225_v12, 16  ;;  %v10223_v54 = vpack.c.bf16 %v2673_v53, %v2673_v53  ;;  %v2676_v46 = vmax.f32 %v2660_v30, 0.0  ;;  %2514 = vst.msk [vmem:[#allocation3 + $0x38] sm:$0xff] %vm2228_vm3, %v2472_v32  ;;  %v2464_v26 = vadd.f32 %v11814_v63, %v2463_v23  ;;  %v2922_v53 = vld [vmem:[#allocation4 + $0x10] sm:$0xf] }
 0x1d2   : > { %v2658_v55 = vld [vmem:[#allocation3 + $0x8] sm:$0xff]  ;;  %v2773_v34 = vshll.u32 %v10225_v12, 16  ;;  %v2925_v30 = vld [vmem:[#allocation4 + $0x14] sm:$0x1] }
 0x1d3   : > { %v2772_v58 = vrot.slane %v2770_v9, 7  ;;  %v2754_v16 = vshrl.u32 %v10223_v54, 16  ;;  %v10226_v4 = vpack.c.bf16 %v2676_v46, %v2676_v46  ;;  %v2757_v19 = vshll.u32 %v10223_v54, 16  ;;  %2512 = vst.msk [vmem:[#allocation3 + $0x28] sm:$0xff] %vm2228_vm3, %v2464_v26 }
 0x1d4   : > { %v2674_v25 = vmax.f32 %v2658_v55, 0.0  ;;  %v2663_v28 = vld [vmem:[#allocation3 + $0x30] sm:$0xff]  ;;  %v11876_v54 = vrot.slane %v3889_v35, 5  ;;  %v9767_v46 = vrot.slane %v11870_v1, 9  ;;  %v2940_v35 = vld [vmem:[#allocation4 + $0x28] sm:$0xf] }
 0x1d5   : > { %v2775_v31 = vor.u32 %v2773_v34, %v2772_v58  ;;  %v2776_v37 = vrot.slane %v2772_v58, 4  ;;  %v2756_v51 = vrot.slane %v2754_v16, 7  ;;  %v2778_v49 = vshrl.u32 %v10226_v4, 16  ;;  %v2955_v58 = vld [vmem:[#allocation4 + $0x3c] sm:$0x1] }
 0x1d6   : > { %v2781_v24 = vshll.u32 %v10226_v4, 16  ;;  %v10224_v47 = vpack.c.bf16 %v2674_v25, %v2674_v25  ;;  %v2679_v5 = vmax.f32 %v2663_v28, 0.0  ;;  %v2661_v27 = vld [vmem:[#allocation3 + $0x20] sm:$0xff] }
 0x1d7   : > { %v2929_v52 = vsel %vm10665_vm8, %v2775_v31, %v2928_v57  ;;  %v2932_v45 = vsel %vm11723_vm9, %v2776_v37, %v2931_v60  ;;  %v2759_v0 = vor.u32 %v2757_v19, %v2756_v51  ;;  %v2760_v39 = vrot.slane %v2756_v51, 4  ;;  %v11883_v60 = vld [vmem:[#allocation4 + $0x54] sm:$0x1]  ;;  %v2943_v31 = vld [vmem:[#allocation4 + $0x2c] sm:$0x1] }
 0x1d8   : > { %2930 = vst [vmem:[#allocation4 + $0x18] sm:$0xf] %v2929_v52  ;;  %2933 = vst [vmem:[#allocation4 + $0x1c] sm:$0x1] %v2932_v45  ;;  %v2780_v62 = vrot.slane %v2778_v49, 7  ;;  %v2762_v10 = vshrl.u32 %v10224_v47, 16  ;;  %v10229_v20 = vpack.c.bf16 %v2679_v5, %v2679_v5 }
 0x1d9   : > { %v2765_v61 = vshll.u32 %v10224_v47, 16  ;;  %v2664_v3 = vld [vmem:[#allocation3 + $0x38] sm:$0xff]  ;;  %v2917_v15 = vsel %vm10665_vm8, %v2759_v0, %v2916_v41  ;;  %v2920_v59 = vsel %vm11723_vm9, %v2760_v39, %v2919_v38  ;;  %v2677_v44 = vmax.f32 %v2661_v27, 0.0  ;;  %v2961_v47 = vld [vmem:[#allocation4 + $0x44] sm:$0x1] }
 0x1da   : > { %v2680_v50 = vmax.f32 %v2664_v3, 0.0  ;;  %2918 = vst [vmem:[#allocation4 + $0x8] sm:$0xf] %v2917_v15  ;;  %2921 = vst [vmem:[#allocation4 + $0xc] sm:$0x1] %v2920_v59  ;;  %v2783_v18 = vor.u32 %v2781_v24, %v2780_v62  ;;  %v2784_v7 = vrot.slane %v2780_v62, 4 }
 0x1db   : > { %v2764_v12 = vrot.slane %v2762_v10, 7  ;;  %v2802_v32 = vshrl.u32 %v10229_v20, 16  ;;  %v10227_v23 = vpack.c.bf16 %v2677_v44, %v2677_v44  ;;  %v2662_v9 = vld [vmem:[#allocation3 + $0x28] sm:$0xff]  ;;  %v2805_v16 = vshll.u32 %v10229_v20, 16  ;;  %v2958_v24 = vld [vmem:[#allocation4 + $0x40] sm:$0xf] }
 0x1dc   : > { %v10230_v2 = vpack.c.bf16 %v2680_v50, %v2680_v50  ;;  %v2935_v57 = vsel %vm10665_vm8, %v2783_v18, %v2934_v13  ;;  %v2938_v55 = vsel %vm11723_vm9, %v2784_v7, %v2937_v36  ;;  %v2678_v37 = vmax.f32 %v2662_v9, 0.0 }
 0x1dd   : > { %v2767_v26 = vor.u32 %v2765_v61, %v2764_v12  ;;  %v2768_v6 = vrot.slane %v2764_v12, 4  ;;  %2936 = vst [vmem:[#allocation4 + $0x20] sm:$0xf] %v2935_v57  ;;  %2939 = vst [vmem:[#allocation4 + $0x24] sm:$0x1] %v2938_v55  ;;  %v2804_v34 = vrot.slane %v2802_v32, 7 }
 0x1de   : > { %v2786_v4 = vshrl.u32 %v10227_v23, 16  ;;  %v2810_v17 = vshrl.u32 %v10230_v2, 16  ;;  %v2789_v28 = vshll.u32 %v10227_v23, 16  ;;  %v2813_v5 = vshll.u32 %v10230_v2, 16  ;;  %v2946_v12 = vld [vmem:[#allocation4 + $0x30] sm:$0xf] }
 0x1df   : > { %v2923_v19 = vsel %vm10665_vm8, %v2767_v26, %v2922_v53  ;;  %v2926_v25 = vsel %vm11723_vm9, %v2768_v6, %v2925_v30  ;;  %v2807_v51 = vor.u32 %v2805_v16, %v2804_v34  ;;  %v2808_v41 = vrot.slane %v2804_v34, 4  ;;  %v11889_v52 = vld [vmem:[#allocation4 + $0x1c] sm:$0x1]  ;;  %v4006_v3 = vld [vmem:[#allocation4 + $0x18] sm:$0xe] }
 0x1e0   : > { %2924 = vst [vmem:[#allocation4 + $0x10] sm:$0xf] %v2923_v19  ;;  %2927 = vst [vmem:[#allocation4 + $0x14] sm:$0x1] %v2926_v25  ;;  %v2788_v49 = vrot.slane %v2786_v4, 7  ;;  %v2812_v38 = vrot.slane %v2810_v17, 7  ;;  %v10228_v27 = vpack.c.bf16 %v2678_v37, %v2678_v37 }
 0x1e1   : > { %v3166_v45 = vshll.u32 %v11883_v60, 16  ;;  %v3350_v0 = vrot.slane %v11883_v60, 5  ;;  %v2953_v39 = vsel %vm10665_vm8, %v2807_v51, %v2952_v42  ;;  %v2956_v62 = vsel %vm11723_vm9, %v2808_v41, %v2955_v58  ;;  %v11897_v20 = vld [vmem:[#allocation4 + $0xc] sm:$0x1]  ;;  %v11899_v13 = vld [vmem:[#allocation4 + $0x18] sm:$0xf] }
 0x1e2   : > { %v2791_v10 = vor.u32 %v2789_v28, %v2788_v49  ;;  %v2792_v61 = vrot.slane %v2788_v49, 4  ;;  %2954 = vst [vmem:[#allocation4 + $0x38] sm:$0xf] %v2953_v39  ;;  %2957 = vst [vmem:[#allocation4 + $0x3c] sm:$0x1] %v2956_v62  ;;  %v2815_v15 = vor.u32 %v2813_v5, %v2812_v38  ;;  %v2816_v59 = vrot.slane %v2812_v38, 4 }
 0x1e3   : > { %v2794_v36 = vshrl.u32 %v10228_v27, 16  ;;  %v2797_v44 = vshll.u32 %v10228_v27, 16  ;;  %v3269_v50 = vld [vmem:[#allocation4 + $0x8] sm:$0xe]  ;;  %v2949_v53 = vld [vmem:[#allocation4 + $0x34] sm:$0x1]  ;;  %v3892_v41 = vsel %vm10864_vm15, %v11864_v40, %v11876_v54  ;;  %v11945_v27 = vsel %vm10792_vm12, %v9767_v46, %v3350_v0 }
 0x1e4   : > { %v2941_v18 = vsel %vm10665_vm8, %v2791_v10, %v2940_v35  ;;  %v2944_v7 = vsel %vm11723_vm9, %v2792_v61, %v2943_v31  ;;  %v9760_v32 = vrot.slane %v3269_v50, 9  ;;  %v3322_v30 = vrot.slane %v11897_v20, 5  ;;  %v11906_v23 = vld [vmem:[#allocation4 + $0xc] sm:$0x1]  ;;  %v3636_v2 = vld [vmem:[#allocation4 + $0x8] sm:$0xe] }
 0x1e5   : > { %2942 = vst [vmem:[#allocation4 + $0x28] sm:$0xf] %v2941_v18  ;;  %2945 = vst [vmem:[#allocation4 + $0x2c] sm:$0x1] %v2944_v7  ;;  %v2959_v9 = vsel %vm10665_vm8, %v2815_v15, %v2958_v24  ;;  %v2962_v57 = vsel %vm11723_vm9, %v2816_v59, %v2961_v47  ;;  %v11912_v55 = vld [vmem:[#allocation4 + $0x20] sm:$0xf] }
 0x1e6   : > { %v2796_v26 = vrot.slane %v2794_v36, 7  ;;  %v11914_v6 = vld [vmem:[#allocation4 + $0x8] sm:$0xf]  ;;  %v9792_v42 = vrot.slane %v4006_v3, 9  ;;  %2960 = vst [vmem:[#allocation4 + $0x40] sm:$0xf] %v2959_v9  ;;  %v9832_v58 = vcombine.low %v11899_v13, %v11912_v55  ;;  %v3323_v34 = vsel %vm10792_vm12, %v9760_v32, %v3322_v30 }
 0x1e7   : > { %2963 = vst [vmem:[#allocation4 + $0x44] sm:$0x1] %v2962_v57  ;;  %v4059_v16 = vrot.slane %v11889_v52, 5  ;;  %v9775_v4 = vrot.slane %v3636_v2, 9  ;;  %v11921_v17 = vld [vmem:[#allocation4 + $0x1c] sm:$0x1]  ;;  %v9823_v38 = vcombine.low %v11855_v8, %v3323_v34 }
 0x1e8   : > { %v3271_v19 = vld [vmem:[#allocation4 + $0x18] sm:$0xe]  ;;  %v2799_v25 = vor.u32 %v2797_v44, %v2796_v26  ;;  %v2800_v28 = vrot.slane %v2796_v26, 4  ;;  %v11923_v35 = vld [vmem:[#allocation4 + $0x10] sm:$0xf]  ;;  %v3686_v37 = vrot.slane %v11906_v23, 5  ;;  %4279 = vrot.lane.b32.xlu1 %v9832_v58, %s10573_s9 }
 0x1e9   : > { %v11925_v31 = vld [vmem:[#allocation4 + $0x14] sm:$0x1]  ;;  %v11928_v51 = vld [vmem:[#allocation4 + $0x1c] sm:$0x1]  ;;  %v9831_v49 = vcombine.low %v11914_v6, %v11923_v35  ;;  %v4005_v24 = vld [vmem:[#allocation4 + $0x10] sm:$0xe]  ;;  %v4060_v1 = vsel %vm10792_vm12, %v9792_v42, %v4059_v16 }
 0x1ea   : > { %v4055_v47 = vrot.slane %v11925_v31, 5  ;;  %v11939_v5 = vld [vmem:[#allocation4 + $0x14] sm:$0x1]  ;;  %v11947_v39 = vld [vmem:[#allocation4 + $0x50] sm:$0xf]  ;;  %v2947_v62 = vsel %vm10665_vm8, %v2799_v25, %v2946_v12  ;;  %v2950_v10 = vsel %vm11723_vm9, %v2800_v28, %v2949_v53  ;;  %v9791_v8 = vrot.slane %v4005_v24, 9 }
 0x1eb   : > { %v3637_v61 = vld [vmem:[#allocation4 + $0x10] sm:$0xe]  ;;  %v9762_v15 = vrot.slane %v3271_v19, 9  ;;  %2948 = vst [vmem:[#allocation4 + $0x30] sm:$0xf] %v2947_v62  ;;  %4277 = vrot.lane.b32.xlu0 %v9831_v49, %s10573_s9  ;;  %v3687_v46 = vsel %vm10792_vm12, %v9775_v4, %v3686_v37  ;;  %v3690_v59 = vrot.slane %v11939_v5, 5 }
 0x1ec   : > { %v11953_v3 = vld [vmem:[#allocation4 + $0x10] sm:$0xf]  ;;  %2951 = vst [vmem:[#allocation4 + $0x34] sm:$0x1] %v2950_v10  ;;  %v9776_v0 = vrot.slane %v3637_v61, 9  ;;  %v4056_v50 = vsel %vm10792_vm12, %v9791_v8, %v4055_v47  ;;  %v3330_v53 = vrot.slane %v11921_v17, 5  ;;  %4221 = vrot.lane.b32.xlu1 %v9823_v38, %s10578_s14 }
 0x1ed   : > { %v11961_v36 = vld [vmem:[#allocation4 + $0x14] sm:$0x1]  ;;  %v3270_v44 = vld [vmem:[#allocation4 + $0x10] sm:$0xe]  ;;  %v11965_v18 = vld [vmem:[#allocation4 + $0x18] sm:$0xf]  ;;  %v9871_v30 = vcombine.low %v4056_v50, %v4060_v1 }
 0x1ee   : > { %v9761_v7 = vrot.slane %v3270_v44, 9  ;;  %v3326_v12 = vrot.slane %v11961_v36, 5  ;;  %v11969_v32 = vld [vmem:[#allocation4 + $0x24] sm:$0x1]  ;;  %v3691_v2 = vsel %vm10792_vm12, %v9776_v0, %v3690_v59  ;;  %v3638_v9 = vld [vmem:[#allocation4 + $0x18] sm:$0xe]  ;;  %v9855_v28 = vcombine.low %v11953_v3, %v11965_v18 }
 0x1ef   : > { %v3639_v57 = vld [vmem:[#allocation4 + $0x20] sm:$0xe]  ;;  %v3694_v26 = vrot.slane %v11928_v51, 5  ;;  %v3698_v42 = vrot.slane %v11969_v32, 5  ;;  %v9847_v58 = vcombine.low %v3687_v46, %v3691_v2  ;;  %v9777_v16 = vrot.slane %v3638_v9, 9  ;;  %9888 = vmatprep.mubr.msk.bf16.mxu1 %vm2228_vm3, %v9871_v30 }
 0x1f0   : > { %v3327_v34 = vsel %vm10792_vm12, %v9761_v7, %v3326_v12  ;;  %v11978_v4 = vld [vmem:[#allocation4 + $0x20] sm:$0xf]  ;;  %v11980_v19 = vld [vmem:[#allocation4 + $0x28] sm:$0xf]  ;;  %v3157_v25 = vshrl.u32 %v11947_v39, 16  ;;  %v3331_v37 = vsel %vm10792_vm12, %v9762_v15, %v3330_v53  ;;  %v9778_v49 = vrot.slane %v3639_v57, 9  ;;  %4413 = vrot.lane.b32.xlu1 %v9855_v28, %s10581_s8 }
 0x1f1   : > { %v11988_v38 = vld [vmem:[#allocation4 + $0x38] sm:$0xf]  ;;  %v11990_v24 = vld [vmem:[#allocation4 + $0x40] sm:$0xf]  ;;  %v3068_v47 = vshll.u32 %v11897_v20, 16  ;;  %4357 = vrot.lane.b32.xlu0 %v9847_v58, %s10580_s30  ;;  %v9824_v62 = vcombine.low %v3327_v34, %v3331_v37  ;;  %v3695_v10 = vsel %vm10792_vm12, %v9777_v16, %v3694_v26  ;;  %v9856_v8 = vcombine.low %v11978_v4, %v11980_v19 }
 0x1f2   : > { %v9834_v61 = vcombine.low %v11988_v38, %v11990_v24  ;;  %v3013_v15 = vld [vmem:[#allocation4 + $0x8] sm:$0xf]  ;;  %v12000_v1 = vld [vmem:[#allocation4 + $0x24] sm:$0x1]  ;;  %v12002_v46 = vld [vmem:[#allocation4 + $0x2c] sm:$0x1]  ;;  %v3699_v20 = vsel %vm10792_vm12, %v9778_v49, %v3698_v42 }
 0x1f3   : > { %v3059_v0 = vshrl.u32 %v3013_v15, 16  ;;  %v3062_v59 = vshll.u32 %v3013_v15, 16  ;;  %v3070_v44 = vrot.slane %v3068_v47, 5  ;;  %v3272_v50 = vld [vmem:[#allocation4 + $0x20] sm:$0xe]  ;;  %v9848_v7 = vcombine.low %v3695_v10, %v3699_v20 }
 0x1f4   : > { %v3273_v12 = vld [vmem:[#allocation4 + $0x28] sm:$0xe]  ;;  %v9763_v53 = vrot.slane %v3272_v50, 9  ;;  %v3334_v30 = vrot.slane %v12000_v1, 5  ;;  %v3338_v2 = vrot.slane %v12002_v46, 5  ;;  %v3441_v34 = vshrl.u32 %v11899_v13, 16 }
 0x1f5   : > { %v3061_v9 = vrot.slane %v3059_v0, 4  ;;  %v3064_v57 = vrot.slane %v3062_v59, 5  ;;  %v9764_v26 = vrot.slane %v3273_v12, 9  ;;  %v12009_v58 = vld [vmem:[#allocation4 + $0x40] sm:$0xf]  ;;  %4223 = vrot.lane.b32.xlu0 %v9824_v62, %s10578_s14  ;;  %v3444_v49 = vshll.u32 %v11899_v13, 16  ;;  %4359 = vrot.lane.b32.xlu1 %v9848_v7, %s10580_s30 }
 0x1f6   : > { %v3335_v42 = vsel %vm10792_vm12, %v9763_v53, %v3334_v30  ;;  %v9858_v16 = vcombine.low %v12009_v58, %v11829_v56  ;;  %v12017_v28 = vld [vmem:[#allocation4 + $0x30] sm:$0xf]  ;;  %v12019_v37 = vld [vmem:[#allocation4 + $0x38] sm:$0xf]  ;;  %v3450_v47 = vshll.u32 %v11928_v51, 16  ;;  %v3443_v20 = vrot.slane %v3441_v34, 4 }
 0x1f7   : > { %v3065_v10 = vor.u32 %v3064_v57, %v3061_v9  ;;  %v3339_v62 = vsel %vm10792_vm12, %v9764_v26, %v3338_v2  ;;  %v9857_v15 = vcombine.low %v12017_v28, %v12019_v37  ;;  %v3446_v56 = vrot.slane %v3444_v49, 5  ;;  %v12035_v57 = vld [vmem:[#allocation4 + $0x30] sm:$0xf]  ;;  %v3015_v48 = vld [vmem:[#allocation4 + $0x18] sm:$0xf]  ;;  %v10458_v54 = vld [vmem:[%s15038_s3 + $0x40] sm:$0xff]  }
 0x1f8   : > { %v9825_v0 = vcombine.low %v3335_v42, %v3339_v62  ;;  %v3452_v59 = vrot.slane %v3450_v47, 5  ;;  %v3455_v50 = vshrl.u32 %v11912_v55, 16  ;;  %v3458_v13 = vshll.u32 %v11912_v55, 16  ;;  %v3014_v42 = vld [vmem:[#allocation4 + $0x10] sm:$0xf] }
 0x1f9   : > { %v3066_v12 = vrot.slane %v3065_v10, 4  ;;  %v3464_v51 = vshll.u32 %v11969_v32, 16  ;;  %v3413_v7 = vshrl.u32 %v11914_v6, 16  ;;  %4415 = vrot.lane.b32.xlu0 %v9856_v8, %s10581_s8  ;;  %v3447_v53 = vor.u32 %v3446_v56, %v3443_v20  ;;  %4283 = vrot.lane.b32.xlu1 %v9834_v61, %s10573_s9  ;;  %v12048_v62 = vld [vmem:[#allocation4 + $0x28] sm:$0xf] }
 0x1fa   : > { %v3457_v30 = vrot.slane %v3455_v50, 4  ;;  %v3416_v2 = vshll.u32 %v11914_v6, 16  ;;  %v3422_v9 = vshll.u32 %v11906_v23, 16  ;;  %v3460_v55 = vrot.slane %v3458_v13, 5 }
 0x1fb   : > { %v3071_v26 = vsel %vm10864_vm15, %v3066_v12, %v3070_v44  ;;  %v3466_v34 = vrot.slane %v3464_v51, 5  ;;  %v3415_v32 = vrot.slane %v3413_v7, 4  ;;  %v3448_v6 = vrot.slane %v3447_v53, 4 }
 0x1fc   : > { %v9815_v8 = vcombine.low %v3057_v21, %v3071_v26  ;;  %v3418_v49 = vrot.slane %v3416_v2, 5  ;;  %v3424_v23 = vrot.slane %v3422_v9, 5  ;;  %v3461_v47 = vor.u32 %v3460_v55, %v3457_v30  ;;  %v10322_v50 = vpop.f32.mrf.mxu0 }
 0x1fd   : > { %v3427_v10 = vshrl.u32 %v11923_v35, 16  ;;  %v3430_v61 = vshll.u32 %v11923_v35, 16  ;;  %v3436_v44 = vshll.u32 %v11939_v5, 16  ;;  %v3453_v20 = vsel %vm10864_vm15, %v3448_v6, %v3452_v59  ;;  %4225 = vrot.lane.b32.xlu1 %v9825_v0, %s10578_s14 }
 0x1fe   : > { %4181 = vrot.lane.b32.xlu0 %v9815_v8, %s10575_s11  ;;  %v3419_v56 = vor.u32 %v3418_v49, %v3415_v32  ;;  %v9833_v22 = vcombine.low %v12048_v62, %v12035_v57  ;;  %v3073_v21 = vshrl.u32 %v3014_v42, 16  ;;  %v3462_v12 = vrot.slane %v3461_v47, 4  ;;  %v2476_v2 = vpop.f32.mrf.mxu0 }
 0x1ff   : > { %v3429_v35 = vrot.slane %v3427_v10, 4  ;;  %v3432_v13 = vrot.slane %v3430_v61, 5  ;;  %v3438_v5 = vrot.slane %v3436_v44, 5  ;;  %v2485_v51 = vadd.f32 %v10322_v50, %v11814_v63 }
 0x200   : > { %v3420_v7 = vrot.slane %v3419_v56, 4  ;;  %v3075_v53 = vrot.slane %v3073_v21, 4  ;;  %v3076_v30 = vshll.u32 %v3014_v42, 16  ;;  %v3467_v59 = vsel %vm10864_vm15, %v3462_v12, %v3466_v34  ;;  %v10323_v42 = vpop.f32.mrf.mxu0 }
 0x201   : > { %v3433_v9 = vor.u32 %v3432_v13, %v3429_v35  ;;  %v3082_v26 = vshll.u32 %v11961_v36, 16  ;;  %v3087_v55 = vshrl.u32 %v3015_v48, 16  ;;  %2517 = vst.msk [vmem:[#allocation3 + $0x50] sm:$0xff] %vm2228_vm3, %v2485_v51  ;;  %v2477_v0 = vadd.f32 %v11814_v63, %v2476_v2  ;;  %4417 = vrot.lane.b32.xlu1 %v9857_v15, %s10581_s8  ;;  %v12077_v35 = vld [vmem:[#allocation4 + $0x3c] sm:$0x1] }
 0x202   : > { %4419 = vrot.lane.b32.xlu0 %v9858_v16, %s10581_s8  ;;  %v9840_v32 = vcombine.low %v3453_v20, %v3467_v59  ;;  %v3425_v8 = vsel %vm10864_vm15, %v3420_v7, %v3424_v23  ;;  %v3078_v6 = vrot.slane %v3076_v30, 5  ;;  %v3090_v10 = vshll.u32 %v3015_v48, 16  ;;  %v2479_v20 = vpop.f32.mrf.mxu0  ;;  %v3642_v13 = vld [vmem:[#allocation4 + $0x38] sm:$0xe]  ;;  %v12088_v2 = vld [vmem:[#allocation4 + $0x44] sm:$0x1] }
 0x203   : > { %v3434_v49 = vrot.slane %v3433_v9, 4  ;;  %v3084_v34 = vrot.slane %v3082_v26, 5  ;;  %v3089_v47 = vrot.slane %v3087_v55, 4  ;;  %2515 = vst.msk [vmem:[#allocation3 + $0x40] sm:$0xff] %vm2228_vm3, %v2477_v0  ;;  %v2488_v36 = vadd.f32 %v10323_v42, %v11814_v63  ;;  %v3643_v59 = vld [vmem:[#allocation4 + $0x40] sm:$0xe] }
 0x204   : > { %v3079_v61 = vor.u32 %v3078_v6, %v3075_v53  ;;  %v3096_v44 = vshll.u32 %v11921_v17, 16  ;;  %v3782_v16 = vshrl.u32 %v11953_v3, 16  ;;  %v3092_v56 = vrot.slane %v3090_v10, 5 }
 0x205   : > { %v3439_v23 = vsel %vm10864_vm15, %v3434_v49, %v3438_v5  ;;  %v3785_v15 = vshll.u32 %v11953_v3, 16  ;;  %v3791_v21 = vshll.u32 %v11925_v31, 16  ;;  %2518 = vst.msk [vmem:[#allocation3 + $0x58] sm:$0xff] %vm2228_vm3, %v2488_v36  ;;  %v2480_v48 = vadd.f32 %v11814_v63, %v2479_v20  ;;  %v3640_v49 = vld [vmem:[#allocation4 + $0x28] sm:$0xe] }
 0x206   : > { %4319 = vrot.lane.b32.xlu0 %v9840_v32, %s10576_s12  ;;  %v9839_v50 = vcombine.low %v3425_v8, %v3439_v23  ;;  %v3080_v12 = vrot.slane %v3079_v61, 4  ;;  %v3098_v17 = vrot.slane %v3096_v44, 5  ;;  %v3093_v51 = vor.u32 %v3092_v56, %v3089_v47  ;;  %v12091_v8 = vld [vmem:[#allocation4 + $0x2c] sm:$0x1]  ;;  %v3641_v56 = vld [vmem:[#allocation4 + $0x30] sm:$0xe] }
 0x207   : > { %v3784_v7 = vrot.slane %v3782_v16, 4  ;;  %v3787_v5 = vrot.slane %v3785_v15, 5  ;;  %v12079_v53 = vrot.slane %v3791_v21, 5  ;;  %2516 = vst.msk [vmem:[#allocation3 + $0x48] sm:$0xff] %vm2228_vm3, %v2480_v48  ;;  %v3796_v31 = vshrl.u32 %v11965_v18, 16 }
 0x208   : > { %4317 = vrot.lane.b32.xlu1 %v9839_v50, %s10576_s12  ;;  %v3085_v63 = vsel %vm10864_vm15, %v3080_v12, %v3084_v34  ;;  %v3799_v3 = vshll.u32 %v11965_v18, 16  ;;  %v3805_v30 = vshll.u32 %v11889_v52, 16  ;;  %v2667_v9 = vld [vmem:[#allocation3 + $0x50] sm:$0xff]  ;;  %v3094_v26 = vrot.slane %v3093_v51, 4 }
 0x209   : > { %v3788_v55 = vor.u32 %v3787_v5, %v3784_v7  ;;  %v9781_v0 = vrot.slane %v3642_v13, 9  ;;  %v3710_v32 = vrot.slane %v12077_v35, 5  ;;  %v2683_v6 = vmax.f32 %v2667_v9, 0.0  ;;  %v12107_v7 = vld [vmem:[#allocation4 + $0x34] sm:$0x1]  ;;  %v10449_v5 = vld [vmem:[%s15038_s3 + $0x38] sm:$0xff]  }
 0x20a   : > { %4281 = vrot.lane.b32.xlu0 %v9833_v22, %s10573_s9  ;;  %v3798_v18 = vrot.slane %v3796_v31, 4  ;;  %v3801_v42 = vrot.slane %v3799_v3, 5  ;;  %v3807_v52 = vrot.slane %v3805_v30, 5  ;;  %v2665_v34 = vld [vmem:[#allocation3 + $0x40] sm:$0xff]  ;;  %v3099_v47 = vsel %vm10864_vm15, %v3094_v26, %v3098_v17  ;;  %4721 = vmatpush1.bf16.msra.mxu1 %v10449_v5 }
 0x20b   : > { %v3789_v10 = vrot.slane %v3788_v55, 4  ;;  %v3711_v36 = vsel %vm10792_vm12, %v9781_v0, %v3710_v32  ;;  %v9782_v61 = vrot.slane %v3643_v59, 9  ;;  %v10233_v44 = vpack.c.bf16 %v2683_v6, %v2683_v6  ;;  %v2976_v0 = vld [vmem:[#allocation4 + $0x68] sm:$0xf]  ;;  %v2979_v32 = vld [vmem:[#allocation4 + $0x6c] sm:$0x1] }
 0x20c   : > { %v2681_v16 = vmax.f32 %v2665_v34, 0.0  ;;  %v9816_v20 = vcombine.low %v3085_v63, %v3099_v47  ;;  %v3802_v23 = vor.u32 %v3801_v42, %v3798_v18  ;;  %v2668_v15 = vld [vmem:[#allocation3 + $0x58] sm:$0xff]  ;;  %v3714_v21 = vrot.slane %v12088_v2, 5 }
 0x20d   : > { %v3794_v22 = vsel %vm10864_vm15, %v3789_v10, %v12079_v53  ;;  %v9779_v48 = vrot.slane %v3640_v49, 9  ;;  %v3702_v50 = vrot.slane %v12091_v8, 5  ;;  %v2834_v12 = vshrl.u32 %v10233_v44, 16 }
 0x20e   : > { %v2837_v17 = vshll.u32 %v10233_v44, 16  ;;  %v10231_v13 = vpack.c.bf16 %v2681_v16, %v2681_v16  ;;  %v2684_v51 = vmax.f32 %v2668_v15, 0.0  ;;  %4183 = vrot.lane.b32.xlu1 %v9816_v20, %s10575_s11  ;;  %v2666_v63 = vld [vmem:[#allocation3 + $0x48] sm:$0xff]  ;;  %v3803_v31 = vrot.slane %v3802_v23, 4  ;;  %v2964_v16 = vld [vmem:[#allocation4 + $0x58] sm:$0xf] }
 0x20f   : > { %v3715_v53 = vsel %vm10792_vm12, %v9782_v61, %v3714_v21  ;;  %v12116_v3 = vsel %vm10792_vm12, %v9779_v48, %v3702_v50  ;;  %v9780_v30 = vrot.slane %v3641_v56, 9  ;;  %v2836_v59 = vrot.slane %v2834_v12, 7  ;;  %v2967_v20 = vld [vmem:[#allocation4 + $0x5c] sm:$0x1]  ;;  %v2982_v12 = vld [vmem:[#allocation4 + $0x70] sm:$0xf] }
 0x210   : > { %v2818_v9 = vshrl.u32 %v10231_v13, 16  ;;  %v2821_v26 = vshll.u32 %v10231_v13, 16  ;;  %v10234_v55 = vpack.c.bf16 %v2684_v51, %v2684_v51  ;;  %v2682_v6 = vmax.f32 %v2666_v63, 0.0  ;;  %v2985_v51 = vld [vmem:[#allocation4 + $0x74] sm:$0x1] }
 0x211   : > { %v3808_v18 = vsel %vm10864_vm15, %v3803_v31, %v3807_v52  ;;  %v9850_v42 = vcombine.low %v3711_v36, %v3715_v53  ;;  %v3706_v49 = vrot.slane %v12107_v7, 5  ;;  %v15103_v34 = vmov 0  }
 0x212   : > { %4722 = vmatprep.subr.bf16.mxu1 %v15103_v34  ;;  %v2839_v47 = vor.u32 %v2837_v17, %v2836_v59  ;;  %v2840_v10 = vrot.slane %v2836_v59, 4  ;;  %v2820_v61 = vrot.slane %v2818_v9, 7  ;;  %v2842_v44 = vshrl.u32 %v10234_v55, 16  ;;  %v3767_v17 = vld [vmem:[#allocation4 + $0x24] sm:$0x1] }
 0x213   : > { %v2845_v23 = vshll.u32 %v10234_v55, 16  ;;  %v10232_v56 = vpack.c.bf16 %v2682_v6, %v2682_v6  ;;  %v9863_v15 = vcombine.low %v3794_v22, %v3808_v18  ;;  %4363 = vrot.lane.b32.xlu1 %v9850_v42, %s10580_s30  ;;  %v3707_v21 = vsel %vm10792_vm12, %v9780_v30, %v3706_v49  ;;  %v2970_v30 = vld [vmem:[#allocation4 + $0x60] sm:$0xf]  ;;  %v2973_v59 = vld [vmem:[#allocation4 + $0x64] sm:$0x1] }
 0x214   : > { %v2977_v52 = vsel %vm10665_vm8, %v2839_v47, %v2976_v0  ;;  %v2980_v36 = vsel %vm11723_vm9, %v2840_v10, %v2979_v32  ;;  %v2823_v48 = vor.u32 %v2821_v26, %v2820_v61  ;;  %v2824_v50 = vrot.slane %v2820_v61, 4  ;;  %v3768_v9 = vld [vmem:[#allocation4 + $0x2c] sm:$0x1]  ;;  %v3274_v42 = vld [vmem:[#allocation4 + $0x30] sm:$0xe] }
 0x215   : > { %2978 = vst [vmem:[#allocation4 + $0x68] sm:$0xf] %v2977_v52  ;;  %2981 = vst [vmem:[#allocation4 + $0x6c] sm:$0x1] %v2980_v36  ;;  %v2844_v13 = vrot.slane %v2842_v44, 7  ;;  %v2826_v22 = vshrl.u32 %v10232_v56, 16  ;;  %4453 = vrot.lane.b32.xlu0 %v9863_v15, %s10582_s15  ;;  %v9849_v63 = vcombine.low %v12116_v3, %v3707_v21 }
 0x216   : > { %v2829_v5 = vshll.u32 %v10232_v56, 16  ;;  %v2965_v31 = vsel %vm10665_vm8, %v2823_v48, %v2964_v16  ;;  %v2968_v53 = vsel %vm11723_vm9, %v2824_v50, %v2967_v20  ;;  %v3810_v26 = vshrl.u32 %v11978_v4, 16  ;;  %v12137_v3 = vld [vmem:[#allocation4 + $0x34] sm:$0x1]  ;;  %v12149_v56 = vld [vmem:[#allocation4 + $0x3c] sm:$0x1] }
 0x217   : > { %v3813_v55 = vshll.u32 %v11978_v4, 16  ;;  %2966 = vst [vmem:[#allocation4 + $0x58] sm:$0xf] %v2965_v31  ;;  %2969 = vst [vmem:[#allocation4 + $0x5c] sm:$0x1] %v2968_v53  ;;  %v2847_v0 = vor.u32 %v2845_v23, %v2844_v13  ;;  %v2848_v32 = vrot.slane %v2844_v13, 4 }
 0x218   : > { %v2828_v6 = vrot.slane %v2826_v22, 7  ;;  %v3819_v18 = vshll.u32 %v3767_v17, 16  ;;  %v3812_v49 = vrot.slane %v3810_v26, 4  ;;  %v3824_v10 = vshrl.u32 %v11980_v19, 16  ;;  %v10451_v44 = vld [vmem:[%s15038_s3 + $0x30] sm:$0xff]   ;;  %v10452_v50 = vld [vmem:[%s15038_s3 + $0x28] sm:$0xff]  }
 0x219   : > { %v3815_v47 = vrot.slane %v3813_v55, 5  ;;  %v3827_v61 = vshll.u32 %v11980_v19, 16  ;;  %v2983_v4 = vsel %vm10665_vm8, %v2847_v0, %v2982_v12  ;;  %v2986_v16 = vsel %vm11723_vm9, %v2848_v32, %v2985_v51  ;;  %4361 = vrot.lane.b32.xlu0 %v9849_v63, %s10580_s30  ;;  %v3275_v15 = vld [vmem:[#allocation4 + $0x38] sm:$0xe]  ;;  %v3016_v48 = vld [vmem:[#allocation4 + $0x20] sm:$0xf]  ;;  %4723 = vmatpush1.bf16.msra.mxu1 %v10451_v44 }
 0x21a   : > { %v2831_v20 = vor.u32 %v2829_v5, %v2828_v6  ;;  %v2832_v23 = vrot.slane %v2828_v6, 4  ;;  %2984 = vst [vmem:[#allocation4 + $0x70] sm:$0xf] %v2983_v4  ;;  %2987 = vst [vmem:[#allocation4 + $0x74] sm:$0x1] %v2986_v16  ;;  %v3821_v21 = vrot.slane %v3819_v18, 5  ;;  %4724 = vmatprep.subr.bf16.mxu1 %v15103_v34 }
 0x21b   : > { %v3816_v19 = vor.u32 %v3815_v47, %v3812_v49  ;;  %v3826_v52 = vrot.slane %v3824_v10, 4  ;;  %v3829_v36 = vrot.slane %v3827_v61, 5  ;;  %v3833_v13 = vshll.u32 %v3768_v9, 16  ;;  %v3017_v53 = vld [vmem:[#allocation4 + $0x28] sm:$0xf]  ;;  %v10453_v18 = vld [vmem:[%s15038_s3 + $0x20] sm:$0xff]  }
 0x21c   : > { %v2971_v12 = vsel %vm10665_vm8, %v2831_v20, %v2970_v30  ;;  %v2974_v17 = vsel %vm11723_vm9, %v2832_v23, %v2973_v59  ;;  %v9765_v51 = vrot.slane %v3274_v42, 9  ;;  %v3342_v63 = vrot.slane %v12137_v3, 5 }
 0x21d   : > { %2972 = vst [vmem:[#allocation4 + $0x60] sm:$0xf] %v2971_v12  ;;  %2975 = vst [vmem:[#allocation4 + $0x64] sm:$0x1] %v2974_v17  ;;  %v3817_v22 = vrot.slane %v3816_v19, 4  ;;  %v3830_v5 = vor.u32 %v3829_v36, %v3826_v52  ;;  %v9766_v31 = vrot.slane %v3275_v15, 9  ;;  %4725 = vmatpush1.bf16.msra.mxu1 %v10452_v50 }
 0x21e   : > { %v3835_v26 = vrot.slane %v3833_v13, 5  ;;  %v3346_v55 = vrot.slane %v12149_v56, 5  ;;  %v3101_v0 = vshrl.u32 %v3016_v48, 16  ;;  %v3104_v30 = vshll.u32 %v3016_v48, 16  ;;  %4726 = vmatprep.subr.bf16.mxu1 %v15103_v34  ;;  %v12175_v19 = vld [vmem:[#allocation4 + $0x68] sm:$0xf] }
 0x21f   : > { %v3822_v59 = vsel %vm10864_vm15, %v3817_v22, %v3821_v21  ;;  %v3831_v9 = vrot.slane %v3830_v5, 4  ;;  %v3343_v32 = vsel %vm10792_vm12, %v9765_v51, %v3342_v63  ;;  %v3110_v6 = vshll.u32 %v12000_v1, 16  ;;  %v10454_v12 = vld [vmem:[%s15038_s3 + $0x18] sm:$0xff]   ;;  %v3771_v22 = vld [vmem:[#allocation4 + $0x44] sm:$0x1] }
 0x220   : > { %v3347_v42 = vsel %vm10792_vm12, %v9766_v31, %v3346_v55  ;;  %v3103_v49 = vrot.slane %v3101_v0, 4  ;;  %v3106_v47 = vrot.slane %v3104_v30, 5  ;;  %v3115_v10 = vshrl.u32 %v3017_v53, 16 }
 0x221   : > { %v3836_v61 = vsel %vm10864_vm15, %v3831_v9, %v3835_v26  ;;  %v9826_v44 = vcombine.low %v3343_v32, %v3347_v42  ;;  %v3112_v4 = vrot.slane %v3110_v6, 5  ;;  %v3118_v16 = vshll.u32 %v3017_v53, 16  ;;  %v12177_v21 = vld [vmem:[#allocation4 + $0x70] sm:$0xf]  ;;  %4727 = vmatpush1.bf16.msra.mxu1 %v10453_v18  ;;  %v3277_v18 = vld [vmem:[#allocation4 + $0x58] sm:$0xe] }
 0x222   : > { %v9864_v1 = vcombine.low %v3822_v59, %v3836_v61  ;;  %v3107_v20 = vor.u32 %v3106_v47, %v3103_v49  ;;  %v3117_v23 = vrot.slane %v3115_v10, 4  ;;  %v3124_v15 = vshll.u32 %v12002_v46, 16  ;;  %4728 = vmatprep.subr.bf16.mxu1 %v15103_v34  ;;  %v12207_v10 = vld [vmem:[#allocation4 + $0x5c] sm:$0x1] }
 0x223   : > { %4227 = vrot.lane.b32.xlu0 %v9826_v44, %s10578_s14  ;;  %v3120_v52 = vrot.slane %v3118_v16, 5  ;;  %v9836_v36 = vcombine.low %v12175_v19, %v12177_v21  ;;  %v3497_v48 = vshrl.u32 %v11988_v38, 16  ;;  %v3500_v50 = vshll.u32 %v11988_v38, 16 }
 0x224   : > { %4455 = vrot.lane.b32.xlu1 %v9864_v1, %s10582_s15  ;;  %v3108_v46 = vrot.slane %v3107_v20, 4  ;;  %v3126_v17 = vrot.slane %v3124_v15, 5  ;;  %v3506_v13 = vshll.u32 %v12077_v35, 16  ;;  %v3511_v51 = vshrl.u32 %v11990_v24, 16  ;;  %v12192_v53 = vld [vmem:[#allocation4 + $0x60] sm:$0xf] }
 0x225   : > { %v3121_v5 = vor.u32 %v3120_v52, %v3117_v23  ;;  %v3499_v63 = vrot.slane %v3497_v48, 4  ;;  %v3502_v31 = vrot.slane %v3500_v50, 5  ;;  %v3514_v38 = vshll.u32 %v11990_v24, 16  ;;  %v12197_v35 = vld [vmem:[#allocation4 + $0x58] sm:$0xf]  ;;  %4729 = vmatpush1.bf16.msra.mxu1 %v10454_v12  ;;  %v10455_v24 = vld [vmem:[%s15038_s3 + $0x10] sm:$0xff]  }
 0x226   : > { %v3113_v26 = vsel %vm10864_vm15, %v3108_v46, %v3112_v4  ;;  %v3508_v55 = vrot.slane %v3506_v13, 5  ;;  %v3513_v0 = vrot.slane %v3511_v51, 4  ;;  %v3520_v30 = vshll.u32 %v12088_v2, 16  ;;  %4730 = vmatprep.subr.bf16.mxu1 %v15103_v34  ;;  %v3769_v1 = vld [vmem:[#allocation4 + $0x34] sm:$0x1]  ;;  %v10456_v12 = vld [vmem:[%s15038_s3 + $0x8] sm:$0xff]  }
 0x227   : > { %v3122_v59 = vrot.slane %v3121_v5, 4  ;;  %v3503_v9 = vor.u32 %v3502_v31, %v3499_v63  ;;  %v3516_v32 = vrot.slane %v3514_v38, 5  ;;  %v3866_v6 = vshrl.u32 %v12009_v58, 16 }
 0x228   : > { %4287 = vrot.lane.b32.xlu1 %v9836_v36, %s10573_s9  ;;  %v3522_v42 = vrot.slane %v3520_v30, 5  ;;  %v3869_v49 = vshll.u32 %v12009_v58, 16  ;;  %v3875_v47 = vshll.u32 %v3771_v22, 16  ;;  %v9835_v2 = vcombine.low %v12197_v35, %v12192_v53 }
 0x229   : > { %v3127_v61 = vsel %vm10864_vm15, %v3122_v59, %v3126_v17  ;;  %v3504_v44 = vrot.slane %v3503_v9, 4  ;;  %v3517_v4 = vor.u32 %v3516_v32, %v3513_v0  ;;  %v3868_v16 = vrot.slane %v3866_v6, 4  ;;  %4731 = vmatpush1.bf16.msra.mxu1 %v10455_v24  ;;  %v3770_v17 = vld [vmem:[#allocation4 + $0x3c] sm:$0x1]  ;;  %v10457_v0 = vld [vmem:[%s15038_s3] sm:$0xff]  }
 0x22a   : > { %v9817_v20 = vcombine.low %v3113_v26, %v3127_v61  ;;  %v3871_v23 = vrot.slane %v3869_v49, 5  ;;  %v3877_v15 = vrot.slane %v3875_v47, 5  ;;  %v9768_v52 = vrot.slane %v3277_v18, 9  ;;  %4732 = vmatprep.subr.bf16.mxu1 %v15103_v34  ;;  %v12230_v26 = vld [vmem:[#allocation4 + $0x60] sm:$0xf] }
 0x22b   : > { %v3509_v58 = vsel %vm10864_vm15, %v3504_v44, %v3508_v55  ;;  %v3518_v36 = vrot.slane %v3517_v4, 4  ;;  %v3354_v48 = vrot.slane %v12207_v10, 5  ;;  %v3838_v50 = vshrl.u32 %v12017_v28, 16  ;;  %v12232_v55 = vld [vmem:[#allocation4 + $0x68] sm:$0xf] }
 0x22c   : > { %4185 = vrot.lane.b32.xlu0 %v9817_v20, %s10575_s11  ;;  %v3872_v46 = vor.u32 %v3871_v23, %v3868_v16  ;;  %v3841_v13 = vshll.u32 %v12017_v28, 16  ;;  %v3847_v51 = vshll.u32 %v3769_v1, 16  ;;  %v3852_v22 = vshrl.u32 %v12019_v37, 16  ;;  %v3644_v28 = vld [vmem:[#allocation4 + $0x58] sm:$0xe]  ;;  %v10326_v61 = vpop.f32.mrf.mxu0 }
 0x22d   : > { %v3523_v5 = vsel %vm10864_vm15, %v3518_v36, %v3522_v42  ;;  %v12227_v63 = vsel %vm10792_vm12, %v9768_v52, %v3354_v48  ;;  %v3840_v31 = vrot.slane %v3838_v50, 4  ;;  %v3855_v38 = vshll.u32 %v12019_v37, 16  ;;  %v12239_v6 = vld [vmem:[#allocation4 + $0x5c] sm:$0x1]  ;;  %v12241_v18 = vld [vmem:[#allocation4 + $0x64] sm:$0x1]  ;;  %4733 = vmatpush1.bf16.msra.mxu1 %v10456_v12 }
 0x22e   : > { %v9842_v30 = vcombine.low %v3509_v58, %v3523_v5  ;;  %v3873_v59 = vrot.slane %v3872_v46, 4  ;;  %v9827_v9 = vcombine.low %v11945_v27, %v12227_v63  ;;  %v3843_v32 = vrot.slane %v3841_v13, 5  ;;  %v3645_v47 = vld [vmem:[#allocation4 + $0x60] sm:$0xe]  ;;  %4734 = vmatprep.subr.bf16.mxu1 %v15103_v34  ;;  %v10530_v1 = vld [vmem:[%s15037_s2] ss:$0 sm:$0xff]  ;;  %v2492_v58 = vpop.f32.mrf.mxu0 }
 0x22f   : > { %v3849_v37 = vrot.slane %v3847_v51, 5  ;;  %v3854_v24 = vrot.slane %v3852_v22, 4  ;;  %v3857_v42 = vrot.slane %v3855_v38, 5  ;;  %v3861_v49 = vshll.u32 %v3770_v17, 16  ;;  %v3278_v63 = vld [vmem:[#allocation4 + $0x60] sm:$0xe] }
 0x230   : > { %4323 = vrot.lane.b32.xlu0 %v9842_v30, %s10576_s12  ;;  %v3878_v44 = vsel %vm10864_vm15, %v3873_v59, %v3877_v15  ;;  %v3844_v4 = vor.u32 %v3843_v32, %v3840_v31  ;;  %v9859_v27 = vcombine.low %v12230_v26, %v12232_v55  ;;  %v9783_v16 = vrot.slane %v3644_v28, 9  ;;  %v3018_v31 = vld [vmem:[#allocation4 + $0x30] sm:$0xf]  ;;  %v12281_v30 = vld [vmem:[#allocation4 + $0x64] sm:$0x1] }
 0x231   : > { %v2501_v20 = vadd.f32 %v10530_v1, %v10326_v61  ;;  %v9866_v23 = vcombine.low %v3878_v44, %v3892_v41  ;;  %v3858_v52 = vor.u32 %v3857_v42, %v3854_v24  ;;  %v3863_v15 = vrot.slane %v3861_v49, 5  ;;  %4735 = vmatpush1.bf16.msra.mxu1 %v10457_v0  ;;  %v10327_v41 = vpop.f32.mrf.mxu0  ;;  %v3279_v59 = vld [vmem:[#allocation4 + $0x68] sm:$0xe]  ;;  %v12286_v49 = vld [vmem:[#allocation4 + $0x6c] sm:$0x1] }
 0x232   : > { %v3845_v36 = vrot.slane %v3844_v4, 4  ;;  %v3718_v48 = vrot.slane %v12239_v6, 5  ;;  %v9784_v50 = vrot.slane %v3645_v47, 9  ;;  %v3722_v12 = vrot.slane %v12241_v18, 5  ;;  %4750 = vmatprep.subr.bf16.mxu1 %v15103_v34 }
 0x233   : > { %2521 = vst.msk [vmem:[#allocation3 + $0x70] sm:$0xff] %vm2228_vm3, %v2501_v20  ;;  %v2493_v46 = vadd.f32 %v10530_v1, %v2492_v58  ;;  %4459 = vrot.lane.b32.xlu1 %v9866_v23, %s10582_s15  ;;  %v3859_v17 = vrot.slane %v3858_v52, 4  ;;  %v3469_v13 = vshrl.u32 %v12048_v62, 16  ;;  %v3472_v40 = vshll.u32 %v12048_v62, 16  ;;  %v2495_v32 = vpop.f32.mrf.mxu0 }
 0x234   : > { %4285 = vrot.lane.b32.xlu0 %v9835_v2, %s10573_s9  ;;  %v3850_v51 = vsel %vm10864_vm15, %v3845_v36, %v3849_v37  ;;  %v3719_v22 = vsel %vm10792_vm12, %v9783_v16, %v3718_v48  ;;  %v3723_v62 = vsel %vm10792_vm12, %v9784_v50, %v3722_v12  ;;  %v3478_v5 = vshll.u32 %v12091_v8, 16  ;;  %v3019_v48 = vld [vmem:[#allocation4 + $0x38] sm:$0xf] }
 0x235   : > { %2519 = vst.msk [vmem:[#allocation3 + $0x60] sm:$0xff] %vm2228_vm3, %v2493_v46  ;;  %v2504_v38 = vadd.f32 %v10530_v1, %v10327_v41  ;;  %v3864_v2 = vsel %vm10864_vm15, %v3859_v17, %v3863_v15  ;;  %v9851_v28 = vcombine.low %v3719_v22, %v3723_v62  ;;  %v3471_v0 = vrot.slane %v3469_v13, 4  ;;  %4751 = vmatpush2.bf16.msra.mxu1 %v10458_v54  ;;  %v12305_v54 = vld [vmem:[#allocation4 + $0x68] sm:$0xe] }
 0x236   : > { %v9865_v37 = vcombine.low %v3850_v51, %v3864_v2  ;;  %v3474_v24 = vrot.slane %v3472_v40, 5  ;;  %v12283_v42 = vrot.slane %v3478_v5, 5  ;;  %v3483_v8 = vshrl.u32 %v12035_v57, 16 }
 0x237   : > { %2522 = vst.msk [vmem:[#allocation3 + $0x78] sm:$0xff] %vm2228_vm3, %v2504_v38  ;;  %v2496_v47 = vadd.f32 %v10530_v1, %v2495_v32  ;;  %4229 = vrot.lane.b32.xlu1 %v9827_v9, %s10578_s14  ;;  %v3486_v61 = vshll.u32 %v12035_v57, 16  ;;  %v3492_v44 = vshll.u32 %v12107_v7, 16  ;;  %v9769_v4 = vrot.slane %v3278_v63, 9 }
 0x238   : > { %4457 = vrot.lane.b32.xlu0 %v9865_v37, %s10582_s15  ;;  %v3475_v16 = vor.u32 %v3474_v24, %v3471_v0  ;;  %v3485_v20 = vrot.slane %v3483_v8, 4  ;;  %v3358_v23 = vrot.slane %v12281_v30, 5  ;;  %v9770_v52 = vrot.slane %v3279_v59, 9 }
 0x239   : > { %2520 = vst.msk [vmem:[#allocation3 + $0x68] sm:$0xff] %vm2228_vm3, %v2496_v47  ;;  %v3488_v15 = vrot.slane %v3486_v61, 5  ;;  %v3494_v58 = vrot.slane %v3492_v44, 5  ;;  %v3362_v1 = vrot.slane %v12286_v49, 5  ;;  %v3129_v9 = vshrl.u32 %v3018_v31, 16 }
 0x23a   : > { %v2671_v36 = vld [vmem:[#allocation3 + $0x70] sm:$0xff]  ;;  %v3476_v57 = vrot.slane %v3475_v16, 4  ;;  %v3359_v7 = vsel %vm10792_vm12, %v9769_v4, %v3358_v23  ;;  %v3132_v50 = vshll.u32 %v3018_v31, 16  ;;  %v3138_v12 = vshll.u32 %v12137_v3, 16 }
 0x23b   : > { %v2687_v46 = vmax.f32 %v2671_v36, 0.0  ;;  %4421 = vrot.lane.b32.xlu1 %v9859_v27, %s10581_s8  ;;  %v3489_v17 = vor.u32 %v3488_v15, %v3485_v20  ;;  %v3363_v13 = vsel %vm10792_vm12, %v9770_v52, %v3362_v1  ;;  %v3131_v40 = vrot.slane %v3129_v9, 4  ;;  %v3000_v20 = vld [vmem:[#allocation4 + $0x88] sm:$0xf]  ;;  %v3003_v15 = vld [vmem:[#allocation4 + $0x8c] sm:$0x1] }
 0x23c   : > { %v2669_v41 = vld [vmem:[#allocation3 + $0x60] sm:$0xff]  ;;  %4365 = vrot.lane.b32.xlu0 %v9851_v28, %s10580_s30  ;;  %v3481_v3 = vsel %vm10864_vm15, %v3476_v57, %v12283_v42  ;;  %v9828_v51 = vcombine.low %v3359_v7, %v3363_v13  ;;  %v3134_v22 = vrot.slane %v3132_v50, 5  ;;  %v3140_v62 = vrot.slane %v3138_v12, 5  ;;  %v2988_v1 = vld [vmem:[#allocation4 + $0x78] sm:$0xf] }
 0x23d   : > { %v10237_v5 = vpack.c.bf16 %v2687_v46, %v2687_v46  ;;  %v2685_v63 = vmax.f32 %v2669_v41, 0.0  ;;  %v3490_v27 = vrot.slane %v3489_v17, 4  ;;  %v3143_v31 = vshrl.u32 %v3019_v48, 16  ;;  %v2991_v12 = vld [vmem:[#allocation4 + $0x7c] sm:$0x1] }
 0x23e   : > { %v2672_v38 = vld [vmem:[#allocation3 + $0x78] sm:$0xff]  ;;  %v3135_v2 = vor.u32 %v3134_v22, %v3131_v40  ;;  %v3146_v0 = vshll.u32 %v3019_v48, 16  ;;  %v3152_v59 = vshll.u32 %v12149_v56, 16  ;;  %v9785_v32 = vrot.slane %v12305_v54, 9 }
 0x23f   : > { %v2866_v37 = vshrl.u32 %v10237_v5, 16  ;;  %v2869_v28 = vshll.u32 %v10237_v5, 16  ;;  %v10235_v24 = vpack.c.bf16 %v2685_v63, %v2685_v63  ;;  %v2688_v8 = vmax.f32 %v2672_v38, 0.0  ;;  %v3006_v63 = vld [vmem:[#allocation4 + $0x90] sm:$0xf] }
 0x240   : > { %v2670_v47 = vld [vmem:[#allocation3 + $0x68] sm:$0xff]  ;;  %v3495_v42 = vsel %vm10864_vm15, %v3490_v27, %v3494_v58  ;;  %4231 = vrot.lane.b32.xlu0 %v9828_v51, %s10578_s14  ;;  %v3136_v61 = vrot.slane %v3135_v2, 4  ;;  %v3145_v44 = vrot.slane %v3143_v31, 4  ;;  %v3148_v4 = vrot.slane %v3146_v0, 5  ;;  %v3009_v27 = vld [vmem:[#allocation4 + $0x94] sm:$0x1] }
 0x241   : > { %v2868_v16 = vrot.slane %v2866_v37, 7  ;;  %v2850_v23 = vshrl.u32 %v10235_v24, 16  ;;  %v2853_v52 = vshll.u32 %v10235_v24, 16  ;;  %v10238_v56 = vpack.c.bf16 %v2688_v8, %v2688_v8  ;;  %v12319_v51 = vld [vmem:[#allocation4 + $0x6c] sm:$0x1] }
 0x242   : > { %v2686_v9 = vmax.f32 %v2670_v47, 0.0  ;;  %v9841_v36 = vcombine.low %v3481_v3, %v3495_v42  ;;  %v3141_v57 = vsel %vm10864_vm15, %v3136_v61, %v3140_v62  ;;  %v3149_v7 = vor.u32 %v3148_v4, %v3145_v44  ;;  %v12325_v31 = vld [vmem:[#allocation4 + $0x74] sm:$0x1]  ;;  %v3647_v38 = vld [vmem:[#allocation4 + $0x70] sm:$0xe] }
 0x243   : > { %v2871_v48 = vor.u32 %v2869_v28, %v2868_v16  ;;  %v2872_v58 = vrot.slane %v2868_v16, 4  ;;  %v2852_v50 = vrot.slane %v2850_v23, 7  ;;  %v2874_v46 = vshrl.u32 %v10238_v56, 16  ;;  %v3280_v28 = vld [vmem:[#allocation4 + $0x70] sm:$0xe] }
 0x244   : > { %v2877_v17 = vshll.u32 %v10238_v56, 16  ;;  %v10236_v13 = vpack.c.bf16 %v2686_v9, %v2686_v9  ;;  %4321 = vrot.lane.b32.xlu1 %v9841_v36, %s10576_s12  ;;  %v3150_v40 = vrot.slane %v3149_v7, 4  ;;  %v3154_v41 = vrot.slane %v3152_v59, 5  ;;  %v2994_v47 = vld [vmem:[#allocation4 + $0x80] sm:$0xf] }
 0x245   : > { %v3001_v3 = vsel %vm10665_vm8, %v2871_v48, %v3000_v20  ;;  %v3004_v22 = vsel %vm11723_vm9, %v2872_v58, %v3003_v15  ;;  %v2855_v62 = vor.u32 %v2853_v52, %v2852_v50  ;;  %v2856_v5 = vrot.slane %v2852_v50, 4  ;;  %v2997_v42 = vld [vmem:[#allocation4 + $0x84] sm:$0x1]  ;;  %v12334_v52 = vld [vmem:[#allocation4 + $0x74] sm:$0x1] }
 0x246   : > { %3002 = vst [vmem:[#allocation4 + $0x88] sm:$0xf] %v3001_v3  ;;  %3005 = vst [vmem:[#allocation4 + $0x8c] sm:$0x1] %v3004_v22  ;;  %v2876_v2 = vrot.slane %v2874_v46, 7  ;;  %v2858_v0 = vshrl.u32 %v10236_v13, 16  ;;  %v3155_v37 = vsel %vm10864_vm15, %v3150_v40, %v3154_v41 }
 0x247   : > { %v2861_v59 = vshll.u32 %v10236_v13, 16  ;;  %v2989_v24 = vsel %vm10665_vm8, %v2855_v62, %v2988_v1  ;;  %v2992_v8 = vsel %vm11723_vm9, %v2856_v5, %v2991_v12  ;;  %v9818_v61 = vcombine.low %v3141_v57, %v3155_v37  ;;  %v12346_v36 = vld [vmem:[#allocation4 + $0x58] sm:$0xf]  ;;  %v12357_v58 = vld [vmem:[#allocation4 + $0x50] sm:$0xf] }
 0x248   : > { %v3726_v44 = vrot.slane %v12319_v51, 5  ;;  %2990 = vst [vmem:[#allocation4 + $0x78] sm:$0xf] %v2989_v24  ;;  %2993 = vst [vmem:[#allocation4 + $0x7c] sm:$0x1] %v2992_v8  ;;  %v2879_v4 = vor.u32 %v2877_v17, %v2876_v2  ;;  %v2880_v16 = vrot.slane %v2876_v2, 4 }
 0x249   : > { %v2860_v20 = vrot.slane %v2858_v0, 7  ;;  %v9786_v23 = vrot.slane %v3647_v38, 9  ;;  %v12338_v56 = vrot.slane %v3166_v45, 5  ;;  %4187 = vrot.lane.b32.xlu1 %v9818_v61, %s10575_s11  ;;  %v3730_v1 = vrot.slane %v12325_v31, 5  ;;  %v12369_v3 = vld [vmem:[#allocation4 + $0x70] sm:$0xf] }
 0x24a   : > { %v3727_v15 = vsel %vm10792_vm12, %v9785_v32, %v3726_v44  ;;  %v9771_v9 = vrot.slane %v3280_v28, 9  ;;  %v3007_v57 = vsel %vm10665_vm8, %v2879_v4, %v3006_v63  ;;  %v3010_v60 = vsel %vm11723_vm9, %v2880_v16, %v3009_v27 }
 0x24b   : > { %v2863_v45 = vor.u32 %v2861_v59, %v2860_v20  ;;  %v2864_v7 = vrot.slane %v2860_v20, 4  ;;  %3008 = vst [vmem:[#allocation4 + $0x90] sm:$0xf] %v3007_v57  ;;  %3011 = vst [vmem:[#allocation4 + $0x94] sm:$0x1] %v3010_v60  ;;  %v3731_v54 = vsel %vm10792_vm12, %v9786_v23, %v3730_v1  ;;  %v3366_v32 = vrot.slane %v12334_v52, 5 }
 0x24c   : > { %v3159_v48 = vrot.slane %v3157_v25, 4  ;;  %v3160_v50 = vshll.u32 %v12357_v58, 16  ;;  %v9852_v17 = vcombine.low %v3727_v15, %v3731_v54  ;;  %v3171_v13 = vshrl.u32 %v12346_v36, 16 }
 0x24d   : > { %v2995_v12 = vsel %vm10665_vm8, %v2863_v45, %v2994_v47  ;;  %v2998_v46 = vsel %vm11723_vm9, %v2864_v7, %v2997_v42  ;;  %v3174_v41 = vshll.u32 %v12346_v36, 16  ;;  %v3180_v39 = vshll.u32 %v12207_v10, 16  ;;  %v12383_v47 = vld [vmem:[#allocation4] sm:$0xf]  ;;  %v12385_v42 = vld [vmem:[#allocation4 + $0x8] sm:$0xf] }
 0x24e   : > { %2996 = vst [vmem:[#allocation4 + $0x80] sm:$0xf] %v2995_v12  ;;  %2999 = vst [vmem:[#allocation4 + $0x84] sm:$0x1] %v2998_v46  ;;  %v3162_v40 = vrot.slane %v3160_v50, 5  ;;  %v3553_v25 = vshrl.u32 %v12175_v19, 16  ;;  %4367 = vrot.lane.b32.xlu1 %v9852_v17, %s10580_s30  ;;  %v3367_v10 = vsel %vm10792_vm12, %v9771_v9, %v3366_v32  ;;  %v15105_v43 = vcombine.low %v12383_v47, %v12385_v42 }
 0x24f   : > { %v3173_v22 = vrot.slane %v3171_v13, 4  ;;  %v3556_v62 = vshll.u32 %v12175_v19, 16  ;;  %v3562_v5 = vshll.u32 %v12319_v51, 16  ;;  %v3567_v63 = vshrl.u32 %v12177_v21, 16  ;;  %v12374_v27 = vld [vmem:[#allocation4 + $0x78] sm:$0xf] }
 0x250   : > { %v12376_v38 = vld [vmem:[#allocation4 + $0x7c] sm:$0x1]  ;;  %v3281_v2 = vld [vmem:[#allocation4 + $0x78] sm:$0xe]  ;;  %v3163_v0 = vor.u32 %v3162_v40, %v3159_v48  ;;  %v9860_v59 = vcombine.low %v12369_v3, %v12374_v27  ;;  %v3176_v19 = vrot.slane %v3174_v41, 5  ;;  %v3555_v51 = vrot.slane %v3553_v25, 4 }
 0x251   : > { %v9772_v37 = vrot.slane %v3281_v2, 9  ;;  %v3370_v28 = vrot.slane %v12376_v38, 5  ;;  %v3558_v8 = vrot.slane %v3556_v62, 5  ;;  %v3182_v16 = vrot.slane %v3180_v39, 5  ;;  %v12402_v32 = vld [vmem:[#allocation4 + $0x88] sm:$0xf] }
 0x252   : > { %v3164_v24 = vrot.slane %v3163_v0, 4  ;;  %4423 = vrot.lane.b32.xlu0 %v9860_v59, %s10581_s8  ;;  %v3177_v4 = vor.u32 %v3176_v19, %v3173_v22  ;;  %v3569_v20 = vrot.slane %v3567_v63, 4  ;;  %v3570_v9 = vshll.u32 %v12177_v21, 16  ;;  %v12409_v13 = vld [vmem:[#allocation4 + $0x60] sm:$0xf] }
 0x253   : > { %v3371_v44 = vsel %vm10792_vm12, %v9772_v37, %v3370_v28  ;;  %v3559_v1 = vor.u32 %v3558_v8, %v3555_v51  ;;  %v3576_v45 = vshll.u32 %v12325_v31, 16  ;;  %v3525_v7 = vshrl.u32 %v12197_v35, 16  ;;  %v12418_v63 = vld [vmem:[#allocation4 + $0x68] sm:$0xf]  ;;  %v12422_v0 = vld [vmem:[#allocation4 + $0x78] sm:$0xf] }
 0x254   : > { %v9829_v23 = vcombine.low %v3367_v10, %v3371_v44  ;;  %v3169_v15 = vsel %vm10864_vm15, %v3164_v24, %v12338_v56  ;;  %v3178_v57 = vrot.slane %v3177_v4, 4  ;;  %v3528_v54 = vshll.u32 %v12197_v35, 16 }
 0x255   : > { %v12396_v60 = vld [vmem:[#allocation4 + $0x80] sm:$0xf]  ;;  %v3560_v48 = vrot.slane %v3559_v1, 4  ;;  %v3564_v50 = vrot.slane %v3562_v5, 5  ;;  %v3572_v12 = vrot.slane %v3570_v9, 5  ;;  %v3534_v56 = vshll.u32 %v12239_v6, 16 }
 0x256   : > { %4233 = vrot.lane.b32.xlu1 %v9829_v23, %s10578_s14  ;;  %v3183_v21 = vsel %vm10864_vm15, %v3178_v57, %v3182_v16  ;;  %v9861_v46 = vcombine.low %v12396_v60, %v12402_v32  ;;  %v3527_v31 = vrot.slane %v3525_v7, 4  ;;  %v3530_v17 = vrot.slane %v3528_v54, 5  ;;  %v12413_v25 = vld [vmem:[#allocation4 + $0x80] sm:$0xf] }
 0x257   : > { %v9819_v35 = vcombine.low %v3169_v15, %v3183_v21  ;;  %v3565_v40 = vsel %vm10864_vm15, %v3560_v48, %v3564_v50  ;;  %v3573_v41 = vor.u32 %v3572_v12, %v3569_v20  ;;  %v3578_v39 = vrot.slane %v3576_v45, 5  ;;  %v12432_v15 = vld [vmem:[#allocation4 + $0x64] sm:$0x1] }
 0x258   : > { %v3531_v22 = vor.u32 %v3530_v17, %v3527_v31  ;;  %v3539_v6 = vshrl.u32 %v12192_v53, 16  ;;  %v3542_v62 = vshll.u32 %v12192_v53, 16  ;;  %v3548_v5 = vshll.u32 %v12241_v18, 16 }
 0x259   : > { %4189 = vrot.lane.b32.xlu0 %v9819_v35, %s10575_s11  ;;  %v3574_v2 = vrot.slane %v3573_v41, 4  ;;  %v3536_v10 = vrot.slane %v3534_v56, 5  ;;  %v3185_v59 = vshrl.u32 %v12409_v13, 16  ;;  %v3188_v37 = vshll.u32 %v12409_v13, 16 }
 0x25a   : > { %4425 = vrot.lane.b32.xlu1 %v9861_v46, %s10581_s8  ;;  %v3532_v28 = vrot.slane %v3531_v22, 4  ;;  %v3541_v19 = vrot.slane %v3539_v6, 4  ;;  %v3544_v24 = vrot.slane %v3542_v62, 5  ;;  %v9837_v53 = vcombine.low %v12422_v0, %v12413_v25  ;;  %v12441_v50 = vpop.permute.xlu1 %4279  ;;  %v12443_v46 = vld [vmem:[#allocation4 + $0x6c] sm:$0x1] }
 0x25b   : > { %v3579_v18 = vsel %vm10864_vm15, %v3574_v2, %v3578_v39  ;;  %v3187_v51 = vrot.slane %v3185_v59, 4  ;;  %v3190_v8 = vrot.slane %v3188_v37, 5  ;;  %v3194_v44 = vshll.u32 %v12281_v30, 16  ;;  %v12453_v62 = vld [vmem:[#allocation4 + $0x74] sm:$0x1] }
 0x25c   : > { %v9844_v4 = vcombine.low %v3565_v40, %v3579_v18  ;;  %v3545_v16 = vor.u32 %v3544_v24, %v3541_v19  ;;  %v3550_v20 = vrot.slane %v3548_v5, 5  ;;  %v3199_v23 = vshrl.u32 %v12418_v63, 16  ;;  %v12458_v37 = vld [vmem:[#allocation4 + $0x7c] sm:$0x1] }
 0x25d   : > { %v3537_v1 = vsel %vm10864_vm15, %v3532_v28, %v3536_v10  ;;  %v3191_v9 = vor.u32 %v3190_v8, %v3187_v51  ;;  %v3202_v57 = vshll.u32 %v12418_v63, 16  ;;  %v3208_v45 = vshll.u32 %v12286_v49, 16  ;;  %v12449_v41 = vpop.permute.xlu0 %4277  ;;  %v12465_v8 = vld [vmem:[#allocation4 + $0x7c] sm:$0x1] }
 0x25e   : > { %4327 = vrot.lane.b32.xlu0 %v9844_v4, %s10576_s12  ;;  %v3546_v7 = vrot.slane %v3545_v16, 4  ;;  %v3201_v54 = vrot.slane %v3199_v23, 4  ;;  %v3894_v30 = vshrl.u32 %v12230_v26, 16  ;;  %v3897_v48 = vshll.u32 %v12230_v26, 16  ;;  %v12460_v28 = vpop.permute.xlu1 %4221 }
 0x25f   : > { %v3192_v12 = vrot.slane %v3191_v9, 4  ;;  %v3196_v56 = vrot.slane %v3194_v44, 5  ;;  %v3204_v21 = vrot.slane %v3202_v57, 5  ;;  %v3903_v31 = vshll.u32 %v12432_v15, 16 }
 0x260   : > { %v3551_v49 = vsel %vm10864_vm15, %v3546_v7, %v3550_v20  ;;  %v3896_v17 = vrot.slane %v3894_v30, 4  ;;  %v3899_v35 = vrot.slane %v3897_v48, 5  ;;  %v3908_v40 = vshrl.u32 %v12232_v55, 16  ;;  %v12469_v20 = vld [vmem:[#allocation4 + $0x84] sm:$0x1] }
 0x261   : > { %v9843_v39 = vcombine.low %v3537_v1, %v3551_v49  ;;  %v3197_v26 = vsel %vm10864_vm15, %v3192_v12, %v3196_v56  ;;  %v3205_v22 = vor.u32 %v3204_v21, %v3201_v54  ;;  %v3210_v6 = vrot.slane %v3208_v45, 5  ;;  %v3649_v45 = vld [vmem:[#allocation4 + $0x80] sm:$0xe]  ;;  %v12477_v12 = vld [vmem:[#allocation4 + $0x70] sm:$0xf] }
 0x262   : > { %4289 = vrot.lane.b32.xlu0 %v9837_v53, %s10573_s9  ;;  %v3900_v5 = vor.u32 %v3899_v35, %v3896_v17  ;;  %v3910_v2 = vrot.slane %v3908_v40, 4  ;;  %v3911_v10 = vshll.u32 %v12232_v55, 16  ;;  %v3917_v59 = vshll.u32 %v12443_v46, 16  ;;  %v3648_v53 = vld [vmem:[#allocation4 + $0x78] sm:$0xe]  ;;  %v12479_v56 = vpop.permute.xlu1 %4413 }
 0x263   : > { %4325 = vrot.lane.b32.xlu1 %v9843_v39, %s10576_s12  ;;  %v3206_v19 = vrot.slane %v3205_v22, 4  ;;  %v3905_v24 = vrot.slane %v3903_v31, 5  ;;  %v3922_v18 = vshrl.u32 %v12369_v3, 16  ;;  %v3925_v51 = vshll.u32 %v12369_v3, 16  ;;  %v12473_v7 = vpop.permute.xlu0 %4357  ;;  %v12483_v35 = vld [vmem:[#allocation4 + $0x90] sm:$0xf] }
 0x264   : > { %v3901_v44 = vrot.slane %v3900_v5, 4  ;;  %v3913_v4 = vrot.slane %v3911_v10, 5  ;;  %v3931_v55 = vshll.u32 %v12453_v62, 16  ;;  %v3936_v16 = vshrl.u32 %v12374_v27, 16 }
 0x265   : > { %v3211_v23 = vsel %vm10864_vm15, %v3206_v19, %v3210_v6  ;;  %v3919_v1 = vrot.slane %v3917_v59, 5  ;;  %v3924_v9 = vrot.slane %v3922_v18, 4  ;;  %v3927_v57 = vrot.slane %v3925_v51, 5  ;;  %v12488_v6 = vld [vmem:[#allocation4 + $0x88] sm:$0xf] }
 0x266   : > { %v9820_v3 = vcombine.low %v3197_v26, %v3211_v23  ;;  %v3906_v54 = vsel %vm10864_vm15, %v3901_v44, %v3905_v24  ;;  %v3914_v30 = vor.u32 %v3913_v4, %v3910_v2  ;;  %v3938_v48 = vrot.slane %v3936_v16, 4 }
 0x267   : > { %v3928_v21 = vor.u32 %v3927_v57, %v3924_v9  ;;  %v3939_v31 = vshll.u32 %v12374_v27, 16  ;;  %v3945_v49 = vshll.u32 %v12458_v37, 16  ;;  %v9787_v17 = vrot.slane %v3648_v53, 9  ;;  %v12490_v27 = vld [vmem:[#allocation4 + $0x78] sm:$0xf]  ;;  %v12492_v19 = vpop.permute.xlu0 %4223  ;;  %v12505_v23 = vpop.permute.xlu1 %4359 }
 0x268   : > { %4191 = vrot.lane.b32.xlu1 %v9820_v3, %s10575_s11  ;;  %v3915_v40 = vrot.slane %v3914_v30, 4  ;;  %v3734_v39 = vrot.slane %v12465_v8, 5  ;;  %v9788_v26 = vrot.slane %v3649_v45, 9  ;;  %v3738_v22 = vrot.slane %v12469_v20, 5 }
 0x269   : > { %v3929_v5 = vrot.slane %v3928_v21, 4  ;;  %v3933_v2 = vrot.slane %v3931_v55, 5  ;;  %v3941_v10 = vrot.slane %v3939_v31, 5  ;;  %v3947_v59 = vrot.slane %v3945_v49, 5 }
 0x26a   : > { %v3920_v24 = vsel %vm10864_vm15, %v3915_v40, %v3919_v1  ;;  %v3735_v18 = vsel %vm10792_vm12, %v9787_v17, %v3734_v39  ;;  %v9838_v51 = vcombine.low %v12488_v6, %v12483_v35  ;;  %v3213_v53 = vshrl.u32 %v12477_v12, 16 }
 0x26b   : > { %v9867_v44 = vcombine.low %v3906_v54, %v3920_v24  ;;  %v3934_v4 = vsel %vm10864_vm15, %v3929_v5, %v3933_v2  ;;  %v3942_v55 = vor.u32 %v3941_v10, %v3938_v48  ;;  %v3739_v16 = vsel %vm10792_vm12, %v9788_v26, %v3738_v22  ;;  %v12514_v21 = vpop.permute.xlu0 %4415  ;;  %v3282_v5 = vld [vmem:[#allocation4 + $0x80] sm:$0xe]  ;;  %v12519_v2 = vpop.permute.xlu1 %4283 }
 0x26c   : > { %v3215_v9 = vrot.slane %v3213_v53, 4  ;;  %v3216_v1 = vshll.u32 %v12477_v12, 16  ;;  %v3222_v57 = vshll.u32 %v12334_v52, 16  ;;  %v3227_v45 = vshrl.u32 %v12490_v27, 16 }
 0x26d   : > { %4461 = vrot.lane.b32.xlu0 %v9867_v44, %s10582_s15  ;;  %v3943_v3 = vrot.slane %v3942_v55, 4  ;;  %v3230_v54 = vshll.u32 %v12490_v27, 16  ;;  %v3236_v30 = vshll.u32 %v12376_v38, 16  ;;  %v3581_v48 = vshrl.u32 %v12422_v0, 16  ;;  %v3042_v44 = vld [vmem:[#allocation4 + $0x84] sm:$0x1] }
 0x26e   : > { %v9853_v31 = vcombine.low %v3735_v18, %v3739_v16  ;;  %v3218_v49 = vrot.slane %v3216_v1, 5  ;;  %v3229_v17 = vrot.slane %v3227_v45, 4  ;;  %v3584_v40 = vshll.u32 %v12422_v0, 16  ;;  %v12522_v18 = vld [vmem:[#allocation4 + $0x8c] sm:$0x1] }
 0x26f   : > { %v3948_v52 = vsel %vm10864_vm15, %v3943_v3, %v3947_v59  ;;  %v3224_v39 = vrot.slane %v3222_v57, 5  ;;  %v3232_v26 = vrot.slane %v3230_v54, 5  ;;  %v3583_v22 = vrot.slane %v3581_v48, 4  ;;  %v3283_v1 = vld [vmem:[#allocation4 + $0x88] sm:$0xe] }
 0x270   : > { %v9868_v10 = vcombine.low %v3934_v4, %v3948_v52  ;;  %v3219_v38 = vor.u32 %v3218_v49, %v3215_v9  ;;  %v3586_v24 = vrot.slane %v3584_v40, 5  ;;  %v3590_v53 = vshll.u32 %v12465_v8, 16  ;;  %v12529_v8 = vld [vmem:[#allocation4 + $0x80] sm:$0xf]  ;;  %v12531_v3 = vpop.permute.xlu0 %4181 }
 0x271   : > { %4369 = vrot.lane.b32.xlu0 %v9853_v31, %s10580_s30  ;;  %v3233_v0 = vor.u32 %v3232_v26, %v3229_v17  ;;  %v3238_v55 = vrot.slane %v3236_v30, 5  ;;  %v3595_v59 = vshrl.u32 %v12413_v25, 16  ;;  %v3598_v16 = vshll.u32 %v12413_v25, 16  ;;  %15104 = vst [vmem:[#allocation8_spill] sm:$0xff] %v12529_v8 }
 0x272   : > { %4463 = vrot.lane.b32.xlu1 %v9868_v10, %s10582_s15  ;;  %v3220_v57 = vrot.slane %v3219_v38, 4  ;;  %v3587_v4 = vor.u32 %v3586_v24, %v3583_v22  ;;  %v3604_v9 = vshll.u32 %v12469_v20, 16  ;;  %v9773_v45 = vrot.slane %v3282_v5, 9  ;;  %v12538_v22 = vld [vmem:[#allocation4 + $0x88] sm:$0xf]  ;;  %v12541_v10 = vpop.permute.xlu1 %4225 }
 0x273   : > { %v3234_v54 = vrot.slane %v3233_v0, 4  ;;  %v3592_v48 = vrot.slane %v3590_v53, 5  ;;  %v3597_v31 = vrot.slane %v3595_v59, 4  ;;  %v3600_v30 = vrot.slane %v3598_v16, 5 }
 0x274   : > { %v3225_v49 = vsel %vm10864_vm15, %v3220_v57, %v3224_v39  ;;  %v3588_v25 = vrot.slane %v3587_v4, 4  ;;  %v3374_v17 = vrot.slane %v3042_v44, 5  ;;  %v9774_v40 = vrot.slane %v3283_v1, 9 }
 0x275   : > { %v3239_v52 = vsel %vm10864_vm15, %v3234_v54, %v3238_v55  ;;  %v3601_v26 = vor.u32 %v3600_v30, %v3597_v31  ;;  %v3378_v20 = vrot.slane %v12522_v18, 5  ;;  %v3241_v5 = vshrl.u32 %v12529_v8, 16 }
 0x276   : > { %4291 = vrot.lane.b32.xlu1 %v9838_v51, %s10573_s9  ;;  %v9821_v38 = vcombine.low %v3225_v49, %v3239_v52  ;;  %v3606_v24 = vrot.slane %v3604_v9, 5  ;;  %v3375_v39 = vsel %vm10792_vm12, %v9773_v45, %v3374_v17  ;;  %v3244_v53 = vshll.u32 %v12529_v8, 16  ;;  %v12554_v9 = vld [vmem:[#allocation4 + $0x84] sm:$0x1]  ;;  %v12556_v45 = vpop.permute.xlu0 %4419  ;;  %v3650_v52 = vld [vmem:[#allocation4 + $0x88] sm:$0xe] }
 0x277   : > { %v3593_v0 = vsel %vm10864_vm15, %v3588_v25, %v3592_v48  ;;  %v3602_v55 = vrot.slane %v3601_v26, 4  ;;  %v3243_v59 = vrot.slane %v3241_v5, 4  ;;  %v3250_v16 = vshll.u32 %v3042_v44, 16 }
 0x278   : > { %4193 = vrot.lane.b32.xlu0 %v9821_v38, %s10575_s11  ;;  %v3379_v1 = vsel %vm10792_vm12, %v9774_v40, %v3378_v20  ;;  %v3246_v57 = vrot.slane %v3244_v53, 5  ;;  %v3255_v51 = vshrl.u32 %v12538_v22, 16  ;;  %v3258_v4 = vshll.u32 %v12538_v22, 16  ;;  %v12562_v40 = vld [vmem:[#allocation4 + $0x8c] sm:$0x1] }
 0x279   : > { %v3607_v54 = vsel %vm10864_vm15, %v3602_v55, %v3606_v24  ;;  %v9830_v48 = vcombine.low %v3375_v39, %v3379_v1  ;;  %v3264_v44 = vshll.u32 %v12522_v18, 16  ;;  %v3950_v31 = vshrl.u32 %v12396_v60, 16  ;;  %v12566_v53 = vld [vmem:[#allocation4 + $0x8c] sm:$0x1]  ;;  %v12568_v24 = vpop.permute.xlu1 %4417 }
 0x27a   : > { %v9845_v30 = vcombine.low %v3593_v0, %v3607_v54  ;;  %v3247_v49 = vor.u32 %v3246_v57, %v3243_v59  ;;  %v3257_v25 = vrot.slane %v3255_v51, 4  ;;  %v3260_v17 = vrot.slane %v3258_v4, 5  ;;  %v3651_v59 = vld [vmem:[#allocation4 + $0x90] sm:$0xe]  ;;  %v3411_v57 = vld [vmem:[#allocation4 + $0x94] sm:$0x1] }
 0x27b   : > { %v3252_v26 = vrot.slane %v3250_v16, 5  ;;  %v3952_v20 = vrot.slane %v3950_v31, 4  ;;  %v3953_v5 = vshll.u32 %v12396_v60, 16  ;;  %v3959_v38 = vshll.u32 %v12554_v9, 16 }
 0x27c   : > { %4329 = vrot.lane.b32.xlu1 %v9845_v30, %s10576_s12  ;;  %4235 = vrot.lane.b32.xlu0 %v9830_v48, %s10578_s14  ;;  %v3248_v18 = vrot.slane %v3247_v49, 4  ;;  %v3261_v39 = vor.u32 %v3260_v17, %v3257_v25  ;;  %v3964_v0 = vshrl.u32 %v12402_v32, 16  ;;  %v3967_v55 = vshll.u32 %v12402_v32, 16  ;;  %v12577_v48 = vpop.permute.xlu0 %4319 }
 0x27d   : > { %v3266_v16 = vrot.slane %v3264_v44, 5  ;;  %v3955_v1 = vrot.slane %v3953_v5, 5  ;;  %v3973_v60 = vshll.u32 %v12562_v40, 16  ;;  %v9789_v51 = vrot.slane %v3650_v52, 9 }
 0x27e   : > { %v3253_v4 = vsel %vm10864_vm15, %v3248_v18, %v3252_v26  ;;  %v3262_v54 = vrot.slane %v3261_v39, 4  ;;  %v3966_v31 = vrot.slane %v3964_v0, 4  ;;  %v3969_v30 = vrot.slane %v3967_v55, 5  ;;  %v4318_v39 = vpop.permute.xlu1 %4317 }
 0x27f   : > { %v3956_v49 = vor.u32 %v3955_v1, %v3952_v20  ;;  %v3961_v25 = vrot.slane %v3959_v38, 5  ;;  %v3742_v17 = vrot.slane %v12566_v53, 5  ;;  %v9790_v32 = vrot.slane %v3651_v59, 9  ;;  %v2593_v59 = vld [vmem:[#allocation4 + $0x98] sm:$0x1] }
 0x280   : > { %v3267_v44 = vsel %vm10864_vm15, %v3262_v54, %v3266_v16  ;;  %v3970_v5 = vor.u32 %v3969_v30, %v3966_v31  ;;  %v3746_v61 = vrot.slane %v3411_v57, 5  ;;  %v3609_v52 = vshrl.u32 %v12488_v6, 16  ;;  %v2654_v16 = vld [vmem:[#allocation4 + $0x9c] sm:$0x1]  ;;  %v12593_v54 = vld [vmem:[#allocation4 + $0x90] sm:$0xf] }
 0x281   : > { %v9822_v14 = vcombine.low %v3253_v4, %v3267_v44  ;;  %v3957_v8 = vrot.slane %v3956_v49, 4  ;;  %v3975_v26 = vrot.slane %v3973_v60, 5  ;;  %v3612_v18 = vshll.u32 %v12488_v6, 16  ;;  %v12598_v49 = vpop.permute.xlu0 %4281  ;;  %v12604_v44 = vld [vmem:[#allocation4 + $0x94] sm:$0x1] }
 0x282   : > { %v3971_v0 = vrot.slane %v3970_v5, 4  ;;  %v3743_v20 = vsel %vm10792_vm12, %v9789_v51, %v3742_v17  ;;  %v3747_v38 = vsel %vm10792_vm12, %v9790_v32, %v3746_v61  ;;  %v3611_v55 = vrot.slane %v3609_v52, 4  ;;  %v10534_v52 = vld [vmem:[#allocation4 + $0x10] sm:$0xf] }
 0x283   : > { %4195 = vrot.lane.b32.xlu1 %v9822_v14, %s10575_s11  ;;  %v3962_v1 = vsel %vm10864_vm15, %v3957_v8, %v3961_v25  ;;  %v3614_v4 = vrot.slane %v3612_v18, 5  ;;  %v3618_v60 = vshll.u32 %v12566_v53, 16  ;;  %v3623_v6 = vshrl.u32 %v12483_v35, 16 }
 0x284   : > { %v3976_v51 = vsel %vm10864_vm15, %v3971_v0, %v3975_v26  ;;  %v9854_v31 = vcombine.low %v3743_v20, %v3747_v38  ;;  %v3626_v61 = vshll.u32 %v12483_v35, 16  ;;  %v3632_v30 = vshll.u32 %v3411_v57, 16  ;;  %v10535_v35 = vld [vmem:[#allocation4 + $0x18] sm:$0xf]  ;;  %v4184_v38 = vpop.permute.xlu1 %4183 }
 0x285   : > { %v9869_v14 = vcombine.low %v3962_v1, %v3976_v51  ;;  %v3615_v17 = vor.u32 %v3614_v4, %v3611_v55  ;;  %v3625_v32 = vrot.slane %v3623_v6, 4  ;;  %v2594_v8 = vsel %vm11723_vm9, 0, %v2593_v59 }
 0x286   : > { %v3628_v53 = vrot.slane %v3626_v61, 5  ;;  %2595 = vst [vmem:[#allocation4 + $0x98] sm:$0x1] %v2594_v8  ;;  %v2655_v25 = vsel %vm11717_vm0, 0, %v2654_v16  ;;  %v3978_v5 = vshrl.u32 %v12593_v54, 16  ;;  %v9808_v57 = vcombine.low %v10534_v52, %v10535_v35 }
 0x287   : > { %4465 = vrot.lane.b32.xlu0 %v9869_v14, %s10582_s15  ;;  %4371 = vrot.lane.b32.xlu1 %v9854_v31, %s10580_s30  ;;  %v3616_v26 = vrot.slane %v3615_v17, 4  ;;  %v3620_v18 = vrot.slane %v3618_v60, 5  ;;  %2656 = vst [vmem:[#allocation4 + $0x9c] sm:$0x1] %v2655_v25  ;;  %v3981_v0 = vshll.u32 %v12593_v54, 16  ;;  %v4495_v20 = vsel %vm2228_vm3, %v15105_v43, %v12531_v3  ;;  %v4454_v42 = vpop.permute.xlu0 %4453 }
 0x288   : > { %v3629_v55 = vor.u32 %v3628_v53, %v3625_v32  ;;  %v3980_v59 = vrot.slane %v3978_v5, 4  ;;  %v4518_v16 = vsel %vm2262_vm6, %v4495_v20, %v12460_v28  ;;  %v3634_v1 = vrot.slane %v3632_v30, 5  ;;  %v4007_v3 = vld [vmem:[#allocation4 + $0x20] sm:$0xe]  ;;  %v4008_v14 = vld [vmem:[#allocation4 + $0x28] sm:$0xe] }
 0x289   : > { %v3983_v4 = vrot.slane %v3981_v0, 5  ;;  %v3987_v60 = vshll.u32 %v12604_v44, 16  ;;  %v4534_v6 = vsel %vm2296_vm10, %v4518_v16, %v12449_v41  ;;  %v4498_v47 = vsel %vm2228_vm3, %v9808_v57, %v4184_v38  ;;  %v4009_v8 = vld [vmem:[#allocation4 + $0x30] sm:$0xe]  ;;  %v10536_v5 = vld [vmem:[#allocation4 + $0x24] sm:$0x1] }
 0x28a   : > { %v3630_v51 = vrot.slane %v3629_v55, 4  ;;  %v4550_v31 = vsel %vm2330_vm13, %v4534_v6, %v4318_v39  ;;  %vm4582_vm0 = vcmask 785408   ;;  %v4520_v30 = vsel %vm2262_vm6, %v4498_v47, %v12492_v19  ;;  %v4841_v35 = vld [vmem:[%s15039_s4] sm:$0xf]  ;;  %v10537_v20 = vld [vmem:[#allocation4 + $0x2c] sm:$0x1] }
 0x28b   : > { %v3984_v61 = vor.u32 %v3983_v4, %v3980_v59  ;;  %v4567_v28 = vsel %vm4565_vm7, %v4550_v31, %v12473_v7  ;;  %v3621_v41 = vsel %vm10864_vm15, %v3616_v26, %v3620_v18  ;;  %v4536_v17 = vsel %vm2296_vm10, %v4520_v30, %v12441_v50  ;;  %10383 = vmatprep.subr.msk.bf16.mxu0 %vm15106_vm11, %v4841_v35  ;;  %v4010_v55 = vld [vmem:[#allocation4 + $0x38] sm:$0xe]  ;;  %v10538_v47 = vld [vmem:[#allocation4 + $0x34] sm:$0x1] }
 0x28c   : > { %v3635_v39 = vsel %vm10864_vm15, %v3630_v51, %v3634_v1  ;;  %v4584_v32 = vsel %vm4582_vm0, %v4567_v28, %v12479_v56  ;;  %v9793_v19 = vrot.slane %v4007_v3, 9  ;;  %v4063_v52 = vrot.slane %v10536_v5, 5  ;;  %v12643_v1 = vpop.permute.xlu1 %4363  ;;  %v4362_v5 = vpop.permute.xlu0 %4361 }
 0x28d   : > { %v9846_v53 = vcombine.low %v3621_v41, %v3635_v39  ;;  %v3764_v7 = vld [vmem:[#allocation4 + $0x98] sm:$0xf]  ;;  %v4601_v25 = vsel %vm4599_vm5, %v4584_v32, %v4454_v42  ;;  %v9794_v50 = vrot.slane %v4008_v14, 9  ;;  %v3985_v56 = vrot.slane %v3984_v61, 4  ;;  %v10539_v14 = vld [vmem:[#allocation4 + $0x3c] sm:$0x1] }
 0x28e   : > { %v12638_v57 = vld [vmem:[#allocation4 + $0x9c] sm:$0x1]  ;;  %v3992_v26 = vshrl.u32 %v3764_v7, 16  ;;  %v3995_v18 = vshll.u32 %v3764_v7, 16  ;;  %4753 = vmatmul.mubr.bf16.vlgmr.msra.gmra.mxu1 %v4601_v25  ;;  %v3989_v0 = vrot.slane %v3987_v60, 5  ;;  %v4067_v38 = vrot.slane %v10537_v20, 5 }
 0x28f   : > { %4331 = vrot.lane.b32.xlu0 %v9846_v53, %s10576_s12  ;;  %v4001_v43 = vshll.u32 %v12638_v57, 16  ;;  %v4552_v4 = vsel %vm2330_vm13, %v4536_v17, %v12577_v48  ;;  %v9795_v6 = vrot.slane %v4009_v8, 9  ;;  %v9862_v51 = vcombine.low %v12593_v54, %v3764_v7  ;;  %v10541_v20 = vld [vmem:[#allocation4 + $0x28] sm:$0xf] }
 0x290   : > { %v3994_v59 = vrot.slane %v3992_v26, 4  ;;  %v3997_v16 = vrot.slane %v3995_v18, 5  ;;  %v4064_v31 = vsel %vm10792_vm12, %v9793_v19, %v4063_v52  ;;  %v4068_v60 = vsel %vm10792_vm12, %v9794_v50, %v4067_v38 }
 0x291   : > { %v4071_v42 = vrot.slane %v10538_v47, 5  ;;  %v4003_v61 = vrot.slane %v4001_v43, 5  ;;  %v9872_v28 = vcombine.low %v4064_v31, %v4068_v60  ;;  %v9796_v30 = vrot.slane %v4010_v55, 9  ;;  %v10540_v43 = vld [vmem:[#allocation4 + $0x20] sm:$0xf] }
 0x292   : > { %v3998_v3 = vor.u32 %v3997_v16, %v3994_v59  ;;  %v4569_v48 = vsel %vm4565_vm7, %v4552_v4, %v12505_v23  ;;  %v4075_v41 = vrot.slane %v10539_v14, 5  ;;  %v3990_v54 = vsel %vm10864_vm15, %v3985_v56, %v3989_v0  ;;  %v4011_v16 = vld [vmem:[#allocation4 + $0x40] sm:$0xe]  ;;  %v4012_v4 = vld [vmem:[#allocation4 + $0x48] sm:$0xe] }
 0x293   : > { %4427 = vrot.lane.b32.xlu0 %v9862_v51, %s10581_s8  ;;  %9889 = vmatprep.mubr.msk.bf16.mxu1 %vm2228_vm3, %v9872_v28  ;;  %v4072_v17 = vsel %vm10792_vm12, %v9795_v6, %v4071_v42  ;;  %v4586_v53 = vsel %vm4582_vm0, %v4569_v48, %v12514_v21  ;;  %v4867_v52 = vsel %vm15107_vm14, %v4841_v35, 0  ;;  %v9809_v38 = vcombine.low %v10540_v43, %v10541_v20  ;;  %v10542_v6 = vld [vmem:[#allocation4 + $0x4c] sm:$0x1]  ;;  %v10543_v47 = vld [vmem:[#allocation4 + $0x44] sm:$0x1] }
 0x294   : > { %v3999_v39 = vrot.slane %v3998_v3, 4  ;;  %v4076_v23 = vsel %vm10792_vm12, %v9796_v30, %v4075_v41  ;;  %10329 = vmatpush3.bf16.msra.mxu0 %v4867_v52  ;;  %v4083_v51 = vrot.slane %v10542_v6, 5  ;;  %v9797_v60 = vrot.slane %v4011_v16, 9 }
 0x295   : > { %v9873_v19 = vcombine.low %v4072_v17, %v4076_v23  ;;  %v4228_v26 = vpop.permute.xlu0 %4227  ;;  %7070 = vmatprep.subr.bf16.mxu0 %v15103_v34  ;;  %v4079_v42 = vrot.slane %v10543_v47, 5  ;;  %v9798_v3 = vrot.slane %v4012_v4, 9  ;;  %v10544_v17 = vld [vmem:[#allocation4 + $0x30] sm:$0xf]  ;;  %v4014_v23 = vld [vmem:[#allocation4 + $0x68] sm:$0xe] }
 0x296   : > { %v4004_v32 = vsel %vm10864_vm15, %v3999_v39, %v4003_v61  ;;  %v4456_v8 = vpop.permute.xlu1 %4455  ;;  %v4091_v43 = vrot.slane %v12443_v46, 5 }
 0x297   : > { %v9870_v7 = vcombine.low %v3990_v54, %v4004_v32  ;;  %v4604_v25 = vsel %vm4599_vm5, %v4586_v53, %v4456_v8  ;;  %v4080_v14 = vsel %vm10792_vm12, %v9797_v60, %v4079_v42  ;;  %v4084_v41 = vsel %vm10792_vm12, %v9798_v3, %v4083_v51  ;;  %v10545_v32 = vld [vmem:[#allocation4 + $0x38] sm:$0xf] }
 0x298   : > { %4761 = vmatmul.mubr.bf16.gmra.mxu1 %v4604_v25  ;;  %v9810_v8 = vcombine.low %v10544_v17, %v10545_v32  ;;  %v9874_v53 = vcombine.low %v4080_v14, %v4084_v41  ;;  %v4016_v3 = vld [vmem:[#allocation4 + $0x78] sm:$0xe]  ;;  %v9812_v14 = vcombine.low %v12409_v13, %v12418_v63  ;;  %v4017_v13 = vld [vmem:[#allocation4 + $0x80] sm:$0xe] }
 0x299   : > { %4467 = vrot.lane.b32.xlu1 %v9870_v7, %s10582_s15  ;;  %9890 = vmatprep.mubr.msk.bf16.mxu1 %vm2228_vm3, %v9873_v19  ;;  %v4087_v19 = vrot.slane %v12432_v15, 5  ;;  %v9802_v41 = vrot.slane %v4016_v3, 9 }
 0x29a   : > { %v12670_v18 = vpop.permute.xlu1 %4287 }
 0x29e   : > { %v4186_v21 = vpop.permute.xlu0 %4185 }
 0x29f   : > { %v4501_v55 = vsel %vm2228_vm3, %v9809_v38, %v4186_v21 }
 0x2a0   : > { %v4522_v31 = vsel %vm2262_vm6, %v4501_v55, %v12541_v10  ;;  %v4013_v10 = vld [vmem:[#allocation4 + $0x60] sm:$0xe] }
 0x2a1   : > { %v4538_v28 = vsel %vm2296_vm10, %v4522_v31, %v12598_v49  ;;  %v9799_v25 = vrot.slane %v4013_v10, 9 }
 0x2a2   : > { %v4324_v0 = vpop.permute.xlu0 %4323 }
 0x2a3   : > { %v4088_v55 = vsel %vm10792_vm12, %v9799_v25, %v4087_v19 }
 0x2a5   : > { %v4460_v50 = vpop.permute.xlu1 %4459 }
 0x2a6   : > { %v4286_v35 = vpop.permute.xlu0 %4285 }
 0x2a9   : > { %v4230_v56 = vpop.permute.xlu1 %4229 }
 0x2aa   : > { %v4458_v30 = vpop.permute.xlu0 %4457 }
 0x2ad   : > { %v12674_v59 = vpop.permute.xlu1 %4421 }
 0x2b6   : > { %v4322_v61 = vpop.permute.xlu1 %4321 }
 0x2b7   : > { %v4554_v48 = vsel %vm2330_vm13, %v4538_v28, %v4322_v61  ;;  %v4015_v28 = vld [vmem:[#allocation4 + $0x70] sm:$0xe] }
 0x2b8   : > { %v4571_v54 = vsel %vm4565_vm7, %v4554_v48, %v4362_v5  ;;  %v4366_v5 = vpop.permute.xlu0 %4365  ;;  %v9801_v10 = vrot.slane %v4015_v28, 9 }
 0x2b9   : > { %v4588_v39 = vsel %vm4582_vm0, %v4571_v54, %v12568_v24  ;;  %v9800_v24 = vrot.slane %v4014_v23, 9  ;;  %v4099_v54 = vrot.slane %v12458_v37, 5  ;;  %v4018_v23 = vld [vmem:[#allocation4 + $0x88] sm:$0xe] }
 0x2ba   : > { %v4607_v49 = vsel %vm4599_vm5, %v4588_v39, %v4458_v30  ;;  %v9804_v19 = vrot.slane %v4018_v23, 9 }
 0x2bb   : > { %v4188_v7 = vpop.permute.xlu1 %4187  ;;  %4769 = vmatmul.mubr.bf16.gmra.mxu1 %v4607_v49  ;;  %v4100_v32 = vsel %vm10792_vm12, %v9802_v41, %v4099_v54 }
 0x2bc   : > { %v4504_v52 = vsel %vm2228_vm3, %v9810_v8, %v4188_v7  ;;  %9891 = vmatprep.mubr.msk.bf16.mxu1 %vm2228_vm3, %v9874_v53  ;;  %v4232_v6 = vpop.permute.xlu0 %4231  ;;  %v9803_v7 = vrot.slane %v4017_v13, 9 }
 0x2bd   : > { %v4524_v21 = vsel %vm2262_vm6, %v4504_v52, %v4228_v26  ;;  %v4092_v26 = vsel %vm10792_vm12, %v9800_v24, %v4091_v43 }
 0x2be   : > { %v4540_v20 = vsel %vm2296_vm10, %v4524_v21, %v12519_v2  ;;  %v9875_v46 = vcombine.low %v4088_v55, %v4092_v26  ;;  %v4019_v26 = vld [vmem:[#allocation4 + $0x90] sm:$0xe] }
 0x2bf   : > { %v4556_v38 = vsel %vm2330_vm13, %v4540_v20, %v4324_v0 }
 0x2c0   : > { %v4573_v15 = vsel %vm4565_vm7, %v4556_v38, %v12643_v1  ;;  %v4368_v2 = vpop.permute.xlu1 %4367  ;;  %v9811_v1 = vcombine.low %v12357_v58, %v12346_v36  ;;  %v9813_v38 = vcombine.low %v12477_v12, %v12490_v27  ;;  %v4111_v12 = vrot.slane %v12604_v44, 5  ;;  %v15108_v44 = vld [vmem:[#allocation8_spill] sm:$0xff] }
 0x2c1   : > { %v4590_v16 = vsel %vm4582_vm0, %v4573_v15, %v12556_v45 }
 0x2c2   : > { %v4610_v4 = vsel %vm4599_vm5, %v4590_v16, %v4460_v50 }
 0x2c3   : > { %4777 = vmatmul.mubr.bf16.gmra.mxu1 %v4610_v4 }
 0x2c4   : > { %9892 = vmatprep.mubr.msk.bf16.mxu1 %vm2228_vm3, %v9875_v46  ;;  %v4424_v0 = vpop.permute.xlu0 %4423 }
 0x2c8   : > { %v4234_v51 = vpop.permute.xlu1 %4233 }
 0x2cb   : > { %v4190_v31 = vpop.permute.xlu0 %4189 }
 0x2cc   : > { %v12707_v60 = vpop.permute.xlu1 %4425  ;;  %v4507_v45 = vsel %vm2228_vm3, %v9811_v1, %v4190_v31  ;;  %v4115_v1 = vrot.slane %v12638_v57, 5  ;;  %v9814_v57 = vcombine.low %v15108_v44, %v12538_v22 }
 0x2cd   : > { %v4526_v42 = vsel %vm2262_vm6, %v4507_v45, %v4230_v56  ;;  %v4095_v56 = vrot.slane %v12453_v62, 5 }
 0x2ce   : > { %v4542_v61 = vsel %vm2296_vm10, %v4526_v42, %v4286_v35 }
 0x2cf   : > { %v4096_v8 = vsel %vm10792_vm12, %v9801_v10, %v4095_v56 }
 0x2d0   : > { %v4328_v47 = vpop.permute.xlu0 %4327  ;;  %v9876_v53 = vcombine.low %v4096_v8, %v4100_v32 }
 0x2d4   : > { %v4290_v48 = vpop.permute.xlu0 %4289 }
 0x2d5   : > { %v4326_v50 = vpop.permute.xlu1 %4325 }
 0x2d6   : > { %v4558_v30 = vsel %vm2330_vm13, %v4542_v61, %v4326_v50 }
 0x2d7   : > { %v4575_v39 = vsel %vm4565_vm7, %v4558_v30, %v4366_v5 }
 0x2d8   : > { %v4592_v37 = vsel %vm4582_vm0, %v4575_v39, %v12674_v59  ;;  %v4107_v59 = vrot.slane %v12562_v40, 5 }
 0x2da   : > { %v4192_v36 = vpop.permute.xlu1 %4191  ;;  %v4108_v43 = vsel %vm10792_vm12, %v9804_v19, %v4107_v59 }
 0x2db   : > { %v4510_v58 = vsel %vm2228_vm3, %v9812_v14, %v4192_v36 }
 0x2dc   : > { %v4528_v35 = vsel %vm2262_vm6, %v4510_v58, %v4232_v6  ;;  %v4020_v6 = vld [vmem:[#allocation4 + $0x98] sm:$0xe] }
 0x2dd   : > { %v4544_v17 = vsel %vm2296_vm10, %v4528_v35, %v12670_v18  ;;  %v4103_v18 = vrot.slane %v12554_v9, 5  ;;  %v9806_v27 = vrot.slane %v4020_v6, 9 }
 0x2de   : > { %v4560_v62 = vsel %vm2330_vm13, %v4544_v17, %v4328_v47 }
 0x2df   : > { %v4462_v63 = vpop.permute.xlu0 %4461  ;;  %v4577_v25 = vsel %vm4565_vm7, %v4560_v62, %v4368_v2  ;;  %v4104_v24 = vsel %vm10792_vm12, %v9803_v7, %v4103_v18  ;;  %v9805_v2 = vrot.slane %v4019_v26, 9 }
 0x2e0   : > { %v4613_v49 = vsel %vm4599_vm5, %v4592_v37, %v4462_v63  ;;  %v4594_v21 = vsel %vm4582_vm0, %v4577_v25, %v4424_v0  ;;  %v9877_v9 = vcombine.low %v4104_v24, %v4108_v43 }
 0x2e1   : > { %4785 = vmatmul.mubr.bf16.gmra.mxu1 %v4613_v49  ;;  %v4112_v47 = vsel %vm10792_vm12, %v9805_v2, %v4111_v12 }
 0x2e2   : > { %9893 = vmatprep.mubr.msk.bf16.mxu1 %vm2228_vm3, %v9876_v53 }
 0x2e3   : > { %v4370_v5 = vpop.permute.xlu0 %4369 }
 0x2e4   : > { %v4464_v52 = vpop.permute.xlu1 %4463 }
 0x2e5   : > { %v4616_v20 = vsel %vm4599_vm5, %v4594_v21, %v4464_v52 }
 0x2e8   : > { %v4292_v55 = vpop.permute.xlu1 %4291 }
 0x2e9   : > { %4793 = vmatmul.mubr.bf16.gmra.mxu1 %v4616_v20 }
 0x2ea   : > { %v4194_v15 = vpop.permute.xlu0 %4193  ;;  %9894 = vmatprep.mubr.msk.bf16.mxu1 %vm2228_vm3, %v9877_v9 }
 0x2eb   : > { %v4513_v40 = vsel %vm2228_vm3, %v9813_v38, %v4194_v15 }
 0x2ec   : > { %v4530_v16 = vsel %vm2262_vm6, %v4513_v40, %v4234_v51  ;;  %v4116_v51 = vsel %vm10792_vm12, %v9806_v27, %v4115_v1 }
 0x2ed   : > { %v4546_v46 = vsel %vm2296_vm10, %v4530_v16, %v4290_v48  ;;  %v9878_v61 = vcombine.low %v4112_v47, %v4116_v51 }
 0x2ee   : > { %v4330_v4 = vpop.permute.xlu1 %4329  ;;  %v4236_v31 = vpop.permute.xlu0 %4235 }
 0x2ef   : > { %v4562_v0 = vsel %vm2330_vm13, %v4546_v46, %v4330_v4 }
 0x2f0   : > { %v4579_v45 = vsel %vm4565_vm7, %v4562_v0, %v4370_v5 }
 0x2f1   : > { %v4596_v50 = vsel %vm4582_vm0, %v4579_v45, %v12707_v60 }
 0x2f5   : > { %v4196_v28 = vpop.permute.xlu1 %4195 }
 0x2f6   : > { %v4516_v30 = vsel %vm2228_vm3, %v9814_v57, %v4196_v28 }
 0x2f7   : > { %v4532_v48 = vsel %vm2262_vm6, %v4516_v30, %v4236_v31 }
 0x2f8   : > { %v4548_v41 = vsel %vm2296_vm10, %v4532_v48, %v4292_v55 }
 0x2f9   : > { %v4466_v42 = vpop.permute.xlu0 %4465  ;;  %v4372_v54 = vpop.permute.xlu1 %4371 }
 0x2fa   : > { %v4619_v3 = vsel %vm4599_vm5, %v4596_v50, %v4466_v42 }
 0x2fb   : > { %4801 = vmatmul.mubr.bf16.gmra.mxu1 %v4619_v3 }
 0x2fc   : > { %9895 = vmatprep.mubr.msk.bf16.mxu1 %vm2228_vm3, %v9878_v61 }
 0x301   : > { %v4332_v14 = vpop.permute.xlu0 %4331 }
 0x302   : > { %v4564_v60 = vsel %vm2330_vm13, %v4548_v41, %v4332_v14 }
 0x303   : > { %v4581_v58 = vsel %vm4565_vm7, %v4564_v60, %v4372_v54 }
 0x305   : > { %v4428_v36 = vpop.permute.xlu0 %4427 }
 0x306   : > { %v4598_v10 = vsel %vm4582_vm0, %v4581_v58, %v4428_v36 }
 0x30b   : > { %v4468_v56 = vpop.permute.xlu1 %4467 }
 0x30c   : > { %v4622_v22 = vsel %vm4599_vm5, %v4598_v10, %v4468_v56  ;;  %v4968_v10 = vld [vmem:[#allocation3 + $0x10] sm:$0xff] }
 0x30d   : > { %4809 = vmatmul.mubr.bf16.gmra.mxu1 %v4622_v22 }
 0x34e   : > { %v4754_v39 = vpop.f32.mrf.mxu1 }
 0x34f   : > { %v4817_v32 = vmax.f32 %v4754_v39, 0.0  ;;  %v4966_v39 = vld [vmem:[#allocation3] sm:$0xff] }
 0x350   : > { %v4756_v35 = vpop.f32.mrf.mxu1 }
 0x352   : > { %v4757_v17 = vpop.f32.mrf.mxu1 }
 0x353   : > { %v4818_v13 = vmax.f32 %v4757_v17, 0.0 }
 0x354   : > { %v4759_v63 = vpop.f32.mrf.mxu1 }
 0x355   : > { %v4833_v37 = vpack.c.bf16 %v4818_v13, %v4817_v32  ;;  %v4969_v32 = vld [vmem:[#allocation3 + $0x18] sm:$0xff] }
 0x357   : > { %10330 = vmatprep.mubr.msk.bf16.mxu0 %vm2203_vm2, %v4833_v37  ;;  %v4967_v37 = vld [vmem:[#allocation3 + $0x8] sm:$0xff] }
 0x358   : > { %v4762_v8 = vpop.f32.mrf.mxu1 }
 0x359   : > { %v4819_v53 = vmax.f32 %v4762_v8, 0.0 }
 0x35a   : > { %v4764_v62 = vpop.f32.mrf.mxu1 }
 0x35b   : > { %v12781_v62 = vld [vmem:[#allocation4] sm:$0xf] }
 0x35c   : > { %v4765_v49 = vpop.f32.mrf.mxu1 }
 0x35d   : > { %v4820_v23 = vmax.f32 %v4765_v49, 0.0 }
 0x35e   : > { %v4767_v7 = vpop.f32.mrf.mxu1 }
 0x35f   : > { %v4834_v18 = vpack.c.bf16 %v4820_v23, %v4819_v53  ;;  %v12783_v23 = vld [vmem:[#allocation4 + $0x48] sm:$0xf] }
 0x361   : > { %10331 = vmatmul.mubr.msk.bf16.vlgmr.msra.gmra.mxu0 %vm2203_vm2, %v4834_v18  ;;  %v5399_v18 = vshrl.u32 %v12781_v62, 16 }
 0x37b   : > { %v4770_v25 = vpop.f32.mrf.mxu1 }
 0x37c   : > { %v4821_v52 = vmax.f32 %v4770_v25, 0.0  ;;  %v5402_v25 = vshll.u32 %v12781_v62, 16 }
 0x37d   : > { %v4772_v19 = vpop.f32.mrf.mxu1 }
 0x37f   : > { %v4773_v59 = vpop.f32.mrf.mxu1 }
 0x380   : > { %v4822_v5 = vmax.f32 %v4773_v59, 0.0 }
 0x381   : > { %v4775_v21 = vpop.f32.mrf.mxu1 }
 0x382   : > { %v4835_v24 = vpack.c.bf16 %v4822_v5, %v4821_v52  ;;  %v6233_v5 = vshrl.u32 %v12783_v23, 16  ;;  %v6236_v21 = vshll.u32 %v12783_v23, 16 }
 0x383   : > { %v4778_v43 = vpop.f32.mrf.mxu1 }
 0x384   : > { %10334 = vmatprep.mubr.msk.bf16.mxu0 %vm2203_vm2, %v4835_v24  ;;  %v4823_v38 = vmax.f32 %v4778_v43, 0.0 }
 0x385   : > { %v4780_v20 = vpop.f32.mrf.mxu1 }
 0x387   : > { %v4781_v9 = vpop.f32.mrf.mxu1 }
 0x388   : > { %v4824_v55 = vmax.f32 %v4781_v9, 0.0 }
 0x389   : > { %v4783_v15 = vpop.f32.mrf.mxu1 }
 0x38a   : > { %v4836_v40 = vpack.c.bf16 %v4824_v55, %v4823_v38  ;;  %v5401_v38 = vrot.slane %v5399_v18, 4  ;;  %v5404_v55 = vrot.slane %v5402_v25, 5 }
 0x38c   : > { %10335 = vmatmul.mubr.msk.bf16.gmra.mxu0 %vm2203_vm2, %v4836_v40 }
 0x3a1   : > { %v4786_v16 = vpop.f32.mrf.mxu1 }
 0x3a2   : > { %v4825_v46 = vmax.f32 %v4786_v16, 0.0 }
 0x3a3   : > { %v4788_v26 = vpop.f32.mrf.mxu1 }
 0x3a5   : > { %v4789_v4 = vpop.f32.mrf.mxu1 }
 0x3a6   : > { %v4826_v6 = vmax.f32 %v4789_v4, 0.0  ;;  %v12789_v4 = vld [vmem:[#allocation4] sm:$0xe] }
 0x3a7   : > { %v4791_v2 = vpop.f32.mrf.mxu1 }
 0x3a8   : > { %v4837_v0 = vpack.c.bf16 %v4826_v6, %v4825_v46  ;;  %v5282_v46 = vld [vmem:[#allocation4 + $0x18] sm:$0xf] }
 0x3a9   : > { %v4794_v31 = vpop.f32.mrf.mxu1 }
 0x3aa   : > { %10338 = vmatprep.mubr.msk.bf16.mxu0 %vm2203_vm2, %v4837_v0  ;;  %v4827_v1 = vmax.f32 %v4794_v31, 0.0  ;;  %v6235_v0 = vrot.slane %v6233_v5, 4  ;;  %v6238_v31 = vrot.slane %v6236_v21, 5  ;;  %v5276_v5 = vld [vmem:[#allocation4 + $0x10] sm:$0xf] }
 0x3ab   : > { %v4796_v12 = vpop.f32.mrf.mxu1  ;;  %v5279_v21 = vld [vmem:[#allocation4 + $0x14] sm:$0x1] }
 0x3ad   : > { %v4797_v27 = vpop.f32.mrf.mxu1 }
 0x3ae   : > { %v4828_v45 = vmax.f32 %v4797_v27, 0.0 }
 0x3af   : > { %v4799_v47 = vpop.f32.mrf.mxu1 }
 0x3b0   : > { %v4838_v51 = vpack.c.bf16 %v4828_v45, %v4827_v1  ;;  %v12791_v47 = vld [vmem:[#allocation4 + $0x4] sm:$0x1] }
 0x3b2   : > { %10339 = vmatmul.mubr.msk.bf16.gmra.mxu0 %vm2203_vm2, %v4838_v51  ;;  %v5285_v51 = vld [vmem:[#allocation4 + $0x1c] sm:$0x1] }
 0x3bb   : > { %v4802_v42 = vpop.f32.mrf.mxu1 }
 0x3bc   : > { %v4829_v61 = vmax.f32 %v4802_v42, 0.0  ;;  %v5270_v42 = vld [vmem:[#allocation4 + $0x8] sm:$0xf] }
 0x3bd   : > { %v4804_v50 = vpop.f32.mrf.mxu1 }
 0x3bf   : > { %v4805_v3 = vpop.f32.mrf.mxu1 }
 0x3c0   : > { %v4830_v28 = vmax.f32 %v4805_v3, 0.0  ;;  %v9920_v3 = vrot.slane %v12789_v4, 9 }
 0x3c1   : > { %v4807_v44 = vpop.f32.mrf.mxu1 }
 0x3c2   : > { %v4839_v57 = vpack.c.bf16 %v4830_v28, %v4829_v61  ;;  %v5408_v61 = vshll.u32 %v12791_v47, 16 }
 0x3c4   : > { %10342 = vmatprep.mubr.msk.bf16.mxu0 %vm2203_vm2, %v4839_v57 }
 0x3cd   : > { %v4810_v30 = vpop.f32.mrf.mxu1 }
 0x3ce   : > { %v4831_v41 = vmax.f32 %v4810_v30, 0.0 }
 0x3cf   : > { %v4812_v48 = vpop.f32.mrf.mxu1 }
 0x3d1   : > { %v4813_v14 = vpop.f32.mrf.mxu1 }
 0x3d2   : > { %v4832_v54 = vmax.f32 %v4813_v14, 0.0  ;;  %v5273_v14 = vld [vmem:[#allocation4 + $0xc] sm:$0x1] }
 0x3d3   : > { %v4815_v60 = vpop.f32.mrf.mxu1 }
 0x3d4   : > { %v4840_v36 = vpack.c.bf16 %v4832_v54, %v4831_v41  ;;  %v6125_v41 = vld [vmem:[#allocation4 + $0x4c] sm:$0x1] }
 0x3d6   : > { %10343 = vmatmul.mubr.msk.bf16.gmra.mxu0 %vm2203_vm2, %v4840_v36 }
 0x421   : > { %v10332_v58 = vpop.f32.mrf.mxu0 }
 0x422   : > { %v4984_v56 = vadd.f32 %v10332_v58, %v4968_v10  ;;  %v5405_v58 = vor.u32 %v5404_v55, %v5401_v38  ;;  %v12799_v10 = vld [vmem:[#allocation4 + $0x50] sm:$0xf] }
 0x423   : > { %v4903_v22 = vpop.f32.mrf.mxu0  ;;  %v5511_v18 = vshrl.u32 %v12799_v10, 16 }
 0x424   : > { %5000 = vst.msk [vmem:[#allocation3 + $0x10] sm:$0xff] %vm2228_vm3, %v4984_v56  ;;  %v4982_v35 = vadd.f32 %v4966_v39, %v4903_v22  ;;  %v5288_v39 = vld [vmem:[#allocation4 + $0x20] sm:$0xf] }
 0x425   : > { %v10333_v17 = vpop.f32.mrf.mxu0 }
 0x426   : > { %4998 = vst.msk [vmem:[#allocation3] sm:$0xff] %vm2228_vm3, %v4982_v35  ;;  %v4985_v13 = vadd.f32 %v10333_v17, %v4969_v32  ;;  %v6239_v35 = vor.u32 %v6238_v31, %v6235_v0  ;;  %v6242_v17 = vshll.u32 %v6125_v41, 16 }
 0x427   : > { %v4906_v63 = vpop.f32.mrf.mxu0 }
 0x428   : > { %5001 = vst.msk [vmem:[#allocation3 + $0x18] sm:$0xff] %vm2228_vm3, %v4985_v13  ;;  %v4983_v8 = vadd.f32 %v4967_v37, %v4906_v63  ;;  %v5291_v63 = vld [vmem:[#allocation4 + $0x24] sm:$0x1] }
 0x42a   : > { %4999 = vst.msk [vmem:[#allocation3 + $0x8] sm:$0xff] %vm2228_vm3, %v4983_v8 }
 0x42b   : > { %v5016_v49 = vld [vmem:[#allocation3 + $0x10] sm:$0xff] }
 0x42c   : > { %v5032_v53 = vmax.f32 %v5016_v49, 0.0  ;;  %v5672_v49 = vrot.slane %v12791_v47, 5 }
 0x42d   : > { %v5014_v7 = vld [vmem:[#allocation3] sm:$0xff] }
 0x42e   : > { %v10241_v19 = vpack.c.bf16 %v5032_v53, %v5032_v53  ;;  %v5030_v59 = vmax.f32 %v5014_v7, 0.0  ;;  %v12806_v53 = vld [vmem:[#allocation4 + $0x54] sm:$0x1]  ;;  %v12808_v7 = vld [vmem:[#allocation4 + $0x50] sm:$0xe] }
 0x42f   : > { %v5017_v52 = vld [vmem:[#allocation3 + $0x18] sm:$0xff] }
 0x430   : > { %v5127_v24 = vshrl.u32 %v10241_v19, 16  ;;  %v10239_v43 = vpack.c.bf16 %v5030_v59, %v5030_v59  ;;  %v5033_v20 = vmax.f32 %v5017_v52, 0.0  ;;  %v5130_v40 = vshll.u32 %v10241_v19, 16 }
 0x431   : > { %v5015_v9 = vld [vmem:[#allocation3 + $0x8] sm:$0xff] }
 0x432   : > { %v5129_v15 = vrot.slane %v5127_v24, 7  ;;  %v5111_v16 = vshrl.u32 %v10239_v43, 16  ;;  %v10242_v26 = vpack.c.bf16 %v5033_v20, %v5033_v20  ;;  %v5114_v6 = vshll.u32 %v10239_v43, 16 }
 0x433   : > { %v5031_v2 = vmax.f32 %v5015_v9, 0.0  ;;  %v12815_v24 = vrot.slane %v5405_v58, 4  ;;  %v12817_v43 = vrot.slane %v5408_v61, 5  ;;  %v12819_v20 = vrot.slane %v6239_v35, 4 }
 0x434   : > { %v5132_v12 = vor.u32 %v5130_v40, %v5129_v15  ;;  %v5133_v27 = vrot.slane %v5129_v15, 4  ;;  %v5113_v1 = vrot.slane %v5111_v16, 7  ;;  %v5135_v45 = vshrl.u32 %v10242_v26, 16 }
 0x435   : > { %v10240_v50 = vpack.c.bf16 %v5031_v2, %v5031_v2  ;;  %v5138_v60 = vshll.u32 %v10242_v26, 16  ;;  %v12821_v9 = vrot.slane %v6242_v17, 5  ;;  %v12836_v2 = vrot.slane %v5511_v18, 4 }
 0x436   : > { %v5283_v44 = vsel %vm10665_vm8, %v5132_v12, %v5282_v46  ;;  %v5286_v57 = vsel %vm11723_vm9, %v5133_v27, %v5285_v51  ;;  %v5116_v30 = vor.u32 %v5114_v6, %v5113_v1  ;;  %v5117_v48 = vrot.slane %v5113_v1, 4 }
 0x437   : > { %5284 = vst [vmem:[#allocation4 + $0x18] sm:$0xf] %v5283_v44  ;;  %5287 = vst [vmem:[#allocation4 + $0x1c] sm:$0x1] %v5286_v57  ;;  %v5137_v54 = vrot.slane %v5135_v45, 7  ;;  %v5119_v36 = vshrl.u32 %v10240_v50, 16  ;;  %v5673_v45 = vsel %vm10792_vm12, %v9920_v3, %v5672_v49  ;;  %v5411_v49 = vsel %vm10864_vm15, %v12815_v24, %v12817_v43 }
 0x438   : > { %v5271_v56 = vsel %vm10665_vm8, %v5116_v30, %v5270_v42  ;;  %v5274_v22 = vsel %vm11723_vm9, %v5117_v48, %v5273_v14  ;;  %v5122_v8 = vshll.u32 %v10240_v50, 16 }
 0x439   : > { %5272 = vst [vmem:[#allocation4 + $0x8] sm:$0xf] %v5271_v56  ;;  %5275 = vst [vmem:[#allocation4 + $0xc] sm:$0x1] %v5274_v22  ;;  %v5140_v32 = vor.u32 %v5138_v60, %v5137_v54  ;;  %v5141_v13 = vrot.slane %v5137_v54, 4  ;;  %v5121_v37 = vrot.slane %v5119_v36, 7 }
 0x43a   : > { %v4970_v36 = vld [vmem:[#allocation3 + $0x20] sm:$0xff] }
 0x43b   : > { %v5289_v25 = vsel %vm10665_vm8, %v5140_v32, %v5288_v39  ;;  %v5292_v19 = vsel %vm11723_vm9, %v5141_v13, %v5291_v63  ;;  %v5124_v59 = vor.u32 %v5122_v8, %v5121_v37  ;;  %v5125_v52 = vrot.slane %v5121_v37, 4 }
 0x43c   : > { %5290 = vst [vmem:[#allocation4 + $0x20] sm:$0xf] %v5289_v25  ;;  %5293 = vst [vmem:[#allocation4 + $0x24] sm:$0x1] %v5292_v19 }
 0x43d   : > { %v5277_v38 = vsel %vm10665_vm8, %v5124_v59, %v5276_v5  ;;  %v5280_v55 = vsel %vm11723_vm9, %v5125_v52, %v5279_v21 }
 0x43e   : > { %5278 = vst [vmem:[#allocation4 + $0x10] sm:$0xf] %v5277_v38  ;;  %5281 = vst [vmem:[#allocation4 + $0x14] sm:$0x1] %v5280_v55  ;;  %v12829_v16 = vld [vmem:[#allocation4 + $0x18] sm:$0xf] }
 0x43f   : > { %v12831_v26 = vld [vmem:[#allocation4 + $0x1c] sm:$0x1]  ;;  %v6359_v4 = vld [vmem:[#allocation4 + $0x18] sm:$0xe]  ;;  %v5795_v46 = vshrl.u32 %v12829_v16, 16  ;;  %v5798_v44 = vshll.u32 %v12829_v16, 16 }
 0x440   : > { %v12834_v6 = vld [vmem:[#allocation4 + $0x18] sm:$0xf]  ;;  %v12840_v12 = vld [vmem:[#allocation4 + $0x8] sm:$0xf]  ;;  %v12842_v27 = vld [vmem:[#allocation4 + $0xc] sm:$0x1] }
 0x441   : > { %v5623_v1 = vld [vmem:[#allocation4 + $0x8] sm:$0xe]  ;;  %v5676_v51 = vrot.slane %v12842_v27, 5  ;;  %v9953_v42 = vrot.slane %v6359_v4, 9  ;;  %v6412_v50 = vrot.slane %v12831_v26, 5  ;;  %v5767_v57 = vshrl.u32 %v12840_v12, 16 }
 0x442   : > { %v9921_v47 = vrot.slane %v5623_v1, 9  ;;  %v12848_v61 = vld [vmem:[#allocation4 + $0xc] sm:$0x1]  ;;  %v5770_v30 = vshll.u32 %v12840_v12, 16  ;;  %v5990_v48 = vld [vmem:[#allocation4 + $0x8] sm:$0xe] }
 0x443   : > { %v6040_v14 = vrot.slane %v12848_v61, 5  ;;  %v12854_v41 = vld [vmem:[#allocation4 + $0x20] sm:$0xf]  ;;  %v9936_v54 = vrot.slane %v5990_v48, 9  ;;  %v6149_v60 = vshrl.u32 %v12834_v6, 16  ;;  %v5422_v17 = vshll.u32 %v12842_v27, 16 }
 0x444   : > { %v5677_v3 = vsel %vm10792_vm12, %v9921_v47, %v5676_v51  ;;  %v9993_v58 = vcombine.low %v12829_v16, %v12854_v41  ;;  %v5809_v56 = vshrl.u32 %v12854_v41, 16  ;;  %v5812_v22 = vshll.u32 %v12854_v41, 16  ;;  %v12864_v39 = vld [vmem:[#allocation4 + $0x1c] sm:$0x1]  ;;  %v5625_v35 = vld [vmem:[#allocation4 + $0x18] sm:$0xe] }
 0x445   : > { %v12867_v32 = vld [vmem:[#allocation4 + $0x10] sm:$0xf]  ;;  %v12869_v13 = vld [vmem:[#allocation4 + $0x14] sm:$0x1]  ;;  %v6413_v37 = vsel %vm10792_vm12, %v9953_v42, %v6412_v50  ;;  %v12873_v8 = vld [vmem:[#allocation4 + $0x1c] sm:$0x1]  ;;  %v9984_v21 = vcombine.low %v5673_v45, %v5677_v3  ;;  %v6041_v4 = vsel %vm10792_vm12, %v9936_v54, %v6040_v14 }
 0x446   : > { %v6358_v63 = vld [vmem:[#allocation4 + $0x10] sm:$0xe]  ;;  %6632 = vrot.lane.b32.xlu1 %v9993_v58, %s10573_s9  ;;  %v9992_v25 = vcombine.low %v12840_v12, %v12867_v32  ;;  %v5781_v19 = vshrl.u32 %v12867_v32, 16  ;;  %v5784_v59 = vshll.u32 %v12867_v32, 16  ;;  %v12888_v5 = vld [vmem:[#allocation4 + $0x14] sm:$0x1] }
 0x447   : > { %v9952_v52 = vrot.slane %v6358_v63, 9  ;;  %v6408_v38 = vrot.slane %v12869_v13, 5  ;;  %v5991_v55 = vld [vmem:[#allocation4 + $0x10] sm:$0xe]  ;;  %v6044_v27 = vrot.slane %v12888_v5, 5  ;;  %v9923_v54 = vrot.slane %v5625_v35, 9 }
 0x448   : > { %v12894_v1 = vld [vmem:[#allocation4 + $0x10] sm:$0xf]  ;;  %6630 = vrot.lane.b32.xlu0 %v9992_v25, %s10573_s9  ;;  %v9937_v47 = vrot.slane %v5991_v55, 9  ;;  %v12901_v50 = vld [vmem:[#allocation4 + $0x14] sm:$0x1]  ;;  %v5684_v58 = vrot.slane %v12864_v39, 5 }
 0x449   : > { %v10016_v51 = vcombine.low %v12894_v1, %v12834_v6  ;;  %v6135_v42 = vshrl.u32 %v12894_v1, 16  ;;  %v6138_v45 = vshll.u32 %v12894_v1, 16  ;;  %v6409_v48 = vsel %vm10792_vm12, %v9952_v52, %v6408_v38  ;;  %v5624_v14 = vld [vmem:[#allocation4 + $0x10] sm:$0xe]  ;;  %v12910_v55 = vld [vmem:[#allocation4 + $0x24] sm:$0x1] }
 0x44a   : > { %v5680_v3 = vrot.slane %v12901_v50, 5  ;;  %6574 = vrot.lane.b32.xlu1 %v9984_v21, %s10578_s14  ;;  %v10032_v32 = vcombine.low %v6409_v48, %v6413_v37  ;;  %v6045_v63 = vsel %vm10792_vm12, %v9937_v47, %v6044_v27  ;;  %v9922_v25 = vrot.slane %v5624_v14, 9  ;;  %v5992_v18 = vld [vmem:[#allocation4 + $0x18] sm:$0xe]  ;;  %v5993_v38 = vld [vmem:[#allocation4 + $0x20] sm:$0xe] }
 0x44b   : > { %v6048_v15 = vrot.slane %v12873_v8, 5  ;;  %v10008_v40 = vcombine.low %v6041_v4, %v6045_v63  ;;  %v5685_v52 = vsel %vm10792_vm12, %v9923_v54, %v5684_v58  ;;  %v9938_v35 = vrot.slane %v5992_v18, 9  ;;  %v12916_v0 = vld [vmem:[#allocation4 + $0x8] sm:$0xf]  ;;  %v4972_v21 = vld [vmem:[#allocation3 + $0x30] sm:$0xff] }
 0x44c   : > { %v6052_v31 = vrot.slane %v12910_v55, 5  ;;  %v10336_v37 = vpop.f32.mrf.mxu0  ;;  %10049 = vmatprep.mubr.msk.bf16.mxu0 %vm2228_vm3, %v10032_v32  ;;  %v5681_v27 = vsel %vm10792_vm12, %v9922_v25, %v5680_v3  ;;  %v9939_v47 = vrot.slane %v5993_v38, 9  ;;  %v5413_v48 = vshrl.u32 %v12916_v0, 16 }
 0x44d   : > { %v5416_v4 = vshll.u32 %v12916_v0, 16  ;;  %v4988_v14 = vadd.f32 %v10336_v37, %v4972_v21  ;;  %6710 = vrot.lane.b32.xlu0 %v10008_v40, %s10580_s30  ;;  %v9985_v18 = vcombine.low %v5681_v27, %v5685_v52  ;;  %v6049_v54 = vsel %vm10792_vm12, %v9938_v35, %v6048_v15  ;;  %v4973_v37 = vld [vmem:[#allocation3 + $0x38] sm:$0xff] }
 0x44e   : > { %v5424_v58 = vrot.slane %v5422_v17, 5  ;;  %v4919_v63 = vpop.f32.mrf.mxu0  ;;  %6766 = vrot.lane.b32.xlu1 %v10016_v51, %s10581_s8  ;;  %v6053_v3 = vsel %vm10792_vm12, %v9939_v47, %v6052_v31  ;;  %v5415_v32 = vrot.slane %v5413_v48, 4  ;;  %v5769_v38 = vrot.slane %v5767_v57, 4  ;;  %v4971_v48 = vld [vmem:[#allocation3 + $0x28] sm:$0xff] }
 0x44f   : > { %v5418_v25 = vrot.slane %v5416_v4, 5  ;;  %5004 = vst.msk [vmem:[#allocation3 + $0x30] sm:$0xff] %vm2228_vm3, %v4988_v14  ;;  %v4986_v40 = vadd.f32 %v4970_v36, %v4919_v63  ;;  %v10009_v52 = vcombine.low %v6049_v54, %v6053_v3  ;;  %v5772_v15 = vrot.slane %v5770_v30, 5 }
 0x450   : > { %v5776_v17 = vshll.u32 %v12848_v61, 16  ;;  %v10337_v35 = vpop.f32.mrf.mxu0  ;;  %v5783_v21 = vrot.slane %v5781_v19, 4  ;;  %v5786_v27 = vrot.slane %v5784_v59, 5  ;;  %v5790_v31 = vshll.u32 %v12888_v5, 16 }
 0x451   : > { %v5419_v51 = vor.u32 %v5418_v25, %v5415_v32  ;;  %5002 = vst.msk [vmem:[#allocation3 + $0x20] sm:$0xff] %vm2228_vm3, %v4986_v40  ;;  %v4989_v47 = vadd.f32 %v10337_v35, %v4973_v37  ;;  %6576 = vrot.lane.b32.xlu0 %v9985_v18, %s10578_s14  ;;  %v5773_v57 = vor.u32 %v5772_v15, %v5769_v38  ;;  %v5797_v12 = vrot.slane %v5795_v46, 4  ;;  %v12947_v46 = vld [vmem:[#allocation4 + $0x10] sm:$0xf]  ;;  %v12964_v40 = vld [vmem:[#allocation4 + $0x18] sm:$0xf] }
 0x452   : > { %v5778_v36 = vrot.slane %v5776_v17, 5  ;;  %v4922_v30 = vpop.f32.mrf.mxu0  ;;  %6712 = vrot.lane.b32.xlu1 %v10009_v52, %s10580_s30  ;;  %v5787_v4 = vor.u32 %v5786_v27, %v5783_v21  ;;  %v5792_v19 = vrot.slane %v5790_v31, 5  ;;  %v5800_v59 = vrot.slane %v5798_v44, 5 }
 0x453   : > { %v5420_v61 = vrot.slane %v5419_v51, 4  ;;  %5005 = vst.msk [vmem:[#allocation3 + $0x38] sm:$0xff] %vm2228_vm3, %v4989_v47  ;;  %v4987_v5 = vadd.f32 %v4971_v48, %v4922_v30  ;;  %v5774_v14 = vrot.slane %v5773_v57, 4  ;;  %v5804_v18 = vshll.u32 %v12873_v8, 16 }
 0x454   : > { %v5811_v54 = vrot.slane %v5809_v56, 4  ;;  %v5788_v3 = vrot.slane %v5787_v4, 4  ;;  %v5801_v32 = vor.u32 %v5800_v59, %v5797_v12  ;;  %v5814_v16 = vrot.slane %v5812_v22, 5  ;;  %v10479_v59 = vld [vmem:[%s15038_s3 + $0x38] sm:$0xff]  }
 0x455   : > { %v5425_v63 = vsel %vm10864_vm15, %v5420_v61, %v5424_v58  ;;  %5003 = vst.msk [vmem:[#allocation3 + $0x28] sm:$0xff] %vm2228_vm3, %v4987_v5  ;;  %v5779_v56 = vsel %vm10864_vm15, %v5774_v14, %v5778_v36  ;;  %v5806_v8 = vrot.slane %v5804_v18, 5  ;;  %v5818_v25 = vshll.u32 %v12910_v55, 16  ;;  %7071 = vmatpush1.bf16.msra.mxu0 %v10479_v59 }
 0x456   : > { %v9976_v44 = vcombine.low %v5411_v49, %v5425_v63  ;;  %v5020_v58 = vld [vmem:[#allocation3 + $0x30] sm:$0xff]  ;;  %v5793_v38 = vsel %vm10864_vm15, %v5788_v3, %v5792_v19  ;;  %v5802_v41 = vrot.slane %v5801_v32, 4  ;;  %v5815_v22 = vor.u32 %v5814_v16, %v5811_v54  ;;  %7072 = vmatprep.subr.bf16.mxu0 %v15103_v34 }
 0x457   : > { %v5427_v52 = vshrl.u32 %v12947_v46, 16  ;;  %v5036_v15 = vmax.f32 %v5020_v58, 0.0  ;;  %v10000_v24 = vcombine.low %v5779_v56, %v5793_v38  ;;  %v5820_v43 = vrot.slane %v5818_v25, 5 }
 0x458   : > { %6534 = vrot.lane.b32.xlu0 %v9976_v44, %s10575_s11  ;;  %v5430_v49 = vshll.u32 %v12947_v46, 16  ;;  %v5018_v17 = vld [vmem:[#allocation3 + $0x20] sm:$0xff]  ;;  %v5807_v55 = vsel %vm10864_vm15, %v5802_v41, %v5806_v8  ;;  %v5816_v35 = vrot.slane %v5815_v22, 4  ;;  %v5436_v51 = vshll.u32 %v12901_v50, 16 }
 0x459   : > { %v5429_v37 = vrot.slane %v5427_v52, 4  ;;  %v10245_v21 = vpack.c.bf16 %v5036_v15, %v5036_v15  ;;  %v5034_v27 = vmax.f32 %v5018_v17, 0.0  ;;  %6670 = vrot.lane.b32.xlu1 %v10000_v24, %s10576_s12  ;;  %v5441_v47 = vshrl.u32 %v12964_v40, 16  ;;  %v10480_v52 = vld [vmem:[%s15038_s3 + $0x30] sm:$0xff]   ;;  %v5306_v15 = vld [vmem:[#allocation4 + $0x38] sm:$0xf] }
 0x45a   : > { %v5432_v31 = vrot.slane %v5430_v49, 5  ;;  %v5021_v57 = vld [vmem:[#allocation3 + $0x38] sm:$0xff]  ;;  %v5821_v36 = vsel %vm10864_vm15, %v5816_v35, %v5820_v43  ;;  %v5438_v12 = vrot.slane %v5436_v51, 5  ;;  %v5444_v30 = vshll.u32 %v12964_v40, 16  ;;  %7073 = vmatpush1.bf16.msra.mxu0 %v10480_v52 }
 0x45b   : > { %v5450_v48 = vshll.u32 %v12864_v39, 16  ;;  %v5159_v61 = vshrl.u32 %v10245_v21, 16  ;;  %v5162_v4 = vshll.u32 %v10245_v21, 16  ;;  %v10243_v19 = vpack.c.bf16 %v5034_v27, %v5034_v27  ;;  %v5309_v24 = vld [vmem:[#allocation4 + $0x3c] sm:$0x1]  ;;  %7074 = vmatprep.subr.bf16.mxu0 %v15103_v34 }
 0x45c   : > { %v5037_v50 = vmax.f32 %v5021_v57, 0.0  ;;  %v5019_v5 = vld [vmem:[#allocation3 + $0x28] sm:$0xff]  ;;  %v10001_v14 = vcombine.low %v5807_v55, %v5821_v36  ;;  %v5433_v18 = vor.u32 %v5432_v31, %v5429_v37  ;;  %v5443_v54 = vrot.slane %v5441_v47, 4 }
 0x45d   : > { %v5446_v63 = vrot.slane %v5444_v30, 5  ;;  %v5161_v3 = vrot.slane %v5159_v61, 7  ;;  %v5143_v32 = vshrl.u32 %v10243_v19, 16  ;;  %v5146_v16 = vshll.u32 %v10243_v19, 16  ;;  %v5294_v27 = vld [vmem:[#allocation4 + $0x28] sm:$0xf] }
 0x45e   : > { %v10246_v44 = vpack.c.bf16 %v5037_v50, %v5037_v50  ;;  %v5035_v56 = vmax.f32 %v5019_v5, 0.0  ;;  %6672 = vrot.lane.b32.xlu0 %v10001_v14, %s10576_s12  ;;  %v5434_v39 = vrot.slane %v5433_v18, 4  ;;  %v5452_v25 = vrot.slane %v5450_v48, 5  ;;  %v5297_v31 = vld [vmem:[#allocation4 + $0x2c] sm:$0x1] }
 0x45f   : > { %v5447_v8 = vor.u32 %v5446_v63, %v5443_v54  ;;  %v5164_v58 = vor.u32 %v5162_v4, %v5161_v3  ;;  %v5165_v38 = vrot.slane %v5161_v3, 4  ;;  %v5145_v41 = vrot.slane %v5143_v32, 7  ;;  %v5312_v61 = vld [vmem:[#allocation4 + $0x40] sm:$0xf]  ;;  %v5315_v5 = vld [vmem:[#allocation4 + $0x44] sm:$0x1] }
 0x460   : > { %v5167_v22 = vshrl.u32 %v10246_v44, 16  ;;  %v5170_v43 = vshll.u32 %v10246_v44, 16  ;;  %v10244_v49 = vpack.c.bf16 %v5035_v56, %v5035_v56  ;;  %v5439_v17 = vsel %vm10864_vm15, %v5434_v39, %v5438_v12  ;;  %v5300_v54 = vld [vmem:[#allocation4 + $0x30] sm:$0xf]  ;;  %v5303_v39 = vld [vmem:[#allocation4 + $0x34] sm:$0x1] }
 0x461   : > { %v5448_v55 = vrot.slane %v5447_v8, 4  ;;  %v5307_v35 = vsel %vm10665_vm8, %v5164_v58, %v5306_v15  ;;  %v5310_v37 = vsel %vm11723_vm9, %v5165_v38, %v5309_v24  ;;  %v5148_v51 = vor.u32 %v5146_v16, %v5145_v41  ;;  %v13014_v8 = vld [vmem:[#allocation4 + $0x20] sm:$0xf] }
 0x462   : > { %v5149_v21 = vrot.slane %v5145_v41, 4  ;;  %5308 = vst [vmem:[#allocation4 + $0x38] sm:$0xf] %v5307_v35  ;;  %5311 = vst [vmem:[#allocation4 + $0x3c] sm:$0x1] %v5310_v37  ;;  %v5169_v47 = vrot.slane %v5167_v22, 7 }
 0x463   : > { %v5151_v57 = vshrl.u32 %v10244_v49, 16  ;;  %v5154_v36 = vshll.u32 %v10244_v49, 16  ;;  %v5453_v12 = vsel %vm10864_vm15, %v5448_v55, %v5452_v25  ;;  %v5295_v30 = vsel %vm10665_vm8, %v5148_v51, %v5294_v27  ;;  %v13016_v25 = vld [vmem:[#allocation4 + $0x24] sm:$0x1]  ;;  %v4977_v35 = vld [vmem:[#allocation3 + $0x58] sm:$0xff] }
 0x464   : > { %v5298_v48 = vsel %vm11723_vm9, %v5149_v21, %v5297_v31  ;;  %v9977_v4 = vcombine.low %v5439_v17, %v5453_v12  ;;  %v6137_v19 = vrot.slane %v6135_v42, 4  ;;  %5296 = vst [vmem:[#allocation4 + $0x28] sm:$0xf] %v5295_v30  ;;  %v5172_v50 = vor.u32 %v5170_v43, %v5169_v47 }
 0x465   : > { %5299 = vst [vmem:[#allocation4 + $0x2c] sm:$0x1] %v5298_v48  ;;  %v5173_v59 = vrot.slane %v5169_v47, 4  ;;  %v5153_v14 = vrot.slane %v5151_v57, 7  ;;  %v6140_v18 = vrot.slane %v6138_v45, 5  ;;  %v6144_v63 = vshll.u32 %v12869_v13, 16 }
 0x466   : > { %6536 = vrot.lane.b32.xlu1 %v9977_v4, %s10575_s11  ;;  %v6151_v3 = vrot.slane %v6149_v60, 4  ;;  %v15110_v32 = vshll.u32 %v12834_v6, 16  ;;  %v6158_v16 = vshll.u32 %v12831_v26, 16  ;;  %v5313_v44 = vsel %vm10665_vm8, %v5172_v50, %v5312_v61  ;;  %v5626_v6 = vld [vmem:[#allocation4 + $0x20] sm:$0xe] }
 0x467   : > { %v5316_v1 = vsel %vm11723_vm9, %v5173_v59, %v5315_v5  ;;  %v5156_v45 = vor.u32 %v5154_v36, %v5153_v14  ;;  %v5157_v56 = vrot.slane %v5153_v14, 4  ;;  %5314 = vst [vmem:[#allocation4 + $0x40] sm:$0xf] %v5313_v44  ;;  %v6141_v13 = vor.u32 %v6140_v18, %v6137_v19 }
 0x468   : > { %v6154_v42 = vrot.slane %v15110_v32, 5  ;;  %5317 = vst [vmem:[#allocation4 + $0x44] sm:$0x1] %v5316_v1  ;;  %v15111_v26 = vshll.u32 %v12799_v10, 16  ;;  %v15112_v38 = vshll.u32 %v12806_v53, 16  ;;  %v6146_v15 = vrot.slane %v6144_v63, 5 }
 0x469   : > { %v5301_v22 = vsel %vm10665_vm8, %v5156_v45, %v5300_v54  ;;  %v5304_v52 = vsel %vm11723_vm9, %v5157_v56, %v5303_v39  ;;  %v6160_v24 = vrot.slane %v6158_v16, 5  ;;  %v6142_v43 = vrot.slane %v6141_v13, 4  ;;  %v13032_v55 = vld [vmem:[#allocation4 + $0x38] sm:$0xf]  ;;  %v10481_v45 = vld [vmem:[%s15038_s3 + $0x28] sm:$0xff]  }
 0x46a   : > { %v6155_v60 = vor.u32 %v6154_v42, %v6151_v3  ;;  %v13020_v58 = vrot.slane %v15111_v26, 5  ;;  %v13024_v41 = vrot.slane %v15112_v38, 5  ;;  %5302 = vst [vmem:[#allocation4 + $0x30] sm:$0xf] %v5301_v22  ;;  %5305 = vst [vmem:[#allocation4 + $0x34] sm:$0x1] %v5304_v52  ;;  %7075 = vmatpush1.bf16.msra.mxu0 %v10481_v45 }
 0x46b   : > { %v6163_v10 = vshrl.u32 %v13014_v8, 16  ;;  %v6166_v17 = vshll.u32 %v13014_v8, 16  ;;  %v9924_v51 = vrot.slane %v5626_v6, 9  ;;  %v5688_v21 = vrot.slane %v13016_v25, 5  ;;  %v13037_v27 = vld [vmem:[#allocation4 + $0x38] sm:$0xf]  ;;  %7076 = vmatprep.subr.bf16.mxu0 %v15103_v34 }
 0x46c   : > { %v6156_v49 = vrot.slane %v6155_v60, 4  ;;  %v6147_v31 = vsel %vm10864_vm15, %v6142_v43, %v6146_v15  ;;  %v13043_v57 = vld [vmem:[#allocation4 + $0x28] sm:$0xf]  ;;  %v13045_v36 = vld [vmem:[#allocation4 + $0x2c] sm:$0x1]  ;;  %v15113_v30 = vrot.slane %v12806_v53, 5 }
 0x46d   : > { %v5627_v12 = vld [vmem:[#allocation4 + $0x28] sm:$0xe]  ;;  %v15114_v48 = vrot.slane %v12808_v7, 9  ;;  %v6177_v50 = vshrl.u32 %v13043_v57, 16  ;;  %v6180_v59 = vshll.u32 %v13043_v57, 16  ;;  %v5692_v7 = vrot.slane %v13045_v36, 5 }
 0x46e   : > { %v6161_v47 = vsel %vm10864_vm15, %v6156_v49, %v6160_v24  ;;  %v13059_v5 = vld [vmem:[#allocation4 + $0x28] sm:$0xf]  ;;  %v9925_v53 = vrot.slane %v5627_v12, 9  ;;  %v10017_v3 = vcombine.low %v13014_v8, %v13043_v57  ;;  %v13069_v32 = vld [vmem:[#allocation4 + $0x40] sm:$0xf]  ;;  %v5689_v60 = vsel %vm10792_vm12, %v9924_v51, %v5688_v21  ;;  %v4976_v22 = vld [vmem:[#allocation3 + $0x50] sm:$0xff] }
 0x46f   : > { %v13053_v61 = vsel %vm10792_vm12, %v15114_v48, %v15113_v30  ;;  %v10024_v19 = vcombine.low %v6147_v31, %v6161_v47  ;;  %v5994_v63 = vld [vmem:[#allocation4 + $0x28] sm:$0xe]  ;;  %v13071_v42 = vld [vmem:[#allocation4 + $0x40] sm:$0xf]  ;;  %v13075_v1 = vld [vmem:[#allocation4 + $0x2c] sm:$0x1]  ;;  %v9995_v56 = vcombine.low %v13032_v55, %v13069_v32 }
 0x470   : > { %v13085_v6 = vld [vmem:[#allocation4 + $0x3c] sm:$0x1]  ;;  %v13087_v26 = vld [vmem:[#allocation4 + $0x44] sm:$0x1]  ;;  %v5996_v38 = vld [vmem:[#allocation4 + $0x38] sm:$0xe]  ;;  %v10019_v52 = vcombine.low %v13071_v42, %v12783_v23  ;;  %v5693_v43 = vsel %vm10792_vm12, %v9925_v53, %v5692_v7 }
 0x471   : > { %6806 = vrot.lane.b32.xlu0 %v10024_v19, %s10582_s15  ;;  %v13095_v49 = vld [vmem:[#allocation4 + $0x30] sm:$0xf]  ;;  %6636 = vrot.lane.b32.xlu1 %v9995_v56, %s10573_s9  ;;  %v9986_v51 = vcombine.low %v5689_v60, %v5693_v43  ;;  %v13104_v12 = vld [vmem:[#allocation4 + $0x34] sm:$0x1]  ;;  %v4974_v19 = vld [vmem:[#allocation3 + $0x40] sm:$0xff]  ;;  %v9940_v60 = vrot.slane %v5994_v63, 9 }
 0x472   : > { %v13097_v31 = vld [vmem:[#allocation4 + $0x30] sm:$0xf]  ;;  %v9994_v21 = vcombine.low %v13059_v5, %v13095_v49  ;;  %v10340_v48 = vpop.f32.mrf.mxu0  ;;  %v5997_v43 = vld [vmem:[#allocation4 + $0x40] sm:$0xe]  ;;  %v6056_v4 = vrot.slane %v13075_v1, 5  ;;  %v6060_v16 = vrot.slane %v13104_v12, 5 }
 0x473   : > { %v5995_v30 = vld [vmem:[#allocation4 + $0x30] sm:$0xe]  ;;  %v10018_v53 = vcombine.low %v13097_v31, %v13037_v27  ;;  %v4992_v14 = vadd.f32 %v10340_v48, %v4976_v22  ;;  %v6120_v23 = vld [vmem:[#allocation4 + $0x24] sm:$0x1]  ;;  %v9942_v63 = vrot.slane %v5996_v38, 9  ;;  %v6064_v47 = vrot.slane %v13085_v6, 5 }
 0x474   : > { %v9941_v44 = vrot.slane %v5995_v30, 9  ;;  %v10482_v7 = vld [vmem:[%s15038_s3 + $0x20] sm:$0xff]   ;;  %v4935_v56 = vpop.f32.mrf.mxu0  ;;  %v9943_v54 = vrot.slane %v5997_v43, 9  ;;  %v6068_v18 = vrot.slane %v13087_v26, 5  ;;  %v13123_v22 = vld [vmem:[#allocation4 + $0x3c] sm:$0x1]  ;;  %v6057_v48 = vsel %vm10792_vm12, %v9940_v60, %v6056_v4 }
 0x475   : > { %6768 = vrot.lane.b32.xlu0 %v10017_v3, %s10581_s8  ;;  %v13116_v3 = vld [vmem:[#allocation4 + $0x34] sm:$0x1]  ;;  %5008 = vst.msk [vmem:[#allocation3 + $0x50] sm:$0xff] %vm2228_vm3, %v4992_v14  ;;  %v4990_v30 = vadd.f32 %v4974_v19, %v4935_v56  ;;  %6578 = vrot.lane.b32.xlu1 %v9986_v51, %s10578_s14  ;;  %v5628_v38 = vld [vmem:[#allocation4 + $0x30] sm:$0xe]  ;;  %v6065_v45 = vsel %vm10792_vm12, %v9942_v63, %v6064_v47  ;;  %v5700_v60 = vrot.slane %v13123_v22, 5 }
 0x476   : > { %v6061_v13 = vsel %vm10792_vm12, %v9941_v44, %v6060_v16  ;;  %v5629_v39 = vld [vmem:[#allocation4 + $0x38] sm:$0xe]  ;;  %v5696_v43 = vrot.slane %v13116_v3, 5  ;;  %v10341_v37 = vpop.f32.mrf.mxu0  ;;  %v6069_v4 = vsel %vm10792_vm12, %v9943_v54, %v6068_v18  ;;  %v9926_v51 = vrot.slane %v5628_v38, 9  ;;  %v4975_v44 = vld [vmem:[#allocation3 + $0x48] sm:$0xff]  ;;  %7077 = vmatpush1.bf16.msra.mxu0 %v10482_v7 }
 0x477   : > { %v10010_v14 = vcombine.low %v6057_v48, %v6061_v13  ;;  %5006 = vst.msk [vmem:[#allocation3 + $0x40] sm:$0xff] %vm2228_vm3, %v4990_v30  ;;  %v4993_v16 = vadd.f32 %v10341_v37, %v4977_v35  ;;  %v10011_v19 = vcombine.low %v6065_v45, %v6069_v4  ;;  %v9927_v56 = vrot.slane %v5629_v39, 9  ;;  %v6121_v24 = vld [vmem:[#allocation4 + $0x2c] sm:$0x1]  ;;  %v5370_v47 = vld [vmem:[#allocation4 + $0x20] sm:$0xf]  ;;  %7078 = vmatprep.subr.bf16.mxu0 %v15103_v34 }
 0x478   : > { %v4938_v15 = vpop.f32.mrf.mxu0  ;;  %v5697_v13 = vsel %vm10792_vm12, %v9926_v51, %v5696_v43  ;;  %v6168_v18 = vrot.slane %v6166_v17, 5  ;;  %v6172_v54 = vshll.u32 %v6120_v23, 16  ;;  %v10484_v35 = vld [vmem:[%s15038_s3 + $0x18] sm:$0xff]   ;;  %v6182_v8 = vrot.slane %v6180_v59, 5  ;;  %v5371_v17 = vld [vmem:[#allocation4 + $0x28] sm:$0xf] }
 0x479   : > { %6772 = vrot.lane.b32.xlu0 %v10019_v52, %s10581_s8  ;;  %v6165_v52 = vrot.slane %v6163_v10, 4  ;;  %5009 = vst.msk [vmem:[#allocation3 + $0x58] sm:$0xff] %vm2228_vm3, %v4993_v16  ;;  %v4991_v37 = vadd.f32 %v4975_v44, %v4938_v15  ;;  %6770 = vrot.lane.b32.xlu1 %v10018_v53, %s10581_s8  ;;  %v5701_v39 = vsel %vm10792_vm12, %v9927_v56, %v5700_v60  ;;  %v6179_v10 = vrot.slane %v6177_v50, 4 }
 0x47a   : > { %v9987_v15 = vcombine.low %v5697_v13, %v5701_v39  ;;  %v6174_v53 = vrot.slane %v6172_v54, 5  ;;  %v6186_v7 = vshll.u32 %v6121_v24, 16  ;;  %v5455_v30 = vshrl.u32 %v5370_v47, 16  ;;  %7079 = vmatpush1.bf16.msra.mxu0 %v10484_v35 }
 0x47b   : > { %v6169_v23 = vor.u32 %v6168_v18, %v6165_v52  ;;  %5007 = vst.msk [vmem:[#allocation3 + $0x48] sm:$0xff] %vm2228_vm3, %v4991_v37  ;;  %v6183_v63 = vor.u32 %v6182_v8, %v6179_v10  ;;  %v5458_v50 = vshll.u32 %v5370_v47, 16  ;;  %v5464_v57 = vshll.u32 %v13016_v25, 16  ;;  %7080 = vmatprep.subr.bf16.mxu0 %v15103_v34  ;;  %v10486_v8 = vld [vmem:[%s15038_s3 + $0x8] sm:$0xff]  }
 0x47c   : > { %v5024_v59 = vld [vmem:[#allocation3 + $0x50] sm:$0xff]  ;;  %v6188_v38 = vrot.slane %v6186_v7, 5  ;;  %v5469_v43 = vshrl.u32 %v5371_v17, 16  ;;  %v5472_v45 = vshll.u32 %v5371_v17, 16  ;;  %v5457_v51 = vrot.slane %v5455_v30, 4 }
 0x47d   : > { %6634 = vrot.lane.b32.xlu0 %v9994_v21, %s10573_s9  ;;  %v6170_v48 = vrot.slane %v6169_v23, 4  ;;  %v10485_v21 = vld [vmem:[%s15038_s3 + $0x10] sm:$0xff]   ;;  %v5040_v4 = vmax.f32 %v5024_v59, 0.0  ;;  %6716 = vrot.lane.b32.xlu1 %v10011_v19, %s10580_s30  ;;  %v6184_v24 = vrot.slane %v6183_v63, 4  ;;  %v5460_v16 = vrot.slane %v5458_v50, 5 }
 0x47e   : > { %v5022_v44 = vld [vmem:[#allocation3 + $0x40] sm:$0xff]  ;;  %v5466_v56 = vrot.slane %v5464_v57, 5  ;;  %v5471_v60 = vrot.slane %v5469_v43, 4  ;;  %v5474_v13 = vrot.slane %v5472_v45, 5  ;;  %v5478_v39 = vshll.u32 %v13045_v36, 16  ;;  %7081 = vmatpush1.bf16.msra.mxu0 %v10485_v21 }
 0x47f   : > { %v6175_v25 = vsel %vm10864_vm15, %v6170_v48, %v6174_v53  ;;  %v10249_v52 = vpack.c.bf16 %v5040_v4, %v5040_v4  ;;  %v5038_v18 = vmax.f32 %v5022_v44, 0.0  ;;  %v6189_v54 = vsel %vm10864_vm15, %v6184_v24, %v6188_v38  ;;  %7082 = vmatprep.subr.bf16.mxu0 %v15103_v34 }
 0x480   : > { %v5461_v19 = vor.u32 %v5460_v16, %v5457_v51  ;;  %v5025_v47 = vld [vmem:[#allocation3 + $0x58] sm:$0xff]  ;;  %v10025_v35 = vcombine.low %v6175_v25, %v6189_v54  ;;  %v5475_v37 = vor.u32 %v5474_v13, %v5471_v60  ;;  %v15115_v10 = vshrl.u32 %v13071_v42, 16  ;;  %v10487_v51 = vld [vmem:[%s15038_s3] sm:$0xff]   ;;  %v5330_v13 = vld [vmem:[#allocation4 + $0x68] sm:$0xf] }
 0x481   : > { %6714 = vrot.lane.b32.xlu0 %v10010_v14, %s10580_s30  ;;  %v5191_v17 = vshrl.u32 %v10249_v52, 16  ;;  %v5194_v23 = vshll.u32 %v10249_v52, 16  ;;  %v10247_v53 = vpack.c.bf16 %v5038_v18, %v5038_v18  ;;  %v5041_v7 = vmax.f32 %v5025_v47, 0.0  ;;  %v6124_v60 = vld [vmem:[#allocation4 + $0x44] sm:$0x1] }
 0x482   : > { %v6221_v14 = vrot.slane %v15115_v10, 4  ;;  %v5023_v63 = vld [vmem:[#allocation3 + $0x48] sm:$0xff]  ;;  %6808 = vrot.lane.b32.xlu1 %v10025_v35, %s10582_s15  ;;  %v5462_v36 = vrot.slane %v5461_v19, 4  ;;  %v5476_v30 = vrot.slane %v5475_v37, 4  ;;  %v5480_v50 = vrot.slane %v5478_v39, 5  ;;  %7083 = vmatpush1.bf16.msra.mxu0 %v10486_v8 }
 0x483   : > { %v15116_v57 = vshll.u32 %v13071_v42, 16  ;;  %v5193_v48 = vrot.slane %v5191_v17, 7  ;;  %v5175_v38 = vshrl.u32 %v10247_v53, 16  ;;  %v5178_v43 = vshll.u32 %v10247_v53, 16  ;;  %7084 = vmatprep.subr.bf16.mxu0 %v15103_v34  ;;  %v5333_v52 = vld [vmem:[#allocation4 + $0x6c] sm:$0x1] }
 0x484   : > { %v10250_v45 = vpack.c.bf16 %v5041_v7, %v5041_v7  ;;  %v5039_v21 = vmax.f32 %v5023_v63, 0.0  ;;  %v5467_v4 = vsel %vm10864_vm15, %v5462_v36, %v5466_v56  ;;  %v5481_v24 = vsel %vm10864_vm15, %v5476_v30, %v5480_v50  ;;  %v5318_v10 = vld [vmem:[#allocation4 + $0x58] sm:$0xf]  ;;  %v10488_v7 = vld [vmem:[%s15038_s3 + $0x40] sm:$0xff]  }
 0x485   : > { %6580 = vrot.lane.b32.xlu0 %v9987_v15, %s10578_s14  ;;  %v6224_v59 = vrot.slane %v15116_v57, 5  ;;  %v5196_v16 = vor.u32 %v5194_v23, %v5193_v48  ;;  %v5197_v42 = vrot.slane %v5193_v48, 4  ;;  %v5177_v44 = vrot.slane %v5175_v38, 7 }
 0x486   : > { %v5199_v25 = vshrl.u32 %v10250_v45, 16  ;;  %v5202_v18 = vshll.u32 %v10250_v45, 16  ;;  %v10248_v56 = vpack.c.bf16 %v5039_v21, %v5039_v21  ;;  %v9978_v54 = vcombine.low %v5467_v4, %v5481_v24  ;;  %7085 = vmatpush1.bf16.msra.mxu0 %v10487_v51  ;;  %v5339_v4 = vld [vmem:[#allocation4 + $0x74] sm:$0x1] }
 0x487   : > { %v6225_v15 = vor.u32 %v6224_v59, %v6221_v14  ;;  %v5331_v47 = vsel %vm10665_vm8, %v5196_v16, %v5330_v13  ;;  %v5334_v35 = vsel %vm11723_vm9, %v5197_v42, %v5333_v52  ;;  %v5180_v37 = vor.u32 %v5178_v43, %v5177_v44  ;;  %v5321_v14 = vld [vmem:[#allocation4 + $0x5c] sm:$0x1]  ;;  %7100 = vmatprep.subr.bf16.mxu0 %v15103_v34  ;;  %v5336_v43 = vld [vmem:[#allocation4 + $0x70] sm:$0xf]  ;;  %v5324_v52 = vld [vmem:[#allocation4 + $0x60] sm:$0xf] }
 0x488   : > { %v5181_v39 = vrot.slane %v5177_v44, 4  ;;  %5332 = vst [vmem:[#allocation4 + $0x68] sm:$0xf] %v5331_v47  ;;  %5335 = vst [vmem:[#allocation4 + $0x6c] sm:$0x1] %v5334_v35  ;;  %v5201_v8 = vrot.slane %v5199_v25, 7 }
 0x489   : > { %v6226_v19 = vrot.slane %v6225_v15, 4  ;;  %v5183_v17 = vshrl.u32 %v10248_v56, 16  ;;  %v5186_v23 = vshll.u32 %v10248_v56, 16  ;;  %6538 = vrot.lane.b32.xlu0 %v9978_v54, %s10575_s11  ;;  %v6228_v53 = vshll.u32 %v6124_v60, 16 }
 0x48a   : > { %v5319_v63 = vsel %vm10665_vm8, %v5180_v37, %v5318_v10  ;;  %v5322_v36 = vsel %vm11723_vm9, %v5181_v39, %v5321_v14  ;;  %v15117_v30 = vshrl.u32 %v13032_v55, 16  ;;  %v15118_v57 = vshll.u32 %v13032_v55, 16  ;;  %7101 = vmatpush2.bf16.msra.mxu0 %v10488_v7  ;;  %v6122_v7 = vld [vmem:[#allocation4 + $0x34] sm:$0x1] }
 0x48b   : > { %5320 = vst [vmem:[#allocation4 + $0x58] sm:$0xf] %v5319_v63  ;;  %5323 = vst [vmem:[#allocation4 + $0x5c] sm:$0x1] %v5322_v36  ;;  %v5204_v48 = vor.u32 %v5202_v18, %v5201_v8  ;;  %v5205_v38 = vrot.slane %v5201_v8, 4  ;;  %v5185_v45 = vrot.slane %v5183_v17, 7  ;;  %9427 = vmatprep.subr.bf16.mxu0 %v15103_v34  ;;  %v15121_v37 = vsel %vm10864_vm15, %v12819_v20, %v12821_v9 }
 0x48c   : > { %v5853_v50 = vrot.slane %v15117_v30, 4  ;;  %v5856_v59 = vrot.slane %v15118_v57, 5  ;;  %v6230_v21 = vrot.slane %v6228_v53, 5  ;;  %v5860_v15 = vshll.u32 %v13085_v6, 16  ;;  %v5327_v18 = vld [vmem:[#allocation4 + $0x64] sm:$0x1] }
 0x48d   : > { %v15119_v51 = vshrl.u32 %v13069_v32, 16  ;;  %v15120_v42 = vshll.u32 %v13069_v32, 16  ;;  %v5337_v44 = vsel %vm10665_vm8, %v5204_v48, %v5336_v43  ;;  %v5340_v25 = vsel %vm11723_vm9, %v5205_v38, %v5339_v4 }
 0x48e   : > { %v5857_v24 = vor.u32 %v5856_v59, %v5853_v50  ;;  %v5188_v60 = vor.u32 %v5186_v23, %v5185_v45  ;;  %v5189_v13 = vrot.slane %v5185_v45, 4  ;;  %5338 = vst [vmem:[#allocation4 + $0x70] sm:$0xf] %v5337_v44  ;;  %5341 = vst [vmem:[#allocation4 + $0x74] sm:$0x1] %v5340_v25  ;;  %v6231_v6 = vsel %vm10864_vm15, %v6226_v19, %v6230_v21 }
 0x48f   : > { %v5867_v16 = vrot.slane %v15119_v51, 4  ;;  %v5870_v55 = vrot.slane %v15120_v42, 5  ;;  %v5862_v54 = vrot.slane %v5860_v15, 5  ;;  %v10027_v39 = vcombine.low %v6231_v6, %v15121_v37  ;;  %v6123_v21 = vld [vmem:[#allocation4 + $0x3c] sm:$0x1] }
 0x490   : > { %v5858_v56 = vrot.slane %v5857_v24, 4  ;;  %v5325_v47 = vsel %vm10665_vm8, %v5188_v60, %v5324_v52  ;;  %v5328_v35 = vsel %vm11723_vm9, %v5189_v13, %v5327_v18  ;;  %v5874_v10 = vshll.u32 %v13087_v26, 16  ;;  %v5372_v24 = vld [vmem:[#allocation4 + $0x30] sm:$0xf] }
 0x491   : > { %v5871_v32 = vor.u32 %v5870_v55, %v5867_v16  ;;  %5326 = vst [vmem:[#allocation4 + $0x60] sm:$0xf] %v5325_v47  ;;  %5329 = vst [vmem:[#allocation4 + $0x64] sm:$0x1] %v5328_v35  ;;  %v15122_v8 = vshrl.u32 %v13059_v5, 16  ;;  %v15123_v23 = vshll.u32 %v13059_v5, 16  ;;  %6812 = vrot.lane.b32.xlu1 %v10027_v39, %s10582_s15 }
 0x492   : > { %v5863_v19 = vsel %vm10864_vm15, %v5858_v56, %v5862_v54  ;;  %v5876_v63 = vrot.slane %v5874_v10, 5  ;;  %v5832_v20 = vshll.u32 %v13075_v1, 16  ;;  %v15124_v9 = vshrl.u32 %v13095_v49, 16  ;;  %v4980_v56 = vld [vmem:[#allocation3 + $0x70] sm:$0xff]  ;;  %v5373_v47 = vld [vmem:[#allocation4 + $0x38] sm:$0xf] }
 0x493   : > { %v5872_v14 = vrot.slane %v5871_v32, 4  ;;  %v5825_v17 = vrot.slane %v15122_v8, 4  ;;  %v5828_v53 = vrot.slane %v15123_v23, 5  ;;  %v15125_v36 = vshll.u32 %v13095_v49, 16  ;;  %v4978_v39 = vld [vmem:[#allocation3 + $0x60] sm:$0xff] }
 0x494   : > { %v5839_v26 = vrot.slane %v15124_v9, 4  ;;  %v5846_v57 = vshll.u32 %v13104_v12, 16  ;;  %v15126_v59 = vshrl.u32 %v13097_v31, 16  ;;  %v15127_v5 = vshll.u32 %v13097_v31, 16  ;;  %v13263_v8 = vld [vmem:[#allocation4 + $0x58] sm:$0xf] }
 0x495   : > { %v5842_v30 = vrot.slane %v15125_v36, 5  ;;  %v5829_v50 = vor.u32 %v5828_v53, %v5825_v17  ;;  %v5877_v43 = vsel %vm10864_vm15, %v5872_v14, %v5876_v63  ;;  %v5834_v45 = vrot.slane %v5832_v20, 5  ;;  %v13267_v20 = vld [vmem:[#allocation4 + $0x68] sm:$0xf]  ;;  %v4981_v9 = vld [vmem:[#allocation3 + $0x78] sm:$0xff] }
 0x496   : > { %v6193_v48 = vrot.slane %v15126_v59, 4  ;;  %v6196_v38 = vrot.slane %v15127_v5, 5  ;;  %v6200_v4 = vshll.u32 %v6122_v7, 16  ;;  %v10003_v15 = vcombine.low %v5863_v19, %v5877_v43  ;;  %v10344_v6 = vpop.f32.mrf.mxu0  ;;  %v13278_v43 = vld [vmem:[#allocation4 + $0x5c] sm:$0x1] }
 0x497   : > { %v5843_v1 = vor.u32 %v5842_v30, %v5839_v26  ;;  %v5830_v49 = vrot.slane %v5829_v50, 4  ;;  %v5848_v51 = vrot.slane %v5846_v57, 5  ;;  %v15128_v55 = vshrl.u32 %v13037_v27, 16 }
 0x498   : > { %v6197_v16 = vor.u32 %v6196_v38, %v6193_v48  ;;  %v6202_v12 = vrot.slane %v6200_v4, 5  ;;  %v15129_v31 = vshll.u32 %v13037_v27, 16  ;;  %6676 = vrot.lane.b32.xlu0 %v10003_v15, %s10576_s12  ;;  %v6214_v52 = vshll.u32 %v6123_v21, 16  ;;  %v4951_v17 = vpop.f32.mrf.mxu0  ;;  %v13272_v50 = vld [vmem:[#allocation4 + $0x60] sm:$0xf] }
 0x499   : > { %v5844_v42 = vrot.slane %v5843_v1, 4  ;;  %v6207_v44 = vrot.slane %v15128_v55, 4  ;;  %v5835_v60 = vsel %vm10864_vm15, %v5830_v49, %v5834_v45  ;;  %v5483_v18 = vshrl.u32 %v5372_v24, 16  ;;  %v5998_v45 = vld [vmem:[#allocation4 + $0x58] sm:$0xe] }
 0x49a   : > { %v6210_v25 = vrot.slane %v15129_v31, 5  ;;  %v6198_v13 = vrot.slane %v6197_v16, 4  ;;  %v5486_v35 = vshll.u32 %v5372_v24, 16  ;;  %v5492_v37 = vshll.u32 %v13116_v3, 16  ;;  %v10345_v57 = vpop.f32.mrf.mxu0  ;;  %v13281_v24 = vld [vmem:[#allocation4 + $0x70] sm:$0xf] }
 0x49b   : > { %v5849_v54 = vsel %vm10864_vm15, %v5844_v42, %v5848_v51  ;;  %v4996_v27 = vadd.f32 %v10344_v6, %v4980_v56  ;;  %v6216_v14 = vrot.slane %v6214_v52, 5  ;;  %v5485_v53 = vrot.slane %v5483_v18, 4  ;;  %v13283_v15 = vld [vmem:[#allocation4 + $0x5c] sm:$0x1]  ;;  %v4979_v51 = vld [vmem:[#allocation3 + $0x68] sm:$0xff] }
 0x49c   : > { %v6211_v32 = vor.u32 %v6210_v25, %v6207_v44  ;;  %v10002_v10 = vcombine.low %v5835_v60, %v5849_v54  ;;  %v6203_v19 = vsel %vm10864_vm15, %v6198_v13, %v6202_v12  ;;  %v5488_v7 = vrot.slane %v5486_v35, 5  ;;  %v4954_v49 = vpop.f32.mrf.mxu0  ;;  %v5631_v44 = vld [vmem:[#allocation4 + $0x58] sm:$0xe]  ;;  %v13292_v52 = vld [vmem:[#allocation4 + $0x64] sm:$0x1] }
 0x49d   : > { %v13265_v63 = vrot.slane %v5492_v37, 5  ;;  %5012 = vst.msk [vmem:[#allocation3 + $0x70] sm:$0xff] %vm2228_vm3, %v4996_v27  ;;  %v4994_v3 = vadd.f32 %v4978_v39, %v4951_v17  ;;  %v5497_v26 = vshrl.u32 %v5373_v47, 16  ;;  %v5500_v36 = vshll.u32 %v5373_v47, 16  ;;  %v5999_v18 = vld [vmem:[#allocation4 + $0x60] sm:$0xe] }
 0x49e   : > { %v6212_v23 = vrot.slane %v6211_v32, 4  ;;  %6674 = vrot.lane.b32.xlu1 %v10002_v10, %s10576_s12  ;;  %v5506_v30 = vshll.u32 %v13123_v22, 16  ;;  %v5489_v48 = vor.u32 %v5488_v7, %v5485_v53  ;;  %v5879_v5 = vshrl.u32 %v13263_v8, 16  ;;  %v5632_v47 = vld [vmem:[#allocation4 + $0x60] sm:$0xe] }
 0x49f   : > { %v5882_v38 = vshll.u32 %v13263_v8, 16  ;;  %5010 = vst.msk [vmem:[#allocation3 + $0x60] sm:$0xff] %vm2228_vm3, %v4994_v3  ;;  %v4997_v1 = vadd.f32 %v10345_v57, %v4981_v9  ;;  %v5499_v4 = vrot.slane %v5497_v26, 4  ;;  %v5502_v22 = vrot.slane %v5500_v36, 5  ;;  %v13304_v10 = vld [vmem:[#allocation4 + $0x64] sm:$0x1] }
 0x4a0   : > { %v6217_v59 = vsel %vm10864_vm15, %v6212_v23, %v6216_v14  ;;  %v5490_v16 = vrot.slane %v5489_v48, 4  ;;  %v5508_v42 = vrot.slane %v5506_v30, 5  ;;  %v9996_v12 = vcombine.low %v13263_v8, %v13272_v50  ;;  %v5633_v26 = vld [vmem:[#allocation4 + $0x68] sm:$0xe] }
 0x4a1   : > { %v10026_v21 = vcombine.low %v6203_v19, %v6217_v59  ;;  %v5893_v55 = vshrl.u32 %v13272_v50, 16  ;;  %5013 = vst.msk [vmem:[#allocation3 + $0x78] sm:$0xff] %vm2228_vm3, %v4997_v1  ;;  %v4995_v31 = vadd.f32 %v4979_v51, %v4954_v49  ;;  %v5503_v25 = vor.u32 %v5502_v22, %v5499_v4  ;;  %v13306_v19 = vld [vmem:[#allocation4 + $0x6c] sm:$0x1]  ;;  %v13315_v30 = vld [vmem:[#allocation4 + $0x68] sm:$0xf] }
 0x4a2   : > { %v5896_v60 = vshll.u32 %v13272_v50, 16  ;;  %v5907_v13 = vshrl.u32 %v13267_v20, 16  ;;  %v5495_v6 = vsel %vm10864_vm15, %v5490_v16, %v13265_v63  ;;  %v5910_v56 = vshll.u32 %v13267_v20, 16  ;;  %v13323_v51 = vld [vmem:[#allocation4 + $0x60] sm:$0xf] }
 0x4a3   : > { %6810 = vrot.lane.b32.xlu0 %v10026_v21, %s10582_s15  ;;  %v9997_v54 = vcombine.low %v13267_v20, %v13281_v24  ;;  %v5921_v32 = vshrl.u32 %v13281_v24, 16  ;;  %5011 = vst.msk [vmem:[#allocation3 + $0x68] sm:$0xff] %vm2228_vm3, %v4995_v31  ;;  %v5504_v35 = vrot.slane %v5503_v25, 4  ;;  %v5924_v37 = vshll.u32 %v13281_v24, 16  ;;  %v13411_v50 = vld [vmem:[#allocation4 + $0x6c] sm:$0x1] }
 0x4a4   : > { %v9944_v27 = vrot.slane %v5998_v45, 9  ;;  %v6072_v39 = vrot.slane %v13278_v43, 5  ;;  %v5028_v14 = vld [vmem:[#allocation3 + $0x70] sm:$0xff]  ;;  %v9945_v17 = vrot.slane %v5999_v18, 9  ;;  %v6076_v23 = vrot.slane %v13292_v52, 5 }
 0x4a5   : > { %v9929_v53 = vrot.slane %v5631_v44, 9  ;;  %v5708_v7 = vrot.slane %v13283_v15, 5  ;;  %v5044_v63 = vmax.f32 %v5028_v14, 0.0  ;;  %v5509_v3 = vsel %vm10864_vm15, %v5504_v35, %v5508_v42 }
 0x4a6   : > { %v6073_v9 = vsel %vm10792_vm12, %v9944_v27, %v6072_v39  ;;  %v9930_v36 = vrot.slane %v5632_v47, 9  ;;  %v5026_v57 = vld [vmem:[#allocation3 + $0x60] sm:$0xff]  ;;  %v9979_v59 = vcombine.low %v5495_v6, %v5509_v3  ;;  %v6077_v48 = vsel %vm10792_vm12, %v9945_v17, %v6076_v23  ;;  %v5354_v3 = vld [vmem:[#allocation4 + $0x88] sm:$0xf] }
 0x4a7   : > { %6638 = vrot.lane.b32.xlu0 %v9996_v12, %s10573_s9  ;;  %v5709_v45 = vsel %vm10792_vm12, %v9929_v53, %v5708_v7  ;;  %v5712_v1 = vrot.slane %v13304_v10, 5  ;;  %v10253_v21 = vpack.c.bf16 %v5044_v63, %v5044_v63  ;;  %v5042_v4 = vmax.f32 %v5026_v57, 0.0  ;;  %v13337_v63 = vld [vmem:[#allocation4 + $0x58] sm:$0xf] }
 0x4a8   : > { %v10012_v22 = vcombine.low %v6073_v9, %v6077_v48  ;;  %v9988_v49 = vcombine.low %v13053_v61, %v5709_v45  ;;  %v5029_v16 = vld [vmem:[#allocation3 + $0x78] sm:$0xff]  ;;  %6540 = vrot.lane.b32.xlu1 %v9979_v59, %s10575_s11  ;;  %v9931_v12 = vrot.slane %v5633_v26, 9  ;;  %v5716_v44 = vrot.slane %v13306_v19, 5 }
 0x4a9   : > { %v5713_v42 = vsel %vm10792_vm12, %v9930_v36, %v5712_v1  ;;  %v6261_v31 = vshrl.u32 %v13315_v30, 16  ;;  %v5223_v25 = vshrl.u32 %v10253_v21, 16  ;;  %v5226_v18 = vshll.u32 %v10253_v21, 16  ;;  %v5357_v1 = vld [vmem:[#allocation4 + $0x8c] sm:$0x1] }
 0x4aa   : > { %v10251_v6 = vpack.c.bf16 %v5042_v4, %v5042_v4  ;;  %v5045_v47 = vmax.f32 %v5029_v16, 0.0  ;;  %v5027_v61 = vld [vmem:[#allocation3 + $0x68] sm:$0xff]  ;;  %v5717_v35 = vsel %vm10792_vm12, %v9931_v12, %v5716_v44  ;;  %v6264_v27 = vshll.u32 %v13315_v30, 16  ;;  %v5345_v16 = vld [vmem:[#allocation4 + $0x7c] sm:$0x1] }
 0x4ab   : > { %6718 = vrot.lane.b32.xlu0 %v10012_v22, %s10580_s30  ;;  %v10020_v39 = vcombine.low %v13323_v51, %v13315_v30  ;;  %v6247_v14 = vshrl.u32 %v13323_v51, 16  ;;  %v5225_v17 = vrot.slane %v5223_v25, 7  ;;  %v5043_v9 = vmax.f32 %v5027_v61, 0.0  ;;  %v5342_v22 = vld [vmem:[#allocation4 + $0x78] sm:$0xf] }
 0x4ac   : > { %v5207_v23 = vshrl.u32 %v10251_v6, 16  ;;  %v5210_v53 = vshll.u32 %v10251_v6, 16  ;;  %v10254_v7 = vpack.c.bf16 %v5045_v47, %v5045_v47  ;;  %6640 = vrot.lane.b32.xlu1 %v9997_v54, %s10573_s9  ;;  %v9989_v26 = vcombine.low %v5713_v42, %v5717_v35  ;;  %v5760_v6 = vld [vmem:[#allocation4 + $0x6c] sm:$0x1]  ;;  %v6000_v47 = vld [vmem:[#allocation4 + $0x68] sm:$0xe] }
 0x4ad   : > { %v6250_v36 = vshll.u32 %v13323_v51, 16  ;;  %v15130_v57 = vor.u32 %v13020_v58, %v12836_v2  ;;  %v5228_v48 = vor.u32 %v5226_v18, %v5225_v17  ;;  %v5229_v45 = vrot.slane %v5225_v17, 4  ;;  %v13433_v30 = vld [vmem:[#allocation4 + $0x70] sm:$0xf] }
 0x4ae   : > { %v5209_v21 = vrot.slane %v5207_v23, 7  ;;  %v5231_v4 = vshrl.u32 %v10254_v7, 16  ;;  %v5234_v12 = vshll.u32 %v10254_v7, 16  ;;  %v10252_v44 = vpack.c.bf16 %v5043_v9, %v5043_v9  ;;  %v6001_v7 = vld [vmem:[#allocation4 + $0x70] sm:$0xe] }
 0x4af   : > { %v13344_v59 = vrot.slane %v15130_v57, 4  ;;  %6584 = vrot.lane.b32.xlu0 %v9989_v26, %s10578_s14  ;;  %v5525_v2 = vshrl.u32 %v13337_v63, 16  ;;  %v5355_v58 = vsel %vm10665_vm8, %v5228_v48, %v5354_v3  ;;  %v5358_v42 = vsel %vm11723_vm9, %v5229_v45, %v5357_v1  ;;  %v5360_v26 = vld [vmem:[#allocation4 + $0x90] sm:$0xf] }
 0x4b0   : > { %v5212_v25 = vor.u32 %v5210_v53, %v5209_v21  ;;  %v5213_v18 = vrot.slane %v5209_v21, 4  ;;  %5356 = vst [vmem:[#allocation4 + $0x88] sm:$0xf] %v5355_v58  ;;  %5359 = vst [vmem:[#allocation4 + $0x8c] sm:$0x1] %v5358_v42  ;;  %v5233_v61 = vrot.slane %v5231_v4, 7  ;;  %6582 = vrot.lane.b32.xlu1 %v9988_v49, %s10578_s14 }
 0x4b1   : > { %v5523_v54 = vsel %vm10864_vm15, %v13344_v59, %v13024_v41  ;;  %v5215_v35 = vshrl.u32 %v10252_v44, 16  ;;  %v5218_v17 = vshll.u32 %v10252_v44, 16  ;;  %v5527_v23 = vrot.slane %v5525_v2, 4  ;;  %v5761_v21 = vld [vmem:[#allocation4 + $0x74] sm:$0x1] }
 0x4b2   : > { %v5343_v9 = vsel %vm10665_vm8, %v5212_v25, %v5342_v22  ;;  %v5346_v3 = vsel %vm11723_vm9, %v5213_v18, %v5345_v16  ;;  %v5528_v53 = vshll.u32 %v13337_v63, 16  ;;  %v5534_v57 = vshll.u32 %v13283_v15, 16  ;;  %v5363_v4 = vld [vmem:[#allocation4 + $0x94] sm:$0x1]  ;;  %v5351_v18 = vld [vmem:[#allocation4 + $0x84] sm:$0x1] }
 0x4b3   : > { %5344 = vst [vmem:[#allocation4 + $0x78] sm:$0xf] %v5343_v9  ;;  %5347 = vst [vmem:[#allocation4 + $0x7c] sm:$0x1] %v5346_v3  ;;  %v5236_v48 = vor.u32 %v5234_v12, %v5233_v61  ;;  %v5237_v45 = vrot.slane %v5233_v61, 4  ;;  %v5217_v1 = vrot.slane %v5215_v35, 7 }
 0x4b4   : > { %v9946_v49 = vrot.slane %v6000_v47, 9  ;;  %v5530_v44 = vrot.slane %v5528_v53, 5  ;;  %v5536_v2 = vrot.slane %v5534_v57, 5  ;;  %v6080_v58 = vrot.slane %v5760_v6, 5  ;;  %6774 = vrot.lane.b32.xlu1 %v10020_v39, %s10581_s8  ;;  %v5348_v12 = vld [vmem:[#allocation4 + $0x80] sm:$0xf] }
 0x4b5   : > { %v9947_v22 = vrot.slane %v6001_v7, 9  ;;  %v5361_v16 = vsel %vm10665_vm8, %v5236_v48, %v5360_v26  ;;  %v5364_v42 = vsel %vm11723_vm9, %v5237_v45, %v5363_v4  ;;  %v5220_v25 = vor.u32 %v5218_v17, %v5217_v1 }
 0x4b6   : > { %v5221_v15 = vrot.slane %v5217_v1, 4  ;;  %5362 = vst [vmem:[#allocation4 + $0x90] sm:$0xf] %v5361_v16  ;;  %5365 = vst [vmem:[#allocation4 + $0x94] sm:$0x1] %v5364_v42  ;;  %v5531_v47 = vor.u32 %v5530_v44, %v5527_v23  ;;  %v6081_v61 = vsel %vm10792_vm12, %v9946_v49, %v6080_v58  ;;  %v6084_v35 = vrot.slane %v5761_v21, 5 }
 0x4b7   : > { %v5909_v7 = vrot.slane %v5907_v13, 4  ;;  %v5349_v9 = vsel %vm10665_vm8, %v5220_v25, %v5348_v12  ;;  %v5912_v39 = vrot.slane %v5910_v56, 5  ;;  %v5916_v3 = vshll.u32 %v5760_v6, 16 }
 0x4b8   : > { %v5352_v17 = vsel %vm11723_vm9, %v5221_v15, %v5351_v18  ;;  %5350 = vst [vmem:[#allocation4 + $0x80] sm:$0xf] %v5349_v9  ;;  %v5532_v23 = vrot.slane %v5531_v47, 4  ;;  %v6085_v26 = vsel %vm10792_vm12, %v9947_v22, %v6084_v35  ;;  %v5923_v53 = vrot.slane %v5921_v32, 4  ;;  %v13415_v22 = vld [vmem:[#allocation4 + $0x60] sm:$0xf] }
 0x4b9   : > { %5353 = vst [vmem:[#allocation4 + $0x84] sm:$0x1] %v5352_v17  ;;  %v5926_v13 = vrot.slane %v5924_v37, 5  ;;  %v10013_v57 = vcombine.low %v6081_v61, %v6085_v26  ;;  %v5913_v48 = vor.u32 %v5912_v39, %v5909_v7  ;;  %v5918_v45 = vrot.slane %v5916_v3, 5  ;;  %v13426_v47 = vld [vmem:[#allocation4 + $0x68] sm:$0xf] }
 0x4ba   : > { %v5930_v1 = vshll.u32 %v5761_v21, 16  ;;  %v5537_v20 = vsel %vm10864_vm15, %v5532_v23, %v5536_v2  ;;  %v5881_v6 = vrot.slane %v5879_v5, 4  ;;  %v5884_v49 = vrot.slane %v5882_v38, 5  ;;  %v13401_v38 = vld [vmem:[#allocation4 + $0x64] sm:$0x1] }
 0x4bb   : > { %v5927_v56 = vor.u32 %v5926_v13, %v5923_v53  ;;  %v9980_v24 = vcombine.low %v5523_v54, %v5537_v20  ;;  %6720 = vrot.lane.b32.xlu1 %v10013_v57, %s10580_s30  ;;  %v5914_v32 = vrot.slane %v5913_v48, 4  ;;  %v5888_v21 = vshll.u32 %v13278_v43, 16  ;;  %v13435_v26 = vld [vmem:[#allocation4 + $0x78] sm:$0xf]  ;;  %v13437_v53 = vld [vmem:[#allocation4 + $0x74] sm:$0x1] }
 0x4bc   : > { %v5932_v37 = vrot.slane %v5930_v1, 5  ;;  %v5885_v44 = vor.u32 %v5884_v49, %v5881_v6  ;;  %v5895_v5 = vrot.slane %v5893_v55, 4  ;;  %v5898_v8 = vrot.slane %v5896_v60, 5  ;;  %v5634_v1 = vld [vmem:[#allocation4 + $0x70] sm:$0xe] }
 0x4bd   : > { %v5928_v4 = vrot.slane %v5927_v56, 4  ;;  %6542 = vrot.lane.b32.xlu0 %v9980_v24, %s10575_s11  ;;  %v5919_v41 = vsel %vm10864_vm15, %v5914_v32, %v5918_v45  ;;  %v5890_v59 = vrot.slane %v5888_v21, 5  ;;  %v5902_v54 = vshll.u32 %v13292_v52, 16  ;;  %v13446_v49 = vld [vmem:[#allocation4 + $0x7c] sm:$0x1] }
 0x4be   : > { %v6249_v43 = vrot.slane %v6247_v14, 4  ;;  %v5886_v55 = vrot.slane %v5885_v44, 4  ;;  %v5899_v58 = vor.u32 %v5898_v8, %v5895_v5  ;;  %v6252_v60 = vrot.slane %v6250_v36, 5  ;;  %v13453_v44 = vld [vmem:[#allocation4 + $0x78] sm:$0xf]  ;;  %v13455_v5 = vpop.permute.xlu1 %6632 }
 0x4bf   : > { %v5933_v2 = vsel %vm10864_vm15, %v5928_v4, %v5932_v37  ;;  %v5904_v42 = vrot.slane %v5902_v54, 5  ;;  %v6256_v25 = vshll.u32 %v13401_v38, 16  ;;  %v6263_v52 = vrot.slane %v6261_v31, 4  ;;  %v5635_v4 = vld [vmem:[#allocation4 + $0x78] sm:$0xe] }
 0x4c0   : > { %v10005_v16 = vcombine.low %v5919_v41, %v5933_v2  ;;  %v5891_v14 = vsel %vm10864_vm15, %v5886_v55, %v5890_v59  ;;  %v5900_v15 = vrot.slane %v5899_v58, 4  ;;  %v6253_v12 = vor.u32 %v6252_v60, %v6249_v43  ;;  %v13457_v54 = vld [vmem:[#allocation4 + $0x80] sm:$0xf]  ;;  %v13459_v43 = vpop.permute.xlu0 %6630 }
 0x4c1   : > { %v6266_v18 = vrot.slane %v6264_v27, 5  ;;  %v6258_v51 = vrot.slane %v6256_v25, 5  ;;  %v6270_v36 = vshll.u32 %v13411_v50, 16  ;;  %v5539_v61 = vshrl.u32 %v13415_v22, 16 }
 0x4c2   : > { %6680 = vrot.lane.b32.xlu0 %v10005_v16, %s10576_s12  ;;  %v5542_v35 = vshll.u32 %v13415_v22, 16  ;;  %v5905_v31 = vsel %vm10864_vm15, %v5900_v15, %v5904_v42  ;;  %v6254_v7 = vrot.slane %v6253_v12, 4  ;;  %v5548_v17 = vshll.u32 %v13304_v10, 16  ;;  %v13464_v16 = vld [vmem:[#allocation4 + $0x88] sm:$0xf] }
 0x4c3   : > { %v6267_v9 = vor.u32 %v6266_v18, %v6263_v52  ;;  %v10004_v27 = vcombine.low %v5891_v14, %v5905_v31  ;;  %v6272_v39 = vrot.slane %v6270_v36, 5  ;;  %v5541_v3 = vrot.slane %v5539_v61, 4  ;;  %v13470_v15 = vld [vmem:[#allocation4 + $0x80] sm:$0xf]  ;;  %v13472_v12 = vld [vmem:[#allocation4 + $0x7c] sm:$0x1] }
 0x4c4   : > { %v5544_v23 = vrot.slane %v5542_v35, 5  ;;  %v6259_v13 = vsel %vm10864_vm15, %v6254_v7, %v6258_v51  ;;  %v5550_v48 = vrot.slane %v5548_v17, 5  ;;  %v5553_v45 = vshrl.u32 %v13426_v47, 16  ;;  %v13480_v35 = vld [vmem:[#allocation4 + $0x84] sm:$0x1] }
 0x4c5   : > { %v6268_v57 = vrot.slane %v6267_v9, 4  ;;  %6678 = vrot.lane.b32.xlu1 %v10004_v27, %s10576_s12  ;;  %v5556_v20 = vshll.u32 %v13426_v47, 16  ;;  %v5562_v56 = vshll.u32 %v13306_v19, 16  ;;  %v6275_v6 = vshrl.u32 %v13433_v30, 16  ;;  %v6002_v31 = vld [vmem:[#allocation4 + $0x78] sm:$0xe] }
 0x4c6   : > { %v5545_v10 = vor.u32 %v5544_v23, %v5541_v3  ;;  %v5555_v32 = vrot.slane %v5553_v45, 4  ;;  %v6278_v37 = vshll.u32 %v13433_v30, 16  ;;  %v10021_v21 = vcombine.low %v13433_v30, %v13435_v26  ;;  %v6003_v27 = vld [vmem:[#allocation4 + $0x80] sm:$0xe] }
 0x4c7   : > { %v6273_v24 = vsel %vm10864_vm15, %v6268_v57, %v6272_v39  ;;  %v5558_v41 = vrot.slane %v5556_v20, 5  ;;  %v5564_v59 = vrot.slane %v5562_v56, 5  ;;  %v6289_v2 = vshrl.u32 %v13435_v26, 16  ;;  %v13492_v57 = vpop.permute.xlu1 %6574  ;;  %v13499_v20 = vld [vmem:[#allocation4 + $0x7c] sm:$0x1]  ;;  %v13501_v56 = vpop.permute.xlu0 %6710 }
 0x4c8   : > { %v10028_v8 = vcombine.low %v6259_v13, %v6273_v24  ;;  %v5546_v19 = vrot.slane %v5545_v10, 4  ;;  %v6292_v55 = vshll.u32 %v13435_v26, 16  ;;  %v9932_v58 = vrot.slane %v5634_v1, 9  ;;  %v13490_v13 = vld [vmem:[#allocation4 + $0x74] sm:$0x1] }
 0x4c9   : > { %v5720_v60 = vrot.slane %v13437_v53, 5  ;;  %v5559_v25 = vor.u32 %v5558_v41, %v5555_v32  ;;  %v9933_v52 = vrot.slane %v5635_v4, 9  ;;  %v5724_v14 = vrot.slane %v13446_v49, 5 }
 0x4ca   : > { %6814 = vrot.lane.b32.xlu0 %v10028_v8, %s10582_s15  ;;  %v5551_v42 = vsel %vm10864_vm15, %v5546_v19, %v5550_v48  ;;  %v5935_v51 = vshrl.u32 %v13453_v44, 16  ;;  %v5938_v36 = vshll.u32 %v13453_v44, 16  ;;  %v9998_v61 = vcombine.low %v13453_v44, %v13457_v54  ;;  %v13505_v19 = vld [vmem:[#allocation4 + $0x70] sm:$0xf] }
 0x4cb   : > { %v5721_v18 = vsel %vm10792_vm12, %v9932_v58, %v5720_v60  ;;  %v5560_v7 = vrot.slane %v5559_v25, 4  ;;  %v5725_v9 = vsel %vm10792_vm12, %v9933_v52, %v5724_v14  ;;  %v5949_v17 = vshrl.u32 %v13457_v54, 16  ;;  %v13514_v14 = vld [vmem:[#allocation4 + $0x78] sm:$0xf] }
 0x4cc   : > { %v5952_v30 = vshll.u32 %v13457_v54, 16  ;;  %v9990_v39 = vcombine.low %v5721_v18, %v5725_v9  ;;  %v10022_v26 = vcombine.low %v13470_v15, %v13464_v16  ;;  %v6303_v45 = vshrl.u32 %v13470_v15, 16 }
 0x4cd   : > { %v5565_v48 = vsel %vm10864_vm15, %v5560_v7, %v5564_v59  ;;  %v6306_v1 = vshll.u32 %v13470_v15, 16  ;;  %v9948_v10 = vrot.slane %v6002_v31, 9  ;;  %v6088_v32 = vrot.slane %v13472_v12, 5 }
 0x4ce   : > { %6776 = vrot.lane.b32.xlu0 %v10021_v21, %s10581_s8  ;;  %v9981_v24 = vcombine.low %v5551_v42, %v5565_v48  ;;  %v9949_v4 = vrot.slane %v6003_v27, 9  ;;  %v6092_v8 = vrot.slane %v13480_v35, 5  ;;  %v6277_v41 = vrot.slane %v6275_v6, 4  ;;  %v13520_v48 = vld [vmem:[#allocation4 + $0x88] sm:$0xf] }
 0x4cf   : > { %v6280_v59 = vrot.slane %v6278_v37, 5  ;;  %v6284_v21 = vshll.u32 %v13490_v13, 16  ;;  %v6291_v58 = vrot.slane %v6289_v2, 4  ;;  %v6089_v60 = vsel %vm10792_vm12, %v9948_v10, %v6088_v32 }
 0x4d0   : > { %6544 = vrot.lane.b32.xlu1 %v9981_v24, %s10575_s11  ;;  %v6093_v42 = vsel %vm10792_vm12, %v9949_v4, %v6092_v8  ;;  %v6294_v25 = vrot.slane %v6292_v55, 5  ;;  %v6298_v52 = vshll.u32 %v13499_v20, 16  ;;  %v5567_v2 = vshrl.u32 %v13505_v19, 16  ;;  %v13522_v55 = vpop.permute.xlu1 %6766  ;;  %v13526_v4 = vld [vmem:[#allocation4 + $0x90] sm:$0xf]  ;;  %v13528_v8 = vpop.permute.xlu0 %6576 }
 0x4d1   : > { %v10014_v6 = vcombine.low %v6089_v60, %v6093_v42  ;;  %v6281_v37 = vor.u32 %v6280_v59, %v6277_v41  ;;  %v6286_v18 = vrot.slane %v6284_v21, 5  ;;  %v5570_v9 = vshll.u32 %v13505_v19, 16 }
 0x4d2   : > { %6642 = vrot.lane.b32.xlu0 %v9998_v61, %s10573_s9  ;;  %v6295_v31 = vor.u32 %v6294_v25, %v6291_v58  ;;  %v6300_v7 = vrot.slane %v6298_v52, 5  ;;  %v5576_v27 = vshll.u32 %v13437_v53, 16  ;;  %v5569_v24 = vrot.slane %v5567_v2, 4  ;;  %v13532_v58 = vld [vmem:[#allocation4 + $0x84] sm:$0x1] }
 0x4d3   : > { %v6282_v10 = vrot.slane %v6281_v37, 4  ;;  %v5581_v32 = vshrl.u32 %v13514_v14, 16  ;;  %v5584_v61 = vshll.u32 %v13514_v14, 16  ;;  %v5572_v59 = vrot.slane %v5570_v9, 5  ;;  %v5636_v37 = vld [vmem:[#allocation4 + $0x80] sm:$0xe] }
 0x4d4   : > { %6586 = vrot.lane.b32.xlu1 %v9990_v39, %s10578_s14  ;;  %v6296_v41 = vrot.slane %v6295_v31, 4  ;;  %v5578_v21 = vrot.slane %v5576_v27, 5  ;;  %v5590_v53 = vshll.u32 %v13446_v49, 16  ;;  %v5963_v52 = vshrl.u32 %v13520_v48, 16  ;;  %v13541_v49 = vld [vmem:[#allocation4 + $0x8c] sm:$0x1] }
 0x4d5   : > { %v6287_v60 = vsel %vm10864_vm15, %v6282_v10, %v6286_v18  ;;  %v5583_v42 = vrot.slane %v5581_v32, 4  ;;  %v5586_v25 = vrot.slane %v5584_v61, 5  ;;  %v5573_v2 = vor.u32 %v5572_v59, %v5569_v24  ;;  %v5637_v27 = vld [vmem:[#allocation4 + $0x88] sm:$0xe]  ;;  %v13552_v61 = vpop.permute.xlu1 %6712 }
 0x4d6   : > { %6722 = vrot.lane.b32.xlu0 %v10014_v6, %s10580_s30  ;;  %v6301_v39 = vsel %vm10864_vm15, %v6296_v41, %v6300_v7  ;;  %v5592_v31 = vrot.slane %v5590_v53, 5  ;;  %v5966_v9 = vshll.u32 %v13520_v48, 16  ;;  %v5977_v3 = vshrl.u32 %v13526_v4, 16 }
 0x4d7   : > { %v10029_v23 = vcombine.low %v6287_v60, %v6301_v39  ;;  %v5587_v6 = vor.u32 %v5586_v25, %v5583_v42  ;;  %v5980_v18 = vshll.u32 %v13526_v4, 16  ;;  %v5574_v10 = vrot.slane %v5573_v2, 4  ;;  %v13557_v42 = vpop.permute.xlu0 %6534 }
 0x4d8   : > { %6778 = vrot.lane.b32.xlu1 %v10022_v26, %s10581_s8  ;;  %v9999_v7 = vcombine.low %v13520_v48, %v13526_v4  ;;  %v9934_v24 = vrot.slane %v5636_v37, 9  ;;  %v5728_v32 = vrot.slane %v13532_v58, 5  ;;  %v9935_v59 = vrot.slane %v5637_v27, 9 }
 0x4d9   : > { %v5588_v41 = vrot.slane %v5587_v6, 4  ;;  %v5732_v53 = vrot.slane %v13541_v49, 5  ;;  %v5937_v60 = vrot.slane %v5935_v51, 4  ;;  %v5579_v26 = vsel %vm10864_vm15, %v5574_v10, %v5578_v21  ;;  %v13574_v6 = vld [vmem:[#allocation4 + $0x84] sm:$0x1] }
 0x4da   : > { %v5729_v25 = vsel %vm10792_vm12, %v9934_v24, %v5728_v32  ;;  %v5940_v37 = vrot.slane %v5938_v36, 5  ;;  %v5944_v39 = vshll.u32 %v13472_v12, 16  ;;  %v5951_v51 = vrot.slane %v5949_v17, 4  ;;  %v13577_v24 = vld [vmem:[#allocation4 + $0x8c] sm:$0x1] }
 0x4db   : > { %v5593_v2 = vsel %vm10864_vm15, %v5588_v41, %v5592_v31  ;;  %v5733_v27 = vsel %vm10792_vm12, %v9935_v59, %v5732_v53  ;;  %v5954_v21 = vrot.slane %v5952_v30, 5  ;;  %v5958_v32 = vshll.u32 %v13480_v35, 16  ;;  %v13584_v17 = vld [vmem:[#allocation4 + $0x80] sm:$0xf]  ;;  %v13592_v35 = vpop.permute.xlu1 %6670 }
 0x4dc   : > { %6816 = vrot.lane.b32.xlu1 %v10029_v23, %s10582_s15  ;;  %v9982_v44 = vcombine.low %v5579_v26, %v5593_v2  ;;  %v9991_v36 = vcombine.low %v5729_v25, %v5733_v27  ;;  %v5941_v10 = vor.u32 %v5940_v37, %v5937_v60  ;;  %v5946_v12 = vrot.slane %v5944_v39, 5 }
 0x4dd   : > { %v5955_v31 = vor.u32 %v5954_v21, %v5951_v51  ;;  %v6305_v41 = vrot.slane %v6303_v45, 4  ;;  %v6308_v54 = vrot.slane %v6306_v1, 5  ;;  %v6312_v23 = vshll.u32 %v13574_v6, 16  ;;  %v13595_v1 = vpop.permute.xlu0 %6672  ;;  %v13600_v51 = vld [vmem:[#allocation4 + $0x88] sm:$0xf] }
 0x4de   : > { %6546 = vrot.lane.b32.xlu0 %v9982_v44, %s10575_s11  ;;  %v5942_v30 = vrot.slane %v5941_v10, 4  ;;  %v15131_v59 = vshrl.u32 %v13464_v16, 16  ;;  %v15132_v60 = vshll.u32 %v13464_v16, 16  ;;  %v5960_v45 = vrot.slane %v5958_v32, 5 }
 0x4df   : > { %v5956_v25 = vrot.slane %v5955_v31, 4  ;;  %v6309_v37 = vor.u32 %v6308_v54, %v6305_v41  ;;  %v6326_v15 = vshll.u32 %v13577_v24, 16  ;;  %v6314_v2 = vrot.slane %v6312_v23, 5 }
 0x4e0   : > { %v6319_v53 = vrot.slane %v15131_v59, 4  ;;  %v6322_v26 = vrot.slane %v15132_v60, 5  ;;  %6644 = vrot.lane.b32.xlu1 %v9999_v7, %s10573_s9  ;;  %v5947_v39 = vsel %vm10864_vm15, %v5942_v30, %v5946_v12  ;;  %v5595_v16 = vshrl.u32 %v13584_v17, 16 }
 0x4e1   : > { %v5961_v21 = vsel %vm10864_vm15, %v5956_v25, %v5960_v45  ;;  %v6310_v44 = vrot.slane %v6309_v37, 4  ;;  %v6328_v10 = vrot.slane %v6326_v15, 5  ;;  %v5598_v31 = vshll.u32 %v13584_v17, 16  ;;  %v5765_v25 = vld [vmem:[#allocation4 + $0x94] sm:$0x1]  ;;  %v13618_v45 = vpop.permute.xlu1 %6536 }
 0x4e2   : > { %v6323_v27 = vor.u32 %v6322_v26, %v6319_v53  ;;  %6588 = vrot.lane.b32.xlu0 %v9991_v36, %s10578_s14  ;;  %v10006_v32 = vcombine.low %v5947_v39, %v5961_v21  ;;  %v5597_v41 = vrot.slane %v5595_v16, 4  ;;  %v5604_v12 = vshll.u32 %v13532_v58, 16  ;;  %v5764_v53 = vld [vmem:[#allocation4 + $0x8c] sm:$0x1] }
 0x4e3   : > { %v6315_v54 = vsel %vm10864_vm15, %v6310_v44, %v6314_v2  ;;  %v5600_v30 = vrot.slane %v5598_v31, 5  ;;  %v5609_v23 = vshrl.u32 %v13600_v51, 16  ;;  %v5612_v59 = vshll.u32 %v13600_v51, 16  ;;  %v13620_v16 = vpop.permute.xlu0 %6806 }
 0x4e4   : > { %v6324_v7 = vrot.slane %v6323_v27, 4  ;;  %6682 = vrot.lane.b32.xlu1 %v10006_v32, %s10576_s12  ;;  %v5606_v36 = vrot.slane %v5604_v12, 5  ;;  %v5618_v26 = vshll.u32 %v13541_v49, 16  ;;  %v5965_v58 = vrot.slane %v5963_v52, 4  ;;  %v6004_v27 = vld [vmem:[#allocation4 + $0x88] sm:$0xe] }
 0x4e5   : > { %v5601_v15 = vor.u32 %v5600_v30, %v5597_v41  ;;  %v5611_v39 = vrot.slane %v5609_v23, 4  ;;  %v5614_v2 = vrot.slane %v5612_v59, 5  ;;  %v5968_v44 = vrot.slane %v5966_v9, 5  ;;  %v6005_v41 = vld [vmem:[#allocation4 + $0x90] sm:$0xe]  ;;  %v13629_v48 = vpop.permute.xlu1 %6636 }
 0x4e6   : > { %v6329_v60 = vsel %vm10864_vm15, %v6324_v7, %v6328_v10  ;;  %v5620_v21 = vrot.slane %v5618_v26, 5  ;;  %v5972_v10 = vshll.u32 %v5764_v53, 16  ;;  %v5979_v49 = vrot.slane %v5977_v3, 4  ;;  %v6116_v59 = vld [vmem:[#allocation4 + $0x90] sm:$0xf] }
 0x4e7   : > { %v10030_v37 = vcombine.low %v6315_v54, %v6329_v60  ;;  %v5602_v52 = vrot.slane %v5601_v15, 4  ;;  %v5615_v31 = vor.u32 %v5614_v2, %v5611_v39  ;;  %v5982_v32 = vrot.slane %v5980_v18, 5  ;;  %v13633_v15 = vpop.permute.xlu0 %6768 }
 0x4e8   : > { %v5986_v7 = vshll.u32 %v5765_v25, 16  ;;  %v5969_v12 = vor.u32 %v5968_v44, %v5965_v58  ;;  %v5974_v54 = vrot.slane %v5972_v10, 5  ;;  %v9950_v30 = vrot.slane %v6004_v27, 9 }
 0x4e9   : > { %6818 = vrot.lane.b32.xlu0 %v10030_v37, %s10582_s15  ;;  %v6096_v23 = vrot.slane %v5764_v53, 5  ;;  %v5607_v9 = vsel %vm10864_vm15, %v5602_v52, %v5606_v36  ;;  %v5616_v3 = vrot.slane %v5615_v31, 4  ;;  %v5983_v60 = vor.u32 %v5982_v32, %v5979_v49  ;;  %v6117_v37 = vld [vmem:[#allocation4 + $0x98] sm:$0xf]  ;;  %v13643_v31 = vld [vmem:[#allocation4 + $0x94] sm:$0x1]  ;;  %v13645_v32 = vpop.permute.xlu1 %6578 }
 0x4ea   : > { %v5988_v26 = vrot.slane %v5986_v7, 5  ;;  %v5970_v4 = vrot.slane %v5969_v12, 4  ;;  %v9951_v58 = vrot.slane %v6005_v41, 9  ;;  %v6100_v39 = vrot.slane %v5765_v25, 5  ;;  %v13650_v25 = vld [vmem:[%s15039_s4] sm:$0xf] }
 0x4eb   : > { %v6097_v18 = vsel %vm10792_vm12, %v9950_v30, %v6096_v23  ;;  %v5621_v53 = vsel %vm10864_vm15, %v5616_v3, %v5620_v21  ;;  %v5984_v2 = vrot.slane %v5983_v60, 4  ;;  %v6331_v27 = vshrl.u32 %v6116_v59, 16  ;;  %10384 = vmatprep.subr.msk.bf16.mxu1 %vm15133_vm1, %v13650_v25 }
 0x4ec   : > { %v6334_v44 = vshll.u32 %v6116_v59, 16  ;;  %v9983_v10 = vcombine.low %v5607_v9, %v5621_v53  ;;  %v5975_v36 = vsel %vm10864_vm15, %v5970_v4, %v5974_v54  ;;  %v6101_v49 = vsel %vm10792_vm12, %v9951_v58, %v6100_v39  ;;  %v6360_v54 = vld [vmem:[#allocation4 + $0x20] sm:$0xe]  ;;  %v13657_v9 = vld [vmem:[#allocation4 + $0x9c] sm:$0x1] }
 0x4ed   : > { %v6345_v52 = vshrl.u32 %v6117_v37, 16  ;;  %v5989_v21 = vsel %vm10864_vm15, %v5984_v2, %v5988_v26  ;;  %v10015_v7 = vcombine.low %v6097_v18, %v6101_v49  ;;  %v6348_v41 = vshll.u32 %v6117_v37, 16  ;;  %v13666_v18 = vpop.permute.xlu0 %6772 }
 0x4ee   : > { %v10023_v12 = vcombine.low %v6116_v59, %v6117_v37  ;;  %6548 = vrot.lane.b32.xlu1 %v9983_v10, %s10575_s11  ;;  %v10007_v30 = vcombine.low %v5975_v36, %v5989_v21  ;;  %v6333_v3 = vrot.slane %v6331_v27, 4  ;;  %v6336_v60 = vrot.slane %v6334_v44, 5  ;;  %v6361_v44 = vld [vmem:[#allocation4 + $0x28] sm:$0xe]  ;;  %v13676_v36 = vpop.permute.xlu1 %6770 }
 0x4ef   : > { %v6347_v23 = vrot.slane %v6345_v52, 4  ;;  %v6350_v4 = vrot.slane %v6348_v41, 5  ;;  %v6340_v58 = vshll.u32 %v13643_v31, 16  ;;  %v6354_v26 = vshll.u32 %v13657_v9, 16 }
 0x4f0   : > { %v15134_v59 = vcombine.low %v12781_v62, %v12916_v0  ;;  %6684 = vrot.lane.b32.xlu0 %v10007_v30, %s10576_s12  ;;  %v6337_v39 = vor.u32 %v6336_v60, %v6333_v3  ;;  %v15135_v2 = vcombine.low %v12947_v46, %v12964_v40  ;;  %v9954_v10 = vrot.slane %v6360_v54, 9  ;;  %v10546_v40 = vld [vmem:[#allocation4 + $0x24] sm:$0x1] }
 0x4f1   : > { %v6342_v62 = vrot.slane %v6340_v58, 5  ;;  %v6351_v0 = vor.u32 %v6350_v4, %v6347_v23  ;;  %v9955_v30 = vrot.slane %v6361_v44, 9  ;;  %v6363_v4 = vld [vmem:[#allocation4 + $0x38] sm:$0xe] }
 0x4f2   : > { %v6848_v37 = vsel %vm2228_vm3, %v15134_v59, %v13557_v42  ;;  %v6851_v27 = vsel %vm2228_vm3, %v15135_v2, %v13618_v45  ;;  %v6356_v42 = vrot.slane %v6354_v26, 5  ;;  %6724 = vrot.lane.b32.xlu1 %v10015_v7, %s10580_s30  ;;  %v6338_v52 = vrot.slane %v6337_v39, 4  ;;  %v13694_v3 = vpop.permute.xlu1 %6716  ;;  %v10548_v39 = vld [vmem:[#allocation4 + $0x34] sm:$0x1]  ;;  %v10549_v2 = vld [vmem:[#allocation4 + $0x3c] sm:$0x1] }
 0x4f3   : > { %v6871_v53 = vsel %vm2262_vm6, %v6848_v37, %v13492_v57  ;;  %v6873_v46 = vsel %vm2262_vm6, %v6851_v27, %v13528_v8  ;;  %v6416_v45 = vrot.slane %v10546_v40, 5  ;;  %v6352_v21 = vrot.slane %v6351_v0, 4  ;;  %v10547_v8 = vld [vmem:[#allocation4 + $0x2c] sm:$0x1]  ;;  %v10551_v40 = vld [vmem:[#allocation4 + $0x28] sm:$0xf] }
 0x4f4   : > { %v6887_v49 = vsel %vm2296_vm10, %v6871_v53, %v13459_v43  ;;  %v6889_v54 = vsel %vm2296_vm10, %v6873_v46, %v13455_v5  ;;  %v6362_v43 = vld [vmem:[#allocation4 + $0x30] sm:$0xe]  ;;  %6780 = vrot.lane.b32.xlu0 %v10023_v12, %s10581_s8  ;;  %v6343_v7 = vsel %vm10864_vm15, %v6338_v52, %v6342_v62  ;;  %v6420_v23 = vrot.slane %v10547_v8, 5  ;;  %v6635_v12 = vpop.permute.xlu0 %6634  ;;  %v10550_v46 = vld [vmem:[#allocation4 + $0x20] sm:$0xf] }
 0x4f5   : > { %v6903_v57 = vsel %vm2330_vm13, %v6887_v49, %v13592_v35  ;;  %v6417_v60 = vsel %vm10792_vm12, %v9954_v10, %v6416_v45  ;;  %v6905_v26 = vsel %vm2330_vm13, %v6889_v54, %v13595_v1  ;;  %v9956_v59 = vrot.slane %v6362_v43, 9  ;;  %v6364_v54 = vld [vmem:[#allocation4 + $0x40] sm:$0xe]  ;;  %v10552_v8 = vld [vmem:[#allocation4 + $0x44] sm:$0x1] }
 0x4f6   : > { %v6919_v41 = vsel %vm4565_vm7, %v6903_v57, %v13501_v56  ;;  %v6357_v56 = vsel %vm10864_vm15, %v6352_v21, %v6356_v42  ;;  %v6424_v53 = vrot.slane %v10548_v39, 5  ;;  %v6428_v27 = vrot.slane %v10549_v2, 5  ;;  %v6809_v10 = vpop.permute.xlu1 %6808  ;;  %v10555_v2 = vld [vmem:[#allocation4 + $0x38] sm:$0xf] }
 0x4f7   : > { %v6935_v35 = vsel %vm4582_vm0, %v6919_v41, %v13522_v55  ;;  %v10031_v58 = vcombine.low %v6343_v7, %v6357_v56  ;;  %v6421_v55 = vsel %vm10792_vm12, %v9955_v30, %v6420_v23  ;;  %v6921_v44 = vsel %vm4565_vm7, %v6905_v26, %v13552_v61  ;;  %v6365_v30 = vld [vmem:[#allocation4 + $0x48] sm:$0xe]  ;;  %v10553_v56 = vld [vmem:[#allocation4 + $0x4c] sm:$0x1] }
 0x4f8   : > { %v6951_v5 = vsel %vm4599_vm5, %v6935_v35, %v13620_v16  ;;  %v10033_v37 = vcombine.low %v6417_v60, %v6421_v55  ;;  %v9957_v16 = vrot.slane %v6363_v4, 9  ;;  %v6937_v62 = vsel %vm4582_vm0, %v6921_v44, %v13633_v15  ;;  %v6715_v0 = vpop.permute.xlu0 %6714  ;;  %v6367_v44 = vld [vmem:[#allocation4 + $0x68] sm:$0xe] }
 0x4f9   : > { %7103 = vmatmul.mubr.bf16.vlgmr.msra.gmra.mxu0 %v6951_v5  ;;  %6820 = vrot.lane.b32.xlu1 %v10031_v58, %s10582_s15  ;;  %v6425_v1 = vsel %vm10792_vm12, %v9956_v59, %v6424_v53  ;;  %v6954_v42 = vsel %vm4599_vm5, %v6937_v62, %v6809_v10  ;;  %v7217_v61 = vsel %vm15136_vm4, %v13650_v25, 0  ;;  %v9970_v45 = vcombine.low %v10550_v46, %v10551_v40 }
 0x4fa   : > { %10050 = vmatprep.mubr.msk.bf16.mxu0 %vm2228_vm3, %v10033_v37  ;;  %v6429_v49 = vsel %vm10792_vm12, %v9957_v16, %v6428_v27  ;;  %10347 = vmatpush3.bf16.msra.mxu1 %v7217_v61  ;;  %v9958_v35 = vrot.slane %v6364_v54, 9  ;;  %v6432_v23 = vrot.slane %v10552_v8, 5  ;;  %v9959_v25 = vrot.slane %v6365_v30, 9  ;;  %v10554_v16 = vld [vmem:[#allocation4 + $0x30] sm:$0xf] }
 0x4fb   : > { %v10034_v52 = vcombine.low %v6425_v1, %v6429_v49  ;;  %10364 = vmatprep.subr.bf16.mxu1 %v15103_v34  ;;  %v6436_v5 = vrot.slane %v10553_v56, 5  ;;  %v9971_v27 = vcombine.low %v10554_v16, %v10555_v2  ;;  %v6440_v1 = vrot.slane %v13401_v38, 5  ;;  %v6368_v56 = vld [vmem:[#allocation4 + $0x70] sm:$0xe] }
 0x4fc   : > { %v6581_v57 = vpop.permute.xlu0 %6580  ;;  %v6433_v26 = vsel %vm10792_vm12, %v9958_v35, %v6432_v23  ;;  %v9961_v49 = vrot.slane %v6367_v44, 9  ;;  %v6369_v23 = vld [vmem:[#allocation4 + $0x78] sm:$0xe]  ;;  %v9973_v16 = vcombine.low %v13415_v22, %v13426_v47  ;;  %v6460_v22 = vrot.slane %v13577_v24, 5 }
 0x500   : > { %v6539_v15 = vpop.permute.xlu0 %6538 }
 0x501   : > { %7111 = vmatmul.mubr.bf16.gmra.mxu0 %v6954_v42  ;;  %v6854_v21 = vsel %vm2228_vm3, %v9970_v45, %v6539_v15 }
 0x502   : > { %10051 = vmatprep.mubr.msk.bf16.mxu0 %vm2228_vm3, %v10034_v52  ;;  %v6875_v43 = vsel %vm2262_vm6, %v6854_v21, %v13645_v32  ;;  %v6437_v32 = vsel %vm10792_vm12, %v9959_v25, %v6436_v5  ;;  %v6444_v52 = vrot.slane %v13411_v50, 5  ;;  %v9963_v5 = vrot.slane %v6369_v23, 9 }
 0x503   : > { %v6813_v41 = vpop.permute.xlu1 %6812  ;;  %v6891_v4 = vsel %vm2296_vm10, %v6875_v43, %v6635_v12  ;;  %v10035_v53 = vcombine.low %v6433_v26, %v6437_v32  ;;  %v6366_v12 = vld [vmem:[#allocation4 + $0x60] sm:$0xe]  ;;  %v6448_v26 = vrot.slane %v13490_v13, 5 }
 0x504   : > { %v9960_v62 = vrot.slane %v6366_v12, 9 }
 0x506   : > { %v6441_v40 = vsel %vm10792_vm12, %v9960_v62, %v6440_v1  ;;  %v6370_v1 = vld [vmem:[#allocation4 + $0x80] sm:$0xe] }
 0x50a   : > { %v6677_v7 = vpop.permute.xlu0 %6676 }
 0x510   : > { %v6675_v60 = vpop.permute.xlu1 %6674 }
 0x511   : > { %v6907_v58 = vsel %vm2330_vm13, %v6891_v4, %v6675_v60  ;;  %v6452_v60 = vrot.slane %v13499_v20, 5 }
 0x512   : > { %v6923_v55 = vsel %vm4565_vm7, %v6907_v58, %v6715_v0 }
 0x513   : > { %v6939_v59 = vsel %vm4582_vm0, %v6923_v55, %v13676_v36  ;;  %v9962_v55 = vrot.slane %v6368_v56, 9 }
 0x515   : > { %v6811_v37 = vpop.permute.xlu0 %6810 }
 0x516   : > { %v6957_v39 = vsel %vm4599_vm5, %v6939_v59, %v6811_v37  ;;  %v6453_v59 = vsel %vm10792_vm12, %v9963_v5, %v6452_v60 }
 0x517   : > { %7119 = vmatmul.mubr.bf16.gmra.mxu0 %v6957_v39 }
 0x518   : > { %10052 = vmatprep.mubr.msk.bf16.mxu0 %vm2228_vm3, %v10035_v53  ;;  %v6449_v53 = vsel %vm10792_vm12, %v9962_v55, %v6448_v26 }
 0x519   : > { %v6639_v42 = vpop.permute.xlu0 %6638  ;;  %v10037_v12 = vcombine.low %v6449_v53, %v6453_v59 }
 0x51a   : > { %v6541_v10 = vpop.permute.xlu1 %6540 }
 0x51b   : > { %v6857_v0 = vsel %vm2228_vm3, %v9971_v27, %v6541_v10 }
 0x51c   : > { %v6877_v36 = vsel %vm2262_vm6, %v6857_v0, %v6581_v57  ;;  %v6445_v57 = vsel %vm10792_vm12, %v9961_v49, %v6444_v52  ;;  %v9964_v49 = vrot.slane %v6370_v1, 9  ;;  %v6456_v52 = vrot.slane %v13574_v6, 5 }
 0x51d   : > { %v6893_v61 = vsel %vm2296_vm10, %v6877_v36, %v13629_v48  ;;  %v10036_v21 = vcombine.low %v6441_v40, %v6445_v57  ;;  %v6719_v54 = vpop.permute.xlu0 %6718  ;;  %v6371_v36 = vld [vmem:[#allocation4 + $0x88] sm:$0xe]  ;;  %v9974_v6 = vcombine.low %v13505_v19, %v13514_v14 }
 0x51e   : > { %v6641_v15 = vpop.permute.xlu1 %6640  ;;  %v6909_v46 = vsel %vm2330_vm13, %v6893_v61, %v6677_v7  ;;  %v10556_v7 = vld [vmem:[#allocation4 + $0x50] sm:$0xf]  ;;  %v9965_v40 = vrot.slane %v6371_v36, 9 }
 0x51f   : > { %v6925_v38 = vsel %vm4565_vm7, %v6909_v46, %v13694_v3  ;;  %v9972_v35 = vcombine.low %v10556_v7, %v13337_v63 }
 0x520   : > { %v6941_v45 = vsel %vm4582_vm0, %v6925_v38, %v13666_v18  ;;  %v6457_v38 = vsel %vm10792_vm12, %v9964_v49, %v6456_v52  ;;  %v6461_v57 = vsel %vm10792_vm12, %v9965_v40, %v6460_v22 }
 0x521   : > { %v6960_v50 = vsel %vm4599_vm5, %v6941_v45, %v6813_v41  ;;  %v6585_v30 = vpop.permute.xlu0 %6584 }
 0x522   : > { %7127 = vmatmul.mubr.bf16.gmra.mxu0 %v6960_v50  ;;  %v6583_v48 = vpop.permute.xlu1 %6582 }
 0x523   : > { %10053 = vmatprep.mubr.msk.bf16.mxu0 %vm2228_vm3, %v10036_v21  ;;  %v10038_v21 = vcombine.low %v6457_v38, %v6461_v57 }
 0x526   : > { %v6775_v43 = vpop.permute.xlu1 %6774 }
 0x52d   : > { %v6721_v18 = vpop.permute.xlu1 %6720 }
 0x52f   : > { %v6543_v3 = vpop.permute.xlu0 %6542 }
 0x530   : > { %v6860_v8 = vsel %vm2228_vm3, %v9972_v35, %v6543_v3  ;;  %v6464_v3 = vrot.slane %v13643_v31, 5 }
 0x531   : > { %v6879_v25 = vsel %vm2262_vm6, %v6860_v8, %v6583_v48  ;;  %v6373_v48 = vld [vmem:[#allocation4 + $0x98] sm:$0xe] }
 0x532   : > { %v6895_v58 = vsel %vm2296_vm10, %v6879_v25, %v6639_v42  ;;  %v9967_v8 = vrot.slane %v6373_v48, 9 }
 0x534   : > { %v6681_v41 = vpop.permute.xlu0 %6680 }
 0x537   : > { %v6679_v4 = vpop.permute.xlu1 %6678 }
 0x538   : > { %v6911_v63 = vsel %vm2330_vm13, %v6895_v58, %v6679_v4  ;;  %v9975_v58 = vcombine.low %v13584_v17, %v13600_v51 }
 0x539   : > { %v6927_v32 = vsel %vm4565_vm7, %v6911_v63, %v6719_v54  ;;  %v6372_v54 = vld [vmem:[#allocation4 + $0x90] sm:$0xe] }
 0x53a   : > { %v6943_v37 = vsel %vm4582_vm0, %v6927_v32, %v6775_v43  ;;  %v9966_v7 = vrot.slane %v6372_v54, 9 }
 0x53c   : > { %v6815_v39 = vpop.permute.xlu0 %6814  ;;  %v6465_v56 = vsel %vm10792_vm12, %v9966_v7, %v6464_v3 }
 0x53d   : > { %v6963_v20 = vsel %vm4599_vm5, %v6943_v37, %v6815_v39 }
 0x53e   : > { %7135 = vmatmul.mubr.bf16.gmra.mxu0 %v6963_v20 }
 0x53f   : > { %10054 = vmatprep.mubr.msk.bf16.mxu0 %vm2228_vm3, %v10037_v12 }
 0x540   : > { %v6777_v13 = vpop.permute.xlu0 %6776 }
 0x542   : > { %v6545_v2 = vpop.permute.xlu1 %6544 }
 0x543   : > { %v6863_v27 = vsel %vm2228_vm3, %v9973_v16, %v6545_v2 }
 0x544   : > { %v6881_v44 = vsel %vm2262_vm6, %v6863_v27, %v6585_v30  ;;  %v6643_v10 = vpop.permute.xlu0 %6642 }
 0x545   : > { %v6897_v62 = vsel %vm2296_vm10, %v6881_v44, %v6641_v15 }
 0x546   : > { %v6587_v0 = vpop.permute.xlu1 %6586  ;;  %v6913_v42 = vsel %vm2330_vm13, %v6897_v62, %v6681_v41 }
 0x547   : > { %v6929_v47 = vsel %vm4565_vm7, %v6913_v42, %v6721_v18  ;;  %v6468_v18 = vrot.slane %v13657_v9, 5 }
 0x548   : > { %v6723_v46 = vpop.permute.xlu0 %6722  ;;  %v6945_v15 = vsel %vm4582_vm0, %v6929_v47, %v6777_v13 }
 0x549   : > { %v6469_v41 = vsel %vm10792_vm12, %v9967_v8, %v6468_v18 }
 0x54a   : > { %v6779_v61 = vpop.permute.xlu1 %6778  ;;  %v10039_v9 = vcombine.low %v6465_v56, %v6469_v41 }
 0x54e   : > { %v6817_v45 = vpop.permute.xlu1 %6816 }
 0x54f   : > { %v6966_v50 = vsel %vm4599_vm5, %v6945_v15, %v6817_v45 }
 0x550   : > { %7143 = vmatmul.mubr.bf16.gmra.mxu0 %v6966_v50  ;;  %v6547_v24 = vpop.permute.xlu0 %6546 }
 0x551   : > { %v6866_v30 = vsel %vm2228_vm3, %v9974_v6, %v6547_v24  ;;  %10055 = vmatprep.mubr.msk.bf16.mxu0 %vm2228_vm3, %v10038_v21 }
 0x552   : > { %v6645_v43 = vpop.permute.xlu1 %6644  ;;  %v6883_v35 = vsel %vm2262_vm6, %v6866_v30, %v6587_v0 }
 0x553   : > { %v6899_v14 = vsel %vm2296_vm10, %v6883_v35, %v6643_v10 }
 0x554   : > { %v6589_v23 = vpop.permute.xlu0 %6588 }
 0x556   : > { %v6683_v19 = vpop.permute.xlu1 %6682 }
 0x557   : > { %v6915_v25 = vsel %vm2330_vm13, %v6899_v14, %v6683_v19 }
 0x558   : > { %v6931_v5 = vsel %vm4565_vm7, %v6915_v25, %v6723_v46 }
 0x559   : > { %v6947_v31 = vsel %vm4582_vm0, %v6931_v5, %v6779_v61 }
 0x55b   : > { %v6819_v60 = vpop.permute.xlu0 %6818 }
 0x55c   : > { %v6969_v4 = vsel %vm4599_vm5, %v6947_v31, %v6819_v60 }
 0x55d   : > { %7151 = vmatmul.mubr.bf16.gmra.mxu0 %v6969_v4 }
 0x55e   : > { %10056 = vmatprep.mubr.msk.bf16.mxu0 %vm2228_vm3, %v10039_v9 }
 0x560   : > { %v6549_v55 = vpop.permute.xlu1 %6548 }
 0x561   : > { %v6869_v26 = vsel %vm2228_vm3, %v9975_v58, %v6549_v55 }
 0x562   : > { %v6885_v63 = vsel %vm2262_vm6, %v6869_v26, %v6589_v23  ;;  %v6685_v32 = vpop.permute.xlu0 %6684 }
 0x563   : > { %v6901_v59 = vsel %vm2296_vm10, %v6885_v63, %v6645_v43 }
 0x564   : > { %v6917_v37 = vsel %vm2330_vm13, %v6901_v59, %v6685_v32  ;;  %v6725_v39 = vpop.permute.xlu1 %6724 }
 0x565   : > { %v6933_v53 = vsel %vm4565_vm7, %v6917_v37, %v6725_v39 }
 0x566   : > { %v6781_v20 = vpop.permute.xlu0 %6780 }
 0x567   : > { %v6949_v12 = vsel %vm4582_vm0, %v6933_v53, %v6781_v20 }
 0x56b   : > { %v6821_v13 = vpop.permute.xlu1 %6820 }
 0x56c   : > { %v6972_v16 = vsel %vm4599_vm5, %v6949_v12, %v6821_v13  ;;  %v7318_v13 = vld [vmem:[#allocation3 + $0x10] sm:$0xff] }
 0x56d   : > { %7159 = vmatmul.mubr.bf16.gmra.mxu0 %v6972_v16 }
 0x5b9   : > { %v7104_v17 = vpop.f32.mrf.mxu0 }
 0x5ba   : > { %v7167_v27 = vmax.f32 %v7104_v17, 0.0 }
 0x5bb   : > { %v7106_v51 = vpop.f32.mrf.mxu0 }
 0x5bc   : > { %v7316_v51 = vld [vmem:[#allocation3] sm:$0xff] }
 0x5bd   : > { %v7107_v2 = vpop.f32.mrf.mxu0 }
 0x5be   : > { %v7168_v44 = vmax.f32 %v7107_v2, 0.0 }
 0x5bf   : > { %v7109_v10 = vpop.f32.mrf.mxu0 }
 0x5c0   : > { %v7183_v62 = vpack.c.bf16 %v7168_v44, %v7167_v27  ;;  %v7319_v44 = vld [vmem:[#allocation3 + $0x18] sm:$0xff] }
 0x5c1   : > { %v7112_v1 = vpop.f32.mrf.mxu0 }
 0x5c2   : > { %10348 = vmatprep.mubr.msk.bf16.mxu1 %vm2203_vm2, %v7183_v62  ;;  %v7169_v42 = vmax.f32 %v7112_v1, 0.0  ;;  %v7317_v1 = vld [vmem:[#allocation3 + $0x8] sm:$0xff] }
 0x5c3   : > { %v7114_v0 = vpop.f32.mrf.mxu0 }
 0x5c5   : > { %v7115_v36 = vpop.f32.mrf.mxu0 }
 0x5c6   : > { %v7170_v49 = vmax.f32 %v7115_v36, 0.0  ;;  %v7717_v36 = vld [vmem:[#allocation4] sm:$0xf] }
 0x5c7   : > { %v7117_v52 = vpop.f32.mrf.mxu0 }
 0x5c8   : > { %v7184_v61 = vpack.c.bf16 %v7170_v49, %v7169_v42  ;;  %v13820_v52 = vld [vmem:[#allocation4 + $0x48] sm:$0xf] }
 0x5ca   : > { %10349 = vmatmul.mubr.msk.bf16.vlgmr.msra.gmra.mxu1 %vm2203_vm2, %v7184_v61 }
 0x5d7   : > { %v7120_v46 = vpop.f32.mrf.mxu0 }
 0x5d8   : > { %v7171_v47 = vmax.f32 %v7120_v46, 0.0  ;;  %v7750_v46 = vshrl.u32 %v7717_v36, 16 }
 0x5d9   : > { %v7122_v40 = vpop.f32.mrf.mxu0 }
 0x5da   : > { %v7753_v40 = vshll.u32 %v7717_v36, 16 }
 0x5db   : > { %v7123_v22 = vpop.f32.mrf.mxu0 }
 0x5dc   : > { %v7172_v38 = vmax.f32 %v7123_v22, 0.0 }
 0x5dd   : > { %v7125_v15 = vpop.f32.mrf.mxu0 }
 0x5de   : > { %v7185_v45 = vpack.c.bf16 %v7172_v38, %v7171_v47  ;;  %v8584_v15 = vshrl.u32 %v13820_v52, 16 }
 0x5e0   : > { %10352 = vmatprep.mubr.msk.bf16.mxu1 %vm2203_vm2, %v7185_v45  ;;  %v8587_v45 = vshll.u32 %v13820_v52, 16 }
 0x5e2   : > { %v7128_v57 = vpop.f32.mrf.mxu0 }
 0x5e3   : > { %v7173_v21 = vmax.f32 %v7128_v57, 0.0 }
 0x5e4   : > { %v7130_v50 = vpop.f32.mrf.mxu0 }
 0x5e6   : > { %v7131_v6 = vpop.f32.mrf.mxu0 }
 0x5e7   : > { %v7174_v54 = vmax.f32 %v7131_v6, 0.0 }
 0x5e8   : > { %v7133_v24 = vpop.f32.mrf.mxu0 }
 0x5e9   : > { %v7186_v48 = vpack.c.bf16 %v7174_v54, %v7173_v21  ;;  %v13824_v54 = vrot.slane %v7750_v46, 4  ;;  %v7755_v24 = vrot.slane %v7753_v40, 5 }
 0x5eb   : > { %10353 = vmatmul.mubr.msk.bf16.gmra.mxu1 %vm2203_vm2, %v7186_v48 }
 0x5fe   : > { %v7136_v30 = vpop.f32.mrf.mxu0 }
 0x5ff   : > { %v7175_v35 = vmax.f32 %v7136_v30, 0.0 }
 0x600   : > { %v7138_v43 = vpop.f32.mrf.mxu0 }
 0x602   : > { %v7139_v7 = vpop.f32.mrf.mxu0 }
 0x603   : > { %v7176_v3 = vmax.f32 %v7139_v7, 0.0 }
 0x604   : > { %v7141_v8 = vpop.f32.mrf.mxu0 }
 0x605   : > { %v7187_v18 = vpack.c.bf16 %v7176_v3, %v7175_v35  ;;  %v13826_v35 = vld [vmem:[#allocation4] sm:$0xe]  ;;  %v7632_v3 = vld [vmem:[#allocation4 + $0x18] sm:$0xf]  ;;  %v7635_v8 = vld [vmem:[#allocation4 + $0x1c] sm:$0x1] }
 0x607   : > { %10356 = vmatprep.mubr.msk.bf16.mxu1 %vm2203_vm2, %v7187_v18 }
 0x610   : > { %v7144_v23 = vpop.f32.mrf.mxu0 }
 0x611   : > { %v7177_v25 = vmax.f32 %v7144_v23, 0.0 }
 0x612   : > { %v7146_v19 = vpop.f32.mrf.mxu0 }
 0x613   : > { %v8586_v19 = vrot.slane %v8584_v15, 4 }
 0x614   : > { %v7147_v14 = vpop.f32.mrf.mxu0 }
 0x615   : > { %v7178_v56 = vmax.f32 %v7147_v14, 0.0  ;;  %v8589_v14 = vrot.slane %v8587_v45, 5 }
 0x616   : > { %v7149_v41 = vpop.f32.mrf.mxu0 }
 0x617   : > { %v7188_v5 = vpack.c.bf16 %v7178_v56, %v7177_v25 }
 0x619   : > { %10357 = vmatmul.mubr.msk.bf16.gmra.mxu1 %vm2203_vm2, %v7188_v5 }
 0x61d   : > { %v7152_v60 = vpop.f32.mrf.mxu0 }
 0x61e   : > { %v7179_v9 = vmax.f32 %v7152_v60, 0.0  ;;  %v13828_v60 = vld [vmem:[#allocation4 + $0x4] sm:$0x1] }
 0x61f   : > { %v7154_v31 = vpop.f32.mrf.mxu0 }
 0x620   : > { %v7620_v31 = vld [vmem:[#allocation4 + $0x8] sm:$0xf] }
 0x621   : > { %v7155_v4 = vpop.f32.mrf.mxu0 }
 0x622   : > { %v7180_v58 = vmax.f32 %v7155_v4, 0.0 }
 0x623   : > { %v7157_v55 = vpop.f32.mrf.mxu0 }
 0x624   : > { %v7189_v26 = vpack.c.bf16 %v7180_v58, %v7179_v9  ;;  %v10081_v9 = vrot.slane %v13826_v35, 9  ;;  %v7756_v58 = vor.u32 %v7755_v24, %v13824_v54  ;;  %v7759_v55 = vshll.u32 %v13828_v60, 16 }
 0x626   : > { %10360 = vmatprep.mubr.msk.bf16.mxu1 %vm2203_vm2, %v7189_v26  ;;  %v7725_v26 = vld [vmem:[#allocation4 + $0x50] sm:$0xf]  ;;  %v13858_v54 = vrot.slane %v7759_v55, 5 }
 0x627   : > { %v7865_v40 = vshll.u32 %v7725_v26, 16 }
 0x62d   : > { %v7160_v63 = vpop.f32.mrf.mxu0 }
 0x62e   : > { %v7181_v37 = vmax.f32 %v7160_v63, 0.0 }
 0x62f   : > { %v7162_v32 = vpop.f32.mrf.mxu0 }
 0x631   : > { %v7163_v59 = vpop.f32.mrf.mxu0 }
 0x632   : > { %v7182_v39 = vmax.f32 %v7163_v59, 0.0 }
 0x633   : > { %v7165_v53 = vpop.f32.mrf.mxu0 }
 0x634   : > { %v7190_v20 = vpack.c.bf16 %v7182_v39, %v7181_v37  ;;  %v7623_v39 = vld [vmem:[#allocation4 + $0xc] sm:$0x1] }
 0x635   : > { %v13837_v53 = vld [vmem:[#allocation4 + $0x4c] sm:$0x1] }
 0x636   : > { %10361 = vmatmul.mubr.msk.bf16.gmra.mxu1 %vm2203_vm2, %v7190_v20 }
 0x68a   : > { %v10350_v12 = vpop.f32.mrf.mxu1 }
 0x68b   : > { %v7334_v16 = vadd.f32 %v10350_v12, %v7318_v13 }
 0x68c   : > { %v7253_v17 = vpop.f32.mrf.mxu1 }
 0x68d   : > { %7350 = vst.msk [vmem:[#allocation3 + $0x10] sm:$0xff] %vm2228_vm3, %v7334_v16  ;;  %v7332_v2 = vadd.f32 %v7316_v51, %v7253_v17  ;;  %v13839_v16 = vld [vmem:[#allocation4 + $0x48] sm:$0xe]  ;;  %v8590_v17 = vor.u32 %v8589_v14, %v8586_v19 }
 0x68e   : > { %v10351_v27 = vpop.f32.mrf.mxu1 }
 0x68f   : > { %7348 = vst.msk [vmem:[#allocation3] sm:$0xff] %vm2228_vm3, %v7332_v2  ;;  %v7335_v10 = vadd.f32 %v10351_v27, %v7319_v44  ;;  %v7638_v27 = vld [vmem:[#allocation4 + $0x20] sm:$0xf]  ;;  %v8593_v44 = vshll.u32 %v13837_v53, 16  ;;  %v13860_v24 = vrot.slane %v8590_v17, 4 }
 0x690   : > { %v7256_v62 = vpop.f32.mrf.mxu1 }
 0x691   : > { %7351 = vst.msk [vmem:[#allocation3 + $0x18] sm:$0xff] %vm2228_vm3, %v7335_v10  ;;  %v7333_v0 = vadd.f32 %v7317_v1, %v7256_v62  ;;  %v7862_v10 = vshrl.u32 %v7725_v26, 16 }
 0x693   : > { %7349 = vst.msk [vmem:[#allocation3 + $0x8] sm:$0xff] %vm2228_vm3, %v7333_v0 }
 0x694   : > { %v7366_v42 = vld [vmem:[#allocation3 + $0x10] sm:$0xff] }
 0x695   : > { %v7382_v49 = vmax.f32 %v7366_v42, 0.0  ;;  %v13846_v42 = vld [vmem:[#allocation4 + $0x54] sm:$0x1] }
 0x696   : > { %v7364_v61 = vld [vmem:[#allocation3] sm:$0xff] }
 0x697   : > { %v10257_v22 = vpack.c.bf16 %v7382_v49, %v7382_v49  ;;  %v7380_v47 = vmax.f32 %v7364_v61, 0.0  ;;  %v7641_v49 = vld [vmem:[#allocation4 + $0x24] sm:$0x1]  ;;  %v8023_v61 = vrot.slane %v13828_v60, 5 }
 0x698   : > { %v7367_v38 = vld [vmem:[#allocation3 + $0x18] sm:$0xff] }
 0x699   : > { %v7477_v57 = vshrl.u32 %v10257_v22, 16  ;;  %v10255_v50 = vpack.c.bf16 %v7380_v47, %v7380_v47  ;;  %v7383_v6 = vmax.f32 %v7367_v38, 0.0  ;;  %v7480_v30 = vshll.u32 %v10257_v22, 16 }
 0x69a   : > { %v7365_v21 = vld [vmem:[#allocation3 + $0x8] sm:$0xff]  ;;  %v7871_v22 = vshll.u32 %v13846_v42, 16 }
 0x69b   : > { %v7479_v48 = vrot.slane %v7477_v57, 7  ;;  %v7461_v43 = vshrl.u32 %v10255_v50, 16  ;;  %v10258_v7 = vpack.c.bf16 %v7383_v6, %v7383_v6  ;;  %v7464_v18 = vshll.u32 %v10255_v50, 16  ;;  %v7626_v57 = vld [vmem:[#allocation4 + $0x10] sm:$0xf] }
 0x69c   : > { %v7381_v23 = vmax.f32 %v7365_v21, 0.0  ;;  %v7629_v50 = vld [vmem:[#allocation4 + $0x14] sm:$0x1]  ;;  %v13856_v21 = vrot.slane %v7756_v58, 4 }
 0x69d   : > { %v7482_v25 = vor.u32 %v7480_v30, %v7479_v48  ;;  %v7483_v56 = vrot.slane %v7479_v48, 4  ;;  %v7463_v41 = vrot.slane %v7461_v43, 7  ;;  %v7485_v5 = vshrl.u32 %v10258_v7, 16 }
 0x69e   : > { %v10256_v4 = vpack.c.bf16 %v7381_v23, %v7381_v23  ;;  %v7488_v12 = vshll.u32 %v10258_v7, 16  ;;  %v13866_v43 = vrot.slane %v8593_v44, 5  ;;  %v13868_v7 = vrot.slane %v7862_v10, 4 }
 0x69f   : > { %v7633_v63 = vsel %vm10665_vm8, %v7482_v25, %v7632_v3  ;;  %v7636_v32 = vsel %vm11723_vm9, %v7483_v56, %v7635_v8  ;;  %v7466_v59 = vor.u32 %v7464_v18, %v7463_v41  ;;  %v7467_v37 = vrot.slane %v7463_v41, 4  ;;  %v13870_v3 = vld [vmem:[#allocation4 + $0x50] sm:$0xe] }
 0x6a0   : > { %7634 = vst [vmem:[#allocation4 + $0x18] sm:$0xf] %v7633_v63  ;;  %7637 = vst [vmem:[#allocation4 + $0x1c] sm:$0x1] %v7636_v32  ;;  %v7487_v20 = vrot.slane %v7485_v5, 7  ;;  %v7469_v13 = vshrl.u32 %v10256_v4, 16 }
 0x6a1   : > { %v7621_v51 = vsel %vm10665_vm8, %v7466_v59, %v7620_v31  ;;  %v7624_v2 = vsel %vm11723_vm9, %v7467_v37, %v7623_v39  ;;  %v7472_v36 = vshll.u32 %v10256_v4, 16  ;;  %v13876_v56 = vrot.slane %v7865_v40, 5 }
 0x6a2   : > { %7622 = vst [vmem:[#allocation4 + $0x8] sm:$0xf] %v7621_v51  ;;  %7625 = vst [vmem:[#allocation4 + $0xc] sm:$0x1] %v7624_v2  ;;  %v7490_v62 = vor.u32 %v7488_v12, %v7487_v20  ;;  %v7491_v1 = vrot.slane %v7487_v20, 4  ;;  %v7471_v0 = vrot.slane %v7469_v13, 7  ;;  %v8024_v20 = vsel %vm10792_vm12, %v10081_v9, %v8023_v61 }
 0x6a3   : > { %v13878_v41 = vrot.slane %v7871_v22, 5  ;;  %v7322_v51 = vld [vmem:[#allocation3 + $0x30] sm:$0xff]  ;;  %v7320_v61 = vld [vmem:[#allocation3 + $0x20] sm:$0xff] }
 0x6a4   : > { %v7639_v47 = vsel %vm10665_vm8, %v7490_v62, %v7638_v27  ;;  %v7642_v38 = vsel %vm11723_vm9, %v7491_v1, %v7641_v49  ;;  %v7474_v15 = vor.u32 %v7472_v36, %v7471_v0  ;;  %v7475_v45 = vrot.slane %v7471_v0, 4 }
 0x6a5   : > { %7640 = vst [vmem:[#allocation4 + $0x20] sm:$0xf] %v7639_v47  ;;  %7643 = vst [vmem:[#allocation4 + $0x24] sm:$0x1] %v7642_v38  ;;  %v7762_v0 = vsel %vm10864_vm15, %v13856_v21, %v13858_v54  ;;  %v7868_v36 = vor.u32 %v13876_v56, %v13868_v7 }
 0x6a6   : > { %v7627_v48 = vsel %vm10665_vm8, %v7474_v15, %v7626_v57  ;;  %v7630_v30 = vsel %vm11723_vm9, %v7475_v45, %v7629_v50 }
 0x6a7   : > { %7628 = vst [vmem:[#allocation4 + $0x10] sm:$0xf] %v7627_v48  ;;  %7631 = vst [vmem:[#allocation4 + $0x14] sm:$0x1] %v7630_v30  ;;  %v8087_v8 = vld [vmem:[#allocation4 + $0x18] sm:$0xf] }
 0x6a8   : > { %v13872_v18 = vld [vmem:[#allocation4 + $0x1c] sm:$0x1]  ;;  %v8710_v23 = vld [vmem:[#allocation4 + $0x18] sm:$0xe]  ;;  %v8146_v19 = vshrl.u32 %v8087_v8, 16  ;;  %v8149_v14 = vshll.u32 %v8087_v8, 16 }
 0x6a9   : > { %v13874_v25 = vld [vmem:[#allocation4 + $0x18] sm:$0xf]  ;;  %v13880_v5 = vld [vmem:[#allocation4 + $0xc] sm:$0x1]  ;;  %v7974_v60 = vld [vmem:[#allocation4 + $0x8] sm:$0xe] }
 0x6aa   : > { %v13882_v31 = vld [vmem:[#allocation4 + $0x8] sm:$0xf]  ;;  %v10082_v4 = vrot.slane %v7974_v60, 9  ;;  %v8027_v58 = vrot.slane %v13880_v5, 5  ;;  %v10114_v55 = vrot.slane %v8710_v23, 9  ;;  %v8763_v26 = vrot.slane %v13872_v18, 5 }
 0x6ab   : > { %v13886_v63 = vrot.slane %v8146_v19, 4  ;;  %v13888_v32 = vrot.slane %v8149_v14, 5  ;;  %v8118_v59 = vshrl.u32 %v13882_v31, 16  ;;  %v8121_v12 = vshll.u32 %v13882_v31, 16  ;;  %v13898_v17 = vld [vmem:[#allocation4 + $0x18] sm:$0xe]  ;;  %v10354_v49 = vpop.f32.mrf.mxu1 }
 0x6ac   : > { %v8088_v39 = vld [vmem:[#allocation4 + $0x20] sm:$0xf]  ;;  %v8500_v13 = vshrl.u32 %v13874_v25, 16  ;;  %v8028_v10 = vsel %vm10792_vm12, %v10082_v4, %v8027_v58  ;;  %v8764_v35 = vsel %vm10792_vm12, %v10114_v55, %v8763_v26  ;;  %v8503_v38 = vshll.u32 %v13874_v25, 16  ;;  %v13917_v15 = vld [vmem:[#allocation4 + $0x1c] sm:$0x1] }
 0x6ad   : > { %v10154_v2 = vcombine.low %v8087_v8, %v8088_v39  ;;  %v8160_v27 = vshrl.u32 %v8088_v39, 16  ;;  %v8163_v44 = vshll.u32 %v8088_v39, 16  ;;  %v10099_v45 = vrot.slane %v13898_v17, 9  ;;  %v13924_v8 = vld [vmem:[#allocation4 + $0x24] sm:$0x1]  ;;  %v7269_v14 = vpop.f32.mrf.mxu1  ;;  %v7323_v60 = vld [vmem:[#allocation3 + $0x38] sm:$0xff] }
 0x6ae   : > { %v13902_v62 = vld [vmem:[#allocation4 + $0x14] sm:$0x1]  ;;  %v8709_v1 = vld [vmem:[#allocation4 + $0x10] sm:$0xe]  ;;  %v7338_v57 = vadd.f32 %v10354_v49, %v7322_v51  ;;  %v10145_v30 = vcombine.low %v8024_v20, %v8028_v10  ;;  %v8344_v23 = vld [vmem:[#allocation4 + $0x20] sm:$0xe]  ;;  %v7336_v17 = vadd.f32 %v7320_v61, %v7269_v14 }
 0x6af   : > { %v8086_v9 = vld [vmem:[#allocation4 + $0x10] sm:$0xf]  ;;  %8983 = vrot.lane.b32.xlu0 %v10154_v2, %s10573_s9  ;;  %v10113_v40 = vrot.slane %v8709_v1, 9  ;;  %v8759_v22 = vrot.slane %v13902_v62, 5  ;;  %v13920_v50 = vrot.slane %v8160_v27, 4  ;;  %v13922_v48 = vrot.slane %v8163_v44, 5  ;;  %v10355_v10 = vpop.f32.mrf.mxu1 }
 0x6b0   : > { %v13914_v47 = vld [vmem:[#allocation4 + $0x10] sm:$0xf]  ;;  %v13926_v19 = vld [vmem:[#allocation4 + $0xc] sm:$0x1]  ;;  %v13930_v58 = vrot.slane %v8118_v59, 4  ;;  %v8132_v55 = vshrl.u32 %v8086_v9, 16  ;;  %v10153_v59 = vcombine.low %v13882_v31, %v8086_v9 }
 0x6b1   : > { %v8760_v4 = vsel %vm10792_vm12, %v10113_v40, %v8759_v22  ;;  %v8135_v26 = vshll.u32 %v8086_v9, 16  ;;  %v13932_v39 = vld [vmem:[#allocation4 + $0x14] sm:$0x1]  ;;  %7354 = vst.msk [vmem:[#allocation3 + $0x30] sm:$0xff] %vm2228_vm3, %v7338_v57  ;;  %v13935_v51 = vrot.slane %v8121_v12, 5  ;;  %v8486_v2 = vshrl.u32 %v13914_v47, 16 }
 0x6b2   : > { %v10193_v20 = vcombine.low %v8760_v4, %v8764_v35  ;;  %v8341_v27 = vld [vmem:[#allocation4 + $0x8] sm:$0xe]  ;;  %v8342_v44 = vld [vmem:[#allocation4 + $0x10] sm:$0xe]  ;;  %v8489_v1 = vshll.u32 %v13914_v47, 16  ;;  %v13941_v49 = vrot.slane %v8500_v13, 4  ;;  %v8152_v12 = vor.u32 %v13888_v32, %v13886_v63 }
 0x6b3   : > { %8925 = vrot.lane.b32.xlu0 %v10145_v30, %s10578_s14  ;;  %v13943_v40 = vld [vmem:[#allocation4 + $0x14] sm:$0x1]  ;;  %v13945_v22 = vld [vmem:[#allocation4 + $0x1c] sm:$0x1]  ;;  %7352 = vst.msk [vmem:[#allocation3 + $0x20] sm:$0xff] %vm2228_vm3, %v7336_v17  ;;  %v7339_v35 = vadd.f32 %v10355_v10, %v7323_v60  ;;  %v7321_v61 = vld [vmem:[#allocation3 + $0x28] sm:$0xff]  ;;  %v7272_v30 = vpop.f32.mrf.mxu1 }
 0x6b4   : > { %10211 = vmatprep.mubr.msk.bf16.mxu0 %vm2228_vm3, %v10193_v20  ;;  %v13951_v57 = vrot.slane %v8132_v55, 4  ;;  %v13953_v31 = vrot.slane %v8135_v26, 5  ;;  %v8399_v13 = vrot.slane %v13917_v15, 5  ;;  %v7975_v9 = vld [vmem:[#allocation4 + $0x10] sm:$0xe]  ;;  %v10100_v14 = vrot.slane %v8344_v23, 9 }
 0x6b5   : > { %v8403_v4 = vrot.slane %v13924_v8, 5  ;;  %v10097_v37 = vrot.slane %v8341_v27, 9  ;;  %v8391_v63 = vrot.slane %v13926_v19, 5  ;;  %v7976_v32 = vld [vmem:[#allocation4 + $0x18] sm:$0xe]  ;;  %7355 = vst.msk [vmem:[#allocation3 + $0x38] sm:$0xff] %vm2228_vm3, %v7339_v35  ;;  %v7337_v60 = vadd.f32 %v7321_v61, %v7272_v30 }
 0x6b6   : > { %v13959_v17 = vrot.slane %v8486_v2, 4  ;;  %v10098_v55 = vrot.slane %v8342_v44, 9  ;;  %v8395_v26 = vrot.slane %v13932_v39, 5  ;;  %v7718_v20 = vld [vmem:[#allocation4 + $0x8] sm:$0xf]  ;;  %v13963_v10 = vrot.slane %v8503_v38, 5 }
 0x6b7   : > { %8981 = vrot.lane.b32.xlu0 %v10153_v59, %s10573_s9  ;;  %v8404_v23 = vsel %vm10792_vm12, %v10100_v14, %v8403_v4  ;;  %v10083_v27 = vrot.slane %v7975_v9, 9  ;;  %v8031_v46 = vrot.slane %v13943_v40, 5  ;;  %7353 = vst.msk [vmem:[#allocation3 + $0x28] sm:$0xff] %vm2228_vm3, %v7337_v60  ;;  %v10177_v2 = vcombine.low %v13914_v47, %v13874_v25  ;;  %v14055_v56 = vld [vmem:[#allocation4 + $0x10] sm:$0xf] }
 0x6b8   : > { %v8396_v44 = vsel %vm10792_vm12, %v10098_v55, %v8395_v26  ;;  %v10084_v35 = vrot.slane %v7976_v32, 9  ;;  %v8035_v61 = vrot.slane %v13945_v22, 5  ;;  %v7370_v59 = vld [vmem:[#allocation3 + $0x30] sm:$0xff]  ;;  %v8400_v38 = vsel %vm10792_vm12, %v10099_v45, %v8399_v13 }
 0x6b9   : > { %v8392_v9 = vsel %vm10792_vm12, %v10097_v37, %v8391_v63  ;;  %v7764_v30 = vshrl.u32 %v7718_v20, 16  ;;  %v7767_v14 = vshll.u32 %v7718_v20, 16  ;;  %v7386_v4 = vmax.f32 %v7370_v59, 0.0 }
 0x6ba   : > { %v13978_v60 = vrot.slane %v8489_v1, 5  ;;  %v10170_v6 = vcombine.low %v8400_v38, %v8404_v23  ;;  %v10169_v25 = vcombine.low %v8392_v9, %v8396_v44  ;;  %v7368_v47 = vld [vmem:[#allocation3 + $0x20] sm:$0xff]  ;;  %v13983_v32 = vsel %vm10792_vm12, %v10083_v27, %v8031_v46 }
 0x6bb   : > { %9117 = vrot.lane.b32.xlu0 %v10177_v2, %s10581_s8  ;;  %v7766_v55 = vrot.slane %v7764_v30, 4  ;;  %v7769_v26 = vrot.slane %v7767_v14, 5  ;;  %v7773_v45 = vshll.u32 %v13880_v5, 16  ;;  %v10261_v13 = vpack.c.bf16 %v7386_v4, %v7386_v4 }
 0x6bc   : > { %v7384_v37 = vmax.f32 %v7368_v47, 0.0  ;;  %v8036_v63 = vsel %vm10792_vm12, %v10084_v35, %v8035_v61  ;;  %v8166_v1 = vor.u32 %v13922_v48, %v13920_v50  ;;  %v7371_v20 = vld [vmem:[#allocation3 + $0x38] sm:$0xff]  ;;  %v13990_v44 = vrot.slane %v8152_v12, 4 }
 0x6bd   : > { %v7770_v23 = vor.u32 %v7769_v26, %v7766_v55  ;;  %v8155_v2 = vshll.u32 %v13917_v15, 16  ;;  %v8169_v46 = vshll.u32 %v13924_v8, 16  ;;  %v7509_v27 = vshrl.u32 %v10261_v13, 16 }
 0x6be   : > { %v10259_v59 = vpack.c.bf16 %v7384_v37, %v7384_v37  ;;  %v7387_v38 = vmax.f32 %v7371_v20, 0.0  ;;  %v10146_v5 = vcombine.low %v13983_v32, %v8036_v63  ;;  %v7369_v9 = vld [vmem:[#allocation3 + $0x28] sm:$0xff]  ;;  %v7775_v61 = vrot.slane %v7773_v45, 5  ;;  %v7656_v45 = vld [vmem:[#allocation4 + $0x38] sm:$0xf] }
 0x6bf   : > { %9063 = vrot.lane.b32.xlu0 %v10170_v6, %s10580_s30  ;;  %v7771_v35 = vrot.slane %v7770_v23, 4  ;;  %v13996_v30 = vrot.slane %v8166_v1, 4  ;;  %v8124_v50 = vor.u32 %v13935_v51, %v13930_v58  ;;  %v7511_v48 = vrot.slane %v7509_v27, 7  ;;  %v7659_v63 = vld [vmem:[#allocation4 + $0x3c] sm:$0x1] }
 0x6c0   : > { %v7512_v12 = vshll.u32 %v10261_v13, 16  ;;  %v7493_v15 = vshrl.u32 %v10259_v59, 16  ;;  %v10262_v14 = vpack.c.bf16 %v7387_v38, %v7387_v38  ;;  %v7496_v8 = vshll.u32 %v10259_v59, 16  ;;  %v7644_v27 = vld [vmem:[#allocation4 + $0x28] sm:$0xf] }
 0x6c1   : > { %v7385_v4 = vmax.f32 %v7369_v9, 0.0  ;;  %v14000_v47 = vrot.slane %v8155_v2, 5  ;;  %v14002_v55 = vrot.slane %v8169_v46, 5  ;;  %v7515_v26 = vrot.slane %v7511_v48, 4 }
 0x6c2   : > { %v7514_v32 = vor.u32 %v7512_v12, %v7511_v48  ;;  %v7495_v6 = vrot.slane %v7493_v15, 7  ;;  %v7517_v37 = vshrl.u32 %v10262_v14, 16  ;;  %v7776_v58 = vsel %vm10864_vm15, %v7771_v35, %v7775_v61 }
 0x6c3   : > { %v10260_v1 = vpack.c.bf16 %v7385_v4, %v7385_v4  ;;  %9061 = vrot.lane.b32.xlu0 %v10169_v25, %s10580_s30  ;;  %v8172_v51 = vsel %vm10864_vm15, %v13996_v30, %v14002_v55  ;;  %v14011_v13 = vrot.slane %v8124_v50, 4  ;;  %v7660_v23 = vsel %vm11723_vm9, %v7515_v26, %v7659_v63  ;;  %v7647_v25 = vld [vmem:[#allocation4 + $0x2c] sm:$0x1]  ;;  %v7665_v4 = vld [vmem:[#allocation4 + $0x44] sm:$0x1] }
 0x6c4   : > { %v7657_v20 = vsel %vm10665_vm8, %v7514_v32, %v7656_v45  ;;  %v7498_v2 = vor.u32 %v7496_v8, %v7495_v6  ;;  %v7499_v46 = vrot.slane %v7495_v6, 4  ;;  %7661 = vst [vmem:[#allocation4 + $0x3c] sm:$0x1] %v7660_v23  ;;  %v7519_v59 = vrot.slane %v7517_v37, 7  ;;  %v7650_v37 = vld [vmem:[#allocation4 + $0x30] sm:$0xf] }
 0x6c5   : > { %7658 = vst [vmem:[#allocation4 + $0x38] sm:$0xf] %v7657_v20  ;;  %v7520_v38 = vshll.u32 %v10262_v14, 16  ;;  %v7501_v9 = vshrl.u32 %v10260_v1, 16  ;;  %v8127_v35 = vshll.u32 %v13926_v19, 16  ;;  %v8138_v50 = vor.u32 %v13953_v31, %v13951_v57 }
 0x6c6   : > { %v7645_v61 = vsel %vm10665_vm8, %v7498_v2, %v7644_v27  ;;  %v7648_v30 = vsel %vm11723_vm9, %v7499_v46, %v7647_v25  ;;  %v8141_v48 = vshll.u32 %v13932_v39, 16  ;;  %v7523_v15 = vrot.slane %v7519_v59, 4  ;;  %v7662_v19 = vld [vmem:[#allocation4 + $0x40] sm:$0xf]  ;;  %v7653_v45 = vld [vmem:[#allocation4 + $0x34] sm:$0x1] }
 0x6c7   : > { %7646 = vst [vmem:[#allocation4 + $0x28] sm:$0xf] %v7645_v61  ;;  %7649 = vst [vmem:[#allocation4 + $0x2c] sm:$0x1] %v7648_v30  ;;  %v7522_v12 = vor.u32 %v7520_v38, %v7519_v59  ;;  %v7503_v8 = vrot.slane %v7501_v9, 7  ;;  %v7504_v14 = vshll.u32 %v10260_v1, 16  ;;  %8927 = vrot.lane.b32.xlu0 %v10146_v5, %s10578_s14  ;;  %v10137_v55 = vcombine.low %v7762_v0, %v7776_v58 }
 0x6c8   : > { %v8139_v32 = vrot.slane %v8138_v50, 4  ;;  %v8492_v39 = vor.u32 %v13978_v60, %v13959_v17  ;;  %v8495_v57 = vshll.u32 %v13902_v62, 16  ;;  %v7666_v5 = vsel %vm11723_vm9, %v7523_v15, %v7665_v4 }
 0x6c9   : > { %v7663_v31 = vsel %vm10665_vm8, %v7522_v12, %v7662_v19  ;;  %v7506_v26 = vor.u32 %v7504_v14, %v7503_v8  ;;  %v7507_v6 = vrot.slane %v7503_v8, 4  ;;  %7667 = vst [vmem:[#allocation4 + $0x44] sm:$0x1] %v7666_v5  ;;  %v8129_v21 = vrot.slane %v8127_v35, 5 }
 0x6ca   : > { %7664 = vst [vmem:[#allocation4 + $0x40] sm:$0xf] %v7663_v31  ;;  %v8143_v54 = vrot.slane %v8141_v48, 5  ;;  %v14041_v0 = vrot.slane %v7868_v36, 4  ;;  %v8055_v62 = vrot.slane %v13846_v42, 5  ;;  %v8158_v63 = vsel %vm10864_vm15, %v13990_v44, %v14000_v47 }
 0x6cb   : > { %v7651_v17 = vsel %vm10665_vm8, %v7506_v26, %v7650_v37  ;;  %v7654_v60 = vsel %vm11723_vm9, %v7507_v6, %v7653_v45  ;;  %8885 = vrot.lane.b32.xlu0 %v10137_v55, %s10575_s11  ;;  %v8506_v7 = vor.u32 %v13963_v10, %v13941_v49  ;;  %v14057_v36 = vld [vmem:[#allocation4 + $0x3c] sm:$0x1]  ;;  %v10162_v20 = vcombine.low %v8158_v63, %v8172_v51 }
 0x6cc   : > { %7652 = vst [vmem:[#allocation4 + $0x30] sm:$0xf] %v7651_v17  ;;  %7655 = vst [vmem:[#allocation4 + $0x34] sm:$0x1] %v7654_v60  ;;  %v7980_v1 = vld [vmem:[#allocation4 + $0x38] sm:$0xe]  ;;  %v8130_v23 = vsel %vm10864_vm15, %v14011_v13, %v8129_v21  ;;  %v8144_v44 = vsel %vm10864_vm15, %v8139_v32, %v8143_v54 }
 0x6cd   : > { %v14059_v58 = vld [vmem:[#allocation4 + $0x38] sm:$0xf]  ;;  %v14066_v47 = vld [vmem:[#allocation4 + $0x3c] sm:$0x1]  ;;  %v8493_v2 = vrot.slane %v8492_v39, 4  ;;  %v8497_v46 = vrot.slane %v8495_v57, 5  ;;  %v10161_v55 = vcombine.low %v8130_v23, %v8144_v44 }
 0x6ce   : > { %v8202_v49 = vshrl.u32 %v14059_v58, 16  ;;  %v8205_v10 = vshll.u32 %v14059_v58, 16  ;;  %v10088_v27 = vrot.slane %v7980_v1, 9  ;;  %v8211_v25 = vshll.u32 %v14066_v47, 16  ;;  %v10509_v26 = vld [vmem:[%s15040_s5 + $0x38] sm:$0xff]  }
 0x6cf   : > { %v8509_v51 = vshll.u32 %v13872_v18, 16  ;;  %v7778_v59 = vshrl.u32 %v14055_v56, 16  ;;  %v8051_v13 = vrot.slane %v14057_v36, 5  ;;  %9023 = vrot.lane.b32.xlu0 %v10162_v20, %s10576_s12  ;;  %v8507_v35 = vrot.slane %v8506_v7, 4  ;;  %9428 = vmatpush1.bf16.msra.mxu0 %v10509_v26  ;;  %v14115_v23 = vld [vmem:[#allocation4 + $0x18] sm:$0xf] }
 0x6d0   : > { %v8204_v38 = vrot.slane %v8202_v49, 4  ;;  %v8207_v9 = vrot.slane %v8205_v10, 5  ;;  %v14075_v61 = vrot.slane %v8211_v25, 5  ;;  %v7781_v48 = vshll.u32 %v14055_v56, 16  ;;  %v14080_v15 = vld [vmem:[#allocation4 + $0x44] sm:$0x1]  ;;  %9429 = vmatprep.subr.bf16.mxu0 %v15103_v34  ;;  %10373 = vmatpush1.bf16.msra.mxu1 %v10509_v26 }
 0x6d1   : > { %v8511_v30 = vrot.slane %v8509_v51, 5  ;;  %v14077_v50 = vrot.slane %v7778_v59, 4  ;;  %v8459_v12 = vld [vmem:[#allocation4 + $0x40] sm:$0xf]  ;;  %v15137_v8 = vrot.slane %v13837_v53, 5  ;;  %v15138_v14 = vrot.slane %v13839_v16, 9  ;;  %10365 = vmatprep.subr.bf16.mxu1 %v15103_v34 }
 0x6d2   : > { %v8715_v18 = vld [vmem:[#allocation4 + $0x40] sm:$0xe]  ;;  %v8208_v4 = vor.u32 %v8207_v9, %v8204_v38  ;;  %v10180_v32 = vcombine.low %v8459_v12, %v13820_v52  ;;  %v8570_v39 = vshrl.u32 %v8459_v12, 16  ;;  %v7787_v5 = vshll.u32 %v13943_v40, 16  ;;  %v14105_v54 = vld [vmem:[#allocation4 + $0x44] sm:$0x1] }
 0x6d3   : > { %v8788_v19 = vsel %vm10792_vm12, %v15138_v14, %v15137_v8  ;;  %v10119_v57 = vrot.slane %v8715_v18, 9  ;;  %v14089_v31 = vld [vmem:[#allocation4 + $0x40] sm:$0xf]  ;;  %v8573_v53 = vshll.u32 %v8459_v12, 16  ;;  %v8783_v16 = vrot.slane %v14080_v15, 5  ;;  %9021 = vrot.lane.b32.xlu0 %v10161_v55, %s10576_s12  ;;  %15139 = vst [vmem:[#allocation6_spill] sm:$0xff] %v14115_v23 }
 0x6d4   : > { %v14096_v6 = vld [vmem:[#allocation4 + $0x34] sm:$0x1]  ;;  %v7979_v37 = vld [vmem:[#allocation4 + $0x30] sm:$0xe]  ;;  %v8052_v45 = vsel %vm10792_vm12, %v10088_v27, %v8051_v13  ;;  %v8498_v52 = vsel %vm10864_vm15, %v8493_v2, %v8497_v46  ;;  %9123 = vrot.lane.b32.xlu1 %v10180_v32, %s10581_s8  ;;  %v8209_v17 = vrot.slane %v8208_v4, 4  ;;  %v8512_v60 = vsel %vm10864_vm15, %v8507_v35, %v8511_v30 }
 0x6d5   : > { %v10087_v40 = vrot.slane %v7979_v37, 9  ;;  %v8047_v21 = vrot.slane %v14096_v6, 5  ;;  %v14109_v63 = vrot.slane %v8570_v39, 4  ;;  %v8784_v7 = vsel %vm10792_vm12, %v10119_v57, %v8783_v16  ;;  %v14121_v46 = vld [vmem:[#allocation4 + $0x20] sm:$0xf]  ;;  %v10510_v27 = vld [vmem:[%s15040_s5 + $0x30] sm:$0xff]  }
 0x6d6   : > { %v8216_v1 = vshrl.u32 %v14089_v31, 16  ;;  %v8219_v20 = vshll.u32 %v14089_v31, 16  ;;  %v10196_v44 = vcombine.low %v8784_v7, %v8788_v19  ;;  %v8225_v10 = vshll.u32 %v14105_v54, 16  ;;  %v14127_v38 = vld [vmem:[#allocation4 + $0x28] sm:$0xf]  ;;  %9430 = vmatpush1.bf16.msra.mxu0 %v10510_v27  ;;  %10374 = vmatpush1.bf16.msra.mxu1 %v10510_v27  ;;  %v7326_v39 = vld [vmem:[#allocation3 + $0x50] sm:$0xff] }
 0x6d7   : > { %v8048_v49 = vsel %vm10792_vm12, %v10087_v40, %v8047_v21  ;;  %v10185_v2 = vcombine.low %v8498_v52, %v8512_v60  ;;  %v7783_v13 = vrot.slane %v7781_v48, 5  ;;  %v14129_v9 = vrot.slane %v8573_v53, 5  ;;  %9431 = vmatprep.subr.bf16.mxu0 %v15103_v34  ;;  %10366 = vmatprep.subr.bf16.mxu1 %v15103_v34  ;;  %v8347_v40 = vld [vmem:[#allocation4 + $0x38] sm:$0xe]  ;;  %v10511_v21 = vld [vmem:[%s15040_s5 + $0x28] sm:$0xff]  }
 0x6d8   : > { %v10148_v25 = vcombine.low %v8048_v49, %v8052_v45  ;;  %v8218_v51 = vrot.slane %v8216_v1, 4  ;;  %v8221_v59 = vrot.slane %v8219_v20, 5  ;;  %10214 = vmatprep.mubr.msk.bf16.mxu1 %vm2228_vm3, %v10196_v44  ;;  %v8227_v35 = vrot.slane %v8225_v10, 5  ;;  %v8348_v20 = vld [vmem:[#allocation4 + $0x40] sm:$0xe] }
 0x6d9   : > { %9157 = vrot.lane.b32.xlu0 %v10185_v2, %s10582_s15  ;;  %v7792_v30 = vshrl.u32 %v14115_v23, 16  ;;  %v7795_v12 = vshll.u32 %v14115_v23, 16  ;;  %v7784_v8 = vor.u32 %v7783_v13, %v14077_v50  ;;  %v7801_v48 = vshll.u32 %v13945_v22, 16  ;;  %v10358_v22 = vpop.f32.mrf.mxu1  ;;  %v7324_v49 = vld [vmem:[#allocation3 + $0x40] sm:$0xff]  ;;  %v7707_v23 = vld [vmem:[#allocation4 + $0x8c] sm:$0x1] }
 0x6da   : > { %8931 = vrot.lane.b32.xlu1 %v10148_v25, %s10578_s14  ;;  %v8222_v18 = vor.u32 %v8221_v59, %v8218_v51  ;;  %v8514_v14 = vshrl.u32 %v14121_v46, 16  ;;  %v8517_v55 = vshll.u32 %v14121_v46, 16  ;;  %v8528_v32 = vshrl.u32 %v14127_v38, 16  ;;  %v8471_v51 = vld [vmem:[#allocation4 + $0x24] sm:$0x1]  ;;  %9432 = vmatpush1.bf16.msra.mxu0 %v10511_v21 }
 0x6db   : > { %v7794_v19 = vrot.slane %v7792_v30, 4  ;;  %v7797_v4 = vrot.slane %v7795_v12, 5  ;;  %v7785_v26 = vrot.slane %v7784_v8, 4  ;;  %v7789_v53 = vrot.slane %v7787_v5, 5  ;;  %v7285_v44 = vpop.f32.mrf.mxu1  ;;  %v10512_v59 = vld [vmem:[%s15040_s5 + $0x20] sm:$0xff]   ;;  %10375 = vmatpush1.bf16.msra.mxu1 %v10511_v21  ;;  %9433 = vmatprep.subr.bf16.mxu0 %v15103_v34 }
 0x6dc   : > { %v8223_v57 = vrot.slane %v8222_v18, 4  ;;  %v8516_v16 = vrot.slane %v8514_v14, 4  ;;  %v8519_v37 = vrot.slane %v8517_v55, 5  ;;  %v8530_v45 = vrot.slane %v8528_v32, 4  ;;  %10367 = vmatprep.subr.bf16.mxu1 %v15103_v34  ;;  %v7327_v18 = vld [vmem:[#allocation3 + $0x58] sm:$0xff] }
 0x6dd   : > { %v7798_v50 = vor.u32 %v7797_v4, %v7794_v19  ;;  %v8531_v52 = vshll.u32 %v14127_v38, 16  ;;  %v7342_v60 = vadd.f32 %v10358_v22, %v7326_v39  ;;  %v8214_v7 = vsel %vm10864_vm15, %v8209_v17, %v14075_v61  ;;  %v10359_v12 = vpop.f32.mrf.mxu1  ;;  %v14165_v4 = vld [vmem:[#allocation4 + $0x30] sm:$0xf]  ;;  %v14463_v29 = vld [vmem:[#allocation4 + $0x28] sm:$0xf] }
 0x6de   : > { %v8228_v5 = vsel %vm10864_vm15, %v8223_v57, %v8227_v35  ;;  %v7803_v1 = vrot.slane %v7801_v48, 5  ;;  %v7790_v2 = vsel %vm10864_vm15, %v7785_v26, %v7789_v53  ;;  %v7340_v61 = vadd.f32 %v7324_v49, %v7285_v44  ;;  %v8472_v35 = vld [vmem:[#allocation4 + $0x2c] sm:$0x1]  ;;  %15140 = vst [vmem:[#allocation7_spill] sm:$0xff] %v14165_v4  ;;  %9434 = vmatpush1.bf16.msra.mxu0 %v10512_v59 }
 0x6df   : > { %v10164_v10 = vcombine.low %v8214_v7, %v8228_v5  ;;  %v7799_v27 = vrot.slane %v7798_v50, 4  ;;  %v8533_v25 = vrot.slane %v8531_v52, 5  ;;  %7358 = vst.msk [vmem:[#allocation3 + $0x50] sm:$0xff] %vm2228_vm3, %v7342_v60  ;;  %v10103_v17 = vrot.slane %v8347_v40, 9  ;;  %v7288_v57 = vpop.f32.mrf.mxu1  ;;  %v7325_v26 = vld [vmem:[#allocation3 + $0x48] sm:$0xff]  ;;  %10376 = vmatpush1.bf16.msra.mxu1 %v10512_v59  ;;  %9435 = vmatprep.subr.bf16.mxu0 %v15103_v34 }
 0x6e0   : > { %v8415_v13 = vrot.slane %v14066_v47, 5  ;;  %v8520_v30 = vor.u32 %v8519_v37, %v8516_v16  ;;  %v10104_v48 = vrot.slane %v8348_v20, 9  ;;  %v8419_v14 = vrot.slane %v14105_v54, 5  ;;  %7356 = vst.msk [vmem:[#allocation3 + $0x40] sm:$0xff] %vm2228_vm3, %v7340_v61  ;;  %v14174_v54 = vld [vmem:[#allocation4 + $0x38] sm:$0xf]  ;;  %10368 = vmatprep.subr.bf16.mxu1 %v15103_v34 }
 0x6e1   : > { %9027 = vrot.lane.b32.xlu1 %v10164_v10, %s10576_s12  ;;  %v7804_v8 = vsel %vm10864_vm15, %v7799_v27, %v7803_v1  ;;  %v8534_v19 = vor.u32 %v8533_v25, %v8530_v45  ;;  %v7343_v47 = vadd.f32 %v10359_v12, %v7327_v18  ;;  %v8523_v32 = vshll.u32 %v8471_v51, 16  ;;  %15141 = vst [vmem:[#allocation9_spill] sm:$0xff] %v14174_v54  ;;  %v14210_v20 = vld [vmem:[#allocation4 + $0x20] sm:$0xf] }
 0x6e2   : > { %v10138_v55 = vcombine.low %v7790_v2, %v7804_v8  ;;  %v8596_v39 = vsel %vm10864_vm15, %v13860_v24, %v13866_v43  ;;  %v10178_v53 = vcombine.low %v14121_v46, %v14127_v38  ;;  %v8537_v16 = vshll.u32 %v8472_v35, 16  ;;  %v10513_v46 = vld [vmem:[%s15040_s5 + $0x18] sm:$0xff]   ;;  %15143 = vst [vmem:[#allocation10_spill] sm:$0xff] %v14210_v20 }
 0x6e3   : > { %v15142_v50 = vrot.slane %v13870_v3, 9  ;;  %7359 = vst.msk [vmem:[#allocation3 + $0x58] sm:$0xff] %vm2228_vm3, %v7343_v47  ;;  %v7341_v38 = vadd.f32 %v7325_v26, %v7288_v57  ;;  %v14195_v42 = vsel %vm10792_vm12, %v10103_v17, %v8415_v13  ;;  %v8521_v3 = vrot.slane %v8520_v30, 4  ;;  %9436 = vmatpush1.bf16.msra.mxu0 %v10513_v46  ;;  %10377 = vmatpush1.bf16.msra.mxu1 %v10513_v46 }
 0x6e4   : > { %8887 = vrot.lane.b32.xlu0 %v10138_v55, %s10575_s11  ;;  %v7834_v45 = vshrl.u32 %v14165_v4, 16  ;;  %v8535_v52 = vrot.slane %v8534_v19, 4  ;;  %v8576_v40 = vor.u32 %v14129_v9, %v14109_v63  ;;  %v7837_v21 = vshll.u32 %v14165_v4, 16  ;;  %v10515_v9 = vld [vmem:[%s15040_s5 + $0x10] sm:$0xff]   ;;  %9437 = vmatprep.subr.bf16.mxu0 %v15103_v34  ;;  %v10516_v19 = vld [vmem:[%s15040_s5 + $0x8] sm:$0xff]  }
 0x6e5   : > { %v14186_v37 = vsel %vm10792_vm12, %v15142_v50, %v8055_v62  ;;  %v14201_v62 = vsel %vm10792_vm12, %v10104_v48, %v8419_v14  ;;  %7357 = vst.msk [vmem:[#allocation3 + $0x48] sm:$0xff] %vm2228_vm3, %v7341_v38  ;;  %v8525_v60 = vrot.slane %v8523_v32, 5  ;;  %v8539_v7 = vrot.slane %v8537_v16, 5  ;;  %10369 = vmatprep.subr.bf16.mxu1 %v15103_v34 }
 0x6e6   : > { %v8579_v5 = vshll.u32 %v14080_v15, 16  ;;  %v7848_v1 = vshrl.u32 %v14174_v54, 16  ;;  %v7374_v44 = vld [vmem:[#allocation3 + $0x50] sm:$0xff]  ;;  %v7836_v49 = vrot.slane %v7834_v45, 4  ;;  %v7839_v10 = vrot.slane %v7837_v21, 5 }
 0x6e7   : > { %v7843_v2 = vshll.u32 %v14096_v6, 16  ;;  %v7851_v63 = vshll.u32 %v14174_v54, 16  ;;  %v7390_v27 = vmax.f32 %v7374_v44, 0.0  ;;  %v10156_v15 = vcombine.low %v14059_v58, %v14089_v31  ;;  %v7372_v51 = vld [vmem:[#allocation3 + $0x40] sm:$0xff]  ;;  %9438 = vmatpush1.bf16.msra.mxu0 %v10515_v9  ;;  %10378 = vmatpush1.bf16.msra.mxu1 %v10515_v9  ;;  %v7683_v44 = vld [vmem:[#allocation4 + $0x6c] sm:$0x1] }
 0x6e8   : > { %9119 = vrot.lane.b32.xlu0 %v10178_v53, %s10581_s8  ;;  %v10172_v25 = vcombine.low %v14195_v42, %v14201_v62  ;;  %v8526_v6 = vsel %vm10864_vm15, %v8521_v3, %v8525_v60  ;;  %v8540_v59 = vsel %vm10864_vm15, %v8535_v52, %v8539_v7  ;;  %v14227_v61 = vrot.slane %v8576_v40, 4  ;;  %9439 = vmatprep.subr.bf16.mxu0 %v15103_v34  ;;  %v14251_v45 = vld [vmem:[#allocation4 + $0x24] sm:$0x1]  ;;  %v7680_v62 = vld [vmem:[#allocation4 + $0x68] sm:$0xf] }
 0x6e9   : > { %v7850_v17 = vrot.slane %v7848_v1, 4  ;;  %v7853_v13 = vrot.slane %v7851_v63, 5  ;;  %v10265_v35 = vpack.c.bf16 %v7390_v27, %v7390_v27  ;;  %v7388_v58 = vmax.f32 %v7372_v51, 0.0  ;;  %10370 = vmatprep.subr.bf16.mxu1 %v15103_v34  ;;  %v10517_v7 = vld [vmem:[%s15040_s5] sm:$0xff]   ;;  %v14264_v27 = vld [vmem:[#allocation4 + $0x28] sm:$0xf] }
 0x6ea   : > { %v7806_v31 = vshrl.u32 %v14210_v20, 16  ;;  %v7809_v30 = vshll.u32 %v14210_v20, 16  ;;  %v7375_v12 = vld [vmem:[#allocation3 + $0x58] sm:$0xff]  ;;  %v14232_v18 = vrot.slane %v8579_v5, 5  ;;  %v7840_v8 = vor.u32 %v7839_v10, %v7836_v49  ;;  %15144 = vst [vmem:[#allocation8_spill] sm:$0xff] %v14264_v27 }
 0x6eb   : > { %v14234_v48 = vrot.slane %v7843_v2, 5  ;;  %v7857_v14 = vshll.u32 %v14057_v36, 16  ;;  %v7541_v47 = vshrl.u32 %v10265_v35, 16  ;;  %v10263_v55 = vpack.c.bf16 %v7388_v58, %v7388_v58  ;;  %9440 = vmatpush1.bf16.msra.mxu0 %v10516_v19  ;;  %10379 = vmatpush1.bf16.msra.mxu1 %v10516_v19  ;;  %v7668_v2 = vld [vmem:[#allocation4 + $0x58] sm:$0xf] }
 0x6ec   : > { %v7391_v32 = vmax.f32 %v7375_v12, 0.0  ;;  %8987 = vrot.lane.b32.xlu0 %v10156_v15, %s10573_s9  ;;  %v10186_v57 = vcombine.low %v8526_v6, %v8540_v59  ;;  %v7373_v26 = vld [vmem:[#allocation3 + $0x48] sm:$0xff]  ;;  %v8582_v36 = vsel %vm10864_vm15, %v14227_v61, %v14232_v18  ;;  %v7854_v53 = vor.u32 %v7853_v13, %v7850_v17  ;;  %9441 = vmatprep.subr.bf16.mxu0 %v15103_v34  ;;  %v7671_v13 = vld [vmem:[#allocation4 + $0x5c] sm:$0x1]  ;;  %v7674_v18 = vld [vmem:[#allocation4 + $0x60] sm:$0xf] }
 0x6ed   : > { %v14246_v16 = vrot.slane %v7806_v31, 4  ;;  %v14248_v50 = vrot.slane %v7809_v30, 5  ;;  %v7543_v46 = vrot.slane %v7541_v47, 7  ;;  %v7544_v38 = vshll.u32 %v10265_v35, 16  ;;  %10371 = vmatprep.subr.bf16.mxu1 %v15103_v34  ;;  %v14274_v35 = vld [vmem:[#allocation4 + $0x2c] sm:$0x1] }
 0x6ee   : > { %v7525_v42 = vshrl.u32 %v10263_v55, 16  ;;  %v10266_v3 = vpack.c.bf16 %v7391_v32, %v7391_v32  ;;  %v7528_v52 = vshll.u32 %v10263_v55, 16  ;;  %v7389_v40 = vmax.f32 %v7373_v26, 0.0  ;;  %v7704_v20 = vld [vmem:[#allocation4 + $0x88] sm:$0xf] }
 0x6ef   : > { %v14253_v21 = vrot.slane %v7840_v8, 4  ;;  %v14255_v60 = vrot.slane %v7857_v14, 5  ;;  %v7546_v5 = vor.u32 %v7544_v38, %v7543_v46  ;;  %v7547_v1 = vrot.slane %v7543_v46, 4  ;;  %9442 = vmatpush1.bf16.msra.mxu0 %v10517_v7  ;;  %v10518_v8 = vld [vmem:[%s15040_s5 + $0x40] sm:$0xff]   ;;  %10380 = vmatpush1.bf16.msra.mxu1 %v10517_v7  ;;  %v7686_v46 = vld [vmem:[#allocation4 + $0x70] sm:$0xf] }
 0x6f0   : > { %v7527_v49 = vrot.slane %v7525_v42, 7  ;;  %v7549_v10 = vshrl.u32 %v10266_v3, 16  ;;  %9067 = vrot.lane.b32.xlu0 %v10172_v25, %s10580_s30  ;;  %v10264_v63 = vpack.c.bf16 %v7389_v40, %v7389_v40  ;;  %v14262_v9 = vrot.slane %v7854_v53, 4  ;;  %9457 = vmatprep.subr.bf16.mxu0 %v15103_v34  ;;  %v7689_v38 = vld [vmem:[#allocation4 + $0x74] sm:$0x1] }
 0x6f1   : > { %v7812_v15 = vor.u32 %v14248_v50, %v14246_v16  ;;  %v7815_v6 = vshll.u32 %v14251_v45, 16  ;;  %v7681_v51 = vsel %vm10665_vm8, %v7546_v5, %v7680_v62  ;;  %v7684_v25 = vsel %vm11723_vm9, %v7547_v1, %v7683_v44  ;;  %v14288_v50 = vld [vmem:[#allocation4 + $0x20] sm:$0xe]  ;;  %10372 = vmatprep.subr.bf16.mxu1 %v15103_v34  ;;  %v7330_v5 = vld [vmem:[#allocation3 + $0x70] sm:$0xff] }
 0x6f2   : > { %v7530_v59 = vor.u32 %v7528_v52, %v7527_v49  ;;  %v7531_v17 = vrot.slane %v7527_v49, 4  ;;  %7682 = vst [vmem:[#allocation4 + $0x68] sm:$0xf] %v7681_v51  ;;  %7685 = vst [vmem:[#allocation4 + $0x6c] sm:$0x1] %v7684_v25  ;;  %v7551_v58 = vrot.slane %v7549_v10, 7  ;;  %v7846_v42 = vsel %vm10864_vm15, %v14253_v21, %v14234_v48 }
 0x6f3   : > { %v7552_v31 = vshll.u32 %v10266_v3, 16  ;;  %v7533_v30 = vshrl.u32 %v10264_v63, 16  ;;  %v7536_v12 = vshll.u32 %v10264_v63, 16  ;;  %v7820_v47 = vshrl.u32 %v14264_v27, 16  ;;  %9458 = vmatpush2.bf16.msra.mxu0 %v10518_v8  ;;  %10381 = vmatpush2.bf16.msra.mxu1 %v10518_v8  ;;  %v7677_v48 = vld [vmem:[#allocation4 + $0x64] sm:$0x1] }
 0x6f4   : > { %v7669_v14 = vsel %vm10665_vm8, %v7530_v59, %v7668_v2  ;;  %v7672_v19 = vsel %vm11723_vm9, %v7531_v17, %v7671_v13  ;;  %9159 = vrot.lane.b32.xlu0 %v10186_v57, %s10582_s15  ;;  %v7823_v55 = vshll.u32 %v14264_v27, 16  ;;  %v7555_v26 = vrot.slane %v7551_v58, 4  ;;  %v7328_v1 = vld [vmem:[#allocation3 + $0x60] sm:$0xff] }
 0x6f5   : > { %7670 = vst [vmem:[#allocation4 + $0x58] sm:$0xf] %v7669_v14  ;;  %7673 = vst [vmem:[#allocation4 + $0x5c] sm:$0x1] %v7672_v19  ;;  %v7554_v32 = vor.u32 %v7552_v31, %v7551_v58  ;;  %v7535_v53 = vrot.slane %v7533_v30, 7  ;;  %v7829_v16 = vshll.u32 %v14274_v35, 16  ;;  %v10188_v57 = vcombine.low %v8582_v36, %v8596_v39 }
 0x6f6   : > { %v7860_v34 = vsel %vm10864_vm15, %v14262_v9, %v14255_v60  ;;  %v14309_v3 = vrot.slane %v7812_v15, 4  ;;  %v7690_v43 = vsel %vm11723_vm9, %v7555_v26, %v7689_v38  ;;  %v14316_v36 = vrot.slane %v7815_v6, 5  ;;  %v10362_v7 = vpop.f32.mrf.mxu1  ;;  %v14339_v31 = vld [vmem:[#allocation4 + $0x28] sm:$0xe]  ;;  %v7331_v26 = vld [vmem:[#allocation3 + $0x78] sm:$0xff] }
 0x6f7   : > { %v7687_v24 = vsel %vm10665_vm8, %v7554_v32, %v7686_v46  ;;  %v7538_v61 = vor.u32 %v7536_v12, %v7535_v53  ;;  %v7539_v39 = vrot.slane %v7535_v53, 4  ;;  %7691 = vst [vmem:[#allocation4 + $0x74] sm:$0x1] %v7690_v43  ;;  %v14318_v62 = vrot.slane %v7820_v47, 4 }
 0x6f8   : > { %7688 = vst [vmem:[#allocation4 + $0x70] sm:$0xf] %v7687_v24  ;;  %9163 = vrot.lane.b32.xlu0 %v10188_v57, %s10582_s15  ;;  %v14320_v52 = vrot.slane %v7823_v55, 5  ;;  %v14327_v44 = vrot.slane %v7829_v16, 5  ;;  %v7346_v10 = vadd.f32 %v10362_v7, %v7330_v5  ;;  %v10140_v15 = vcombine.low %v7846_v42, %v7860_v34  ;;  %v7301_v25 = vpop.f32.mrf.mxu1  ;;  %v7329_v42 = vld [vmem:[#allocation3 + $0x68] sm:$0xff] }
 0x6f9   : > { %v7675_v21 = vsel %vm10665_vm8, %v7538_v61, %v7674_v18  ;;  %v7678_v60 = vsel %vm11723_vm9, %v7539_v39, %v7677_v48  ;;  %v8095_v2 = vld [vmem:[#allocation4 + $0x68] sm:$0xf]  ;;  %v14330_v63 = vld [vmem:[#allocation4 + $0x6c] sm:$0x1]  ;;  %v7344_v30 = vadd.f32 %v7328_v1, %v7301_v25 }
 0x6fa   : > { %7676 = vst [vmem:[#allocation4 + $0x60] sm:$0xf] %v7675_v21  ;;  %7679 = vst [vmem:[#allocation4 + $0x64] sm:$0x1] %v7678_v60  ;;  %v8351_v9 = vld [vmem:[#allocation4 + $0x68] sm:$0xe]  ;;  %v10363_v32 = vpop.f32.mrf.mxu1 }
 0x6fb   : > { %v8258_v59 = vshrl.u32 %v8095_v2, 16  ;;  %v8261_v17 = vshll.u32 %v8095_v2, 16  ;;  %v10107_v13 = vrot.slane %v8351_v9, 9  ;;  %v8431_v58 = vrot.slane %v14330_v63, 5  ;;  %7362 = vst.msk [vmem:[#allocation3 + $0x70] sm:$0xff] %vm2228_vm3, %v7346_v10  ;;  %7360 = vst.msk [vmem:[#allocation3 + $0x60] sm:$0xff] %vm2228_vm3, %v7344_v30 }
 0x6fc   : > { %v14342_v12 = vld [vmem:[#allocation4 + $0x58] sm:$0xf]  ;;  %v14344_v8 = vld [vmem:[#allocation4 + $0x5c] sm:$0x1]  ;;  %8891 = vrot.lane.b32.xlu0 %v10140_v15, %s10575_s11  ;;  %v7347_v57 = vadd.f32 %v10363_v32, %v7331_v26  ;;  %v7304_v61 = vpop.f32.mrf.mxu1  ;;  %v7984_v25 = vld [vmem:[#allocation4 + $0x68] sm:$0xe] }
 0x6fd   : > { %v8349_v14 = vld [vmem:[#allocation4 + $0x58] sm:$0xe]  ;;  %v14353_v53 = vrot.slane %v8258_v59, 4  ;;  %v14355_v16 = vrot.slane %v8261_v17, 5  ;;  %v8230_v46 = vshrl.u32 %v14342_v12, 16  ;;  %v8233_v38 = vshll.u32 %v14342_v12, 16 }
 0x6fe   : > { %v10105_v34 = vrot.slane %v8349_v14, 9  ;;  %v8423_v24 = vrot.slane %v14344_v8, 5  ;;  %v14366_v21 = vld [vmem:[#allocation4 + $0x74] sm:$0x1]  ;;  %v14370_v60 = vsel %vm10792_vm12, %v10107_v13, %v8431_v58  ;;  %7363 = vst.msk [vmem:[#allocation3 + $0x78] sm:$0xff] %vm2228_vm3, %v7347_v57  ;;  %v7345_v5 = vadd.f32 %v7329_v42, %v7304_v61 }
 0x6ff   : > { %v8096_v39 = vld [vmem:[#allocation4 + $0x70] sm:$0xf]  ;;  %v14362_v18 = vrot.slane %v8230_v46, 4  ;;  %v14364_v48 = vrot.slane %v8233_v38, 5  ;;  %v8435_v30 = vrot.slane %v14366_v21, 5 }
 0x700   : > { %v10158_v1 = vcombine.low %v8095_v2, %v8096_v39  ;;  %v8272_v10 = vshrl.u32 %v8096_v39, 16  ;;  %v8275_v9 = vshll.u32 %v8096_v39, 16  ;;  %v8352_v15 = vld [vmem:[#allocation4 + $0x70] sm:$0xe]  ;;  %v14380_v13 = vsel %vm10792_vm12, %v10105_v34, %v8423_v24  ;;  %v14382_v58 = vld [vmem:[#allocation4 + $0x6c] sm:$0x1] }
 0x701   : > { %v8094_v59 = vld [vmem:[#allocation4 + $0x60] sm:$0xf]  ;;  %v10108_v17 = vrot.slane %v8352_v15, 9  ;;  %v14376_v14 = vld [vmem:[#allocation4 + $0x64] sm:$0x1]  ;;  %7361 = vst.msk [vmem:[#allocation3 + $0x68] sm:$0xff] %vm2228_vm3, %v7345_v5 }
 0x702   : > { %8991 = vrot.lane.b32.xlu1 %v10158_v1, %s10573_s9  ;;  %v14388_v2 = vrot.slane %v8272_v10, 4  ;;  %v14390_v26 = vrot.slane %v8275_v9, 5  ;;  %v10157_v46 = vcombine.low %v14342_v12, %v8094_v59  ;;  %v8244_v38 = vshrl.u32 %v8094_v59, 16  ;;  %v8350_v57 = vld [vmem:[#allocation4 + $0x60] sm:$0xe]  ;;  %v7378_v24 = vld [vmem:[#allocation3 + $0x70] sm:$0xff] }
 0x703   : > { %v7726_v42 = vld [vmem:[#allocation4 + $0x58] sm:$0xf]  ;;  %v14393_v34 = vld [vmem:[#allocation4 + $0x5c] sm:$0x1]  ;;  %v8247_v61 = vshll.u32 %v8094_v59, 16  ;;  %v8436_v39 = vsel %vm10792_vm12, %v10108_v17, %v8435_v30  ;;  %v10106_v15 = vrot.slane %v8350_v57, 9 }
 0x704   : > { %v8427_v5 = vrot.slane %v14376_v14, 5  ;;  %v14398_v1 = vld [vmem:[#allocation4 + $0x64] sm:$0x1]  ;;  %v7394_v10 = vmax.f32 %v7378_v24, 0.0  ;;  %v14400_v9 = vrot.slane %v8244_v38, 4  ;;  %v10174_v12 = vcombine.low %v14370_v60, %v8436_v39 }
 0x705   : > { %v7983_v55 = vld [vmem:[#allocation4 + $0x60] sm:$0xe]  ;;  %v8063_v47 = vrot.slane %v14398_v1, 5  ;;  %v14404_v40 = vrot.slane %v8247_v61, 5  ;;  %v10092_v30 = vrot.slane %v7984_v25, 9  ;;  %v8067_v24 = vrot.slane %v14382_v58, 5 }
 0x706   : > { %v7376_v51 = vld [vmem:[#allocation3 + $0x60] sm:$0xff]  ;;  %v8428_v59 = vsel %vm10792_vm12, %v10106_v15, %v8427_v5  ;;  %v10091_v17 = vrot.slane %v7983_v55, 9  ;;  %v10269_v57 = vpack.c.bf16 %v7394_v10, %v7394_v10  ;;  %8989 = vrot.lane.b32.xlu1 %v10157_v46, %s10573_s9  ;;  %v7379_v60 = vld [vmem:[#allocation3 + $0x78] sm:$0xff]  ;;  %v7876_v6 = vshrl.u32 %v7726_v42, 16 }
 0x707   : > { %v7392_v49 = vmax.f32 %v7376_v51, 0.0  ;;  %v10173_v38 = vcombine.low %v14380_v13, %v8428_v59  ;;  %v7879_v61 = vshll.u32 %v7726_v42, 16  ;;  %v7885_v43 = vshll.u32 %v14393_v34, 16  ;;  %v7982_v5 = vld [vmem:[#allocation4 + $0x58] sm:$0xe] }
 0x708   : > { %v8064_v39 = vsel %vm10792_vm12, %v10091_v17, %v8063_v47  ;;  %v7573_v19 = vshrl.u32 %v10269_v57, 16  ;;  %v7576_v15 = vshll.u32 %v10269_v57, 16  ;;  %v7395_v25 = vmax.f32 %v7379_v60, 0.0  ;;  %v7377_v51 = vld [vmem:[#allocation3 + $0x68] sm:$0xff] }
 0x709   : > { %v10267_v55 = vpack.c.bf16 %v7392_v49, %v7392_v49  ;;  %v8068_v46 = vsel %vm10792_vm12, %v10092_v30, %v8067_v24  ;;  %v7878_v13 = vrot.slane %v7876_v6, 4  ;;  %v7881_v10 = vrot.slane %v7879_v61, 5 }
 0x70a   : > { %v7887_v59 = vrot.slane %v7885_v43, 5  ;;  %v7575_v32 = vrot.slane %v7573_v19, 7  ;;  %v10270_v47 = vpack.c.bf16 %v7395_v25, %v7395_v25  ;;  %9071 = vrot.lane.b32.xlu1 %v10174_v12, %s10580_s30  ;;  %v7393_v42 = vmax.f32 %v7377_v51, 0.0  ;;  %v7713_v51 = vld [vmem:[#allocation4 + $0x94] sm:$0x1] }
 0x70b   : > { %v7557_v7 = vshrl.u32 %v10267_v55, 16  ;;  %v7560_v22 = vshll.u32 %v10267_v55, 16  ;;  %v10150_v17 = vcombine.low %v8064_v39, %v8068_v46  ;;  %v7882_v27 = vor.u32 %v7881_v10, %v7878_v13  ;;  %v7692_v55 = vld [vmem:[#allocation4 + $0x78] sm:$0xf]  ;;  %v8462_v10 = vld [vmem:[#allocation4 + $0x68] sm:$0xf] }
 0x70c   : > { %v10090_v57 = vrot.slane %v7982_v5, 9  ;;  %v7578_v49 = vor.u32 %v7576_v15, %v7575_v32  ;;  %v7579_v60 = vrot.slane %v7575_v32, 4  ;;  %v7581_v4 = vshrl.u32 %v10270_v47, 16 }
 0x70d   : > { %v7559_v54 = vrot.slane %v7557_v7, 7  ;;  %v7584_v30 = vshll.u32 %v10270_v47, 16  ;;  %v10268_v6 = vpack.c.bf16 %v7393_v42, %v7393_v42  ;;  %v7883_v24 = vrot.slane %v7882_v27, 4  ;;  %v7695_v7 = vld [vmem:[#allocation4 + $0x7c] sm:$0x1] }
 0x70e   : > { %v8059_v19 = vrot.slane %v14393_v34, 5  ;;  %v7705_v43 = vsel %vm10665_vm8, %v7578_v49, %v7704_v20  ;;  %v7708_v12 = vsel %vm11723_vm9, %v7579_v60, %v7707_v23  ;;  %9069 = vrot.lane.b32.xlu1 %v10173_v38, %s10580_s30  ;;  %v7583_v32 = vrot.slane %v7581_v4, 7 }
 0x70f   : > { %v7562_v39 = vor.u32 %v7560_v22, %v7559_v54  ;;  %v7563_v61 = vrot.slane %v7559_v54, 4  ;;  %7706 = vst [vmem:[#allocation4 + $0x88] sm:$0xf] %v7705_v43  ;;  %7709 = vst [vmem:[#allocation4 + $0x8c] sm:$0x1] %v7708_v12  ;;  %v7565_v15 = vshrl.u32 %v10268_v6, 16  ;;  %v7888_v27 = vsel %vm10864_vm15, %v7883_v24, %v7887_v59 }
 0x710   : > { %v7568_v25 = vshll.u32 %v10268_v6, 16  ;;  %v7710_v22 = vld [vmem:[#allocation4 + $0x90] sm:$0xf]  ;;  %v15145_v54 = vsel %vm10864_vm15, %v14041_v0, %v13878_v41  ;;  %v8060_v4 = vsel %vm10792_vm12, %v10090_v57, %v8059_v19  ;;  %v7586_v38 = vor.u32 %v7584_v30, %v7583_v32  ;;  %v8461_v57 = vld [vmem:[#allocation4 + $0x60] sm:$0xf] }
 0x711   : > { %v7693_v20 = vsel %vm10665_vm8, %v7562_v39, %v7692_v55  ;;  %v7696_v23 = vsel %vm11723_vm9, %v7563_v61, %v7695_v7  ;;  %v10141_v34 = vcombine.low %v15145_v54, %v7888_v27  ;;  %v7587_v5 = vrot.slane %v7583_v32, 4  ;;  %v7698_v30 = vld [vmem:[#allocation4 + $0x80] sm:$0xf]  ;;  %v14454_v43 = vld [vmem:[#allocation4 + $0x64] sm:$0x1] }
 0x712   : > { %7694 = vst [vmem:[#allocation4 + $0x78] sm:$0xf] %v7693_v20  ;;  %7697 = vst [vmem:[#allocation4 + $0x7c] sm:$0x1] %v7696_v23  ;;  %v7567_v46 = vrot.slane %v7565_v15, 7  ;;  %v10149_v13 = vcombine.low %v14186_v37, %v8060_v4  ;;  %8935 = vrot.lane.b32.xlu1 %v10150_v17, %s10578_s14  ;;  %v15146_v59 = vor.u32 %v14355_v16, %v14353_v53  ;;  %v8267_v41 = vshll.u32 %v14330_v63, 16 }
 0x713   : > { %v8278_v0 = vor.u32 %v14390_v26, %v14388_v2  ;;  %v8281_v42 = vshll.u32 %v14366_v21, 16  ;;  %v7711_v49 = vsel %vm10665_vm8, %v7586_v38, %v7710_v22  ;;  %v7714_v37 = vsel %vm11723_vm9, %v7587_v5, %v7713_v51  ;;  %v7701_v63 = vld [vmem:[#allocation4 + $0x84] sm:$0x1]  ;;  %15147 = vst [vmem:[#allocation5_spill] sm:$0xff] %v14454_v43  ;;  %v14456_v12 = vld [vmem:[#allocation4 + $0x6c] sm:$0x1] }
 0x714   : > { %v8265_v47 = vrot.slane %v15146_v59, 4  ;;  %v7570_v60 = vor.u32 %v7568_v25, %v7567_v46  ;;  %v7571_v17 = vrot.slane %v7567_v46, 4  ;;  %8933 = vrot.lane.b32.xlu0 %v10149_v13, %s10578_s14  ;;  %7712 = vst [vmem:[#allocation4 + $0x90] sm:$0xf] %v7711_v49  ;;  %7715 = vst [vmem:[#allocation4 + $0x94] sm:$0x1] %v7714_v37  ;;  %v10181_v19 = vcombine.low %v8461_v57, %v8462_v10 }
 0x715   : > { %v8269_v53 = vrot.slane %v8267_v41, 5  ;;  %v8279_v16 = vrot.slane %v8278_v0, 4  ;;  %v8283_v2 = vrot.slane %v8281_v42, 5  ;;  %v8612_v26 = vshrl.u32 %v8462_v10, 16  ;;  %15148 = vst [vmem:[#allocation11_spill] sm:$0xff] %v14456_v12 }
 0x716   : > { %v7699_v21 = vsel %vm10665_vm8, %v7570_v60, %v7698_v30  ;;  %v7702_v6 = vsel %vm11723_vm9, %v7571_v17, %v7701_v63  ;;  %v8615_v24 = vshll.u32 %v8462_v10, 16  ;;  %8893 = vrot.lane.b32.xlu1 %v10141_v34, %s10575_s11  ;;  %v8598_v55 = vshrl.u32 %v8461_v57, 16  ;;  %v14466_v25 = vld [vmem:[#allocation4 + $0x60] sm:$0xf]  ;;  %v14479_v13 = vld [vmem:[#allocation4 + $0x68] sm:$0xf] }
 0x717   : > { %7700 = vst [vmem:[#allocation4 + $0x80] sm:$0xf] %v7699_v21  ;;  %7703 = vst [vmem:[#allocation4 + $0x84] sm:$0x1] %v7702_v6  ;;  %v8270_v39 = vsel %vm10864_vm15, %v8265_v47, %v8269_v53  ;;  %v8284_v28 = vsel %vm10864_vm15, %v8279_v16, %v8283_v2  ;;  %v8614_v61 = vrot.slane %v8612_v26, 4  ;;  %v8601_v15 = vshll.u32 %v8461_v57, 16 }
 0x718   : > { %v10166_v7 = vcombine.low %v8270_v39, %v8284_v28  ;;  %v8617_v32 = vrot.slane %v8615_v24, 5  ;;  %9125 = vrot.lane.b32.xlu0 %v10181_v19, %s10581_s8  ;;  %15149 = vst [vmem:[#allocation12_spill] sm:$0xff] %v14466_v25  ;;  %v8043_v27 = vrot.slane %v14274_v35, 5  ;;  %v8600_v20 = vrot.slane %v8598_v55, 4  ;;  %15151 = vst [vmem:[#allocation13_spill] sm:$0xff] %v14479_v13 }
 0x719   : > { %v8607_v23 = vshll.u32 %v14454_v43, 16  ;;  %v8621_v22 = vshll.u32 %v14456_v12, 16  ;;  %v8239_v54 = vshll.u32 %v14344_v8, 16  ;;  %v8603_v34 = vrot.slane %v8601_v15, 5  ;;  %v14493_v63 = vld [vmem:[#allocation4 + $0x70] sm:$0xf] }
 0x71a   : > { %v8618_v4 = vor.u32 %v8617_v32, %v8614_v61  ;;  %v15150_v38 = vor.u32 %v14364_v48, %v14362_v18  ;;  %v8250_v51 = vor.u32 %v14404_v40, %v14400_v9  ;;  %9031 = vrot.lane.b32.xlu1 %v10166_v7, %s10576_s12  ;;  %v8253_v35 = vshll.u32 %v14376_v14, 16  ;;  %v14497_v21 = vld [vmem:[#allocation4 + $0x78] sm:$0xf]  ;;  %v14499_v6 = vld [vmem:[#allocation4 + $0x30] sm:$0xf] }
 0x71b   : > { %v8241_v46 = vrot.slane %v8239_v54, 5  ;;  %v7890_v10 = vshrl.u32 %v14466_v25, 16  ;;  %v8174_v8 = vshrl.u32 %v14463_v29, 16  ;;  %v8604_v59 = vor.u32 %v8603_v34, %v8600_v20  ;;  %v14505_v61 = vld [vmem:[#allocation4 + $0x30] sm:$0xf] }
 0x71c   : > { %v8237_v5 = vrot.slane %v15150_v38, 4  ;;  %v8619_v47 = vrot.slane %v8618_v4, 4  ;;  %v8251_v41 = vrot.slane %v8250_v51, 4  ;;  %v7893_v18 = vshll.u32 %v14466_v25, 16  ;;  %v7988_v51 = vld [vmem:[#allocation4 + $0x88] sm:$0xe] }
 0x71d   : > { %v8609_v48 = vrot.slane %v8607_v23, 5  ;;  %v8623_v0 = vrot.slane %v8621_v22, 5  ;;  %v8255_v42 = vrot.slane %v8253_v35, 5  ;;  %v7892_v40 = vrot.slane %v7890_v10, 4  ;;  %v14519_v22 = vld [vmem:[#allocation4 + $0x38] sm:$0xf] }
 0x71e   : > { %v8605_v9 = vrot.slane %v8604_v59, 4  ;;  %v8242_v57 = vsel %vm10864_vm15, %v8237_v5, %v8241_v46  ;;  %v7895_v14 = vrot.slane %v7893_v18, 5  ;;  %v7904_v49 = vshrl.u32 %v14479_v13, 16  ;;  %v14543_v35 = vld [vmem:[#allocation4 + $0x90] sm:$0xf] }
 0x71f   : > { %v8624_v37 = vsel %vm10864_vm15, %v8619_v47, %v8623_v0  ;;  %v8256_v60 = vsel %vm10864_vm15, %v8251_v41, %v8255_v42  ;;  %v7899_v17 = vshll.u32 %v14398_v1, 16  ;;  %v7907_v30 = vshll.u32 %v14479_v13, 16  ;;  %v14552_v41 = vld [vmem:[#allocation4 + $0x7c] sm:$0x1]  ;;  %v14554_v18 = vld [vmem:[#allocation4 + $0x2c] sm:$0x1] }
 0x720   : > { %v8610_v53 = vsel %vm10864_vm15, %v8605_v9, %v8609_v48  ;;  %v10165_v16 = vcombine.low %v8242_v57, %v8256_v60  ;;  %v7896_v2 = vor.u32 %v7895_v14, %v7892_v40  ;;  %v7906_v26 = vrot.slane %v7904_v49, 4  ;;  %v7986_v9 = vld [vmem:[#allocation4 + $0x78] sm:$0xe] }
 0x721   : > { %v10189_v24 = vcombine.low %v8610_v53, %v8624_v37  ;;  %v7909_v19 = vrot.slane %v7907_v30, 5  ;;  %v7913_v39 = vshll.u32 %v14382_v58, 16  ;;  %v15152_v1 = vor.u32 %v14320_v52, %v14318_v62  ;;  %v14521_v54 = vpop.permute.xlu0 %8983 }
 0x722   : > { %9029 = vrot.lane.b32.xlu0 %v10165_v16, %s10576_s12  ;;  %v7897_v55 = vrot.slane %v7896_v2, 4  ;;  %v8626_v7 = vshrl.u32 %v14493_v63, 16  ;;  %v8629_v32 = vshll.u32 %v14493_v63, 16  ;;  %v15153_v15 = vrot.slane %v14339_v31, 9  ;;  %v14570_v16 = vld [vmem:[#allocation4 + $0x74] sm:$0x1] }
 0x723   : > { %v7827_v28 = vrot.slane %v15152_v1, 4  ;;  %9165 = vrot.lane.b32.xlu1 %v10189_v24, %s10582_s15  ;;  %v7901_v58 = vrot.slane %v7899_v17, 5  ;;  %v7910_v23 = vor.u32 %v7909_v19, %v7906_v26  ;;  %v8640_v52 = vshrl.u32 %v14497_v21, 16  ;;  %v8106_v17 = vld [vmem:[#allocation4 + $0x34] sm:$0x1] }
 0x724   : > { %v8044_v20 = vsel %vm10792_vm12, %v15153_v15, %v8043_v27  ;;  %v15154_v31 = vsel %vm10864_vm15, %v14309_v3, %v14316_v36  ;;  %v15155_v34 = vrot.slane %v14251_v45, 5  ;;  %v15156_v4 = vrot.slane %v14288_v50, 9  ;;  %v7985_v2 = vld [vmem:[#allocation4 + $0x70] sm:$0xe] }
 0x725   : > { %v7832_v62 = vsel %vm10864_vm15, %v7827_v28, %v14327_v44  ;;  %v14534_v44 = vld [vmem:[#allocation4 + $0x88] sm:$0xf]  ;;  %v10155_v5 = vcombine.low %v14463_v29, %v14499_v6  ;;  %v7902_v46 = vsel %vm10864_vm15, %v7897_v55, %v7901_v58  ;;  %v7911_v3 = vrot.slane %v7910_v23, 4  ;;  %v14561_v57 = vpop.permute.xlu0 %8925  ;;  %v14577_v55 = vld [vmem:[#allocation4 + $0x78] sm:$0xf] }
 0x726   : > { %v10139_v27 = vcombine.low %v15154_v31, %v7832_v62  ;;  %v8040_v38 = vsel %vm10792_vm12, %v15156_v4, %v15155_v34  ;;  %v7915_v36 = vrot.slane %v7913_v39, 5  ;;  %v8643_v45 = vshll.u32 %v14497_v21, 16  ;;  %v14589_v23 = vld [vmem:[#allocation4 + $0x80] sm:$0xf]  ;;  %v8346_v34 = vld [vmem:[#allocation4 + $0x30] sm:$0xe] }
 0x727   : > { %v14546_v50 = vrot.slane %v8626_v7, 4  ;;  %v14548_v10 = vrot.slane %v8629_v32, 5  ;;  %v10182_v59 = vcombine.low %v14493_v63, %v14497_v21  ;;  %v10147_v47 = vcombine.low %v8040_v38, %v8044_v20 }
 0x728   : > { %8889 = vrot.lane.b32.xlu0 %v10139_v27, %s10575_s11  ;;  %v7916_v48 = vsel %vm10864_vm15, %v7911_v3, %v7915_v36  ;;  %v14558_v0 = vrot.slane %v8640_v52, 4  ;;  %v8176_v42 = vrot.slane %v8174_v8, 4  ;;  %v8177_v40 = vshll.u32 %v14463_v29, 16 }
 0x729   : > { %v10142_v14 = vcombine.low %v7902_v46, %v7916_v48  ;;  %v8314_v49 = vshrl.u32 %v14534_v44, 16  ;;  %v8317_v37 = vshll.u32 %v14534_v44, 16  ;;  %v8328_v60 = vshrl.u32 %v14543_v35, 16  ;;  %v14579_v7 = vpop.permute.xlu0 %8981 }
 0x72a   : > { %v14566_v30 = vrot.slane %v8643_v45, 5  ;;  %v8179_v63 = vrot.slane %v8177_v40, 5  ;;  %v8188_v53 = vshrl.u32 %v14499_v6, 16  ;;  %v8191_v8 = vshll.u32 %v14499_v6, 16  ;;  %v8345_v6 = vld [vmem:[#allocation4 + $0x28] sm:$0xe] }
 0x72b   : > { %8895 = vrot.lane.b32.xlu1 %v10142_v14, %s10575_s11  ;;  %v8331_v29 = vshll.u32 %v14543_v35, 16  ;;  %v10094_v26 = vrot.slane %v7986_v9, 9  ;;  %v8075_v21 = vrot.slane %v14552_v41, 5  ;;  %v8183_v24 = vshll.u32 %v14554_v18, 16 }
 0x72c   : > { %8929 = vrot.lane.b32.xlu0 %v10147_v47, %s10578_s14  ;;  %v8190_v19 = vrot.slane %v8188_v53, 4  ;;  %v8193_v39 = vrot.slane %v8191_v8, 5  ;;  %v8180_v1 = vor.u32 %v8179_v63, %v8176_v42  ;;  %v8197_v28 = vshll.u32 %v8106_v17, 16  ;;  %v14601_v47 = vld [vmem:[#allocation4 + $0x80] sm:$0xf] }
 0x72d   : > { %v14581_v32 = vrot.slane %v8314_v49, 4  ;;  %v14583_v15 = vrot.slane %v8317_v37, 5  ;;  %v10160_v20 = vcombine.low %v14534_v44, %v14543_v35  ;;  %v14587_v58 = vrot.slane %v8328_v60, 4  ;;  %v14603_v48 = vpop.permute.xlu0 %9117  ;;  %v14616_v8 = vld [vmem:[#allocation4 + $0x88] sm:$0xf] }
 0x72e   : > { %v10093_v62 = vrot.slane %v7985_v2, 9  ;;  %v8071_v52 = vrot.slane %v14570_v16, 5  ;;  %v8181_v31 = vrot.slane %v8180_v1, 4  ;;  %v8194_v27 = vor.u32 %v8193_v39, %v8190_v19  ;;  %v14631_v19 = vld [vmem:[#allocation4 + $0x3c] sm:$0x1] }
 0x72f   : > { %9127 = vrot.lane.b32.xlu1 %v10182_v59, %s10581_s8  ;;  %v14593_v4 = vrot.slane %v8331_v29, 5  ;;  %v8076_v38 = vsel %vm10792_vm12, %v10094_v26, %v8075_v21  ;;  %v8185_v44 = vrot.slane %v8183_v24, 5  ;;  %v8286_v46 = vshrl.u32 %v14577_v55, 16  ;;  %v14627_v21 = vld [vmem:[#allocation4 + $0x94] sm:$0x1] }
 0x730   : > { %8985 = vrot.lane.b32.xlu0 %v10155_v5, %s10573_s9  ;;  %v8195_v3 = vrot.slane %v8194_v27, 4  ;;  %v8199_v36 = vrot.slane %v8197_v28, 5  ;;  %v8289_v45 = vshll.u32 %v14577_v55, 16  ;;  %v8300_v35 = vshrl.u32 %v14589_v23, 16  ;;  %v14629_v24 = vld [vmem:[#allocation4 + $0x34] sm:$0x1] }
 0x731   : > { %v8303_v59 = vshll.u32 %v14589_v23, 16  ;;  %v10101_v42 = vrot.slane %v8345_v6, 9  ;;  %v8407_v5 = vrot.slane %v14554_v18, 5  ;;  %v10102_v40 = vrot.slane %v8346_v34, 9  ;;  %v14633_v39 = vpop.permute.xlu0 %9063 }
 0x732   : > { %v8072_v9 = vsel %vm10792_vm12, %v10093_v62, %v8071_v52  ;;  %v8186_v14 = vsel %vm10864_vm15, %v8181_v31, %v8185_v44  ;;  %v8200_v49 = vsel %vm10864_vm15, %v8195_v3, %v8199_v36  ;;  %v8411_v37 = vrot.slane %v8106_v17, 5  ;;  %v8356_v62 = vld [vmem:[#allocation4 + $0x90] sm:$0xe] }
 0x733   : > { %8995 = vrot.lane.b32.xlu1 %v10160_v20, %s10573_s9  ;;  %v10151_v60 = vcombine.low %v8072_v9, %v8076_v38  ;;  %v10163_v63 = vcombine.low %v8186_v14, %v8200_v49  ;;  %v14614_v53 = vrot.slane %v8286_v46, 4  ;;  %v8654_v18 = vshrl.u32 %v14601_v47, 16  ;;  %v14642_v20 = vld [vmem:[#allocation4 + $0x8c] sm:$0x1]  ;;  %v14648_v38 = vld [vmem:[#allocation4 + $0x7c] sm:$0x1] }
 0x734   : > { %v14619_v29 = vrot.slane %v8289_v45, 5  ;;  %v10159_v2 = vcombine.low %v14577_v55, %v14589_v23  ;;  %v14623_v26 = vrot.slane %v8300_v35, 4  ;;  %v8412_v17 = vsel %vm10792_vm12, %v10102_v40, %v8411_v37  ;;  %v8355_v23 = vld [vmem:[#allocation4 + $0x88] sm:$0xe]  ;;  %v14654_v45 = vld [vmem:[#allocation4 + $0x84] sm:$0x1] }
 0x735   : > { %9025 = vrot.lane.b32.xlu0 %v10163_v63, %s10576_s12  ;;  %v14636_v1 = vrot.slane %v8303_v59, 5  ;;  %v8408_v28 = vsel %vm10792_vm12, %v10101_v42, %v8407_v5  ;;  %v8657_v55 = vshll.u32 %v14601_v47, 16  ;;  %v8542_v6 = vshrl.u32 %v14505_v61, 16  ;;  %v8353_v35 = vld [vmem:[#allocation4 + $0x78] sm:$0xe]  ;;  %v14658_v14 = vpop.permute.xlu0 %9061 }
 0x736   : > { %v8668_v52 = vshrl.u32 %v14616_v8, 16  ;;  %v8545_v31 = vshll.u32 %v14505_v61, 16  ;;  %v8556_v27 = vshrl.u32 %v14519_v22, 16  ;;  %v8559_v34 = vshll.u32 %v14519_v22, 16  ;;  %v8354_v9 = vld [vmem:[#allocation4 + $0x80] sm:$0xe] }
 0x737   : > { %8937 = vrot.lane.b32.xlu1 %v10151_v60, %s10578_s14  ;;  %v10171_v44 = vcombine.low %v8408_v28, %v8412_v17  ;;  %v14651_v46 = vrot.slane %v8654_v18, 4  ;;  %v8544_v36 = vrot.slane %v8542_v6, 4  ;;  %v10183_v59 = vcombine.low %v14601_v47, %v14616_v8  ;;  %v14664_v18 = vld [vmem:[#allocation4 + $0x84] sm:$0x1] }
 0x738   : > { %v8547_v42 = vrot.slane %v8545_v31, 5  ;;  %v8558_v5 = vrot.slane %v8556_v27, 4  ;;  %v8561_v40 = vrot.slane %v8559_v34, 5  ;;  %v10112_v49 = vrot.slane %v8356_v62, 9  ;;  %v14667_v31 = vld [vmem:[#allocation4 + $0x8c] sm:$0x1] }
 0x739   : > { %9065 = vrot.lane.b32.xlu0 %v10171_v44, %s10580_s30  ;;  %v8451_v37 = vrot.slane %v14627_v21, 5  ;;  %v8551_v60 = vshll.u32 %v14629_v24, 16  ;;  %v8565_v63 = vshll.u32 %v14631_v19, 16  ;;  %v10111_v17 = vrot.slane %v8355_v23, 9  ;;  %v7987_v27 = vld [vmem:[#allocation4 + $0x80] sm:$0xe]  ;;  %v14672_v43 = vpop.permute.xlu0 %8927 }
 0x73a   : > { %v8447_v47 = vrot.slane %v14642_v20, 5  ;;  %v8548_v28 = vor.u32 %v8547_v42, %v8544_v36  ;;  %v8562_v6 = vor.u32 %v8561_v40, %v8558_v5  ;;  %v10109_v62 = vrot.slane %v8353_v35, 9 }
 0x73b   : > { %8993 = vrot.lane.b32.xlu1 %v10159_v2, %s10573_s9  ;;  %v8553_v34 = vrot.slane %v8551_v60, 5  ;;  %v8439_v44 = vrot.slane %v14648_v38, 5  ;;  %v10110_v3 = vrot.slane %v8354_v9, 9  ;;  %v8567_v12 = vrot.slane %v8565_v63, 5  ;;  %v14688_v63 = vld [vmem:[#allocation4 + $0x7c] sm:$0x1] }
 0x73c   : > { %v8549_v25 = vrot.slane %v8548_v28, 4  ;;  %v8563_v13 = vrot.slane %v8562_v6, 4  ;;  %v8443_v23 = vrot.slane %v14654_v45, 5  ;;  %v14674_v36 = vrot.slane %v8657_v55, 5  ;;  %v14690_v28 = vld [vmem:[#allocation4 + $0x70] sm:$0xf] }
 0x73d   : > { %v15157_v42 = vcombine.low %v14505_v61, %v14519_v22  ;;  %v8452_v2 = vsel %vm10792_vm12, %v10112_v49, %v8451_v37  ;;  %v10095_v35 = vrot.slane %v7987_v27, 9  ;;  %v8079_v5 = vrot.slane %v14664_v18, 5  ;;  %v14699_v37 = vld [vmem:[#allocation4 + $0x78] sm:$0xf]  ;;  %v14709_v6 = vpop.permute.xlu0 %8885  ;;  %s10222_s9 = sshll.u32 %s15172_s26, 6 }
 0x73e   : > { %v8554_v40 = vsel %vm10864_vm15, %v8549_v25, %v8553_v34  ;;  %v8568_v9 = vsel %vm10864_vm15, %v8563_v13, %v8567_v12  ;;  %v10096_v60 = vrot.slane %v7988_v51, 9  ;;  %v8083_v55 = vrot.slane %v14667_v31, 5  ;;  %v14703_v51 = vld [vmem:[#allocation4 + $0x74] sm:$0x1] }
 0x73f   : > { %9121 = vrot.lane.b32.xlu0 %v15157_v42, %s10581_s8  ;;  %v14692_v61 = vrot.slane %v8668_v52, 4  ;;  %9129 = vrot.lane.b32.xlu1 %v10183_v59, %s10581_s8  ;;  %v8448_v22 = vsel %vm10792_vm12, %v10111_v17, %v8447_v47  ;;  %v10187_v49 = vcombine.low %v8554_v40, %v8568_v9  ;;  %v8444_v25 = vsel %vm10792_vm12, %v10110_v3, %v8443_v23 }
 0x740   : > { %v10176_v12 = vcombine.low %v8448_v22, %v8452_v2  ;;  %v8440_v13 = vsel %vm10792_vm12, %v10109_v62, %v8439_v44  ;;  %v8632_v52 = vor.u32 %v14548_v10, %v14546_v50  ;;  %v8646_v59 = vor.u32 %v14566_v30, %v14558_v0 }
 0x741   : > { %v8080_v3 = vsel %vm10792_vm12, %v10095_v35, %v8079_v5  ;;  %v8649_v17 = vshll.u32 %v14688_v63, 16  ;;  %v7918_v47 = vshrl.u32 %v14690_v28, 16  ;;  %v7921_v27 = vshll.u32 %v14690_v28, 16 }
 0x742   : > { %v10175_v34 = vcombine.low %v8440_v13, %v8444_v25  ;;  %v8084_v50 = vsel %vm10792_vm12, %v10096_v60, %v8083_v55  ;;  %v7932_v10 = vshrl.u32 %v14699_v37, 16  ;;  %v7935_v0 = vshll.u32 %v14699_v37, 16  ;;  %v14730_v13 = vpop.permute.xlu0 %9023 }
 0x743   : > { %9161 = vrot.lane.b32.xlu0 %v10187_v49, %s10582_s15  ;;  %9075 = vrot.lane.b32.xlu1 %v10176_v12, %s10580_s30  ;;  %v8635_v30 = vshll.u32 %v14703_v51, 16  ;;  %v8647_v62 = vrot.slane %v8646_v59, 4  ;;  %v7920_v44 = vrot.slane %v7918_v47, 4  ;;  %v7923_v23 = vrot.slane %v7921_v27, 5  ;;  %v14741_v27 = vld [vmem:[#allocation4 + $0x84] sm:$0x1] }
 0x744   : > { %v10152_v42 = vcombine.low %v8080_v3, %v8084_v50  ;;  %v8633_v2 = vrot.slane %v8632_v52, 4  ;;  %v7934_v35 = vrot.slane %v7932_v10, 4  ;;  %v7937_v5 = vrot.slane %v7935_v0, 5 }
 0x745   : > { %v8651_v40 = vrot.slane %v8649_v17, 5  ;;  %v7924_v9 = vor.u32 %v7923_v23, %v7920_v44  ;;  %v7941_v22 = vshll.u32 %v14552_v41, 16  ;;  %v8320_v60 = vor.u32 %v14583_v15, %v14581_v32  ;;  %v14759_v44 = vld [vmem:[#allocation4 + $0x8c] sm:$0x1] }
 0x746   : > { %v7927_v55 = vshll.u32 %v14570_v16, 16  ;;  %v7938_v49 = vor.u32 %v7937_v5, %v7934_v35  ;;  %v8323_v25 = vshll.u32 %v14642_v20, 16  ;;  %v8334_v12 = vor.u32 %v14593_v4, %v14587_v58 }
 0x747   : > { %9073 = vrot.lane.b32.xlu1 %v10175_v34, %s10580_s30  ;;  %v8637_v52 = vrot.slane %v8635_v30, 5  ;;  %v8652_v59 = vsel %vm10864_vm15, %v8647_v62, %v8651_v40  ;;  %v7925_v41 = vrot.slane %v7924_v9, 4  ;;  %v8337_v3 = vshll.u32 %v14627_v21, 16  ;;  %v14747_v30 = vld [vmem:[#allocation4 + $0x80] sm:$0xf] }
 0x748   : > { %v7939_v32 = vrot.slane %v7938_v49, 4  ;;  %v8321_v15 = vrot.slane %v8320_v60, 4  ;;  %v8335_v16 = vrot.slane %v8334_v12, 4  ;;  %v8292_v20 = vor.u32 %v14619_v29, %v14614_v53  ;;  %v14764_v40 = vld [vmem:[#allocation4 + $0x88] sm:$0xf] }
 0x749   : > { %v7943_v17 = vrot.slane %v7941_v22, 5  ;;  %v8339_v47 = vrot.slane %v8337_v3, 5  ;;  %v8295_v58 = vshll.u32 %v14648_v38, 16  ;;  %v8306_v4 = vor.u32 %v14636_v1, %v14623_v26  ;;  %v10557_v49 = vld [vmem:[#allocation4] sm:$0xf] }
 0x74a   : > { %v15158_v34 = vshll.u32 %v14616_v8, 16  ;;  %v8638_v21 = vsel %vm10864_vm15, %v8633_v2, %v8637_v52  ;;  %v7929_v10 = vrot.slane %v7927_v55, 5  ;;  %v8325_v0 = vrot.slane %v8323_v25, 5  ;;  %v14768_v55 = vld [vmem:[#allocation4 + $0x90] sm:$0xf] }
 0x74b   : > { %8939 = vrot.lane.b32.xlu1 %v10152_v42, %s10578_s14  ;;  %v7944_v53 = vsel %vm10864_vm15, %v7939_v32, %v7943_v17  ;;  %v8340_v29 = vsel %vm10864_vm15, %v8335_v16, %v8339_v47  ;;  %v8293_v26 = vrot.slane %v8292_v20, 4  ;;  %v8309_v1 = vshll.u32 %v14654_v45, 16  ;;  %v9022_v42 = vpop.permute.xlu0 %9021  ;;  %v10558_v25 = vld [vmem:[#allocation4 + $0x8] sm:$0xf]  ;;  %v14776_v16 = vld [vmem:[#allocation4 + $0x98] sm:$0xf] }
 0x74c   : > { %v8673_v50 = vrot.slane %v15158_v34, 5  ;;  %v10190_v8 = vcombine.low %v8638_v21, %v8652_v59  ;;  %v7930_v38 = vsel %vm10864_vm15, %v7925_v41, %v7929_v10  ;;  %v8326_v62 = vsel %vm10864_vm15, %v8321_v15, %v8325_v0 }
 0x74d   : > { %v8660_v23 = vor.u32 %v14674_v36, %v14651_v46  ;;  %v8297_v2 = vrot.slane %v8295_v58, 5  ;;  %v8307_v35 = vrot.slane %v8306_v4, 4  ;;  %v8663_v5 = vshll.u32 %v14741_v27, 16 }
 0x74e   : > { %v7946_v45 = vshrl.u32 %v14747_v30, 16  ;;  %v10143_v9 = vcombine.low %v7930_v38, %v7944_v53  ;;  %v10168_v22 = vcombine.low %v8326_v62, %v8340_v29  ;;  %v7949_v60 = vshll.u32 %v14747_v30, 16 }
 0x74f   : > { %v10129_v12 = vcombine.low %v10557_v49, %v10558_v25  ;;  %9167 = vrot.lane.b32.xlu1 %v10190_v8, %s10582_s15  ;;  %v8298_v46 = vsel %vm10864_vm15, %v8293_v26, %v8297_v2  ;;  %v8311_v36 = vrot.slane %v8309_v1, 5  ;;  %v8674_v52 = vor.u32 %v8673_v50, %v14692_v61  ;;  %v9158_v21 = vpop.permute.xlu0 %9157 }
 0x750   : > { %v7948_v59 = vrot.slane %v7946_v45, 4  ;;  %v8661_v41 = vrot.slane %v8660_v23, 4  ;;  %v8677_v3 = vshll.u32 %v14759_v44, 16  ;;  %v7951_v32 = vrot.slane %v7949_v60, 5 }
 0x751   : > { %v7960_v15 = vshrl.u32 %v14764_v40, 16  ;;  %v8312_v20 = vsel %vm10864_vm15, %v8307_v35, %v8311_v36  ;;  %v8665_v17 = vrot.slane %v8663_v5, 5  ;;  %v7963_v47 = vshll.u32 %v14764_v40, 16  ;;  %v8711_v35 = vld [vmem:[#allocation4 + $0x20] sm:$0xe] }
 0x752   : > { %v8682_v58 = vshrl.u32 %v14768_v55, 16  ;;  %v7952_v4 = vor.u32 %v7951_v32, %v7948_v59  ;;  %v7955_v61 = vshll.u32 %v14664_v18, 16  ;;  %v8685_v50 = vshll.u32 %v14768_v55, 16 }
 0x753   : > { %v7962_v34 = vrot.slane %v7960_v15, 4  ;;  %8897 = vrot.lane.b32.xlu1 %v10143_v9, %s10575_s11  ;;  %v8675_v10 = vrot.slane %v8674_v52, 4  ;;  %v7965_v0 = vrot.slane %v7963_v47, 5  ;;  %v8696_v29 = vshrl.u32 %v14776_v16, 16 }
 0x754   : > { %v8684_v53 = vrot.slane %v8682_v58, 4  ;;  %v10167_v26 = vcombine.low %v8298_v46, %v8312_v20  ;;  %v8679_v1 = vrot.slane %v8677_v3, 5  ;;  %v8687_v8 = vrot.slane %v8685_v50, 5  ;;  %v14797_v46 = vld [vmem:[#allocation4 + $0x94] sm:$0x1] }
 0x755   : > { %v8699_v38 = vshll.u32 %v14776_v16, 16  ;;  %v8666_v62 = vsel %vm10864_vm15, %v8661_v41, %v8665_v17  ;;  %v7969_v18 = vshll.u32 %v14667_v31, 16  ;;  %v8698_v23 = vrot.slane %v8696_v29, 4  ;;  %v14799_v31 = vld [vmem:[#allocation4 + $0x9c] sm:$0x1] }
 0x756   : > { %v9199_v2 = vsel %vm2228_vm3, %v10129_v12, %v14709_v6  ;;  %v7953_v5 = vrot.slane %v7952_v4, 4  ;;  %v7966_v45 = vor.u32 %v7965_v0, %v7962_v34  ;;  %v8680_v49 = vsel %vm10864_vm15, %v8675_v10, %v8679_v1  ;;  %v10559_v20 = vld [vmem:[#allocation4 + $0x24] sm:$0x1]  ;;  %v15159_v1 = vld [vmem:[#allocation6_spill] sm:$0xff] }
 0x757   : > { %v8701_v9 = vrot.slane %v8699_v38, 5  ;;  %v9222_v60 = vsel %vm2262_vm6, %v9199_v2, %v14561_v57  ;;  %9035 = vrot.lane.b32.xlu1 %v10168_v22, %s10576_s12  ;;  %v7957_v25 = vrot.slane %v7955_v61, 5  ;;  %v8688_v36 = vor.u32 %v8687_v8, %v8684_v53  ;;  %v8712_v57 = vld [vmem:[#allocation4 + $0x28] sm:$0xe]  ;;  %v8888_v22 = vpop.permute.xlu0 %8887 }
 0x758   : > { %v9238_v6 = vsel %vm2296_vm10, %v9222_v60, %v14579_v7  ;;  %v8705_v52 = vshll.u32 %v14799_v31, 16  ;;  %v10115_v41 = vrot.slane %v8711_v35, 9  ;;  %v10191_v3 = vcombine.low %v8666_v62, %v8680_v49  ;;  %v8714_v35 = vld [vmem:[#allocation4 + $0x38] sm:$0xe] }
 0x759   : > { %v8702_v12 = vor.u32 %v8701_v9, %v8698_v23  ;;  %v9254_v59 = vsel %vm2330_vm13, %v9238_v6, %v9022_v42  ;;  %v7971_v32 = vrot.slane %v7969_v18, 5  ;;  %v8767_v17 = vrot.slane %v10559_v20, 5  ;;  %v8713_v42 = vld [vmem:[#allocation4 + $0x30] sm:$0xe]  ;;  %v8720_v9 = vld [vmem:[#allocation4 + $0x78] sm:$0xe] }
 0x75a   : > { %v9270_v15 = vsel %vm4565_vm7, %v9254_v59, %v14658_v14  ;;  %v7958_v47 = vsel %vm10864_vm15, %v7953_v5, %v7957_v25  ;;  %v7967_v58 = vrot.slane %v7966_v45, 4  ;;  %v8691_v7 = vshll.u32 %v14797_v46, 16  ;;  %v10560_v14 = vld [vmem:[#allocation4 + $0x2c] sm:$0x1]  ;;  %v8719_v45 = vld [vmem:[#allocation4 + $0x70] sm:$0xe] }
 0x75b   : > { %v9286_v4 = vsel %vm4582_vm0, %v9270_v15, %v14603_v48  ;;  %9033 = vrot.lane.b32.xlu1 %v10167_v26, %s10576_s12  ;;  %v14813_v61 = vrot.slane %v8688_v36, 4  ;;  %v10116_v50 = vrot.slane %v8712_v57, 9  ;;  %v8771_v10 = vrot.slane %v10560_v14, 5  ;;  %v9120_v26 = vpop.permute.xlu0 %9119  ;;  %v8723_v57 = vld [vmem:[#allocation4 + $0x90] sm:$0xe] }
 0x75c   : > { %v9302_v34 = vsel %vm4599_vm5, %v9286_v4, %v9158_v21  ;;  %v14816_v0 = vrot.slane %v8702_v12, 4  ;;  %v8707_v53 = vrot.slane %v8705_v52, 5  ;;  %v8768_v29 = vsel %vm10792_vm12, %v10115_v41, %v8767_v17 }
 0x75d   : > { %9460 = vmatmul.mubr.bf16.vlgmr.msra.gmra.mxu0 %v9302_v34  ;;  %v15160_v48 = vcombine.low %v14055_v56, %v15159_v1  ;;  %v8772_v38 = vsel %vm10792_vm12, %v10116_v50, %v8771_v10  ;;  %v10117_v62 = vrot.slane %v8713_v42, 9  ;;  %v8775_v18 = vrot.slane %v14629_v24, 5 }
 0x75e   : > { %v10194_v23 = vcombine.low %v8768_v29, %v8772_v38  ;;  %v7972_v56 = vsel %vm10864_vm15, %v7967_v58, %v7971_v32  ;;  %v8693_v5 = vrot.slane %v8691_v7, 5  ;;  %v8708_v36 = vsel %vm10864_vm15, %v14816_v0, %v8707_v53  ;;  %v8724_v32 = vld [vmem:[#allocation4 + $0x98] sm:$0xe]  ;;  %v9124_v58 = vpop.permute.xlu1 %9123  ;;  %v8718_v38 = vld [vmem:[#allocation4 + $0x68] sm:$0xe] }
 0x75f   : > { %v9202_v8 = vsel %vm2228_vm3, %v15160_v48, %v8888_v22  ;;  %9169 = vrot.lane.b32.xlu1 %v10191_v3, %s10582_s15  ;;  %v10144_v60 = vcombine.low %v7958_v47, %v7972_v56  ;;  %v8988_v49 = vpop.permute.xlu0 %8987  ;;  %v8776_v6 = vsel %vm10792_vm12, %v10117_v62, %v8775_v18  ;;  %v10118_v12 = vrot.slane %v8714_v35, 9  ;;  %v15161_v18 = vld [vmem:[#allocation5_spill] sm:$0xff] }
 0x760   : > { %v9224_v21 = vsel %vm2262_vm6, %v9202_v8, %v14672_v43  ;;  %v10184_v43 = vcombine.low %v14768_v55, %v14776_v16  ;;  %10212 = vmatprep.mubr.msk.bf16.mxu0 %vm2228_vm3, %v10194_v23  ;;  %v8694_v25 = vsel %vm10864_vm15, %v14813_v61, %v8693_v5  ;;  %v8722_v55 = vld [vmem:[#allocation4 + $0x88] sm:$0xe]  ;;  %v8779_v16 = vrot.slane %v14631_v19, 5  ;;  %v15163_v35 = vld [vmem:[#allocation9_spill] sm:$0xff] }
 0x761   : > { %v9240_v2 = vsel %vm2296_vm10, %v9224_v21, %v14521_v54  ;;  %v8721_v54 = vld [vmem:[#allocation4 + $0x80] sm:$0xe]  ;;  %v10123_v52 = vrot.slane %v8719_v45, 9  ;;  %v10124_v59 = vrot.slane %v8720_v9, 9  ;;  %v8803_v11 = vrot.slane %v14688_v63, 5 }
 0x762   : > { %v9256_v24 = vsel %vm2330_vm13, %v9240_v2, %v14730_v13  ;;  %v8799_v13 = vrot.slane %v14703_v51, 5  ;;  %v10125_v22 = vrot.slane %v8721_v54, 9  ;;  %v8807_v3 = vrot.slane %v14741_v27, 5  ;;  %v8932_v48 = vpop.permute.xlu1 %8931  ;;  %v15162_v2 = vld [vmem:[#allocation7_spill] sm:$0xff] }
 0x763   : > { %8899 = vrot.lane.b32.xlu1 %v10144_v60, %s10575_s11  ;;  %v9272_v41 = vsel %vm4565_vm7, %v9256_v24, %v14633_v39  ;;  %v9068_v15 = vpop.permute.xlu0 %9067  ;;  %v10126_v20 = vrot.slane %v8722_v55, 9  ;;  %v8811_v51 = vrot.slane %v14759_v44, 5  ;;  %v10135_v17 = vcombine.low %v14690_v28, %v14699_v37 }
 0x764   : > { %v14856_v19 = vsel %vm10792_vm12, %v10123_v52, %v8799_v13  ;;  %v14863_v39 = vsel %vm10792_vm12, %v10124_v59, %v8803_v11  ;;  %v14867_v63 = vsel %vm10792_vm12, %v10125_v22, %v8807_v3  ;;  %v10127_v27 = vrot.slane %v8723_v57, 9  ;;  %v10561_v3 = vld [vmem:[#allocation4 + $0x50] sm:$0xf] }
 0x765   : > { %v8815_v47 = vrot.slane %v14797_v46, 5  ;;  %v10198_v7 = vcombine.low %v14856_v19, %v14863_v39  ;;  %v14874_v44 = vsel %vm10792_vm12, %v10126_v20, %v8811_v51  ;;  %v10128_v4 = vrot.slane %v8724_v32, 9  ;;  %v10562_v32 = vld [vmem:[#allocation4 + $0x58] sm:$0xf]  ;;  %v15169_v19 = vld [vmem:[#allocation13_spill] sm:$0xff] }
 0x766   : > { %v8819_v42 = vrot.slane %v14799_v31, 5  ;;  %v10199_v61 = vcombine.low %v14867_v63, %v14874_v44  ;;  %v10136_v46 = vcombine.low %v14747_v30, %v14764_v40  ;;  %v9288_v50 = vsel %vm4582_vm0, %v9272_v41, %v9120_v26  ;;  %v8717_v26 = vld [vmem:[#allocation4 + $0x60] sm:$0xe]  ;;  %v9028_v45 = vpop.permute.xlu1 %9027  ;;  %v15170_v39 = vld [vmem:[#allocation12_spill] sm:$0xff]  ;;  %v14977_v30 = vld [vmem:[%s15041_s6] ss:$0 sm:$0xff] }
 0x767   : > { %9131 = vrot.lane.b32.xlu1 %v10184_v43, %s10581_s8  ;;  %v14882_v34 = vsel %vm10792_vm12, %v10127_v27, %v8815_v47  ;;  %v9160_v14 = vpop.permute.xlu0 %9159  ;;  %v8780_v10 = vsel %vm10792_vm12, %v10118_v12, %v8779_v16  ;;  %v10192_v0 = vcombine.low %v8694_v25, %v8708_v36  ;;  %v10121_v62 = vrot.slane %v8717_v26, 9  ;;  %v15165_v43 = vld [vmem:[#allocation11_spill] sm:$0xff]  ;;  %s14982_s8 = scalar_lea.vmem %s15042_s7, %s10222_s9 }
 0x768   : > { %v14891_v31 = vsel %vm10792_vm12, %v10128_v4, %v8819_v42  ;;  %v9305_v53 = vsel %vm4599_vm5, %v9288_v50, %v9160_v14  ;;  %v10195_v29 = vcombine.low %v8776_v6, %v8780_v10  ;;  %v8791_v23 = vrot.slane %v15161_v18, 5 }
 0x769   : > { %v10200_v1 = vcombine.low %v14882_v34, %v14891_v31  ;;  %9468 = vmatmul.mubr.bf16.gmra.mxu0 %v9305_v53  ;;  %v15164_v56 = vcombine.low %v15162_v2, %v15163_v35  ;;  %v10122_v60 = vrot.slane %v8718_v38, 9  ;;  %v8795_v24 = vrot.slane %v15165_v43, 5  ;;  %v15167_v2 = vld [vmem:[#allocation8_spill] sm:$0xff] }
 0x76a   : > { %10213 = vmatprep.mubr.msk.bf16.mxu0 %vm2228_vm3, %v10195_v29  ;;  %v8792_v36 = vsel %vm10792_vm12, %v10121_v62, %v8791_v23  ;;  %v15166_v23 = vld [vmem:[#allocation10_spill] sm:$0xff] }
 0x76b   : > { %9171 = vrot.lane.b32.xlu1 %v10192_v0, %s10582_s15  ;;  %v9164_v8 = vpop.permute.xlu0 %9163  ;;  %v8796_v16 = vsel %vm10792_vm12, %v10122_v60, %v8795_v24  ;;  %v15168_v35 = vcombine.low %v15166_v23, %v15167_v2 }
 0x76c   : > { %v10197_v13 = vcombine.low %v8792_v36, %v8796_v16 }
 0x76f   : > { %v8892_v21 = vpop.permute.xlu0 %8891 }
 0x770   : > { %v9208_v5 = vsel %vm2228_vm3, %v15164_v56, %v8892_v21 }
 0x771   : > { %v9228_v9 = vsel %vm2262_vm6, %v9208_v5, %v8932_v48 }
 0x772   : > { %v9244_v54 = vsel %vm2296_vm10, %v9228_v9, %v8988_v49 }
 0x773   : > { %v9260_v25 = vsel %vm2330_vm13, %v9244_v54, %v9028_v45 }
 0x774   : > { %v9276_v6 = vsel %vm4565_vm7, %v9260_v25, %v9068_v15  ;;  %v8992_v12 = vpop.permute.xlu1 %8991  ;;  %v10133_v15 = vcombine.low %v10561_v3, %v10562_v32 }
 0x775   : > { %v9292_v55 = vsel %vm4582_vm0, %v9276_v6, %v9124_v58 }
 0x776   : > { %v9311_v52 = vsel %vm4599_vm5, %v9292_v55, %v9164_v8 }
 0x777   : > { %9484 = vmatmul.mubr.bf16.vlgmr.msra.gmra.mxu1 %v9311_v52 }
 0x778   : > { %10215 = vmatprep.mubr.msk.bf16.mxu1 %vm2228_vm3, %v10197_v13  ;;  %v8990_v49 = vpop.permute.xlu1 %8989 }
 0x77c   : > { %v9072_v59 = vpop.permute.xlu1 %9071 }
 0x780   : > { %v9070_v57 = vpop.permute.xlu1 %9069 }
 0x784   : > { %v8936_v41 = vpop.permute.xlu1 %8935 }
 0x786   : > { %v8934_v11 = vpop.permute.xlu0 %8933 }
 0x788   : > { %v8894_v22 = vpop.permute.xlu1 %8893 }
 0x789   : > { %v9211_v51 = vsel %vm2228_vm3, %v10133_v15, %v8894_v22 }
 0x78a   : > { %v9126_v20 = vpop.permute.xlu0 %9125  ;;  %v9230_v27 = vsel %vm2262_vm6, %v9211_v51, %v8934_v11 }
 0x78b   : > { %v9246_v47 = vsel %vm2296_vm10, %v9230_v27, %v8990_v49 }
 0x78c   : > { %v9032_v33 = vpop.permute.xlu1 %9031 }
 0x794   : > { %v9030_v58 = vpop.permute.xlu0 %9029 }
 0x795   : > { %v9262_v4 = vsel %vm2330_vm13, %v9246_v47, %v9030_v58  ;;  %v9166_v42 = vpop.permute.xlu1 %9165 }
 0x796   : > { %v9278_v50 = vsel %vm4565_vm7, %v9262_v4, %v9070_v57 }
 0x797   : > { %v9294_v14 = vsel %vm4582_vm0, %v9278_v50, %v9126_v20 }
 0x798   : > { %v9314_v0 = vsel %vm4599_vm5, %v9294_v14, %v9166_v42 }
 0x799   : > { %9492 = vmatmul.mubr.bf16.gmra.mxu1 %v9314_v0 }
 0x79a   : > { %v8890_v10 = vpop.permute.xlu0 %8889  ;;  %10216 = vmatprep.mubr.msk.bf16.mxu1 %vm2228_vm3, %v10198_v7  ;;  %v10134_v7 = vcombine.low %v15170_v39, %v15169_v19 }
 0x79b   : > { %v9205_v56 = vsel %vm2228_vm3, %v15168_v35, %v8890_v10 }
 0x79d   : > { %v8896_v53 = vpop.permute.xlu1 %8895 }
 0x79e   : > { %v8930_v29 = vpop.permute.xlu0 %8929  ;;  %v9214_v24 = vsel %vm2228_vm3, %v10134_v7, %v8896_v53 }
 0x79f   : > { %v9226_v5 = vsel %vm2262_vm6, %v9205_v56, %v8930_v29  ;;  %v9232_v55 = vsel %vm2262_vm6, %v9214_v24, %v8936_v41 }
 0x7a0   : > { %v9248_v52 = vsel %vm2296_vm10, %v9232_v55, %v8992_v12 }
 0x7a1   : > { %v9128_v48 = vpop.permute.xlu1 %9127  ;;  %v9264_v49 = vsel %vm2330_vm13, %v9248_v52, %v9032_v33 }
 0x7a2   : > { %v8986_v8 = vpop.permute.xlu0 %8985  ;;  %v9280_v11 = vsel %vm4565_vm7, %v9264_v49, %v9072_v59 }
 0x7a3   : > { %v9242_v9 = vsel %vm2296_vm10, %v9226_v5, %v8986_v8  ;;  %v9296_v22 = vsel %vm4582_vm0, %v9280_v11, %v9128_v48 }
 0x7a5   : > { %v8996_v26 = vpop.permute.xlu1 %8995 }
 0x7a7   : > { %v9026_v38 = vpop.permute.xlu0 %9025 }
 0x7a8   : > { %v9258_v60 = vsel %vm2330_vm13, %v9242_v9, %v9026_v38 }
 0x7a9   : > { %v8938_v21 = vpop.permute.xlu1 %8937 }
 0x7ab   : > { %v9066_v62 = vpop.permute.xlu0 %9065 }
 0x7ac   : > { %v9274_v54 = vsel %vm4565_vm7, %v9258_v60, %v9066_v62 }
 0x7ad   : > { %v8994_v18 = vpop.permute.xlu1 %8993 }
 0x7b1   : > { %v9122_v45 = vpop.permute.xlu0 %9121  ;;  %v9130_v43 = vpop.permute.xlu1 %9129 }
 0x7b2   : > { %v9290_v25 = vsel %vm4582_vm0, %v9274_v54, %v9122_v45 }
 0x7b5   : > { %v9162_v36 = vpop.permute.xlu0 %9161  ;;  %v9076_v16 = vpop.permute.xlu1 %9075 }
 0x7b6   : > { %v9308_v6 = vsel %vm4599_vm5, %v9290_v25, %v9162_v36 }
 0x7b7   : > { %9476 = vmatmul.mubr.bf16.gmra.mxu0 %v9308_v6 }
 0x7b9   : > { %v9074_v13 = vpop.permute.xlu1 %9073 }
 0x7bd   : > { %v8940_v57 = vpop.permute.xlu1 %8939 }
 0x7c1   : > { %v9168_v3 = vpop.permute.xlu1 %9167 }
 0x7c2   : > { %v9317_v32 = vsel %vm4599_vm5, %v9296_v22, %v9168_v3 }
 0x7c3   : > { %9500 = vmatmul.mubr.bf16.gmra.mxu1 %v9317_v32 }
 0x7c4   : > { %10217 = vmatprep.mubr.msk.bf16.mxu1 %vm2228_vm3, %v10199_v61 }
 0x7c5   : > { %v8898_v41 = vpop.permute.xlu1 %8897 }
 0x7c6   : > { %v9217_v12 = vsel %vm2228_vm3, %v10135_v17, %v8898_v41 }
 0x7c7   : > { %v9234_v59 = vsel %vm2262_vm6, %v9217_v12, %v8938_v21 }
 0x7c8   : > { %v9250_v20 = vsel %vm2296_vm10, %v9234_v59, %v8994_v18 }
 0x7c9   : > { %v9036_v15 = vpop.permute.xlu1 %9035 }
 0x7cd   : > { %v9034_v51 = vpop.permute.xlu1 %9033 }
 0x7ce   : > { %v9266_v33 = vsel %vm2330_vm13, %v9250_v20, %v9034_v51 }
 0x7cf   : > { %v9282_v27 = vsel %vm4565_vm7, %v9266_v33, %v9074_v13 }
 0x7d0   : > { %v9298_v63 = vsel %vm4582_vm0, %v9282_v27, %v9130_v43 }
 0x7d1   : > { %v9170_v44 = vpop.permute.xlu1 %9169 }
 0x7d2   : > { %v9320_v61 = vsel %vm4599_vm5, %v9298_v63, %v9170_v44 }
 0x7d3   : > { %9508 = vmatmul.mubr.bf16.gmra.mxu1 %v9320_v61 }
 0x7d4   : > { %10218 = vmatprep.mubr.msk.bf16.mxu1 %vm2228_vm3, %v10200_v1 }
 0x7d5   : > { %v8900_v28 = vpop.permute.xlu1 %8899 }
 0x7d6   : > { %v9220_v37 = vsel %vm2228_vm3, %v10136_v46, %v8900_v28 }
 0x7d7   : > { %v9236_v17 = vsel %vm2262_vm6, %v9220_v37, %v8940_v57 }
 0x7d8   : > { %v9252_v47 = vsel %vm2296_vm10, %v9236_v17, %v8996_v26 }
 0x7d9   : > { %v9268_v58 = vsel %vm2330_vm13, %v9252_v47, %v9036_v15  ;;  %v9132_v4 = vpop.permute.xlu1 %9131 }
 0x7da   : > { %v9284_v42 = vsel %vm4565_vm7, %v9268_v58, %v9076_v16 }
 0x7db   : > { %v9300_v50 = vsel %vm4582_vm0, %v9284_v42, %v9132_v4 }
 0x7dd   : > { %v9172_v34 = vpop.permute.xlu1 %9171 }
 0x7de   : > { %v9323_v31 = vsel %vm4599_vm5, %v9300_v50, %v9172_v34 }
 0x7df   : > { %9516 = vmatmul.mubr.bf16.gmra.mxu1 %v9323_v31 }
 0x81d   : > { %v9461_v40 = vpop.f32.mrf.mxu0 }
 0x81e   : > { %v9462_v46 = vadd.f32 %v14977_v30, %v9461_v40 }
 0x81f   : > { %v9463_v1 = vpop.f32.mrf.mxu0 }
 0x820   : > { %9524 = vst.msk [vmem:[%s14982_s8] sm:$0xff] %vm2228_vm3, %v9462_v46 }
 0x821   : > { %v9464_v14 = vpop.f32.mrf.mxu0 }
 0x822   : > { %v9465_v10 = vadd.f32 %v14977_v30, %v9464_v14 }
 0x823   : > { %v9466_v0 = vpop.f32.mrf.mxu0 }
 0x824   : > { %9525 = vst.msk [vmem:[%s14982_s8 + $0x8] sm:$0xff] %vm2228_vm3, %v9465_v10 }
 0x829   : > { %v9469_v53 = vpop.f32.mrf.mxu0 }
 0x82a   : > { %v9470_v29 = vadd.f32 %v14977_v30, %v9469_v53 }
 0x82b   : > { %v9471_v48 = vpop.f32.mrf.mxu0 }
 0x82c   : > { %9526 = vst.msk [vmem:[%s14982_s8 + $0x10] sm:$0xff] %vm2228_vm3, %v9470_v29 }
 0x82d   : > { %v9472_v8 = vpop.f32.mrf.mxu0 }
 0x82e   : > { %v9473_v26 = vadd.f32 %v14977_v30, %v9472_v8 }
 0x82f   : > { %v9474_v38 = vpop.f32.mrf.mxu0 }
 0x830   : > { %9527 = vst.msk [vmem:[%s14982_s8 + $0x18] sm:$0xff] %vm2228_vm3, %v9473_v26 }
 0x837   : > { %v9485_v21 = vpop.f32.mrf.mxu1 }
 0x838   : > { %v9486_v62 = vadd.f32 %v14977_v30, %v9485_v21 }
 0x839   : > { %v9487_v18 = vpop.f32.mrf.mxu1 }
 0x83a   : > { %9530 = vst.msk [vmem:[%s14982_s8 + $0x30] sm:$0xff] %vm2228_vm3, %v9486_v62 }
 0x83b   : > { %v9488_v23 = vpop.f32.mrf.mxu1 }
 0x83c   : > { %v9489_v2 = vadd.f32 %v14977_v30, %v9488_v23 }
 0x83d   : > { %v9490_v35 = vpop.f32.mrf.mxu1 }
 0x83e   : > { %9531 = vst.msk [vmem:[%s14982_s8 + $0x38] sm:$0xff] %vm2228_vm3, %v9489_v2 }
 0x859   : > { %v9493_v56 = vpop.f32.mrf.mxu1 }
 0x85a   : > { %v9494_v5 = vadd.f32 %v14977_v30, %v9493_v56 }
 0x85b   : > { %v9495_v45 = vpop.f32.mrf.mxu1 }
 0x85c   : > { %9532 = vst.msk [vmem:[%s14982_s8 + $0x40] sm:$0xff] %vm2228_vm3, %v9494_v5 }
 0x85d   : > { %v9496_v19 = vpop.f32.mrf.mxu1 }
 0x85e   : > { %v9497_v39 = vadd.f32 %v14977_v30, %v9496_v19 }
 0x85f   : > { %v9498_v7 = vpop.f32.mrf.mxu1 }
 0x860   : > { %9533 = vst.msk [vmem:[%s14982_s8 + $0x48] sm:$0xff] %vm2228_vm3, %v9497_v39 }
 0x877   : > { %v9477_v9 = vpop.f32.mrf.mxu0 }
 0x878   : > { %v9478_v60 = vadd.f32 %v14977_v30, %v9477_v9 }
 0x879   : > { %v9479_v43 = vpop.f32.mrf.mxu0 }
 0x87a   : > { %9528 = vst.msk [vmem:[%s14982_s8 + $0x20] sm:$0xff] %vm2228_vm3, %v9478_v60 }
 0x87b   : > { %v9480_v24 = vpop.f32.mrf.mxu0 }
 0x87c   : > { %v9481_v54 = vadd.f32 %v14977_v30, %v9480_v24 }
 0x87d   : > { %v9482_v25 = vpop.f32.mrf.mxu0 }
 0x87e   : > { %9529 = vst.msk [vmem:[%s14982_s8 + $0x28] sm:$0xff] %vm2228_vm3, %v9481_v54 }
 0x883   : > { %v9501_v36 = vpop.f32.mrf.mxu1 }
 0x884   : > { %v9502_v6 = vadd.f32 %v14977_v30, %v9501_v36 }
 0x885   : > { %v9503_v55 = vpop.f32.mrf.mxu1 }
 0x886   : > { %9534 = vst.msk [vmem:[%s14982_s8 + $0x50] sm:$0xff] %vm2228_vm3, %v9502_v6 }
 0x887   : > { %v9504_v16 = vpop.f32.mrf.mxu1 }
 0x888   : > { %v9505_v52 = vadd.f32 %v14977_v30, %v9504_v16 }
 0x889   : > { %v9506_v13 = vpop.f32.mrf.mxu1 }
 0x88a   : > { %9535 = vst.msk [vmem:[%s14982_s8 + $0x58] sm:$0xff] %vm2228_vm3, %v9505_v52 }
 0x893   : > { %v9509_v49 = vpop.f32.mrf.mxu1 }
 0x894   : > { %v9510_v57 = vadd.f32 %v14977_v30, %v9509_v49 }
 0x895   : > { %v9511_v11 = vpop.f32.mrf.mxu1 }
 0x896   : > { %9536 = vst.msk [vmem:[%s14982_s8 + $0x60] sm:$0xff] %vm2228_vm3, %v9510_v57 }
 0x897   : > { %v9512_v22 = vpop.f32.mrf.mxu1 }
 0x898   : > { %v9513_v3 = vadd.f32 %v14977_v30, %v9512_v22 }
 0x899   : > { %v9514_v32 = vpop.f32.mrf.mxu1 }
 0x89a   : > { %9537 = vst.msk [vmem:[%s14982_s8 + $0x68] sm:$0xff] %vm2228_vm3, %v9513_v3 }
 0x89f   : > { %v9517_v41 = vpop.f32.mrf.mxu1 }
 0x8a0   : > { %v9518_v12 = vadd.f32 %v14977_v30, %v9517_v41 }
 0x8a1   : > { %v9519_v15 = vpop.f32.mrf.mxu1 }
 0x8a2   : > { %9538 = vst.msk [vmem:[%s14982_s8 + $0x70] sm:$0xff] %vm2228_vm3, %v9518_v12 }
 0x8a3   : > { %v9520_v59 = vpop.f32.mrf.mxu1 }
 0x8a4   : > { %v9521_v20 = vadd.f32 %v14977_v30, %v9520_v59 }
 0x8a5   : > { %v9522_v51 = vpop.f32.mrf.mxu1 }
 0x8a6   : > { %9539 = vst.msk [vmem:[%s14982_s8 + $0x78] sm:$0xff] %vm2228_vm3, %v9521_v20 }
 0x8a7 PF: > { %s17_s24 = sadd.s32 1, %s10569_s24  }
 0x8a8   : > { %p14_p4 = scmp.ge.s32.totalorder %s17_s24, 4  }
 0x8aa   :  { %16 = sbr.rel (!%p14_p4) target bundleno = 1 (0x1), region = 84 }

</bundles_post_ra>
